<compile_context>
chip_gen: v5e
topology: v5e:2x2
jax: 0.10.0
libtpu: 0.0.40
codegen_flags: <defaults>
</compile_context>

<pallas_src>
import functools

import jax
import jax.numpy as jnp
from jax import lax
from jax.experimental import pallas as pl
from jax.experimental.pallas import tpu as pltpu


def _attention_kernel(hr_ref, lr_ref, wq_ref, wk_ref, wv_ref, msk_ref,
                      out_ref, v_scr, *, H, W, kH, kW, block_n, compute_dtype):
    """One grid step = block_n images; tensors are (C, H*W) inside."""
    HW = H * W
    C = hr_ref.shape[1]
    f32 = jnp.float32
    cdt = compute_dtype
    use_mxu_reduce = jnp.dtype(cdt) != jnp.dtype(jnp.float32)

    conv_offsets = tuple((p - 1, q - 1) for p in range(3) for q in range(3))
    rH, rW = kH // 2, kW // 2
    att_offsets = tuple((dy - rH, dx - rW) for dy in range(kH) for dx in range(kW))

    def roll_pix(x, dy, dx):
        """x[c, i*W+j] -> x[c, (i+dy)*W + (j+dx)] (wrap; OOB handled by masks)."""
        if dy == 0 and dx == 0:
            return x
        return pltpu.roll(x, shift=(-(dy * W + dx)) % HW, axis=1)

    # Attention-window boundary masks, precomputed in the wrapper and shared by
    # every image in this block (row a <-> att_offsets[a]).
    att_masks = msk_ref[...]                                   # (kH*kW, HW) f32

    if use_mxu_reduce:
        ones_row = jnp.ones((1, C), cdt)                       # MXU reduction row

    for b in range(block_n):
        # ---- depthwise 3x3 key/value convs (zero-pad mask folded into slabs) --
        hr_c = hr_ref[b].astype(cdt)                           # (C, HW)
        k = jnp.zeros((C, HW), f32)
        v = jnp.zeros((C, HW), f32)
        for t, (dy, dx) in enumerate(conv_offsets):
            hs = roll_pix(hr_c, dy, dx)                        # shared by key/value
            k = k + hs * wk_ref[t]
            v = v + hs * wv_ref[t]
        v_scr[...] = v.astype(cdt)                             # park value (bounds live range)
        k_c = k.astype(cdt)

        # ---- depthwise 3x3 query conv on the low-res feature -------------------
        lr_c = lr_ref[b].astype(cdt)
        q = jnp.zeros((C, HW), f32)
        for t, (dy, dx) in enumerate(conv_offsets):
            q = q + roll_pix(lr_c, dy, dx) * wq_ref[t]
        q_c = q.astype(cdt)

        # ---- similarity logits: one lane-dense (1, HW) row per window offset ---
        # bf16 path: channel reduction on the (otherwise idle) MXU.
        # f32 path:  exact XLU sublane reduction (keeps the tight f32 parity).
        logits = []
        for a, (dy, dx) in enumerate(att_offsets):
            prod = q_c * roll_pix(k_c, dy, dx)
            if use_mxu_reduce:
                lg = jnp.dot(ones_row, prod, preferred_element_type=f32)
            else:
                lg = jnp.sum(prod, axis=0, keepdims=True)
            if (dy, dx) != (0, 0):
                lg = lg * att_masks[a:a + 1, :]                # OOB logits -> exactly 0
            logits.append(lg)

        # ---- softmax over the window axis (no (kHW, H, W) stack materialized) --
        m = logits[0]
        for lg in logits[1:]:
            m = jnp.maximum(m, lg)
        es = [jnp.exp(lg - m) for lg in logits]
        denom = es[0]
        for e in es[1:]:
            denom = denom + e
        rcp = pl.reciprocal(denom, approx=True)                # EUP slot
        rcp = rcp * (2.0 - denom * rcp)                        # Newton step -> ~f32 accuracy

        # ---- weighting: mask & 1/denom folded into the (1, HW) weight row ------
        acc = jnp.zeros((C, HW), f32)
        for a, (e, (dy, dx)) in enumerate(zip(es, att_offsets)):
            w = e * rcp
            if (dy, dx) != (0, 0):
                w = w * att_masks[a:a + 1, :]                  # zero OOB contributions
            vs = roll_pix(v_scr[...], dy, dx)                  # reload from scratch
            acc = acc + w.astype(cdt) * vs

        # ---- residual with the (re-read, full-precision) lr feature ------------
        out_ref[b] = (lr_ref[b].astype(f32) + acc).astype(out_ref.dtype)


def _pick_block_n(N, C, HW):
    """Images per grid step: VMEM-budgeted divisor of N, keep >=2 steps (megacore)."""
    per_img = (3 * 2 + 6) * C * HW * 4          # 3 dbl-buffered blocks + ~6 f32 temps
    cap = max(1, (12 << 20) // per_img)
    nb = 1
    for d in range(1, N + 1):
        if N % d == 0 and d <= cap and (N // d) >= 2:
            nb = d
    return nb


def my_attention(hr_feat, lr_feat, wq, wk, wv, kH=3, kW=3, *,
                 compute_dtype=jnp.float32, block_n=None):
    """hr_feat, lr_feat: NCHW float32.  wq/wk/wv: depthwise weights (C, 1, 3, 3).

    compute_dtype=jnp.bfloat16 enables the bf16 operand path (recommended on
    v6e/v7x); the default f32 path is best on v5e and matches the f32 reference
    to ~1e-6.
    """
    N, C, H, W = hr_feat.shape
    HW = H * W
    if HW % 128 != 0:
        # TODO(synk): pad H*W to a lane multiple (and mask) for odd spatial sizes.
        raise ValueError("H*W must be a multiple of 128 for the lane-roll layout")

    # NCHW -> (N, C, H*W): free reshape of contiguous data (no transpose, no pad).
    hr = hr_feat.reshape(N, C, HW)
    lr = lr_feat.reshape(N, C, HW)

    # Boundary masks (depend only on the lane index) — built once on the host.
    ii = jnp.arange(HW, dtype=jnp.int32) // W
    jj = jnp.arange(HW, dtype=jnp.int32) % W

    def boundary_mask(dy, dx):
        ok = ((ii + dy) >= 0) & ((ii + dy) < H) & ((jj + dx) >= 0) & ((jj + dx) < W)
        return ok.astype(jnp.float32)

    rH, rW = kH // 2, kW // 2
    att_offsets = tuple((dy - rH, dx - rW) for dy in range(kH) for dx in range(kW))
    att_masks = jnp.stack([boundary_mask(dy, dx) for dy, dx in att_offsets], 0)

    # Depthwise conv weights pre-broadcast to (9, C, HW) slabs with the conv
    # zero-padding mask folded in (removes in-kernel lane broadcasts entirely).
    conv_offsets = tuple((p - 1, q - 1) for p in range(3) for q in range(3))
    conv_masks = jnp.stack([boundary_mask(dy, dx) for dy, dx in conv_offsets], 0)

    def weight_slabs(w):
        w9 = w[:, 0].reshape(C, 9).astype(jnp.float32)         # tap index = p*3 + q
        return (w9.T[:, :, None] * conv_masks[:, None, :]).astype(compute_dtype)

    wq_s, wk_s, wv_s = weight_slabs(wq), weight_slabs(wk), weight_slabs(wv)

    if block_n is None:
        block_n = _pick_block_n(N, C, HW)
    assert N % block_n == 0

    kernel = functools.partial(_attention_kernel, H=H, W=W, kH=kH, kW=kW,
                               block_n=block_n, compute_dtype=compute_dtype)

    out = pl.pallas_call(
        kernel,
        out_shape=jax.ShapeDtypeStruct((N, C, HW), hr_feat.dtype),
        grid_spec=pltpu.PrefetchScalarGridSpec(
            num_scalar_prefetch=0,
            grid=(N // block_n,),
            in_specs=[
                pl.BlockSpec((block_n, C, HW), lambda n: (n, 0, 0)),   # hr
                pl.BlockSpec((block_n, C, HW), lambda n: (n, 0, 0)),   # lr
                pl.BlockSpec((9, C, HW), lambda n: (0, 0, 0)),         # wq slabs
                pl.BlockSpec((9, C, HW), lambda n: (0, 0, 0)),         # wk slabs
                pl.BlockSpec((9, C, HW), lambda n: (0, 0, 0)),         # wv slabs
                pl.BlockSpec((kH * kW, HW), lambda n: (0, 0)),         # att masks
            ],
            out_specs=pl.BlockSpec((block_n, C, HW), lambda n: (n, 0, 0)),
            scratch_shapes=[pltpu.VMEM((C, HW), compute_dtype)],       # parked value
        ),
        compiler_params=pltpu.CompilerParams(
            dimension_semantics=("parallel",)),
    )(hr, lr, wq_s, wk_s, wv_s, att_masks)

    return out.reshape(N, C, H, W)


def _reference(hr, lr, wq, wk, wv, kH, kW):
    """Pure-JAX reference (lax depthwise conv + explicit local attention)."""
    def dwconv(x, w):
        return lax.conv_general_dilated(
            x, w, window_strides=(1, 1), padding=((1, 1), (1, 1)),
            dimension_numbers=("NCHW", "OIHW", "NCHW"),
            feature_group_count=x.shape[1])

    q = dwconv(lr, wq)
    k = dwconv(hr, wk)
    v = dwconv(hr, wv)
    N, C, H, W = q.shape
    rH, rW = kH // 2, kW // 2
    kp = jnp.pad(k, ((0, 0), (0, 0), (rH, rH), (rW, rW)))
    vp = jnp.pad(v, ((0, 0), (0, 0), (rH, rH), (rW, rW)))

    logits = []
    for dy in range(kH):
        for dx in range(kW):
            logits.append(jnp.sum(q * kp[:, :, dy:dy + H, dx:dx + W], axis=1))
    logits = jnp.stack(logits, axis=-1)                      # (N, H, W, kH*kW)
    wgt = jax.nn.softmax(logits, axis=-1)

    out = jnp.zeros_like(v)
    i = 0
    for dy in range(kH):
        for dx in range(kW):
            out = out + vp[:, :, dy:dy + H, dx:dx + W] * wgt[..., i][:, None]
            i += 1
    return lr + out


if __name__ == "__main__":
    N, C, H, W = 4, 32, 16, 16
    kH = kW = 3

    key = jax.random.PRNGKey(0)
    k_hr, k_lr, k_q, k_k, k_v = jax.random.split(key, 5)

    hr_feat = jax.random.normal(k_hr, (N, C, H, W), jnp.float32)
    lr_feat = jax.random.normal(k_lr, (N, C, H, W), jnp.float32)

    # kaiming_normal_(a=1): gain = sqrt(2/(1+1)) = 1, fan_in = 1*3*3 -> std = 1/3.
    # Bias is initialized to 0 by init_weight(), so biases are omitted.
    std = 1.0 / 3.0
    wq = jax.random.normal(k_q, (C, 1, 3, 3), jnp.float32) * std
    wk = jax.random.normal(k_k, (C, 1, 3, 3), jnp.float32) * std
    wv = jax.random.normal(k_v, (C, 1, 3, 3), jnp.float32) * std

    # f32 path (default; v5e-safe) — tight parity vs the pure-JAX reference.
    out = jax.block_until_ready(my_attention(hr_feat, lr_feat, wq, wk, wv, kH, kW))
    ref = jax.block_until_ready(_reference(hr_feat, lr_feat, wq, wk, wv, kH, kW))
    assert out.shape == (N, C, H, W)
    assert jnp.allclose(out, ref, atol=1e-4, rtol=1e-4), "f32 mismatch vs reference"

    # bf16 operand path (recommended on v6e/v7x): loose precision sanity check.
    out_bf = jax.block_until_ready(
        my_attention(hr_feat, lr_feat, wq, wk, wv, kH, kW,
                     compute_dtype=jnp.bfloat16))
    err = jnp.abs(out_bf.astype(jnp.float32) - ref)
    assert float(jnp.mean(err)) < 0.1 and float(jnp.max(err)) < 1.0, \
        "bf16 path mismatch vs reference"

    print("KERNEL_OK")
</pallas_src>

<mosaic_0001>
module attributes {stable_mosaic.version = 11 : i64} {
  func.func @_attention_kernel(%arg0: i32, %arg1: memref<2x32x256xf32, #tpu.memory_space<vmem>>, %arg2: memref<2x32x256xf32, #tpu.memory_space<vmem>>, %arg3: memref<9x32x256xf32, #tpu.memory_space<vmem>>, %arg4: memref<9x32x256xf32, #tpu.memory_space<vmem>>, %arg5: memref<9x32x256xf32, #tpu.memory_space<vmem>>, %arg6: memref<9x256xf32, #tpu.memory_space<vmem>>, %arg7: memref<2x32x256xf32, #tpu.memory_space<vmem>>, %arg8: memref<32x256xf32, #tpu.memory_space<vmem>>) attributes {dimension_semantics = [#tpu.dimension_semantics<parallel>], iteration_bounds = array<i64: 2>, scalar_prefetch = 0 : i64, scratch_operands = 1 : i64, tpu.core_type = #tpu.core_type<tc>, window_params = [{transform_indices = @transform_0, window_bounds = array<i64: 2, 32, 256>}, {transform_indices = @transform_1, window_bounds = array<i64: 2, 32, 256>}, {pipeline_mode = #tpu.pipeline_mode<synchronous>, transform_indices = @transform_2, window_bounds = array<i64: 9, 32, 256>}, {pipeline_mode = #tpu.pipeline_mode<synchronous>, transform_indices = @transform_3, window_bounds = array<i64: 9, 32, 256>}, {pipeline_mode = #tpu.pipeline_mode<synchronous>, transform_indices = @transform_4, window_bounds = array<i64: 9, 32, 256>}, {pipeline_mode = #tpu.pipeline_mode<synchronous>, transform_indices = @transform_5, window_bounds = array<i64: 9, 256>}, {transform_indices = @transform_6, window_bounds = array<i64: 2, 32, 256>}]} {
    %c0 = arith.constant 0 : index
    %c0_0 = arith.constant 0 : index
    %0 = vector.load %arg6[%c0, %c0_0] : memref<9x256xf32, #tpu.memory_space<vmem>>, vector<9x256xf32>
    %c0_1 = arith.constant 0 : index
    %c0_2 = arith.constant 0 : index
    %c0_3 = arith.constant 0 : index
    %1 = vector.load %arg1[%c0_1, %c0_2, %c0_3] : memref<2x32x256xf32, #tpu.memory_space<vmem>>, vector<1x32x256xf32>
    %2 = vector.shape_cast %1 : vector<1x32x256xf32> to vector<32x256xf32>
    %cst = arith.constant 0.000000e+00 : f32
    %3 = vector.broadcast %cst : f32 to vector<32x256xf32>
    %cst_4 = arith.constant 0.000000e+00 : f32
    %4 = vector.broadcast %cst_4 : f32 to vector<32x256xf32>
    %c17_i32 = arith.constant 17 : i32
    %5 = tpu.dynamic_rotate %2 by %c17_i32 dim 1 : vector<32x256xf32>, i32 -> vector<32x256xf32>
    %c0_5 = arith.constant 0 : index
    %c0_6 = arith.constant 0 : index
    %c0_7 = arith.constant 0 : index
    %6 = vector.load %arg4[%c0_5, %c0_6, %c0_7] : memref<9x32x256xf32, #tpu.memory_space<vmem>>, vector<1x32x256xf32>
    %7 = vector.shape_cast %6 : vector<1x32x256xf32> to vector<32x256xf32>
    %8 = arith.mulf %5, %7 : vector<32x256xf32>
    %9 = arith.addf %3, %8 : vector<32x256xf32>
    %c0_8 = arith.constant 0 : index
    %c0_9 = arith.constant 0 : index
    %c0_10 = arith.constant 0 : index
    %10 = vector.load %arg5[%c0_8, %c0_9, %c0_10] : memref<9x32x256xf32, #tpu.memory_space<vmem>>, vector<1x32x256xf32>
    %11 = vector.shape_cast %10 : vector<1x32x256xf32> to vector<32x256xf32>
    %12 = arith.mulf %5, %11 : vector<32x256xf32>
    %13 = arith.addf %4, %12 : vector<32x256xf32>
    %c16_i32 = arith.constant 16 : i32
    %14 = tpu.dynamic_rotate %2 by %c16_i32 dim 1 : vector<32x256xf32>, i32 -> vector<32x256xf32>
    %c1 = arith.constant 1 : index
    %c0_11 = arith.constant 0 : index
    %c0_12 = arith.constant 0 : index
    %15 = vector.load %arg4[%c1, %c0_11, %c0_12] : memref<9x32x256xf32, #tpu.memory_space<vmem>>, vector<1x32x256xf32>
    %16 = vector.shape_cast %15 : vector<1x32x256xf32> to vector<32x256xf32>
    %17 = arith.mulf %14, %16 : vector<32x256xf32>
    %18 = arith.addf %9, %17 : vector<32x256xf32>
    %c1_13 = arith.constant 1 : index
    %c0_14 = arith.constant 0 : index
    %c0_15 = arith.constant 0 : index
    %19 = vector.load %arg5[%c1_13, %c0_14, %c0_15] : memref<9x32x256xf32, #tpu.memory_space<vmem>>, vector<1x32x256xf32>
    %20 = vector.shape_cast %19 : vector<1x32x256xf32> to vector<32x256xf32>
    %21 = arith.mulf %14, %20 : vector<32x256xf32>
    %22 = arith.addf %13, %21 : vector<32x256xf32>
    %c15_i32 = arith.constant 15 : i32
    %23 = tpu.dynamic_rotate %2 by %c15_i32 dim 1 : vector<32x256xf32>, i32 -> vector<32x256xf32>
    %c2 = arith.constant 2 : index
    %c0_16 = arith.constant 0 : index
    %c0_17 = arith.constant 0 : index
    %24 = vector.load %arg4[%c2, %c0_16, %c0_17] : memref<9x32x256xf32, #tpu.memory_space<vmem>>, vector<1x32x256xf32>
    %25 = vector.shape_cast %24 : vector<1x32x256xf32> to vector<32x256xf32>
    %26 = arith.mulf %23, %25 : vector<32x256xf32>
    %27 = arith.addf %18, %26 : vector<32x256xf32>
    %c2_18 = arith.constant 2 : index
    %c0_19 = arith.constant 0 : index
    %c0_20 = arith.constant 0 : index
    %28 = vector.load %arg5[%c2_18, %c0_19, %c0_20] : memref<9x32x256xf32, #tpu.memory_space<vmem>>, vector<1x32x256xf32>
    %29 = vector.shape_cast %28 : vector<1x32x256xf32> to vector<32x256xf32>
    %30 = arith.mulf %23, %29 : vector<32x256xf32>
    %31 = arith.addf %22, %30 : vector<32x256xf32>
    %c1_i32 = arith.constant 1 : i32
    %32 = tpu.dynamic_rotate %2 by %c1_i32 dim 1 : vector<32x256xf32>, i32 -> vector<32x256xf32>
    %c3 = arith.constant 3 : index
    %c0_21 = arith.constant 0 : index
    %c0_22 = arith.constant 0 : index
    %33 = vector.load %arg4[%c3, %c0_21, %c0_22] : memref<9x32x256xf32, #tpu.memory_space<vmem>>, vector<1x32x256xf32>
    %34 = vector.shape_cast %33 : vector<1x32x256xf32> to vector<32x256xf32>
    %35 = arith.mulf %32, %34 : vector<32x256xf32>
    %36 = arith.addf %27, %35 : vector<32x256xf32>
    %c3_23 = arith.constant 3 : index
    %c0_24 = arith.constant 0 : index
    %c0_25 = arith.constant 0 : index
    %37 = vector.load %arg5[%c3_23, %c0_24, %c0_25] : memref<9x32x256xf32, #tpu.memory_space<vmem>>, vector<1x32x256xf32>
    %38 = vector.shape_cast %37 : vector<1x32x256xf32> to vector<32x256xf32>
    %39 = arith.mulf %32, %38 : vector<32x256xf32>
    %40 = arith.addf %31, %39 : vector<32x256xf32>
    %c4 = arith.constant 4 : index
    %c0_26 = arith.constant 0 : index
    %c0_27 = arith.constant 0 : index
    %41 = vector.load %arg4[%c4, %c0_26, %c0_27] : memref<9x32x256xf32, #tpu.memory_space<vmem>>, vector<1x32x256xf32>
    %42 = vector.shape_cast %41 : vector<1x32x256xf32> to vector<32x256xf32>
    %43 = arith.mulf %2, %42 : vector<32x256xf32>
    %44 = arith.addf %36, %43 : vector<32x256xf32>
    %c4_28 = arith.constant 4 : index
    %c0_29 = arith.constant 0 : index
    %c0_30 = arith.constant 0 : index
    %45 = vector.load %arg5[%c4_28, %c0_29, %c0_30] : memref<9x32x256xf32, #tpu.memory_space<vmem>>, vector<1x32x256xf32>
    %46 = vector.shape_cast %45 : vector<1x32x256xf32> to vector<32x256xf32>
    %47 = arith.mulf %2, %46 : vector<32x256xf32>
    %48 = arith.addf %40, %47 : vector<32x256xf32>
    %c255_i32 = arith.constant 255 : i32
    %49 = tpu.dynamic_rotate %2 by %c255_i32 dim 1 : vector<32x256xf32>, i32 -> vector<32x256xf32>
    %c5 = arith.constant 5 : index
    %c0_31 = arith.constant 0 : index
    %c0_32 = arith.constant 0 : index
    %50 = vector.load %arg4[%c5, %c0_31, %c0_32] : memref<9x32x256xf32, #tpu.memory_space<vmem>>, vector<1x32x256xf32>
    %51 = vector.shape_cast %50 : vector<1x32x256xf32> to vector<32x256xf32>
    %52 = arith.mulf %49, %51 : vector<32x256xf32>
    %53 = arith.addf %44, %52 : vector<32x256xf32>
    %c5_33 = arith.constant 5 : index
    %c0_34 = arith.constant 0 : index
    %c0_35 = arith.constant 0 : index
    %54 = vector.load %arg5[%c5_33, %c0_34, %c0_35] : memref<9x32x256xf32, #tpu.memory_space<vmem>>, vector<1x32x256xf32>
    %55 = vector.shape_cast %54 : vector<1x32x256xf32> to vector<32x256xf32>
    %56 = arith.mulf %49, %55 : vector<32x256xf32>
    %57 = arith.addf %48, %56 : vector<32x256xf32>
    %c241_i32 = arith.constant 241 : i32
    %58 = tpu.dynamic_rotate %2 by %c241_i32 dim 1 : vector<32x256xf32>, i32 -> vector<32x256xf32>
    %c6 = arith.constant 6 : index
    %c0_36 = arith.constant 0 : index
    %c0_37 = arith.constant 0 : index
    %59 = vector.load %arg4[%c6, %c0_36, %c0_37] : memref<9x32x256xf32, #tpu.memory_space<vmem>>, vector<1x32x256xf32>
    %60 = vector.shape_cast %59 : vector<1x32x256xf32> to vector<32x256xf32>
    %61 = arith.mulf %58, %60 : vector<32x256xf32>
    %62 = arith.addf %53, %61 : vector<32x256xf32>
    %c6_38 = arith.constant 6 : index
    %c0_39 = arith.constant 0 : index
    %c0_40 = arith.constant 0 : index
    %63 = vector.load %arg5[%c6_38, %c0_39, %c0_40] : memref<9x32x256xf32, #tpu.memory_space<vmem>>, vector<1x32x256xf32>
    %64 = vector.shape_cast %63 : vector<1x32x256xf32> to vector<32x256xf32>
    %65 = arith.mulf %58, %64 : vector<32x256xf32>
    %66 = arith.addf %57, %65 : vector<32x256xf32>
    %c240_i32 = arith.constant 240 : i32
    %67 = tpu.dynamic_rotate %2 by %c240_i32 dim 1 : vector<32x256xf32>, i32 -> vector<32x256xf32>
    %c7 = arith.constant 7 : index
    %c0_41 = arith.constant 0 : index
    %c0_42 = arith.constant 0 : index
    %68 = vector.load %arg4[%c7, %c0_41, %c0_42] : memref<9x32x256xf32, #tpu.memory_space<vmem>>, vector<1x32x256xf32>
    %69 = vector.shape_cast %68 : vector<1x32x256xf32> to vector<32x256xf32>
    %70 = arith.mulf %67, %69 : vector<32x256xf32>
    %71 = arith.addf %62, %70 : vector<32x256xf32>
    %c7_43 = arith.constant 7 : index
    %c0_44 = arith.constant 0 : index
    %c0_45 = arith.constant 0 : index
    %72 = vector.load %arg5[%c7_43, %c0_44, %c0_45] : memref<9x32x256xf32, #tpu.memory_space<vmem>>, vector<1x32x256xf32>
    %73 = vector.shape_cast %72 : vector<1x32x256xf32> to vector<32x256xf32>
    %74 = arith.mulf %67, %73 : vector<32x256xf32>
    %75 = arith.addf %66, %74 : vector<32x256xf32>
    %c239_i32 = arith.constant 239 : i32
    %76 = tpu.dynamic_rotate %2 by %c239_i32 dim 1 : vector<32x256xf32>, i32 -> vector<32x256xf32>
    %c8 = arith.constant 8 : index
    %c0_46 = arith.constant 0 : index
    %c0_47 = arith.constant 0 : index
    %77 = vector.load %arg4[%c8, %c0_46, %c0_47] : memref<9x32x256xf32, #tpu.memory_space<vmem>>, vector<1x32x256xf32>
    %78 = vector.shape_cast %77 : vector<1x32x256xf32> to vector<32x256xf32>
    %79 = arith.mulf %76, %78 : vector<32x256xf32>
    %80 = arith.addf %71, %79 : vector<32x256xf32>
    %c8_48 = arith.constant 8 : index
    %c0_49 = arith.constant 0 : index
    %c0_50 = arith.constant 0 : index
    %81 = vector.load %arg5[%c8_48, %c0_49, %c0_50] : memref<9x32x256xf32, #tpu.memory_space<vmem>>, vector<1x32x256xf32>
    %82 = vector.shape_cast %81 : vector<1x32x256xf32> to vector<32x256xf32>
    %83 = arith.mulf %76, %82 : vector<32x256xf32>
    %84 = arith.addf %75, %83 : vector<32x256xf32>
    %c0_51 = arith.constant 0 : index
    %c0_52 = arith.constant 0 : index
    %85 = vector.load %arg8[%c0_51, %c0_52] : memref<32x256xf32, #tpu.memory_space<vmem>>, vector<32x256xf32>
    tpu.vector_store %arg8[%c0_51, %c0_52], %84 {strides = array<i32>} : memref<32x256xf32, #tpu.memory_space<vmem>>, vector<32x256xf32>,
    %c0_53 = arith.constant 0 : index
    %c0_54 = arith.constant 0 : index
    %c0_55 = arith.constant 0 : index
    %86 = vector.load %arg2[%c0_53, %c0_54, %c0_55] : memref<2x32x256xf32, #tpu.memory_space<vmem>>, vector<1x32x256xf32>
    %87 = vector.shape_cast %86 : vector<1x32x256xf32> to vector<32x256xf32>
    %cst_56 = arith.constant 0.000000e+00 : f32
    %88 = vector.broadcast %cst_56 : f32 to vector<32x256xf32>
    %c17_i32_57 = arith.constant 17 : i32
    %89 = tpu.dynamic_rotate %87 by %c17_i32_57 dim 1 : vector<32x256xf32>, i32 -> vector<32x256xf32>
    %c0_58 = arith.constant 0 : index
    %c0_59 = arith.constant 0 : index
    %c0_60 = arith.constant 0 : index
    %90 = vector.load %arg3[%c0_58, %c0_59, %c0_60] : memref<9x32x256xf32, #tpu.memory_space<vmem>>, vector<1x32x256xf32>
    %91 = vector.shape_cast %90 : vector<1x32x256xf32> to vector<32x256xf32>
    %92 = arith.mulf %89, %91 : vector<32x256xf32>
    %93 = arith.addf %88, %92 : vector<32x256xf32>
    %c16_i32_61 = arith.constant 16 : i32
    %94 = tpu.dynamic_rotate %87 by %c16_i32_61 dim 1 : vector<32x256xf32>, i32 -> vector<32x256xf32>
    %c1_62 = arith.constant 1 : index
    %c0_63 = arith.constant 0 : index
    %c0_64 = arith.constant 0 : index
    %95 = vector.load %arg3[%c1_62, %c0_63, %c0_64] : memref<9x32x256xf32, #tpu.memory_space<vmem>>, vector<1x32x256xf32>
    %96 = vector.shape_cast %95 : vector<1x32x256xf32> to vector<32x256xf32>
    %97 = arith.mulf %94, %96 : vector<32x256xf32>
    %98 = arith.addf %93, %97 : vector<32x256xf32>
    %c15_i32_65 = arith.constant 15 : i32
    %99 = tpu.dynamic_rotate %87 by %c15_i32_65 dim 1 : vector<32x256xf32>, i32 -> vector<32x256xf32>
    %c2_66 = arith.constant 2 : index
    %c0_67 = arith.constant 0 : index
    %c0_68 = arith.constant 0 : index
    %100 = vector.load %arg3[%c2_66, %c0_67, %c0_68] : memref<9x32x256xf32, #tpu.memory_space<vmem>>, vector<1x32x256xf32>
    %101 = vector.shape_cast %100 : vector<1x32x256xf32> to vector<32x256xf32>
    %102 = arith.mulf %99, %101 : vector<32x256xf32>
    %103 = arith.addf %98, %102 : vector<32x256xf32>
    %c1_i32_69 = arith.constant 1 : i32
    %104 = tpu.dynamic_rotate %87 by %c1_i32_69 dim 1 : vector<32x256xf32>, i32 -> vector<32x256xf32>
    %c3_70 = arith.constant 3 : index
    %c0_71 = arith.constant 0 : index
    %c0_72 = arith.constant 0 : index
    %105 = vector.load %arg3[%c3_70, %c0_71, %c0_72] : memref<9x32x256xf32, #tpu.memory_space<vmem>>, vector<1x32x256xf32>
    %106 = vector.shape_cast %105 : vector<1x32x256xf32> to vector<32x256xf32>
    %107 = arith.mulf %104, %106 : vector<32x256xf32>
    %108 = arith.addf %103, %107 : vector<32x256xf32>
    %c4_73 = arith.constant 4 : index
    %c0_74 = arith.constant 0 : index
    %c0_75 = arith.constant 0 : index
    %109 = vector.load %arg3[%c4_73, %c0_74, %c0_75] : memref<9x32x256xf32, #tpu.memory_space<vmem>>, vector<1x32x256xf32>
    %110 = vector.shape_cast %109 : vector<1x32x256xf32> to vector<32x256xf32>
    %111 = arith.mulf %87, %110 : vector<32x256xf32>
    %112 = arith.addf %108, %111 : vector<32x256xf32>
    %c255_i32_76 = arith.constant 255 : i32
    %113 = tpu.dynamic_rotate %87 by %c255_i32_76 dim 1 : vector<32x256xf32>, i32 -> vector<32x256xf32>
    %c5_77 = arith.constant 5 : index
    %c0_78 = arith.constant 0 : index
    %c0_79 = arith.constant 0 : index
    %114 = vector.load %arg3[%c5_77, %c0_78, %c0_79] : memref<9x32x256xf32, #tpu.memory_space<vmem>>, vector<1x32x256xf32>
    %115 = vector.shape_cast %114 : vector<1x32x256xf32> to vector<32x256xf32>
    %116 = arith.mulf %113, %115 : vector<32x256xf32>
    %117 = arith.addf %112, %116 : vector<32x256xf32>
    %c241_i32_80 = arith.constant 241 : i32
    %118 = tpu.dynamic_rotate %87 by %c241_i32_80 dim 1 : vector<32x256xf32>, i32 -> vector<32x256xf32>
    %c6_81 = arith.constant 6 : index
    %c0_82 = arith.constant 0 : index
    %c0_83 = arith.constant 0 : index
    %119 = vector.load %arg3[%c6_81, %c0_82, %c0_83] : memref<9x32x256xf32, #tpu.memory_space<vmem>>, vector<1x32x256xf32>
    %120 = vector.shape_cast %119 : vector<1x32x256xf32> to vector<32x256xf32>
    %121 = arith.mulf %118, %120 : vector<32x256xf32>
    %122 = arith.addf %117, %121 : vector<32x256xf32>
    %c240_i32_84 = arith.constant 240 : i32
    %123 = tpu.dynamic_rotate %87 by %c240_i32_84 dim 1 : vector<32x256xf32>, i32 -> vector<32x256xf32>
    %c7_85 = arith.constant 7 : index
    %c0_86 = arith.constant 0 : index
    %c0_87 = arith.constant 0 : index
    %124 = vector.load %arg3[%c7_85, %c0_86, %c0_87] : memref<9x32x256xf32, #tpu.memory_space<vmem>>, vector<1x32x256xf32>
    %125 = vector.shape_cast %124 : vector<1x32x256xf32> to vector<32x256xf32>
    %126 = arith.mulf %123, %125 : vector<32x256xf32>
    %127 = arith.addf %122, %126 : vector<32x256xf32>
    %c239_i32_88 = arith.constant 239 : i32
    %128 = tpu.dynamic_rotate %87 by %c239_i32_88 dim 1 : vector<32x256xf32>, i32 -> vector<32x256xf32>
    %c8_89 = arith.constant 8 : index
    %c0_90 = arith.constant 0 : index
    %c0_91 = arith.constant 0 : index
    %129 = vector.load %arg3[%c8_89, %c0_90, %c0_91] : memref<9x32x256xf32, #tpu.memory_space<vmem>>, vector<1x32x256xf32>
    %130 = vector.shape_cast %129 : vector<1x32x256xf32> to vector<32x256xf32>
    %131 = arith.mulf %128, %130 : vector<32x256xf32>
    %132 = arith.addf %127, %131 : vector<32x256xf32>
    %c17_i32_92 = arith.constant 17 : i32
    %133 = tpu.dynamic_rotate %80 by %c17_i32_92 dim 1 : vector<32x256xf32>, i32 -> vector<32x256xf32>
    %134 = arith.mulf %132, %133 : vector<32x256xf32>
    %cst_93 = arith.constant dense<0.000000e+00> : vector<256xf32>
    %135 = vector.multi_reduction <add>, %134, %cst_93 [0] : vector<32x256xf32> to vector<256xf32>
    %136 = vector.shape_cast %135 : vector<256xf32> to vector<1x256xf32>
    %137 = vector.extract_strided_slice %0 {offsets = [0, 0], sizes = [1, 256], strides = [1, 1]} : vector<9x256xf32> to vector<1x256xf32>
    %138 = arith.mulf %136, %137 : vector<1x256xf32>
    %c16_i32_94 = arith.constant 16 : i32
    %139 = tpu.dynamic_rotate %80 by %c16_i32_94 dim 1 : vector<32x256xf32>, i32 -> vector<32x256xf32>
    %140 = arith.mulf %132, %139 : vector<32x256xf32>
    %cst_95 = arith.constant dense<0.000000e+00> : vector<256xf32>
    %141 = vector.multi_reduction <add>, %140, %cst_95 [0] : vector<32x256xf32> to vector<256xf32>
    %142 = vector.shape_cast %141 : vector<256xf32> to vector<1x256xf32>
    %143 = vector.extract_strided_slice %0 {offsets = [1, 0], sizes = [1, 256], strides = [1, 1]} : vector<9x256xf32> to vector<1x256xf32>
    %144 = arith.mulf %142, %143 : vector<1x256xf32>
    %c15_i32_96 = arith.constant 15 : i32
    %145 = tpu.dynamic_rotate %80 by %c15_i32_96 dim 1 : vector<32x256xf32>, i32 -> vector<32x256xf32>
    %146 = arith.mulf %132, %145 : vector<32x256xf32>
    %cst_97 = arith.constant dense<0.000000e+00> : vector<256xf32>
    %147 = vector.multi_reduction <add>, %146, %cst_97 [0] : vector<32x256xf32> to vector<256xf32>
    %148 = vector.shape_cast %147 : vector<256xf32> to vector<1x256xf32>
    %149 = vector.extract_strided_slice %0 {offsets = [2, 0], sizes = [1, 256], strides = [1, 1]} : vector<9x256xf32> to vector<1x256xf32>
    %150 = arith.mulf %148, %149 : vector<1x256xf32>
    %c1_i32_98 = arith.constant 1 : i32
    %151 = tpu.dynamic_rotate %80 by %c1_i32_98 dim 1 : vector<32x256xf32>, i32 -> vector<32x256xf32>
    %152 = arith.mulf %132, %151 : vector<32x256xf32>
    %cst_99 = arith.constant dense<0.000000e+00> : vector<256xf32>
    %153 = vector.multi_reduction <add>, %152, %cst_99 [0] : vector<32x256xf32> to vector<256xf32>
    %154 = vector.shape_cast %153 : vector<256xf32> to vector<1x256xf32>
    %155 = vector.extract_strided_slice %0 {offsets = [3, 0], sizes = [1, 256], strides = [1, 1]} : vector<9x256xf32> to vector<1x256xf32>
    %156 = arith.mulf %154, %155 : vector<1x256xf32>
    %157 = arith.mulf %132, %80 : vector<32x256xf32>
    %cst_100 = arith.constant dense<0.000000e+00> : vector<256xf32>
    %158 = vector.multi_reduction <add>, %157, %cst_100 [0] : vector<32x256xf32> to vector<256xf32>
    %159 = vector.shape_cast %158 : vector<256xf32> to vector<1x256xf32>
    %c255_i32_101 = arith.constant 255 : i32
    %160 = tpu.dynamic_rotate %80 by %c255_i32_101 dim 1 : vector<32x256xf32>, i32 -> vector<32x256xf32>
    %161 = arith.mulf %132, %160 : vector<32x256xf32>
    %cst_102 = arith.constant dense<0.000000e+00> : vector<256xf32>
    %162 = vector.multi_reduction <add>, %161, %cst_102 [0] : vector<32x256xf32> to vector<256xf32>
    %163 = vector.shape_cast %162 : vector<256xf32> to vector<1x256xf32>
    %164 = vector.extract_strided_slice %0 {offsets = [5, 0], sizes = [1, 256], strides = [1, 1]} : vector<9x256xf32> to vector<1x256xf32>
    %165 = arith.mulf %163, %164 : vector<1x256xf32>
    %c241_i32_103 = arith.constant 241 : i32
    %166 = tpu.dynamic_rotate %80 by %c241_i32_103 dim 1 : vector<32x256xf32>, i32 -> vector<32x256xf32>
    %167 = arith.mulf %132, %166 : vector<32x256xf32>
    %cst_104 = arith.constant dense<0.000000e+00> : vector<256xf32>
    %168 = vector.multi_reduction <add>, %167, %cst_104 [0] : vector<32x256xf32> to vector<256xf32>
    %169 = vector.shape_cast %168 : vector<256xf32> to vector<1x256xf32>
    %170 = vector.extract_strided_slice %0 {offsets = [6, 0], sizes = [1, 256], strides = [1, 1]} : vector<9x256xf32> to vector<1x256xf32>
    %171 = arith.mulf %169, %170 : vector<1x256xf32>
    %c240_i32_105 = arith.constant 240 : i32
    %172 = tpu.dynamic_rotate %80 by %c240_i32_105 dim 1 : vector<32x256xf32>, i32 -> vector<32x256xf32>
    %173 = arith.mulf %132, %172 : vector<32x256xf32>
    %cst_106 = arith.constant dense<0.000000e+00> : vector<256xf32>
    %174 = vector.multi_reduction <add>, %173, %cst_106 [0] : vector<32x256xf32> to vector<256xf32>
    %175 = vector.shape_cast %174 : vector<256xf32> to vector<1x256xf32>
    %176 = vector.extract_strided_slice %0 {offsets = [7, 0], sizes = [1, 256], strides = [1, 1]} : vector<9x256xf32> to vector<1x256xf32>
    %177 = arith.mulf %175, %176 : vector<1x256xf32>
    %c239_i32_107 = arith.constant 239 : i32
    %178 = tpu.dynamic_rotate %80 by %c239_i32_107 dim 1 : vector<32x256xf32>, i32 -> vector<32x256xf32>
    %179 = arith.mulf %132, %178 : vector<32x256xf32>
    %cst_108 = arith.constant dense<0.000000e+00> : vector<256xf32>
    %180 = vector.multi_reduction <add>, %179, %cst_108 [0] : vector<32x256xf32> to vector<256xf32>
    %181 = vector.shape_cast %180 : vector<256xf32> to vector<1x256xf32>
    %182 = vector.extract_strided_slice %0 {offsets = [8, 0], sizes = [1, 256], strides = [1, 1]} : vector<9x256xf32> to vector<1x256xf32>
    %183 = arith.mulf %181, %182 : vector<1x256xf32>
    %184 = arith.maximumf %138, %144 : vector<1x256xf32>
    %185 = arith.maximumf %184, %150 : vector<1x256xf32>
    %186 = arith.maximumf %185, %156 : vector<1x256xf32>
    %187 = arith.maximumf %186, %159 : vector<1x256xf32>
    %188 = arith.maximumf %187, %165 : vector<1x256xf32>
    %189 = arith.maximumf %188, %171 : vector<1x256xf32>
    %190 = arith.maximumf %189, %177 : vector<1x256xf32>
    %191 = arith.maximumf %190, %183 : vector<1x256xf32>
    %192 = arith.subf %138, %191 : vector<1x256xf32>
    %193 = math.exp %192 : vector<1x256xf32>
    %194 = arith.subf %144, %191 : vector<1x256xf32>
    %195 = math.exp %194 : vector<1x256xf32>
    %196 = arith.subf %150, %191 : vector<1x256xf32>
    %197 = math.exp %196 : vector<1x256xf32>
    %198 = arith.subf %156, %191 : vector<1x256xf32>
    %199 = math.exp %198 : vector<1x256xf32>
    %200 = arith.subf %159, %191 : vector<1x256xf32>
    %201 = math.exp %200 : vector<1x256xf32>
    %202 = arith.subf %165, %191 : vector<1x256xf32>
    %203 = math.exp %202 : vector<1x256xf32>
    %204 = arith.subf %171, %191 : vector<1x256xf32>
    %205 = math.exp %204 : vector<1x256xf32>
    %206 = arith.subf %177, %191 : vector<1x256xf32>
    %207 = math.exp %206 : vector<1x256xf32>
    %208 = arith.subf %183, %191 : vector<1x256xf32>
    %209 = math.exp %208 : vector<1x256xf32>
    %210 = arith.addf %193, %195 : vector<1x256xf32>
    %211 = arith.addf %210, %197 : vector<1x256xf32>
    %212 = arith.addf %211, %199 : vector<1x256xf32>
    %213 = arith.addf %212, %201 : vector<1x256xf32>
    %214 = arith.addf %213, %203 : vector<1x256xf32>
    %215 = arith.addf %214, %205 : vector<1x256xf32>
    %216 = arith.addf %215, %207 : vector<1x256xf32>
    %217 = arith.addf %216, %209 : vector<1x256xf32>
    %218 = tpu.reciprocal %217 {approx = true} : vector<1x256xf32> -> vector<1x256xf32>
    %219 = arith.mulf %217, %218 : vector<1x256xf32>
    %cst_109 = arith.constant 2.000000e+00 : f32
    %220 = vector.broadcast %cst_109 : f32 to vector<1x256xf32>
    %221 = arith.subf %220, %219 : vector<1x256xf32>
    %222 = arith.mulf %218, %221 : vector<1x256xf32>
    %cst_110 = arith.constant 0.000000e+00 : f32
    %223 = vector.broadcast %cst_110 : f32 to vector<32x256xf32>
    %224 = arith.mulf %193, %222 : vector<1x256xf32>
    %225 = vector.extract_strided_slice %0 {offsets = [0, 0], sizes = [1, 256], strides = [1, 1]} : vector<9x256xf32> to vector<1x256xf32>
    %226 = arith.mulf %224, %225 : vector<1x256xf32>
    %c0_111 = arith.constant 0 : index
    %c0_112 = arith.constant 0 : index
    %227 = vector.load %arg8[%c0_111, %c0_112] : memref<32x256xf32, #tpu.memory_space<vmem>>, vector<32x256xf32>
    %c17_i32_113 = arith.constant 17 : i32
    %228 = tpu.dynamic_rotate %227 by %c17_i32_113 dim 1 : vector<32x256xf32>, i32 -> vector<32x256xf32>
    %229 = vector.broadcast %226 : vector<1x256xf32> to vector<32x256xf32>
    %230 = arith.mulf %229, %228 : vector<32x256xf32>
    %231 = arith.addf %223, %230 : vector<32x256xf32>
    %232 = arith.mulf %195, %222 : vector<1x256xf32>
    %233 = vector.extract_strided_slice %0 {offsets = [1, 0], sizes = [1, 256], strides = [1, 1]} : vector<9x256xf32> to vector<1x256xf32>
    %234 = arith.mulf %232, %233 : vector<1x256xf32>
    %c0_114 = arith.constant 0 : index
    %c0_115 = arith.constant 0 : index
    %235 = vector.load %arg8[%c0_114, %c0_115] : memref<32x256xf32, #tpu.memory_space<vmem>>, vector<32x256xf32>
    %c16_i32_116 = arith.constant 16 : i32
    %236 = tpu.dynamic_rotate %235 by %c16_i32_116 dim 1 : vector<32x256xf32>, i32 -> vector<32x256xf32>
    %237 = vector.broadcast %234 : vector<1x256xf32> to vector<32x256xf32>
    %238 = arith.mulf %237, %236 : vector<32x256xf32>
    %239 = arith.addf %231, %238 : vector<32x256xf32>
    %240 = arith.mulf %197, %222 : vector<1x256xf32>
    %241 = vector.extract_strided_slice %0 {offsets = [2, 0], sizes = [1, 256], strides = [1, 1]} : vector<9x256xf32> to vector<1x256xf32>
    %242 = arith.mulf %240, %241 : vector<1x256xf32>
    %c0_117 = arith.constant 0 : index
    %c0_118 = arith.constant 0 : index
    %243 = vector.load %arg8[%c0_117, %c0_118] : memref<32x256xf32, #tpu.memory_space<vmem>>, vector<32x256xf32>
    %c15_i32_119 = arith.constant 15 : i32
    %244 = tpu.dynamic_rotate %243 by %c15_i32_119 dim 1 : vector<32x256xf32>, i32 -> vector<32x256xf32>
    %245 = vector.broadcast %242 : vector<1x256xf32> to vector<32x256xf32>
    %246 = arith.mulf %245, %244 : vector<32x256xf32>
    %247 = arith.addf %239, %246 : vector<32x256xf32>
    %248 = arith.mulf %199, %222 : vector<1x256xf32>
    %249 = vector.extract_strided_slice %0 {offsets = [3, 0], sizes = [1, 256], strides = [1, 1]} : vector<9x256xf32> to vector<1x256xf32>
    %250 = arith.mulf %248, %249 : vector<1x256xf32>
    %c0_120 = arith.constant 0 : index
    %c0_121 = arith.constant 0 : index
    %251 = vector.load %arg8[%c0_120, %c0_121] : memref<32x256xf32, #tpu.memory_space<vmem>>, vector<32x256xf32>
    %c1_i32_122 = arith.constant 1 : i32
    %252 = tpu.dynamic_rotate %251 by %c1_i32_122 dim 1 : vector<32x256xf32>, i32 -> vector<32x256xf32>
    %253 = vector.broadcast %250 : vector<1x256xf32> to vector<32x256xf32>
    %254 = arith.mulf %253, %252 : vector<32x256xf32>
    %255 = arith.addf %247, %254 : vector<32x256xf32>
    %256 = arith.mulf %201, %222 : vector<1x256xf32>
    %c0_123 = arith.constant 0 : index
    %c0_124 = arith.constant 0 : index
    %257 = vector.load %arg8[%c0_123, %c0_124] : memref<32x256xf32, #tpu.memory_space<vmem>>, vector<32x256xf32>
    %258 = vector.broadcast %256 : vector<1x256xf32> to vector<32x256xf32>
    %259 = arith.mulf %258, %257 : vector<32x256xf32>
    %260 = arith.addf %255, %259 : vector<32x256xf32>
    %261 = arith.mulf %203, %222 : vector<1x256xf32>
    %262 = vector.extract_strided_slice %0 {offsets = [5, 0], sizes = [1, 256], strides = [1, 1]} : vector<9x256xf32> to vector<1x256xf32>
    %263 = arith.mulf %261, %262 : vector<1x256xf32>
    %c0_125 = arith.constant 0 : index
    %c0_126 = arith.constant 0 : index
    %264 = vector.load %arg8[%c0_125, %c0_126] : memref<32x256xf32, #tpu.memory_space<vmem>>, vector<32x256xf32>
    %c255_i32_127 = arith.constant 255 : i32
    %265 = tpu.dynamic_rotate %264 by %c255_i32_127 dim 1 : vector<32x256xf32>, i32 -> vector<32x256xf32>
    %266 = vector.broadcast %263 : vector<1x256xf32> to vector<32x256xf32>
    %267 = arith.mulf %266, %265 : vector<32x256xf32>
    %268 = arith.addf %260, %267 : vector<32x256xf32>
    %269 = arith.mulf %205, %222 : vector<1x256xf32>
    %270 = vector.extract_strided_slice %0 {offsets = [6, 0], sizes = [1, 256], strides = [1, 1]} : vector<9x256xf32> to vector<1x256xf32>
    %271 = arith.mulf %269, %270 : vector<1x256xf32>
    %c0_128 = arith.constant 0 : index
    %c0_129 = arith.constant 0 : index
    %272 = vector.load %arg8[%c0_128, %c0_129] : memref<32x256xf32, #tpu.memory_space<vmem>>, vector<32x256xf32>
    %c241_i32_130 = arith.constant 241 : i32
    %273 = tpu.dynamic_rotate %272 by %c241_i32_130 dim 1 : vector<32x256xf32>, i32 -> vector<32x256xf32>
    %274 = vector.broadcast %271 : vector<1x256xf32> to vector<32x256xf32>
    %275 = arith.mulf %274, %273 : vector<32x256xf32>
    %276 = arith.addf %268, %275 : vector<32x256xf32>
    %277 = arith.mulf %207, %222 : vector<1x256xf32>
    %278 = vector.extract_strided_slice %0 {offsets = [7, 0], sizes = [1, 256], strides = [1, 1]} : vector<9x256xf32> to vector<1x256xf32>
    %279 = arith.mulf %277, %278 : vector<1x256xf32>
    %c0_131 = arith.constant 0 : index
    %c0_132 = arith.constant 0 : index
    %280 = vector.load %arg8[%c0_131, %c0_132] : memref<32x256xf32, #tpu.memory_space<vmem>>, vector<32x256xf32>
    %c240_i32_133 = arith.constant 240 : i32
    %281 = tpu.dynamic_rotate %280 by %c240_i32_133 dim 1 : vector<32x256xf32>, i32 -> vector<32x256xf32>
    %282 = vector.broadcast %279 : vector<1x256xf32> to vector<32x256xf32>
    %283 = arith.mulf %282, %281 : vector<32x256xf32>
    %284 = arith.addf %276, %283 : vector<32x256xf32>
    %285 = arith.mulf %209, %222 : vector<1x256xf32>
    %286 = vector.extract_strided_slice %0 {offsets = [8, 0], sizes = [1, 256], strides = [1, 1]} : vector<9x256xf32> to vector<1x256xf32>
    %287 = arith.mulf %285, %286 : vector<1x256xf32>
    %c0_134 = arith.constant 0 : index
    %c0_135 = arith.constant 0 : index
    %288 = vector.load %arg8[%c0_134, %c0_135] : memref<32x256xf32, #tpu.memory_space<vmem>>, vector<32x256xf32>
    %c239_i32_136 = arith.constant 239 : i32
    %289 = tpu.dynamic_rotate %288 by %c239_i32_136 dim 1 : vector<32x256xf32>, i32 -> vector<32x256xf32>
    %290 = vector.broadcast %287 : vector<1x256xf32> to vector<32x256xf32>
    %291 = arith.mulf %290, %289 : vector<32x256xf32>
    %292 = arith.addf %284, %291 : vector<32x256xf32>
    %c0_137 = arith.constant 0 : index
    %c0_138 = arith.constant 0 : index
    %c0_139 = arith.constant 0 : index
    %293 = vector.load %arg2[%c0_137, %c0_138, %c0_139] : memref<2x32x256xf32, #tpu.memory_space<vmem>>, vector<1x32x256xf32>
    %294 = vector.shape_cast %293 : vector<1x32x256xf32> to vector<32x256xf32>
    %295 = arith.addf %294, %292 : vector<32x256xf32>
    %c0_140 = arith.constant 0 : index
    %c0_141 = arith.constant 0 : index
    %c0_142 = arith.constant 0 : index
    %296 = vector.load %arg7[%c0_140, %c0_141, %c0_142] : memref<2x32x256xf32, #tpu.memory_space<vmem>>, vector<1x32x256xf32>
    %297 = vector.shape_cast %296 : vector<1x32x256xf32> to vector<32x256xf32>
    %298 = vector.shape_cast %295 : vector<32x256xf32> to vector<1x32x256xf32>
    tpu.vector_store %arg7[%c0_140, %c0_141, %c0_142], %298 {strides = array<i32>} : memref<2x32x256xf32, #tpu.memory_space<vmem>>, vector<1x32x256xf32>,
    %c1_143 = arith.constant 1 : index
    %c0_144 = arith.constant 0 : index
    %c0_145 = arith.constant 0 : index
    %299 = vector.load %arg1[%c1_143, %c0_144, %c0_145] : memref<2x32x256xf32, #tpu.memory_space<vmem>>, vector<1x32x256xf32>
    %300 = vector.shape_cast %299 : vector<1x32x256xf32> to vector<32x256xf32>
    %cst_146 = arith.constant 0.000000e+00 : f32
    %301 = vector.broadcast %cst_146 : f32 to vector<32x256xf32>
    %cst_147 = arith.constant 0.000000e+00 : f32
    %302 = vector.broadcast %cst_147 : f32 to vector<32x256xf32>
    %c17_i32_148 = arith.constant 17 : i32
    %303 = tpu.dynamic_rotate %300 by %c17_i32_148 dim 1 : vector<32x256xf32>, i32 -> vector<32x256xf32>
    %c0_149 = arith.constant 0 : index
    %c0_150 = arith.constant 0 : index
    %c0_151 = arith.constant 0 : index
    %304 = vector.load %arg4[%c0_149, %c0_150, %c0_151] : memref<9x32x256xf32, #tpu.memory_space<vmem>>, vector<1x32x256xf32>
    %305 = vector.shape_cast %304 : vector<1x32x256xf32> to vector<32x256xf32>
    %306 = arith.mulf %303, %305 : vector<32x256xf32>
    %307 = arith.addf %301, %306 : vector<32x256xf32>
    %c0_152 = arith.constant 0 : index
    %c0_153 = arith.constant 0 : index
    %c0_154 = arith.constant 0 : index
    %308 = vector.load %arg5[%c0_152, %c0_153, %c0_154] : memref<9x32x256xf32, #tpu.memory_space<vmem>>, vector<1x32x256xf32>
    %309 = vector.shape_cast %308 : vector<1x32x256xf32> to vector<32x256xf32>
    %310 = arith.mulf %303, %309 : vector<32x256xf32>
    %311 = arith.addf %302, %310 : vector<32x256xf32>
    %c16_i32_155 = arith.constant 16 : i32
    %312 = tpu.dynamic_rotate %300 by %c16_i32_155 dim 1 : vector<32x256xf32>, i32 -> vector<32x256xf32>
    %c1_156 = arith.constant 1 : index
    %c0_157 = arith.constant 0 : index
    %c0_158 = arith.constant 0 : index
    %313 = vector.load %arg4[%c1_156, %c0_157, %c0_158] : memref<9x32x256xf32, #tpu.memory_space<vmem>>, vector<1x32x256xf32>
    %314 = vector.shape_cast %313 : vector<1x32x256xf32> to vector<32x256xf32>
    %315 = arith.mulf %312, %314 : vector<32x256xf32>
    %316 = arith.addf %307, %315 : vector<32x256xf32>
    %c1_159 = arith.constant 1 : index
    %c0_160 = arith.constant 0 : index
    %c0_161 = arith.constant 0 : index
    %317 = vector.load %arg5[%c1_159, %c0_160, %c0_161] : memref<9x32x256xf32, #tpu.memory_space<vmem>>, vector<1x32x256xf32>
    %318 = vector.shape_cast %317 : vector<1x32x256xf32> to vector<32x256xf32>
    %319 = arith.mulf %312, %318 : vector<32x256xf32>
    %320 = arith.addf %311, %319 : vector<32x256xf32>
    %c15_i32_162 = arith.constant 15 : i32
    %321 = tpu.dynamic_rotate %300 by %c15_i32_162 dim 1 : vector<32x256xf32>, i32 -> vector<32x256xf32>
    %c2_163 = arith.constant 2 : index
    %c0_164 = arith.constant 0 : index
    %c0_165 = arith.constant 0 : index
    %322 = vector.load %arg4[%c2_163, %c0_164, %c0_165] : memref<9x32x256xf32, #tpu.memory_space<vmem>>, vector<1x32x256xf32>
    %323 = vector.shape_cast %322 : vector<1x32x256xf32> to vector<32x256xf32>
    %324 = arith.mulf %321, %323 : vector<32x256xf32>
    %325 = arith.addf %316, %324 : vector<32x256xf32>
    %c2_166 = arith.constant 2 : index
    %c0_167 = arith.constant 0 : index
    %c0_168 = arith.constant 0 : index
    %326 = vector.load %arg5[%c2_166, %c0_167, %c0_168] : memref<9x32x256xf32, #tpu.memory_space<vmem>>, vector<1x32x256xf32>
    %327 = vector.shape_cast %326 : vector<1x32x256xf32> to vector<32x256xf32>
    %328 = arith.mulf %321, %327 : vector<32x256xf32>
    %329 = arith.addf %320, %328 : vector<32x256xf32>
    %c1_i32_169 = arith.constant 1 : i32
    %330 = tpu.dynamic_rotate %300 by %c1_i32_169 dim 1 : vector<32x256xf32>, i32 -> vector<32x256xf32>
    %c3_170 = arith.constant 3 : index
    %c0_171 = arith.constant 0 : index
    %c0_172 = arith.constant 0 : index
    %331 = vector.load %arg4[%c3_170, %c0_171, %c0_172] : memref<9x32x256xf32, #tpu.memory_space<vmem>>, vector<1x32x256xf32>
    %332 = vector.shape_cast %331 : vector<1x32x256xf32> to vector<32x256xf32>
    %333 = arith.mulf %330, %332 : vector<32x256xf32>
    %334 = arith.addf %325, %333 : vector<32x256xf32>
    %c3_173 = arith.constant 3 : index
    %c0_174 = arith.constant 0 : index
    %c0_175 = arith.constant 0 : index
    %335 = vector.load %arg5[%c3_173, %c0_174, %c0_175] : memref<9x32x256xf32, #tpu.memory_space<vmem>>, vector<1x32x256xf32>
    %336 = vector.shape_cast %335 : vector<1x32x256xf32> to vector<32x256xf32>
    %337 = arith.mulf %330, %336 : vector<32x256xf32>
    %338 = arith.addf %329, %337 : vector<32x256xf32>
    %c4_176 = arith.constant 4 : index
    %c0_177 = arith.constant 0 : index
    %c0_178 = arith.constant 0 : index
    %339 = vector.load %arg4[%c4_176, %c0_177, %c0_178] : memref<9x32x256xf32, #tpu.memory_space<vmem>>, vector<1x32x256xf32>
    %340 = vector.shape_cast %339 : vector<1x32x256xf32> to vector<32x256xf32>
    %341 = arith.mulf %300, %340 : vector<32x256xf32>
    %342 = arith.addf %334, %341 : vector<32x256xf32>
    %c4_179 = arith.constant 4 : index
    %c0_180 = arith.constant 0 : index
    %c0_181 = arith.constant 0 : index
    %343 = vector.load %arg5[%c4_179, %c0_180, %c0_181] : memref<9x32x256xf32, #tpu.memory_space<vmem>>, vector<1x32x256xf32>
    %344 = vector.shape_cast %343 : vector<1x32x256xf32> to vector<32x256xf32>
    %345 = arith.mulf %300, %344 : vector<32x256xf32>
    %346 = arith.addf %338, %345 : vector<32x256xf32>
    %c255_i32_182 = arith.constant 255 : i32
    %347 = tpu.dynamic_rotate %300 by %c255_i32_182 dim 1 : vector<32x256xf32>, i32 -> vector<32x256xf32>
    %c5_183 = arith.constant 5 : index
    %c0_184 = arith.constant 0 : index
    %c0_185 = arith.constant 0 : index
    %348 = vector.load %arg4[%c5_183, %c0_184, %c0_185] : memref<9x32x256xf32, #tpu.memory_space<vmem>>, vector<1x32x256xf32>
    %349 = vector.shape_cast %348 : vector<1x32x256xf32> to vector<32x256xf32>
    %350 = arith.mulf %347, %349 : vector<32x256xf32>
    %351 = arith.addf %342, %350 : vector<32x256xf32>
    %c5_186 = arith.constant 5 : index
    %c0_187 = arith.constant 0 : index
    %c0_188 = arith.constant 0 : index
    %352 = vector.load %arg5[%c5_186, %c0_187, %c0_188] : memref<9x32x256xf32, #tpu.memory_space<vmem>>, vector<1x32x256xf32>
    %353 = vector.shape_cast %352 : vector<1x32x256xf32> to vector<32x256xf32>
    %354 = arith.mulf %347, %353 : vector<32x256xf32>
    %355 = arith.addf %346, %354 : vector<32x256xf32>
    %c241_i32_189 = arith.constant 241 : i32
    %356 = tpu.dynamic_rotate %300 by %c241_i32_189 dim 1 : vector<32x256xf32>, i32 -> vector<32x256xf32>
    %c6_190 = arith.constant 6 : index
    %c0_191 = arith.constant 0 : index
    %c0_192 = arith.constant 0 : index
    %357 = vector.load %arg4[%c6_190, %c0_191, %c0_192] : memref<9x32x256xf32, #tpu.memory_space<vmem>>, vector<1x32x256xf32>
    %358 = vector.shape_cast %357 : vector<1x32x256xf32> to vector<32x256xf32>
    %359 = arith.mulf %356, %358 : vector<32x256xf32>
    %360 = arith.addf %351, %359 : vector<32x256xf32>
    %c6_193 = arith.constant 6 : index
    %c0_194 = arith.constant 0 : index
    %c0_195 = arith.constant 0 : index
    %361 = vector.load %arg5[%c6_193, %c0_194, %c0_195] : memref<9x32x256xf32, #tpu.memory_space<vmem>>, vector<1x32x256xf32>
    %362 = vector.shape_cast %361 : vector<1x32x256xf32> to vector<32x256xf32>
    %363 = arith.mulf %356, %362 : vector<32x256xf32>
    %364 = arith.addf %355, %363 : vector<32x256xf32>
    %c240_i32_196 = arith.constant 240 : i32
    %365 = tpu.dynamic_rotate %300 by %c240_i32_196 dim 1 : vector<32x256xf32>, i32 -> vector<32x256xf32>
    %c7_197 = arith.constant 7 : index
    %c0_198 = arith.constant 0 : index
    %c0_199 = arith.constant 0 : index
    %366 = vector.load %arg4[%c7_197, %c0_198, %c0_199] : memref<9x32x256xf32, #tpu.memory_space<vmem>>, vector<1x32x256xf32>
    %367 = vector.shape_cast %366 : vector<1x32x256xf32> to vector<32x256xf32>
    %368 = arith.mulf %365, %367 : vector<32x256xf32>
    %369 = arith.addf %360, %368 : vector<32x256xf32>
    %c7_200 = arith.constant 7 : index
    %c0_201 = arith.constant 0 : index
    %c0_202 = arith.constant 0 : index
    %370 = vector.load %arg5[%c7_200, %c0_201, %c0_202] : memref<9x32x256xf32, #tpu.memory_space<vmem>>, vector<1x32x256xf32>
    %371 = vector.shape_cast %370 : vector<1x32x256xf32> to vector<32x256xf32>
    %372 = arith.mulf %365, %371 : vector<32x256xf32>
    %373 = arith.addf %364, %372 : vector<32x256xf32>
    %c239_i32_203 = arith.constant 239 : i32
    %374 = tpu.dynamic_rotate %300 by %c239_i32_203 dim 1 : vector<32x256xf32>, i32 -> vector<32x256xf32>
    %c8_204 = arith.constant 8 : index
    %c0_205 = arith.constant 0 : index
    %c0_206 = arith.constant 0 : index
    %375 = vector.load %arg4[%c8_204, %c0_205, %c0_206] : memref<9x32x256xf32, #tpu.memory_space<vmem>>, vector<1x32x256xf32>
    %376 = vector.shape_cast %375 : vector<1x32x256xf32> to vector<32x256xf32>
    %377 = arith.mulf %374, %376 : vector<32x256xf32>
    %378 = arith.addf %369, %377 : vector<32x256xf32>
    %c8_207 = arith.constant 8 : index
    %c0_208 = arith.constant 0 : index
    %c0_209 = arith.constant 0 : index
    %379 = vector.load %arg5[%c8_207, %c0_208, %c0_209] : memref<9x32x256xf32, #tpu.memory_space<vmem>>, vector<1x32x256xf32>
    %380 = vector.shape_cast %379 : vector<1x32x256xf32> to vector<32x256xf32>
    %381 = arith.mulf %374, %380 : vector<32x256xf32>
    %382 = arith.addf %373, %381 : vector<32x256xf32>
    %c0_210 = arith.constant 0 : index
    %c0_211 = arith.constant 0 : index
    %383 = vector.load %arg8[%c0_210, %c0_211] : memref<32x256xf32, #tpu.memory_space<vmem>>, vector<32x256xf32>
    tpu.vector_store %arg8[%c0_210, %c0_211], %382 {strides = array<i32>} : memref<32x256xf32, #tpu.memory_space<vmem>>, vector<32x256xf32>,
    %c1_212 = arith.constant 1 : index
    %c0_213 = arith.constant 0 : index
    %c0_214 = arith.constant 0 : index
    %384 = vector.load %arg2[%c1_212, %c0_213, %c0_214] : memref<2x32x256xf32, #tpu.memory_space<vmem>>, vector<1x32x256xf32>
    %385 = vector.shape_cast %384 : vector<1x32x256xf32> to vector<32x256xf32>
    %cst_215 = arith.constant 0.000000e+00 : f32
    %386 = vector.broadcast %cst_215 : f32 to vector<32x256xf32>
    %c17_i32_216 = arith.constant 17 : i32
    %387 = tpu.dynamic_rotate %385 by %c17_i32_216 dim 1 : vector<32x256xf32>, i32 -> vector<32x256xf32>
    %c0_217 = arith.constant 0 : index
    %c0_218 = arith.constant 0 : index
    %c0_219 = arith.constant 0 : index
    %388 = vector.load %arg3[%c0_217, %c0_218, %c0_219] : memref<9x32x256xf32, #tpu.memory_space<vmem>>, vector<1x32x256xf32>
    %389 = vector.shape_cast %388 : vector<1x32x256xf32> to vector<32x256xf32>
    %390 = arith.mulf %387, %389 : vector<32x256xf32>
    %391 = arith.addf %386, %390 : vector<32x256xf32>
    %c16_i32_220 = arith.constant 16 : i32
    %392 = tpu.dynamic_rotate %385 by %c16_i32_220 dim 1 : vector<32x256xf32>, i32 -> vector<32x256xf32>
    %c1_221 = arith.constant 1 : index
    %c0_222 = arith.constant 0 : index
    %c0_223 = arith.constant 0 : index
    %393 = vector.load %arg3[%c1_221, %c0_222, %c0_223] : memref<9x32x256xf32, #tpu.memory_space<vmem>>, vector<1x32x256xf32>
    %394 = vector.shape_cast %393 : vector<1x32x256xf32> to vector<32x256xf32>
    %395 = arith.mulf %392, %394 : vector<32x256xf32>
    %396 = arith.addf %391, %395 : vector<32x256xf32>
    %c15_i32_224 = arith.constant 15 : i32
    %397 = tpu.dynamic_rotate %385 by %c15_i32_224 dim 1 : vector<32x256xf32>, i32 -> vector<32x256xf32>
    %c2_225 = arith.constant 2 : index
    %c0_226 = arith.constant 0 : index
    %c0_227 = arith.constant 0 : index
    %398 = vector.load %arg3[%c2_225, %c0_226, %c0_227] : memref<9x32x256xf32, #tpu.memory_space<vmem>>, vector<1x32x256xf32>
    %399 = vector.shape_cast %398 : vector<1x32x256xf32> to vector<32x256xf32>
    %400 = arith.mulf %397, %399 : vector<32x256xf32>
    %401 = arith.addf %396, %400 : vector<32x256xf32>
    %c1_i32_228 = arith.constant 1 : i32
    %402 = tpu.dynamic_rotate %385 by %c1_i32_228 dim 1 : vector<32x256xf32>, i32 -> vector<32x256xf32>
    %c3_229 = arith.constant 3 : index
    %c0_230 = arith.constant 0 : index
    %c0_231 = arith.constant 0 : index
    %403 = vector.load %arg3[%c3_229, %c0_230, %c0_231] : memref<9x32x256xf32, #tpu.memory_space<vmem>>, vector<1x32x256xf32>
    %404 = vector.shape_cast %403 : vector<1x32x256xf32> to vector<32x256xf32>
    %405 = arith.mulf %402, %404 : vector<32x256xf32>
    %406 = arith.addf %401, %405 : vector<32x256xf32>
    %c4_232 = arith.constant 4 : index
    %c0_233 = arith.constant 0 : index
    %c0_234 = arith.constant 0 : index
    %407 = vector.load %arg3[%c4_232, %c0_233, %c0_234] : memref<9x32x256xf32, #tpu.memory_space<vmem>>, vector<1x32x256xf32>
    %408 = vector.shape_cast %407 : vector<1x32x256xf32> to vector<32x256xf32>
    %409 = arith.mulf %385, %408 : vector<32x256xf32>
    %410 = arith.addf %406, %409 : vector<32x256xf32>
    %c255_i32_235 = arith.constant 255 : i32
    %411 = tpu.dynamic_rotate %385 by %c255_i32_235 dim 1 : vector<32x256xf32>, i32 -> vector<32x256xf32>
    %c5_236 = arith.constant 5 : index
    %c0_237 = arith.constant 0 : index
    %c0_238 = arith.constant 0 : index
    %412 = vector.load %arg3[%c5_236, %c0_237, %c0_238] : memref<9x32x256xf32, #tpu.memory_space<vmem>>, vector<1x32x256xf32>
    %413 = vector.shape_cast %412 : vector<1x32x256xf32> to vector<32x256xf32>
    %414 = arith.mulf %411, %413 : vector<32x256xf32>
    %415 = arith.addf %410, %414 : vector<32x256xf32>
    %c241_i32_239 = arith.constant 241 : i32
    %416 = tpu.dynamic_rotate %385 by %c241_i32_239 dim 1 : vector<32x256xf32>, i32 -> vector<32x256xf32>
    %c6_240 = arith.constant 6 : index
    %c0_241 = arith.constant 0 : index
    %c0_242 = arith.constant 0 : index
    %417 = vector.load %arg3[%c6_240, %c0_241, %c0_242] : memref<9x32x256xf32, #tpu.memory_space<vmem>>, vector<1x32x256xf32>
    %418 = vector.shape_cast %417 : vector<1x32x256xf32> to vector<32x256xf32>
    %419 = arith.mulf %416, %418 : vector<32x256xf32>
    %420 = arith.addf %415, %419 : vector<32x256xf32>
    %c240_i32_243 = arith.constant 240 : i32
    %421 = tpu.dynamic_rotate %385 by %c240_i32_243 dim 1 : vector<32x256xf32>, i32 -> vector<32x256xf32>
    %c7_244 = arith.constant 7 : index
    %c0_245 = arith.constant 0 : index
    %c0_246 = arith.constant 0 : index
    %422 = vector.load %arg3[%c7_244, %c0_245, %c0_246] : memref<9x32x256xf32, #tpu.memory_space<vmem>>, vector<1x32x256xf32>
    %423 = vector.shape_cast %422 : vector<1x32x256xf32> to vector<32x256xf32>
    %424 = arith.mulf %421, %423 : vector<32x256xf32>
    %425 = arith.addf %420, %424 : vector<32x256xf32>
    %c239_i32_247 = arith.constant 239 : i32
    %426 = tpu.dynamic_rotate %385 by %c239_i32_247 dim 1 : vector<32x256xf32>, i32 -> vector<32x256xf32>
    %c8_248 = arith.constant 8 : index
    %c0_249 = arith.constant 0 : index
    %c0_250 = arith.constant 0 : index
    %427 = vector.load %arg3[%c8_248, %c0_249, %c0_250] : memref<9x32x256xf32, #tpu.memory_space<vmem>>, vector<1x32x256xf32>
    %428 = vector.shape_cast %427 : vector<1x32x256xf32> to vector<32x256xf32>
    %429 = arith.mulf %426, %428 : vector<32x256xf32>
    %430 = arith.addf %425, %429 : vector<32x256xf32>
    %c17_i32_251 = arith.constant 17 : i32
    %431 = tpu.dynamic_rotate %378 by %c17_i32_251 dim 1 : vector<32x256xf32>, i32 -> vector<32x256xf32>
    %432 = arith.mulf %430, %431 : vector<32x256xf32>
    %cst_252 = arith.constant dense<0.000000e+00> : vector<256xf32>
    %433 = vector.multi_reduction <add>, %432, %cst_252 [0] : vector<32x256xf32> to vector<256xf32>
    %434 = vector.shape_cast %433 : vector<256xf32> to vector<1x256xf32>
    %435 = vector.extract_strided_slice %0 {offsets = [0, 0], sizes = [1, 256], strides = [1, 1]} : vector<9x256xf32> to vector<1x256xf32>
    %436 = arith.mulf %434, %435 : vector<1x256xf32>
    %c16_i32_253 = arith.constant 16 : i32
    %437 = tpu.dynamic_rotate %378 by %c16_i32_253 dim 1 : vector<32x256xf32>, i32 -> vector<32x256xf32>
    %438 = arith.mulf %430, %437 : vector<32x256xf32>
    %cst_254 = arith.constant dense<0.000000e+00> : vector<256xf32>
    %439 = vector.multi_reduction <add>, %438, %cst_254 [0] : vector<32x256xf32> to vector<256xf32>
    %440 = vector.shape_cast %439 : vector<256xf32> to vector<1x256xf32>
    %441 = vector.extract_strided_slice %0 {offsets = [1, 0], sizes = [1, 256], strides = [1, 1]} : vector<9x256xf32> to vector<1x256xf32>
    %442 = arith.mulf %440, %441 : vector<1x256xf32>
    %c15_i32_255 = arith.constant 15 : i32
    %443 = tpu.dynamic_rotate %378 by %c15_i32_255 dim 1 : vector<32x256xf32>, i32 -> vector<32x256xf32>
    %444 = arith.mulf %430, %443 : vector<32x256xf32>
    %cst_256 = arith.constant dense<0.000000e+00> : vector<256xf32>
    %445 = vector.multi_reduction <add>, %444, %cst_256 [0] : vector<32x256xf32> to vector<256xf32>
    %446 = vector.shape_cast %445 : vector<256xf32> to vector<1x256xf32>
    %447 = vector.extract_strided_slice %0 {offsets = [2, 0], sizes = [1, 256], strides = [1, 1]} : vector<9x256xf32> to vector<1x256xf32>
    %448 = arith.mulf %446, %447 : vector<1x256xf32>
    %c1_i32_257 = arith.constant 1 : i32
    %449 = tpu.dynamic_rotate %378 by %c1_i32_257 dim 1 : vector<32x256xf32>, i32 -> vector<32x256xf32>
    %450 = arith.mulf %430, %449 : vector<32x256xf32>
    %cst_258 = arith.constant dense<0.000000e+00> : vector<256xf32>
    %451 = vector.multi_reduction <add>, %450, %cst_258 [0] : vector<32x256xf32> to vector<256xf32>
    %452 = vector.shape_cast %451 : vector<256xf32> to vector<1x256xf32>
    %453 = vector.extract_strided_slice %0 {offsets = [3, 0], sizes = [1, 256], strides = [1, 1]} : vector<9x256xf32> to vector<1x256xf32>
    %454 = arith.mulf %452, %453 : vector<1x256xf32>
    %455 = arith.mulf %430, %378 : vector<32x256xf32>
    %cst_259 = arith.constant dense<0.000000e+00> : vector<256xf32>
    %456 = vector.multi_reduction <add>, %455, %cst_259 [0] : vector<32x256xf32> to vector<256xf32>
    %457 = vector.shape_cast %456 : vector<256xf32> to vector<1x256xf32>
    %c255_i32_260 = arith.constant 255 : i32
    %458 = tpu.dynamic_rotate %378 by %c255_i32_260 dim 1 : vector<32x256xf32>, i32 -> vector<32x256xf32>
    %459 = arith.mulf %430, %458 : vector<32x256xf32>
    %cst_261 = arith.constant dense<0.000000e+00> : vector<256xf32>
    %460 = vector.multi_reduction <add>, %459, %cst_261 [0] : vector<32x256xf32> to vector<256xf32>
    %461 = vector.shape_cast %460 : vector<256xf32> to vector<1x256xf32>
    %462 = vector.extract_strided_slice %0 {offsets = [5, 0], sizes = [1, 256], strides = [1, 1]} : vector<9x256xf32> to vector<1x256xf32>
    %463 = arith.mulf %461, %462 : vector<1x256xf32>
    %c241_i32_262 = arith.constant 241 : i32
    %464 = tpu.dynamic_rotate %378 by %c241_i32_262 dim 1 : vector<32x256xf32>, i32 -> vector<32x256xf32>
    %465 = arith.mulf %430, %464 : vector<32x256xf32>
    %cst_263 = arith.constant dense<0.000000e+00> : vector<256xf32>
    %466 = vector.multi_reduction <add>, %465, %cst_263 [0] : vector<32x256xf32> to vector<256xf32>
    %467 = vector.shape_cast %466 : vector<256xf32> to vector<1x256xf32>
    %468 = vector.extract_strided_slice %0 {offsets = [6, 0], sizes = [1, 256], strides = [1, 1]} : vector<9x256xf32> to vector<1x256xf32>
    %469 = arith.mulf %467, %468 : vector<1x256xf32>
    %c240_i32_264 = arith.constant 240 : i32
    %470 = tpu.dynamic_rotate %378 by %c240_i32_264 dim 1 : vector<32x256xf32>, i32 -> vector<32x256xf32>
    %471 = arith.mulf %430, %470 : vector<32x256xf32>
    %cst_265 = arith.constant dense<0.000000e+00> : vector<256xf32>
    %472 = vector.multi_reduction <add>, %471, %cst_265 [0] : vector<32x256xf32> to vector<256xf32>
    %473 = vector.shape_cast %472 : vector<256xf32> to vector<1x256xf32>
    %474 = vector.extract_strided_slice %0 {offsets = [7, 0], sizes = [1, 256], strides = [1, 1]} : vector<9x256xf32> to vector<1x256xf32>
    %475 = arith.mulf %473, %474 : vector<1x256xf32>
    %c239_i32_266 = arith.constant 239 : i32
    %476 = tpu.dynamic_rotate %378 by %c239_i32_266 dim 1 : vector<32x256xf32>, i32 -> vector<32x256xf32>
    %477 = arith.mulf %430, %476 : vector<32x256xf32>
    %cst_267 = arith.constant dense<0.000000e+00> : vector<256xf32>
    %478 = vector.multi_reduction <add>, %477, %cst_267 [0] : vector<32x256xf32> to vector<256xf32>
    %479 = vector.shape_cast %478 : vector<256xf32> to vector<1x256xf32>
    %480 = vector.extract_strided_slice %0 {offsets = [8, 0], sizes = [1, 256], strides = [1, 1]} : vector<9x256xf32> to vector<1x256xf32>
    %481 = arith.mulf %479, %480 : vector<1x256xf32>
    %482 = arith.maximumf %436, %442 : vector<1x256xf32>
    %483 = arith.maximumf %482, %448 : vector<1x256xf32>
    %484 = arith.maximumf %483, %454 : vector<1x256xf32>
    %485 = arith.maximumf %484, %457 : vector<1x256xf32>
    %486 = arith.maximumf %485, %463 : vector<1x256xf32>
    %487 = arith.maximumf %486, %469 : vector<1x256xf32>
    %488 = arith.maximumf %487, %475 : vector<1x256xf32>
    %489 = arith.maximumf %488, %481 : vector<1x256xf32>
    %490 = arith.subf %436, %489 : vector<1x256xf32>
    %491 = math.exp %490 : vector<1x256xf32>
    %492 = arith.subf %442, %489 : vector<1x256xf32>
    %493 = math.exp %492 : vector<1x256xf32>
    %494 = arith.subf %448, %489 : vector<1x256xf32>
    %495 = math.exp %494 : vector<1x256xf32>
    %496 = arith.subf %454, %489 : vector<1x256xf32>
    %497 = math.exp %496 : vector<1x256xf32>
    %498 = arith.subf %457, %489 : vector<1x256xf32>
    %499 = math.exp %498 : vector<1x256xf32>
    %500 = arith.subf %463, %489 : vector<1x256xf32>
    %501 = math.exp %500 : vector<1x256xf32>
    %502 = arith.subf %469, %489 : vector<1x256xf32>
    %503 = math.exp %502 : vector<1x256xf32>
    %504 = arith.subf %475, %489 : vector<1x256xf32>
    %505 = math.exp %504 : vector<1x256xf32>
    %506 = arith.subf %481, %489 : vector<1x256xf32>
    %507 = math.exp %506 : vector<1x256xf32>
    %508 = arith.addf %491, %493 : vector<1x256xf32>
    %509 = arith.addf %508, %495 : vector<1x256xf32>
    %510 = arith.addf %509, %497 : vector<1x256xf32>
    %511 = arith.addf %510, %499 : vector<1x256xf32>
    %512 = arith.addf %511, %501 : vector<1x256xf32>
    %513 = arith.addf %512, %503 : vector<1x256xf32>
    %514 = arith.addf %513, %505 : vector<1x256xf32>
    %515 = arith.addf %514, %507 : vector<1x256xf32>
    %516 = tpu.reciprocal %515 {approx = true} : vector<1x256xf32> -> vector<1x256xf32>
    %517 = arith.mulf %515, %516 : vector<1x256xf32>
    %cst_268 = arith.constant 2.000000e+00 : f32
    %518 = vector.broadcast %cst_268 : f32 to vector<1x256xf32>
    %519 = arith.subf %518, %517 : vector<1x256xf32>
    %520 = arith.mulf %516, %519 : vector<1x256xf32>
    %cst_269 = arith.constant 0.000000e+00 : f32
    %521 = vector.broadcast %cst_269 : f32 to vector<32x256xf32>
    %522 = arith.mulf %491, %520 : vector<1x256xf32>
    %523 = vector.extract_strided_slice %0 {offsets = [0, 0], sizes = [1, 256], strides = [1, 1]} : vector<9x256xf32> to vector<1x256xf32>
    %524 = arith.mulf %522, %523 : vector<1x256xf32>
    %c0_270 = arith.constant 0 : index
    %c0_271 = arith.constant 0 : index
    %525 = vector.load %arg8[%c0_270, %c0_271] : memref<32x256xf32, #tpu.memory_space<vmem>>, vector<32x256xf32>
    %c17_i32_272 = arith.constant 17 : i32
    %526 = tpu.dynamic_rotate %525 by %c17_i32_272 dim 1 : vector<32x256xf32>, i32 -> vector<32x256xf32>
    %527 = vector.broadcast %524 : vector<1x256xf32> to vector<32x256xf32>
    %528 = arith.mulf %527, %526 : vector<32x256xf32>
    %529 = arith.addf %521, %528 : vector<32x256xf32>
    %530 = arith.mulf %493, %520 : vector<1x256xf32>
    %531 = vector.extract_strided_slice %0 {offsets = [1, 0], sizes = [1, 256], strides = [1, 1]} : vector<9x256xf32> to vector<1x256xf32>
    %532 = arith.mulf %530, %531 : vector<1x256xf32>
    %c0_273 = arith.constant 0 : index
    %c0_274 = arith.constant 0 : index
    %533 = vector.load %arg8[%c0_273, %c0_274] : memref<32x256xf32, #tpu.memory_space<vmem>>, vector<32x256xf32>
    %c16_i32_275 = arith.constant 16 : i32
    %534 = tpu.dynamic_rotate %533 by %c16_i32_275 dim 1 : vector<32x256xf32>, i32 -> vector<32x256xf32>
    %535 = vector.broadcast %532 : vector<1x256xf32> to vector<32x256xf32>
    %536 = arith.mulf %535, %534 : vector<32x256xf32>
    %537 = arith.addf %529, %536 : vector<32x256xf32>
    %538 = arith.mulf %495, %520 : vector<1x256xf32>
    %539 = vector.extract_strided_slice %0 {offsets = [2, 0], sizes = [1, 256], strides = [1, 1]} : vector<9x256xf32> to vector<1x256xf32>
    %540 = arith.mulf %538, %539 : vector<1x256xf32>
    %c0_276 = arith.constant 0 : index
    %c0_277 = arith.constant 0 : index
    %541 = vector.load %arg8[%c0_276, %c0_277] : memref<32x256xf32, #tpu.memory_space<vmem>>, vector<32x256xf32>
    %c15_i32_278 = arith.constant 15 : i32
    %542 = tpu.dynamic_rotate %541 by %c15_i32_278 dim 1 : vector<32x256xf32>, i32 -> vector<32x256xf32>
    %543 = vector.broadcast %540 : vector<1x256xf32> to vector<32x256xf32>
    %544 = arith.mulf %543, %542 : vector<32x256xf32>
    %545 = arith.addf %537, %544 : vector<32x256xf32>
    %546 = arith.mulf %497, %520 : vector<1x256xf32>
    %547 = vector.extract_strided_slice %0 {offsets = [3, 0], sizes = [1, 256], strides = [1, 1]} : vector<9x256xf32> to vector<1x256xf32>
    %548 = arith.mulf %546, %547 : vector<1x256xf32>
    %c0_279 = arith.constant 0 : index
    %c0_280 = arith.constant 0 : index
    %549 = vector.load %arg8[%c0_279, %c0_280] : memref<32x256xf32, #tpu.memory_space<vmem>>, vector<32x256xf32>
    %c1_i32_281 = arith.constant 1 : i32
    %550 = tpu.dynamic_rotate %549 by %c1_i32_281 dim 1 : vector<32x256xf32>, i32 -> vector<32x256xf32>
    %551 = vector.broadcast %548 : vector<1x256xf32> to vector<32x256xf32>
    %552 = arith.mulf %551, %550 : vector<32x256xf32>
    %553 = arith.addf %545, %552 : vector<32x256xf32>
    %554 = arith.mulf %499, %520 : vector<1x256xf32>
    %c0_282 = arith.constant 0 : index
    %c0_283 = arith.constant 0 : index
    %555 = vector.load %arg8[%c0_282, %c0_283] : memref<32x256xf32, #tpu.memory_space<vmem>>, vector<32x256xf32>
    %556 = vector.broadcast %554 : vector<1x256xf32> to vector<32x256xf32>
    %557 = arith.mulf %556, %555 : vector<32x256xf32>
    %558 = arith.addf %553, %557 : vector<32x256xf32>
    %559 = arith.mulf %501, %520 : vector<1x256xf32>
    %560 = vector.extract_strided_slice %0 {offsets = [5, 0], sizes = [1, 256], strides = [1, 1]} : vector<9x256xf32> to vector<1x256xf32>
    %561 = arith.mulf %559, %560 : vector<1x256xf32>
    %c0_284 = arith.constant 0 : index
    %c0_285 = arith.constant 0 : index
    %562 = vector.load %arg8[%c0_284, %c0_285] : memref<32x256xf32, #tpu.memory_space<vmem>>, vector<32x256xf32>
    %c255_i32_286 = arith.constant 255 : i32
    %563 = tpu.dynamic_rotate %562 by %c255_i32_286 dim 1 : vector<32x256xf32>, i32 -> vector<32x256xf32>
    %564 = vector.broadcast %561 : vector<1x256xf32> to vector<32x256xf32>
    %565 = arith.mulf %564, %563 : vector<32x256xf32>
    %566 = arith.addf %558, %565 : vector<32x256xf32>
    %567 = arith.mulf %503, %520 : vector<1x256xf32>
    %568 = vector.extract_strided_slice %0 {offsets = [6, 0], sizes = [1, 256], strides = [1, 1]} : vector<9x256xf32> to vector<1x256xf32>
    %569 = arith.mulf %567, %568 : vector<1x256xf32>
    %c0_287 = arith.constant 0 : index
    %c0_288 = arith.constant 0 : index
    %570 = vector.load %arg8[%c0_287, %c0_288] : memref<32x256xf32, #tpu.memory_space<vmem>>, vector<32x256xf32>
    %c241_i32_289 = arith.constant 241 : i32
    %571 = tpu.dynamic_rotate %570 by %c241_i32_289 dim 1 : vector<32x256xf32>, i32 -> vector<32x256xf32>
    %572 = vector.broadcast %569 : vector<1x256xf32> to vector<32x256xf32>
    %573 = arith.mulf %572, %571 : vector<32x256xf32>
    %574 = arith.addf %566, %573 : vector<32x256xf32>
    %575 = arith.mulf %505, %520 : vector<1x256xf32>
    %576 = vector.extract_strided_slice %0 {offsets = [7, 0], sizes = [1, 256], strides = [1, 1]} : vector<9x256xf32> to vector<1x256xf32>
    %577 = arith.mulf %575, %576 : vector<1x256xf32>
    %c0_290 = arith.constant 0 : index
    %c0_291 = arith.constant 0 : index
    %578 = vector.load %arg8[%c0_290, %c0_291] : memref<32x256xf32, #tpu.memory_space<vmem>>, vector<32x256xf32>
    %c240_i32_292 = arith.constant 240 : i32
    %579 = tpu.dynamic_rotate %578 by %c240_i32_292 dim 1 : vector<32x256xf32>, i32 -> vector<32x256xf32>
    %580 = vector.broadcast %577 : vector<1x256xf32> to vector<32x256xf32>
    %581 = arith.mulf %580, %579 : vector<32x256xf32>
    %582 = arith.addf %574, %581 : vector<32x256xf32>
    %583 = arith.mulf %507, %520 : vector<1x256xf32>
    %584 = vector.extract_strided_slice %0 {offsets = [8, 0], sizes = [1, 256], strides = [1, 1]} : vector<9x256xf32> to vector<1x256xf32>
    %585 = arith.mulf %583, %584 : vector<1x256xf32>
    %c0_293 = arith.constant 0 : index
    %c0_294 = arith.constant 0 : index
    %586 = vector.load %arg8[%c0_293, %c0_294] : memref<32x256xf32, #tpu.memory_space<vmem>>, vector<32x256xf32>
    %c239_i32_295 = arith.constant 239 : i32
    %587 = tpu.dynamic_rotate %586 by %c239_i32_295 dim 1 : vector<32x256xf32>, i32 -> vector<32x256xf32>
    %588 = vector.broadcast %585 : vector<1x256xf32> to vector<32x256xf32>
    %589 = arith.mulf %588, %587 : vector<32x256xf32>
    %590 = arith.addf %582, %589 : vector<32x256xf32>
    %c1_296 = arith.constant 1 : index
    %c0_297 = arith.constant 0 : index
    %c0_298 = arith.constant 0 : index
    %591 = vector.load %arg2[%c1_296, %c0_297, %c0_298] : memref<2x32x256xf32, #tpu.memory_space<vmem>>, vector<1x32x256xf32>
    %592 = vector.shape_cast %591 : vector<1x32x256xf32> to vector<32x256xf32>
    %593 = arith.addf %592, %590 : vector<32x256xf32>
    %c1_299 = arith.constant 1 : index
    %c0_300 = arith.constant 0 : index
    %c0_301 = arith.constant 0 : index
    %594 = vector.load %arg7[%c1_299, %c0_300, %c0_301] : memref<2x32x256xf32, #tpu.memory_space<vmem>>, vector<1x32x256xf32>
    %595 = vector.shape_cast %594 : vector<1x32x256xf32> to vector<32x256xf32>
    %596 = vector.shape_cast %593 : vector<32x256xf32> to vector<1x32x256xf32>
    tpu.vector_store %arg7[%c1_299, %c0_300, %c0_301], %596 {strides = array<i32>} : memref<2x32x256xf32, #tpu.memory_space<vmem>>, vector<1x32x256xf32>,
    return
  }
  func.func @transform_0(%arg0: i32) -> (i32, i32, i32) {
    %c0_i32 = arith.constant 0 : i32
    %c0_i32_0 = arith.constant 0 : i32
    %c0_i32_1 = arith.constant 0 : i32
    return %arg0, %c0_i32, %c0_i32_0 : i32, i32, i32
  }
  func.func @transform_1(%arg0: i32) -> (i32, i32, i32) {
    %c0_i32 = arith.constant 0 : i32
    %c0_i32_0 = arith.constant 0 : i32
    %c0_i32_1 = arith.constant 0 : i32
    return %arg0, %c0_i32, %c0_i32_0 : i32, i32, i32
  }
  func.func @transform_2(%arg0: i32) -> (i32, i32, i32) {
    %c0_i32 = arith.constant 0 : i32
    %c0_i32_0 = arith.constant 0 : i32
    %c0_i32_1 = arith.constant 0 : i32
    %c0_i32_2 = arith.constant 0 : i32
    return %c0_i32, %c0_i32_0, %c0_i32_1 : i32, i32, i32
  }
  func.func @transform_3(%arg0: i32) -> (i32, i32, i32) {
    %c0_i32 = arith.constant 0 : i32
    %c0_i32_0 = arith.constant 0 : i32
    %c0_i32_1 = arith.constant 0 : i32
    %c0_i32_2 = arith.constant 0 : i32
    return %c0_i32, %c0_i32_0, %c0_i32_1 : i32, i32, i32
  }
  func.func @transform_4(%arg0: i32) -> (i32, i32, i32) {
    %c0_i32 = arith.constant 0 : i32
    %c0_i32_0 = arith.constant 0 : i32
    %c0_i32_1 = arith.constant 0 : i32
    %c0_i32_2 = arith.constant 0 : i32
    return %c0_i32, %c0_i32_0, %c0_i32_1 : i32, i32, i32
  }
  func.func @transform_5(%arg0: i32) -> (i32, i32) {
    %c0_i32 = arith.constant 0 : i32
    %c0_i32_0 = arith.constant 0 : i32
    %c0_i32_1 = arith.constant 0 : i32
    return %c0_i32, %c0_i32_0 : i32, i32
  }
  func.func @transform_6(%arg0: i32) -> (i32, i32, i32) {
    %c0_i32 = arith.constant 0 : i32
    %c0_i32_0 = arith.constant 0 : i32
    %c0_i32_1 = arith.constant 0 : i32
    return %arg0, %c0_i32, %c0_i32_0 : i32, i32, i32
  }
}

</mosaic_0001>

<bundles_post_ra>
// kernel: tpu_custom_call.1
= control target key start
LH: loop header
LB: loop body
LE: loop exit
PB: predicated region body
PF: predicated region fallthrough
CT: control target
= control target key end

     0   :  { %s10747_s0 = inlined_call_operand.hbm [shape: f32[4,32,256], index: 0, kind: input, shape index: {}]   ;;  %s10748_s1 = inlined_call_operand.hbm [shape: f32[4,32,256], index: 1, kind: input, shape index: {}]   ;;  %s10749_s2 = inlined_call_operand.hbm [shape: f32[9,32,256], index: 2, kind: input, shape index: {}]   ;;  %s10750_s3 = inlined_call_operand.hbm [shape: f32[9,32,256], index: 3, kind: input, shape index: {}]   ;;  %s10751_s4 = inlined_call_operand.hbm [shape: f32[9,32,256], index: 4, kind: input, shape index: {}]   ;;  %s10752_s5 = inlined_call_operand.hbm [shape: f32[9,256], index: 5, kind: input, shape index: {}]   ;;  %s10753_s6 = inlined_call_operand.hbm [shape: f32[4,32,256], index: 6, kind: output, shape index: {}]  }
   0x1   :  { %11018 = sst [smem:[#allocation102_spill]] %s10747_s0 }
   0x2   :  { %11019 = sst [smem:[#allocation103_spill]] %s10749_s2 }
   0x3   :  { %11020 = sst [smem:[#allocation104_spill]] %s10750_s3 }
   0x4   :  { %11021 = sst [smem:[#allocation105_spill]] %s10751_s4 }
   0x5   :  { %11022 = sst [smem:[#allocation106_spill]] %s10752_s5 }
   0x6   :  { %11 = vsyncpa [#allocation4], 0 }
   0x7   :  { %13 = vsyncpa [#allocation4 + $0x1], 0 }
   0x8   :  { %14 = vsyncpa [#allocation7], 0 }
   0x9   :  { %16 = vsyncpa [#allocation7 + $0x1], 0 }
   0xa   :  { %17 = vsyncpa [#allocation10], 0 }
   0xb   :  { %18 = vsyncpa [#allocation13], 0 }
   0xc   :  { %19 = vsyncpa [#allocation5], 0 }
   0xd   :  { %21 = vsyncpa [#allocation5 + $0x1], 0  ;;  %s5445_s21 = smov 0   ;;  %s5447_s22 = smov 0  }
   0xe   :  { %s5449_s23 = smov 0   ;;  %s5451_s24 = smov 0  }
   0xf LB: > { %s5466_s25 = sadd.s32 4294967295, %s5393_s24   ;;  %s4833_s26 = sadd.s32 4294967294, %s5393_s24   ;;  %s5393_s24 = sphi %s5451_s24, %s11537_s24   ;;  %s5389_s23 = sphi %s5449_s23, %s11536_s23   ;;  %s5385_s22 = sphi %s5447_s22, %s11535_s22   ;;  %s5381_s21 = sphi %s5445_s21, %s11534_s21  }
  0x10   : > { %p47_p0 = scmp.ne.s32.totalorder %s5385_s22, %s5381_s21  ;;  %p48_p1 = scmp.eq.s32.totalorder %s5466_s25, 0 }
  0x11   : > { %p181_p2 = scmp.eq.s32.totalorder %s5466_s25, 1  ;;  %p187_p3 = scmp.eq.s32.totalorder %s4833_s26, 1 }
  0x12   : > { %p5475_p4 = por %p48_p1, %p47_p0  ;;  %p4834_p5 = scmp.ge.s32.totalorder %s5393_s24, 1 }
  0x13   : > { %p5480_p6 = por %p187_p3, %p47_p0  ;;  %p194_p7 = scmp.lt.s32.totalorder %s5393_s24, 3 }
  0x14   : > { %s11025_s2 = sld [smem:[#allocation103_spill]]  ;;  %s5395_s9 = smov [#allocation8]  }
  0x15   : > { %p5488_p8 = pnand %p4834_p5, %p194_p7  ;;  %s207_s10 = sshll.u32 %s5395_s9, 4  ;;  %s208_s10 = int_to_ptr.vmem [resolvable:$true] %s207_s10 }
  0x16   : > { %s11028_s3 = sld [smem:[#allocation104_spill]]  ;;  %s10754_s15 = smov 256  }
  0x17   : > { %p4914_p9 = pneg %p5488_p8  ;;  %s10756_s16 = smov 16  }
  0x18   : > { %s5398_s17 = smov [#allocation9]   ;;  %s11029_s4 = sld [smem:[#allocation105_spill]] }
  0x19   : > { %p5496_p10 = pnand %p4914_p9, %p48_p1  ;;  %s221_s18 = sshll.u32 %s5398_s17, 4  ;;  %s222_s18 = int_to_ptr.vmem [resolvable:$true] %s221_s18 }
  0x1a   : > { %s205_s7 = sshll.u32 %s11025_s2, 4  ;;  %s11030_s5 = sld [smem:[#allocation106_spill]]  ;;  %s206_s7 = int_to_ptr.hbm [resolvable:$true] %s205_s7 }
  0x1b   : > { %4917 = dma.hbm_to_vmem [thread:$0]  (!%p5496_p10), %s206_s7, 9216, %s208_s10, [#allocation7], %s10754_s15, %s10754_s15, %s10756_s16  }
  0x1c   : > { %s219_s14 = sshll.u32 %s11028_s3, 4  ;;  %s5399_s9 = smov [#allocation11]   ;;  %s220_s14 = int_to_ptr.hbm [resolvable:$true] %s219_s14 }
  0x1d   : > { %4920 = dma.hbm_to_vmem [thread:$0]  (!%p5496_p10), %s220_s14, 9216, %s222_s18, [#allocation10], %s10754_s15, %s10754_s15, %s10756_s16  }
  0x1e   : > { %s233_s26 = sshll.u32 %s11029_s4, 4  ;;  %s235_s10 = sshll.u32 %s5399_s9, 4  ;;  %s234_s26 = int_to_ptr.hbm [resolvable:$true] %s233_s26  ;;  %s236_s10 = int_to_ptr.vmem [resolvable:$true] %s235_s10 }
  0x1f   : > { %4923 = dma.hbm_to_vmem [thread:$0]  (!%p5496_p10), %s234_s26, 9216, %s236_s10, [#allocation10], %s10754_s15, %s10754_s15, %s10756_s16  }
  0x20   : > { %s247_s7 = sshll.u32 %s11030_s5, 4  ;;  %s5400_s12 = smov [#allocation12]   ;;  %s248_s7 = int_to_ptr.hbm [resolvable:$true] %s247_s7 }
  0x21   : > { %s249_s13 = sshll.u32 %s5400_s12, 4  ;;  %s5531_s14 = sadd.s32 1, %s5393_s24   ;;  %s250_s13 = int_to_ptr.vmem [resolvable:$true] %s249_s13 }
  0x22   : > { %4926 = dma.hbm_to_vmem [thread:$0]  (!%p5496_p10), %s248_s7, 512, %s250_s13, [#allocation13], %s10754_s15, %s10754_s15, %s10756_s16  }
  0x23   : > { %s34_s17 = sadd.s32 1, %s5389_s23  ;;  %s31_s18 = ssub.s32 %s5393_s24, %s5531_s14 }
  0x24   : > { %p41_p12 = scmp.ne.s32.totalorder %s5389_s23, %s5385_s22  ;;  %p32_p13 = scmp.eq.s32.totalorder %s31_s18, 0 }
  0x25   : > { %p42_p0 = scmp.eq.s32.totalorder %s5393_s24, 0  ;;  %p4942_p5 = scmp.lt.s32.totalorder %s5393_s24, 2 }
  0x26   : > { %p5541_p3 = por %p181_p2, %p41_p12  ;;  %s263_s11 = sand.u32 1, %s5389_s23  }
  0x27   : > { %s5547_s20 = scalar_select %p32_p13, %s5389_s23, %s34_s17  }
  0x28   : > { %p43_p7 = por %p42_p0, %p41_p12  ;;  %s5550_s26 = sshll.u32 %s263_s11, 7 }
  0x29   : > { %s4887_s29 = sshll.u32 %s5393_s24, 7  ;;  %s11032_s0 = sld [smem:[#allocation102_spill]] }
  0x2a   : > { %s267_s10 = scalar_lea.vmem [#allocation3], %s5550_s26  ;;  %p5557_p2 = pnand %p4942_p5, %p43_p7 }
  0x2b   : > { %s276_s12 = sshll.u32 %s267_s10, 4  ;;  %s296_s16 = scalar_lea.hbm %s10748_s1, %s4887_s29  ;;  %s277_s12 = int_to_ptr.vmem [resolvable:$true] %s276_s12 }
  0x2c   : > { %s297_s2 = sshll.u32 %s296_s16, 4  ;;  %s264_s3 = scalar_lea.sflag [#allocation4], %s263_s11  ;;  %s298_s2 = int_to_ptr.hbm [resolvable:$true] %s297_s2 }
  0x2d   : > { %p5255_p10 = pneg %p5557_p2 }
  0x2f   : > { %s273_s9 = scalar_lea.hbm %s11032_s0, %s4887_s29  ;;  %s5258_s10 = scalar_lea.hbm %s11032_s0, 256 }
  0x30   : > { %s274_s13 = sshll.u32 %s273_s9, 4  ;;  %s275_s13 = int_to_ptr.hbm [resolvable:$true] %s274_s13 }
  0x31   : > { %s5251_s4 = sshra.s32 %s275_s13, 4  ;;  %s5252_s4 = int_to_ptr.hbm [resolvable:$true] %s5251_s4 }
  0x32   : > { %s5253_s30 = scalar_lea.hbm %s5252_s4, 128  ;;  %p5259_p0 = scmp.lt.s32.totalorder %s5252_s4, %s11032_s0 }
  0x33   : > { %p5254_p9 = scmp.ne.s32.totalorder %s5252_s4, %s5253_s30  ;;  %p5260_p5 = scmp.lt.s32.totalorder %s5258_s10, %s5253_s30 }
  0x35   : > { %p5256_p12 = pnand %p5255_p10, %p5254_p9  ;;  %p5261_p7 = por %p5260_p5, %p5259_p0 }
  0x37   : > { %p5257_p13 = pneg %p5256_p12 }
  0x39   : > { %p5262_p11 = pnand %p5261_p7, %p5257_p13 }
  0x3b   : > { %5265 = shalt.err (!%p5262_p11)
}
  0x3c   : > { %s11034_s16 = smov 16   ;;  %s11035_s11 = smov 256  }
  0x3d   : > { %4930 = dma.hbm_to_vmem [thread:$0]  (!%p5557_p2), %s275_s13, 2048, %s277_s12, %s264_s3, %s11035_s11, %s11035_s11, %s11034_s16  }
  0x3e   : > { %s290_s29 = scalar_lea.vmem [#allocation6], %s5550_s26  ;;  %s286_s9 = sand.u32 1, %s5393_s24  }
  0x3f   : > { %s299_s7 = sshll.u32 %s290_s29, 4  ;;  %s287_s15 = scalar_lea.sflag [#allocation7], %s286_s9  ;;  %s300_s7 = int_to_ptr.vmem [resolvable:$true] %s299_s7 }
  0x40   : > { %s5281_s4 = sshra.s32 %s298_s2, 4  ;;  %s5288_s0 = scalar_lea.hbm %s10748_s1, 256  ;;  %s5282_s4 = int_to_ptr.hbm [resolvable:$true] %s5281_s4 }
  0x41   : > { %s5283_s30 = scalar_lea.hbm %s5282_s4, 128  ;;  %p5289_p13 = scmp.lt.s32.totalorder %s5282_s4, %s10748_s1 }
  0x42   : > { %p5284_p9 = scmp.ne.s32.totalorder %s5282_s4, %s5283_s30  ;;  %p5290_p0 = scmp.lt.s32.totalorder %s5288_s0, %s5283_s30 }
  0x44   : > { %p5286_p11 = pnand %p5284_p9, %p5255_p10  ;;  %p5291_p5 = por %p5290_p0, %p5289_p13 }
  0x46   : > { %p5287_p12 = pneg %p5286_p11 }
  0x48   : > { %p5292_p7 = pnand %p5291_p5, %p5287_p12 }
  0x4a   : > { %5295 = shalt.err (!%p5292_p7)
}
  0x4b   : > { %4933 = dma.hbm_to_vmem [thread:$0]  (!%p5557_p2), %s298_s2, 2048, %s300_s7, %s287_s15, %s11035_s11, %s11035_s11, %s11034_s16  }
  0x4c   : > { %311 = sbr.rel (%p5488_p8) target bundleno = 1590 (0x636), region = 44 }
  0x51   : > { %s5599_s26 = sand.u32 1, %s5385_s22  }
  0x52   : > { %s5602_s5 = sshll.u32 %s5599_s26, 7  ;;  %s314_s0 = scalar_lea.sflag [#allocation4], %s5599_s26 }
  0x53   : > { %s5606_s12 = scalar_lea.vmem [#allocation3], %s5602_s5 }
  0x54   : > { %5356 = dma.done.wait (%p5475_p4), %s314_s0, 2048  }
  0x55   : > { %5358 = vsyncadd (%p5475_p4), %s314_s0, 4294965248  ;;  %s323_s2 = sand.u32 1, %s5466_s25   ;;  %s5614_s13 = scalar_lea.vmem [#allocation6], %s5602_s5 }
  0x56   : > { %s324_s8 = scalar_lea.sflag [#allocation7], %s323_s2 }
  0x57   : > { %5360 = dma.done.wait (%p5475_p4), %s324_s8, 2048  }
  0x58   : > { %5362 = vsyncadd (%p5475_p4), %s324_s8, 4294965248 }
  0x59   : > { %5364 = dma.done.wait (%p48_p1), [#allocation7], 9216  }
  0x5a   : > { %5366 = vsyncadd (%p48_p1), [#allocation7], 4294958080 }
  0x5b   : > { %5368 = dma.done.wait (%p48_p1), [#allocation10], 18432  }
  0x5c   : > { %5370 = vsyncadd (%p48_p1), [#allocation10], 4294948864 }
  0x5d   : > { %5372 = dma.done.wait (%p48_p1), [#allocation13], 512  }
  0x5e   : > { %5374 = vsyncadd (%p48_p1), [#allocation13], 4294966784  ;;  %v5633_v0 = vld [vmem:[%s5606_s12 + $0x20] sm:$0xff]  ;;  %v5636_v1 = vld [vmem:[%s5606_s12 + $0x8] sm:$0xff]  ;;  %s5401_s27 = smov 17   ;;  %s5402_s18 = smov 16   ;;  %v413_v17 = vlaneseq }
  0x5f   : > { %v5639_v2 = vld [vmem:[%s5606_s12] sm:$0xff]  ;;  %401 = vrot.lane.b32.xlu1 %v5633_v0, %s5401_s27  ;;  %405 = vrot.lane.b32.xlu2 %v5636_v1, %s5401_s27  ;;  %v5648_v3 = vld [vmem:[%s5606_s12 + $0x30] sm:$0xff]  ;;  %s5403_s16 = smov 15   ;;  %s5404_s11 = smov 1   ;;  %v453_v23 = vld [vmem:[#allocation11 + $0x28] sm:$0xff] }
  0x60   : > { %397 = vrot.lane.b32.xlu0 %v5639_v2, %s5401_s27  ;;  %v5651_v4 = vld [vmem:[%s5606_s12 + $0x18] sm:$0xff]  ;;  %v5654_v5 = vld [vmem:[%s5606_s12 + $0x10] sm:$0xff]  ;;  %v5666_v7 = vld [vmem:[%s5606_s12 + $0x28] sm:$0xff]  ;;  %s5405_s29 = smov 127   ;;  %s5406_s7 = smov 113   ;;  %v5770_v21 = vand.u32 127, %v413_v17 }
  0x61   : > { %v5663_v6 = vld [vmem:[%s5606_s12 + $0x38] sm:$0xff]  ;;  %s5407_s9 = smov 112   ;;  %v452_v22 = vld [vmem:[#allocation11 + $0x20] sm:$0xff]  ;;  %v528_v27 = vld [vmem:[#allocation11 + $0x68] sm:$0xff]  ;;  %s5408_s15 = smov 111  }
  0x62   : > { %11036 = vst [vmem:[#allocation21_spill] sm:$0xff] %v5770_v21  ;;  %vm415_vm0 = vcmp.lt.s32.totalorder %v5770_v21, 17  ;;  %vm488_vm1 = vcmp.lt.s32.totalorder %v5770_v21, 16  ;;  %v527_v26 = vld [vmem:[#allocation11 + $0x60] sm:$0xff]  ;;  %v450_v39 = vld [vmem:[#allocation11 + $0x10] sm:$0xff]  ;;  %v451_v40 = vld [vmem:[#allocation11 + $0x18] sm:$0xff] }
  0x63   : > { %v525_v43 = vld [vmem:[#allocation11 + $0x50] sm:$0xff]  ;;  %v526_v44 = vld [vmem:[#allocation11 + $0x58] sm:$0xff]  ;;  %v448_v47 = vld [vmem:[#allocation11] sm:$0xff]  ;;  %vm563_vm2 = vcmp.lt.s32.totalorder %v5770_v21, 15  ;;  %vm638_vm3 = vcmp.lt.s32.totalorder %v5770_v21, 1  ;;  %vm763_vm4 = vcmp.lt.s32.totalorder %v5770_v21, 127 }
  0x64   : > { %v449_v53 = vld [vmem:[#allocation11 + $0x8] sm:$0xff]  ;;  %v523_v58 = vld [vmem:[#allocation11 + $0x40] sm:$0xff]  ;;  %vm838_vm5 = vcmp.lt.s32.totalorder %v5770_v21, 113  ;;  %vm913_vm6 = vcmp.lt.s32.totalorder %v5770_v21, 112  ;;  %vm988_vm7 = vcmp.lt.s32.totalorder %v5770_v21, 111  ;;  %s8426_s4 = scalar_lea.vmem [#allocation14], %s5602_s5 }
  0x65   : > { %v524_v59 = vld [vmem:[#allocation11 + $0x48] sm:$0xff]  ;;  %v428_v21 = vld [vmem:[#allocation9 + $0x20] sm:$0xff]  ;;  %s4891_s30 = sshll.u32 %s5466_s25, 7  ;;  %s4696_s3 = sshll.u32 %s8426_s4, 4  ;;  %s4697_s3 = int_to_ptr.vmem [resolvable:$true] %s4696_s3 }
  0x66   : > { %v599_v17 = vld [vmem:[#allocation11 + $0x88] sm:$0xff]  ;;  %s4695_s17 = scalar_lea.hbm %s10753_s6, %s4891_s30  ;;  %s4683_s0 = scalar_lea.sflag [#allocation5], %s5599_s26 }
  0x67   : > { %403 = vrot.lane.b32.xlu1 %v5648_v3, %s5401_s27  ;;  %407 = vrot.lane.b32.xlu2 %v5651_v4, %s5401_s27  ;;  %s4698_s5 = sshll.u32 %s4695_s17, 4  ;;  %s4699_s5 = int_to_ptr.hbm [resolvable:$true] %s4698_s5 }
  0x68   : > { %399 = vrot.lane.b32.xlu0 %v5654_v5, %s5401_s27 }
  0x6f   : > { %411 = vrot.lane.b32.xlu1 %v5663_v6, %s5401_s27  ;;  %472 = vrot.lane.b32.xlu2 %v5639_v2, %s5402_s18 }
  0x70   : > { %409 = vrot.lane.b32.xlu0 %v5666_v7, %s5401_s27 }
  0x77   : > { %476 = vrot.lane.b32.xlu1 %v5633_v0, %s5402_s18  ;;  %478 = vrot.lane.b32.xlu2 %v5648_v3, %s5402_s18 }
  0x78   : > { %474 = vrot.lane.b32.xlu0 %v5654_v5, %s5402_s18 }
  0x7f   : > { %482 = vrot.lane.b32.xlu1 %v5651_v4, %s5402_s18  ;;  %484 = vrot.lane.b32.xlu2 %v5666_v7, %s5402_s18 }
  0x80   : > { %480 = vrot.lane.b32.xlu0 %v5636_v1, %s5402_s18 }
  0x87   : > { %547 = vrot.lane.b32.xlu1 %v5639_v2, %s5403_s16  ;;  %549 = vrot.lane.b32.xlu2 %v5654_v5, %s5403_s16 }
  0x88   : > { %486 = vrot.lane.b32.xlu0 %v5663_v6, %s5402_s18 }
  0x8f   : > { %553 = vrot.lane.b32.xlu1 %v5648_v3, %s5403_s16  ;;  %555 = vrot.lane.b32.xlu2 %v5636_v1, %s5403_s16 }
  0x90   : > { %551 = vrot.lane.b32.xlu0 %v5633_v0, %s5403_s16 }
  0x97   : > { %559 = vrot.lane.b32.xlu1 %v5666_v7, %s5403_s16  ;;  %561 = vrot.lane.b32.xlu2 %v5663_v6, %s5403_s16 }
  0x98   : > { %557 = vrot.lane.b32.xlu0 %v5651_v4, %s5403_s16 }
  0x9f   : > { %624 = vrot.lane.b32.xlu1 %v5654_v5, %s5404_s11  ;;  %626 = vrot.lane.b32.xlu2 %v5633_v0, %s5404_s11 }
  0xa0   : > { %622 = vrot.lane.b32.xlu0 %v5639_v2, %s5404_s11 }
  0xa7   : > { %630 = vrot.lane.b32.xlu1 %v5636_v1, %s5404_s11  ;;  %632 = vrot.lane.b32.xlu2 %v5651_v4, %s5404_s11 }
  0xa8   : > { %628 = vrot.lane.b32.xlu0 %v5648_v3, %s5404_s11 }
  0xaf   : > { %636 = vrot.lane.b32.xlu1 %v5663_v6, %s5404_s11  ;;  %747 = vrot.lane.b32.xlu2 %v5639_v2, %s5405_s29 }
  0xb0   : > { %634 = vrot.lane.b32.xlu0 %v5666_v7, %s5404_s11 }
  0xb7   : > { %751 = vrot.lane.b32.xlu1 %v5633_v0, %s5405_s29  ;;  %753 = vrot.lane.b32.xlu2 %v5648_v3, %s5405_s29 }
  0xb8   : > { %749 = vrot.lane.b32.xlu0 %v5654_v5, %s5405_s29 }
  0xb9   : > { %v5728_v8 = vpop.permute.xlu2 %405 }
  0xbf   : > { %757 = vrot.lane.b32.xlu1 %v5651_v4, %s5405_s29  ;;  %759 = vrot.lane.b32.xlu2 %v5666_v7, %s5405_s29 }
  0xc0   : > { %755 = vrot.lane.b32.xlu0 %v5636_v1, %s5405_s29 }
  0xc1   : > { %v408_v9 = vpop.permute.xlu2 %407 }
  0xc7   : > { %822 = vrot.lane.b32.xlu1 %v5639_v2, %s5406_s7  ;;  %824 = vrot.lane.b32.xlu2 %v5654_v5, %s5406_s7 }
  0xc8   : > { %761 = vrot.lane.b32.xlu0 %v5663_v6, %s5405_s29 }
  0xc9   : > { %v5742_v10 = vpop.permute.xlu2 %472 }
  0xcf   : > { %828 = vrot.lane.b32.xlu1 %v5648_v3, %s5406_s7  ;;  %830 = vrot.lane.b32.xlu2 %v5636_v1, %s5406_s7 }
  0xd0   : > { %826 = vrot.lane.b32.xlu0 %v5633_v0, %s5406_s7 }
  0xd1   : > { %v402_v11 = vpop.permute.xlu1 %401  ;;  %v5750_v12 = vpop.permute.xlu2 %478 }
  0xd2   : > { %v398_v13 = vpop.permute.xlu0 %397 }
  0xd3   : > { %v5821_v48 = vsel %vm415_vm0, %v398_v13, %v5728_v8  ;;  %v5826_v49 = vsel %vm415_vm0, %v5728_v8, %v398_v13 }
  0xd4   : > { %v456_v8 = vmul.f32 %v448_v47, %v5826_v49 }
  0xd7   : > { %834 = vrot.lane.b32.xlu1 %v5666_v7, %s5406_s7  ;;  %836 = vrot.lane.b32.xlu2 %v5663_v6, %s5406_s7 }
  0xd8   : > { %832 = vrot.lane.b32.xlu0 %v5651_v4, %s5406_s7 }
  0xd9   : > { %v5758_v14 = vpop.permute.xlu1 %403  ;;  %v485_v15 = vpop.permute.xlu2 %484 }
  0xda   : > { %v400_v16 = vpop.permute.xlu0 %399 }
  0xdb   : > { %v5810_v41 = vsel %vm415_vm0, %v400_v16, %v408_v9  ;;  %v5814_v42 = vsel %vm415_vm0, %v408_v9, %v400_v16  ;;  %v457_v9 = vmul.f32 %v449_v53, %v5821_v48  ;;  %v598_v16 = vld [vmem:[#allocation11 + $0x80] sm:$0xff] }
  0xdc   : > { %v458_v54 = vmul.f32 %v450_v39, %v5814_v42  ;;  %v459_v55 = vmul.f32 %v451_v40, %v5810_v41  ;;  %v530_v39 = vld [vmem:[#allocation11 + $0x78] sm:$0xff] }
  0xdf   : > { %899 = vrot.lane.b32.xlu1 %v5654_v5, %s5407_s9  ;;  %901 = vrot.lane.b32.xlu2 %v5633_v0, %s5407_s9 }
  0xe0   : > { %897 = vrot.lane.b32.xlu0 %v5639_v2, %s5407_s9 }
  0xe1   : > { %v5766_v18 = vpop.permute.xlu1 %411  ;;  %v5768_v19 = vpop.permute.xlu2 %549 }
  0xe2   : > { %v410_v20 = vpop.permute.xlu0 %409 }
  0xe3   : > { %v5780_v24 = vsel %vm415_vm0, %v402_v11, %v410_v20  ;;  %v5784_v25 = vsel %vm415_vm0, %v410_v20, %v402_v11 }
  0xe4   : > { %v460_v33 = vmul.f32 %v452_v22, %v5784_v25  ;;  %v461_v34 = vmul.f32 %v453_v23, %v5780_v24  ;;  %v454_v23 = vld [vmem:[#allocation11 + $0x30] sm:$0xff] }
  0xe7   : > { %905 = vrot.lane.b32.xlu1 %v5636_v1, %s5407_s9  ;;  %907 = vrot.lane.b32.xlu2 %v5651_v4, %s5407_s9 }
  0xe8   : > { %903 = vrot.lane.b32.xlu0 %v5648_v3, %s5407_s9 }
  0xe9   : > { %v477_v28 = vpop.permute.xlu1 %476  ;;  %v556_v29 = vpop.permute.xlu2 %555 }
  0xea   : > { %v5790_v30 = vsel %vm488_vm1, %v477_v28, %v485_v15  ;;  %v5794_v31 = vsel %vm488_vm1, %v485_v15, %v477_v28  ;;  %v475_v32 = vpop.permute.xlu0 %474 }
  0xeb   : > { %v535_v35 = vmul.f32 %v527_v26, %v5794_v31  ;;  %v536_v36 = vmul.f32 %v528_v27, %v5790_v30 }
  0xed   : > { %v5800_v37 = vadd.f32 %v535_v35, %v460_v33  ;;  %v5802_v38 = vadd.f32 %v536_v36, %v461_v34  ;;  %v5879_v33 = vsel %vm415_vm0, %v5758_v14, %v5766_v18  ;;  %v5885_v34 = vsel %vm415_vm0, %v5766_v18, %v5758_v14 }
  0xee   : > { %v462_v18 = vmul.f32 %v454_v23, %v5885_v34 }
  0xef   : > { %911 = vrot.lane.b32.xlu1 %v5663_v6, %s5407_s9  ;;  %972 = vrot.lane.b32.xlu2 %v5639_v2, %s5408_s15 }
  0xf0   : > { %909 = vrot.lane.b32.xlu0 %v5666_v7, %s5407_s9 }
  0xf1   : > { %v483_v45 = vpop.permute.xlu1 %482  ;;  %v562_v46 = vpop.permute.xlu2 %561 }
  0xf2   : > { %v5830_v50 = vsel %vm488_vm1, %v475_v32, %v483_v45  ;;  %v5834_v51 = vsel %vm488_vm1, %v483_v45, %v475_v32  ;;  %v481_v52 = vpop.permute.xlu0 %480  ;;  %v455_v32 = vld [vmem:[#allocation11 + $0x38] sm:$0xff] }
  0xf3   : > { %v533_v56 = vmul.f32 %v525_v43, %v5834_v51  ;;  %v534_v57 = vmul.f32 %v526_v44, %v5830_v50  ;;  %v5843_v60 = vsel %vm488_vm1, %v5742_v10, %v481_v52  ;;  %v5848_v61 = vsel %vm488_vm1, %v481_v52, %v5742_v10 }
  0xf4   : > { %v531_v11 = vmul.f32 %v523_v58, %v5848_v61  ;;  %v532_v13 = vmul.f32 %v524_v59, %v5843_v60  ;;  %v463_v45 = vmul.f32 %v455_v32, %v5879_v33 }
  0xf5   : > { %v5850_v62 = vadd.f32 %v533_v56, %v458_v54  ;;  %v5852_v63 = vadd.f32 %v534_v57, %v459_v55  ;;  %v604_v54 = vld [vmem:[#allocation11 + $0xb0] sm:$0xff]  ;;  %v605_v55 = vld [vmem:[#allocation11 + $0xb8] sm:$0xff] }
  0xf6   : > { %v539_v10 = vadd.f32 %v531_v11, %v456_v8  ;;  %v540_v15 = vadd.f32 %v532_v13, %v457_v9  ;;  %v5924_v13 = vld [vmem:[%s5614_s13] sm:$0xff] }
  0xf7   : > { %976 = vrot.lane.b32.xlu1 %v5633_v0, %s5408_s15  ;;  %978 = vrot.lane.b32.xlu2 %v5648_v3, %s5408_s15 }
  0xf8   : > { %974 = vrot.lane.b32.xlu0 %v5654_v5, %s5408_s15 }
  0xf9   : > { %v548_v20 = vpop.permute.xlu1 %547  ;;  %v5865_v22 = vpop.permute.xlu2 %626 }
  0xfa   : > { %v5869_v26 = vsel %vm563_vm2, %v548_v20, %v556_v29  ;;  %v5873_v27 = vsel %vm563_vm2, %v556_v29, %v548_v20  ;;  %v487_v28 = vpop.permute.xlu0 %486  ;;  %v529_v29 = vld [vmem:[#allocation11 + $0x70] sm:$0xff] }
  0xfb   : > { %v606_v35 = vmul.f32 %v598_v16, %v5873_v27  ;;  %v607_v36 = vmul.f32 %v599_v17, %v5869_v26  ;;  %v5892_v40 = vsel %vm488_vm1, %v5750_v12, %v487_v28  ;;  %v5897_v43 = vsel %vm488_vm1, %v487_v28, %v5750_v12  ;;  %v603_v17 = vld [vmem:[#allocation11 + $0xa8] sm:$0xff] }
  0xfc   : > { %v537_v47 = vmul.f32 %v529_v29, %v5897_v43  ;;  %v538_v52 = vmul.f32 %v530_v39, %v5892_v40  ;;  %v600_v39 = vld [vmem:[#allocation11 + $0x90] sm:$0xff] }
  0xfd   : > { %v5899_v44 = vadd.f32 %v606_v35, %v539_v10  ;;  %v5901_v14 = vadd.f32 %v607_v36, %v540_v15  ;;  %v5927_v10 = vld [vmem:[%s5614_s13 + $0x10] sm:$0xff] }
  0xfe   : > { %v545_v12 = vadd.f32 %v537_v47, %v462_v18  ;;  %v546_v53 = vadd.f32 %v538_v52, %v463_v45  ;;  %v601_v18 = vld [vmem:[#allocation11 + $0x98] sm:$0xff]  ;;  %v5962_v52 = vld [vmem:[%s5614_s13 + $0x30] sm:$0xff] }
  0xff   : > { %982 = vrot.lane.b32.xlu1 %v5651_v4, %s5408_s15  ;;  %984 = vrot.lane.b32.xlu2 %v5666_v7, %s5408_s15 }
 0x100   : > { %980 = vrot.lane.b32.xlu0 %v5636_v1, %s5408_s15 }
 0x101   : > { %v554_v56 = vpop.permute.xlu1 %553  ;;  %v633_v57 = vpop.permute.xlu2 %632 }
 0x102   : > { %v5915_v58 = vsel %vm563_vm2, %v554_v56, %v562_v46  ;;  %v5919_v59 = vsel %vm563_vm2, %v562_v46, %v554_v56  ;;  %v552_v8 = vpop.permute.xlu0 %551  ;;  %v602_v46 = vld [vmem:[#allocation11 + $0xa0] sm:$0xff] }
 0x103   : > { %11037 = vst [vmem:[#allocation22_spill] sm:$0xff] %v5915_v58  ;;  %v612_v9 = vmul.f32 %v604_v54, %v5919_v59  ;;  %v613_v11 = vmul.f32 %v605_v55, %v5915_v58  ;;  %v5974_v55 = vld [vmem:[%s5614_s13 + $0x20] sm:$0xff] }
 0x104   : > { %11038 = vst [vmem:[#allocation23_spill] sm:$0xff] %v5919_v59  ;;  %v799_v59 = vld [vmem:[#allocation11 + $0x148] sm:$0xff] }
 0x105   : > { %v5929_v15 = vadd.f32 %v612_v9, %v545_v12  ;;  %v5931_v16 = vadd.f32 %v613_v11, %v546_v53  ;;  %v5965_v12 = vld [vmem:[%s5614_s13 + $0x8] sm:$0xff]  ;;  %v676_v9 = vld [vmem:[#allocation11 + $0xd8] sm:$0xff] }
 0x107   : > { %1063 = vrot.lane.b32.xlu1 %v5924_v13, %s5401_s27  ;;  %1065 = vrot.lane.b32.xlu2 %v5927_v10, %s5401_s27 }
 0x108   : > { %986 = vrot.lane.b32.xlu0 %v5663_v6, %s5408_s15 }
 0x109   : > { %v560_v20 = vpop.permute.xlu1 %559  ;;  %v5939_v23 = vpop.permute.xlu2 %747 }
 0x10a   : > { %v5943_v28 = vsel %vm563_vm2, %v552_v8, %v560_v20  ;;  %v5947_v32 = vsel %vm563_vm2, %v560_v20, %v552_v8  ;;  %v558_v35 = vpop.permute.xlu0 %557 }
 0x10b   : > { %11039 = vst [vmem:[#allocation24_spill] sm:$0xff] %v5943_v28  ;;  %v610_v36 = vmul.f32 %v602_v46, %v5947_v32  ;;  %v611_v29 = vmul.f32 %v603_v17, %v5943_v28  ;;  %v5954_v45 = vsel %vm563_vm2, %v5768_v19, %v558_v35  ;;  %v5959_v47 = vsel %vm563_vm2, %v558_v35, %v5768_v19 }
 0x10c   : > { %11040 = vst [vmem:[#allocation25_spill] sm:$0xff] %v5947_v32  ;;  %v608_v56 = vmul.f32 %v600_v39, %v5959_v47  ;;  %v609_v8 = vmul.f32 %v601_v18, %v5954_v45  ;;  %v727_v32 = vld [vmem:[#allocation11 + $0x120] sm:$0xff] }
 0x10d   : > { %11041 = vst [vmem:[#allocation26_spill] sm:$0xff] %v5954_v45  ;;  %v5968_v53 = vadd.f32 %v610_v36, %v5800_v37  ;;  %v5971_v54 = vadd.f32 %v611_v29, %v5802_v38  ;;  %v675_v38 = vld [vmem:[#allocation11 + $0xd0] sm:$0xff]  ;;  %v6000_v36 = vld [vmem:[%s5614_s13 + $0x28] sm:$0xff]  ;;  %v6003_v29 = vld [vmem:[%s5614_s13 + $0x38] sm:$0xff] }
 0x10e   : > { %11042 = vst [vmem:[#allocation27_spill] sm:$0xff] %v5959_v47  ;;  %v616_v19 = vadd.f32 %v608_v56, %v5850_v62  ;;  %v617_v37 = vadd.f32 %v609_v8, %v5852_v63  ;;  %v6010_v56 = vld [vmem:[%s5614_s13 + $0x18] sm:$0xff]  ;;  %v674_v8 = vld [vmem:[#allocation11 + $0xc8] sm:$0xff] }
 0x10f   : > { %1069 = vrot.lane.b32.xlu1 %v5962_v52, %s5401_s27  ;;  %1071 = vrot.lane.b32.xlu2 %v5965_v12, %s5401_s27 }
 0x110   : > { %1067 = vrot.lane.b32.xlu0 %v5974_v55, %s5401_s27 }
 0x111   : > { %v625_v11 = vpop.permute.xlu1 %624  ;;  %v5987_v46 = vpop.permute.xlu2 %753 }
 0x112   : > { %v5991_v17 = vsel %vm638_vm3, %v625_v11, %v633_v57  ;;  %v5995_v20 = vsel %vm638_vm3, %v633_v57, %v625_v11  ;;  %v623_v62 = vpop.permute.xlu0 %622  ;;  %v673_v57 = vld [vmem:[#allocation11 + $0xc0] sm:$0xff] }
 0x113   : > { %11043 = vst [vmem:[#allocation28_spill] sm:$0xff] %v5991_v17  ;;  %v683_v35 = vmul.f32 %v675_v38, %v5995_v20  ;;  %v684_v63 = vmul.f32 %v676_v9, %v5991_v17 }
 0x114   : > { %11044 = vst [vmem:[#allocation29_spill] sm:$0xff] %v5995_v20  ;;  %v678_v20 = vld [vmem:[#allocation11 + $0xe8] sm:$0xff] }
 0x115   : > { %v6005_v39 = vadd.f32 %v683_v35, %v616_v19  ;;  %v6007_v18 = vadd.f32 %v684_v63, %v617_v37 }
 0x117   : > { %1075 = vrot.lane.b32.xlu1 %v6000_v36, %s5401_s27  ;;  %1077 = vrot.lane.b32.xlu2 %v6003_v29, %s5401_s27 }
 0x118   : > { %1073 = vrot.lane.b32.xlu0 %v6010_v56, %s5401_s27 }
 0x119   : > { %v631_v38 = vpop.permute.xlu1 %630  ;;  %v760_v9 = vpop.permute.xlu2 %759 }
 0x11a   : > { %v6020_v19 = vsel %vm638_vm3, %v623_v62, %v631_v38  ;;  %v6024_v37 = vsel %vm638_vm3, %v631_v38, %v623_v62  ;;  %v629_v11 = vpop.permute.xlu0 %628  ;;  %v679_v62 = vld [vmem:[#allocation11 + $0xf0] sm:$0xff]  ;;  %v680_v38 = vld [vmem:[#allocation11 + $0xf8] sm:$0xff] }
 0x11b   : > { %11045 = vst [vmem:[#allocation30_spill] sm:$0xff] %v6020_v19  ;;  %v681_v35 = vmul.f32 %v673_v57, %v6024_v37  ;;  %v682_v63 = vmul.f32 %v674_v8, %v6020_v19  ;;  %v677_v19 = vld [vmem:[#allocation11 + $0xe0] sm:$0xff] }
 0x11d   : > { %v6029_v58 = vadd.f32 %v681_v35, %v5899_v44  ;;  %v6032_v17 = vadd.f32 %v682_v63, %v5901_v14 }
 0x11f   : > { %1113 = vrot.lane.b32.xlu1 %v5927_v10, %s5402_s18  ;;  %1115 = vrot.lane.b32.xlu2 %v5974_v55, %s5402_s18 }
 0x120   : > { %1111 = vrot.lane.b32.xlu0 %v5924_v13, %s5402_s18 }
 0x121   : > { %v637_v57 = vpop.permute.xlu1 %636  ;;  %v6040_v45 = vpop.permute.xlu2 %824 }
 0x122   : > { %v6044_v44 = vsel %vm638_vm3, %v629_v11, %v637_v57  ;;  %v6048_v14 = vsel %vm638_vm3, %v637_v57, %v629_v11  ;;  %v635_v8 = vpop.permute.xlu0 %634 }
 0x123   : > { %11046 = vst [vmem:[#allocation31_spill] sm:$0xff] %v6044_v44  ;;  %v687_v35 = vmul.f32 %v679_v62, %v6048_v14  ;;  %v688_v63 = vmul.f32 %v680_v38, %v6044_v44  ;;  %v6055_v28 = vsel %vm638_vm3, %v5865_v22, %v635_v8  ;;  %v6060_v47 = vsel %vm638_vm3, %v635_v8, %v5865_v22  ;;  %v728_v38 = vld [vmem:[#allocation11 + $0x128] sm:$0xff] }
 0x124   : > { %11047 = vst [vmem:[#allocation32_spill] sm:$0xff] %v6048_v14  ;;  %v685_v57 = vmul.f32 %v677_v19, %v6060_v47  ;;  %v686_v44 = vmul.f32 %v678_v20, %v6055_v28  ;;  %v735_v22 = vmul.f32 %v727_v32, %v5633_v0  ;;  %v802_v20 = vld [vmem:[#allocation11 + $0x160] sm:$0xff]  ;;  %v803_v19 = vld [vmem:[#allocation11 + $0x168] sm:$0xff] }
 0x125   : > { %11048 = vst [vmem:[#allocation33_spill] sm:$0xff] %v6055_v28  ;;  %v6063_v11 = vadd.f32 %v687_v35, %v5929_v15  ;;  %v6066_v62 = vadd.f32 %v688_v63, %v5931_v16  ;;  %v736_v16 = vmul.f32 %v728_v38, %v5666_v7  ;;  %v726_v38 = vld [vmem:[#allocation11 + $0x118] sm:$0xff] }
 0x126   : > { %11049 = vst [vmem:[#allocation34_spill] sm:$0xff] %v6060_v47  ;;  %v693_v8 = vadd.f32 %v685_v57, %v5968_v53  ;;  %v694_v15 = vadd.f32 %v686_v44, %v5971_v54  ;;  %v725_v44 = vld [vmem:[#allocation11 + $0x110] sm:$0xff] }
 0x127   : > { %1119 = vrot.lane.b32.xlu1 %v5965_v12, %s5402_s18  ;;  %1121 = vrot.lane.b32.xlu2 %v6010_v56, %s5402_s18 }
 0x128   : > { %1117 = vrot.lane.b32.xlu0 %v5962_v52, %s5402_s18  ;;  %v743_v32 = vadd.f32 %v735_v22, %v693_v8  ;;  %v744_v53 = vadd.f32 %v736_v16, %v694_v15  ;;  %v734_v22 = vmul.f32 %v726_v38, %v5651_v4  ;;  %v723_v8 = vld [vmem:[#allocation11 + $0x100] sm:$0xff]  ;;  %v724_v15 = vld [vmem:[#allocation11 + $0x108] sm:$0xff]  ;;  %v800_v16 = vld [vmem:[#allocation11 + $0x150] sm:$0xff] }
 0x129   : > { %v752_v35 = vpop.permute.xlu1 %751  ;;  %v831_v63 = vpop.permute.xlu2 %830 }
 0x12a   : > { %v750_v28 = vpop.permute.xlu0 %749  ;;  %v6083_v14 = vsel %vm763_vm4, %v752_v35, %v760_v9  ;;  %v6087_v0 = vsel %vm763_vm4, %v760_v9, %v752_v35  ;;  %v733_v9 = vmul.f32 %v725_v44, %v5654_v5  ;;  %v732_v5 = vmul.f32 %v724_v15, %v5636_v1  ;;  %v730_v15 = vld [vmem:[#allocation11 + $0x138] sm:$0xff] }
 0x12b   : > { %11050 = vst [vmem:[#allocation35_spill] sm:$0xff] %v6083_v14  ;;  %v810_v54 = vmul.f32 %v802_v20, %v6083_v14  ;;  %v811_v7 = vmul.f32 %v803_v19, %v6087_v0  ;;  %v801_v20 = vld [vmem:[#allocation11 + $0x158] sm:$0xff]  ;;  %v742_v44 = vadd.f32 %v734_v22, %v6007_v18  ;;  %v798_v14 = vld [vmem:[#allocation11 + $0x140] sm:$0xff] }
 0x12c   : > { %11051 = vst [vmem:[#allocation36_spill] sm:$0xff] %v6087_v0  ;;  %v740_v18 = vadd.f32 %v732_v5, %v6032_v17  ;;  %v874_v17 = vld [vmem:[#allocation11 + $0x188] sm:$0xff] }
 0x12d   : > { %v6091_v57 = vadd.f32 %v810_v54, %v743_v32  ;;  %v6093_v47 = vadd.f32 %v811_v7, %v744_v53  ;;  %v731_v54 = vmul.f32 %v723_v8, %v5639_v2  ;;  %v741_v7 = vadd.f32 %v733_v9, %v6005_v39 }
 0x12f   : > { %1125 = vrot.lane.b32.xlu1 %v6003_v29, %s5402_s18  ;;  %1160 = vrot.lane.b32.xlu2 %v5924_v13, %s5403_s16  ;;  %v739_v9 = vadd.f32 %v731_v54, %v6029_v58  ;;  %v873_v58 = vld [vmem:[#allocation11 + $0x180] sm:$0xff] }
 0x130   : > { %1123 = vrot.lane.b32.xlu0 %v6000_v36, %s5402_s18 }
 0x131   : > { %v758_v19 = vpop.permute.xlu1 %757  ;;  %v837_v35 = vpop.permute.xlu2 %836 }
 0x132   : > { %v6105_v32 = vsel %vm763_vm4, %v750_v28, %v758_v19  ;;  %v6109_v53 = vsel %vm763_vm4, %v758_v19, %v750_v28  ;;  %v756_v4 = vpop.permute.xlu0 %755 }
 0x133   : > { %11052 = vst [vmem:[#allocation37_spill] sm:$0xff] %v6109_v53  ;;  %v808_v38 = vmul.f32 %v800_v16, %v6105_v32  ;;  %v809_v0 = vmul.f32 %v801_v20, %v6109_v53  ;;  %v6120_v28 = vsel %vm763_vm4, %v5939_v23, %v756_v4  ;;  %v6125_v1 = vsel %vm763_vm4, %v756_v4, %v5939_v23  ;;  %v729_v23 = vld [vmem:[#allocation11 + $0x130] sm:$0xff]  ;;  %v431_v53 = vld [vmem:[#allocation9 + $0x38] sm:$0xff] }
 0x134   : > { %11053 = vst [vmem:[#allocation38_spill] sm:$0xff] %v6125_v1  ;;  %v806_v22 = vmul.f32 %v798_v14, %v6120_v28  ;;  %v807_v8 = vmul.f32 %v799_v59, %v6125_v1  ;;  %v737_v5 = vmul.f32 %v729_v23, %v5648_v3  ;;  %v738_v4 = vmul.f32 %v730_v15, %v5663_v6 }
 0x135   : > { %v6127_v2 = vadd.f32 %v808_v38, %v741_v7  ;;  %v6129_v39 = vadd.f32 %v809_v0, %v742_v44  ;;  %v804_v38 = vld [vmem:[#allocation11 + $0x170] sm:$0xff] }
 0x136   : > { %v814_v0 = vadd.f32 %v806_v22, %v739_v9  ;;  %v815_v16 = vadd.f32 %v807_v8, %v740_v18  ;;  %v805_v18 = vld [vmem:[#allocation11 + $0x178] sm:$0xff]  ;;  %v745_v22 = vadd.f32 %v737_v5, %v6063_v11  ;;  %v746_v8 = vadd.f32 %v738_v4, %v6066_v62 }
 0x137   : > { %1164 = vrot.lane.b32.xlu1 %v5974_v55, %s5403_s16  ;;  %1166 = vrot.lane.b32.xlu2 %v5962_v52, %s5403_s16 }
 0x138   : > { %1162 = vrot.lane.b32.xlu0 %v5927_v10, %s5403_s16 }
 0x139   : > { %v823_v14 = vpop.permute.xlu1 %822  ;;  %v6142_v20 = vpop.permute.xlu2 %901 }
 0x13a   : > { %v6146_v59 = vsel %vm838_vm5, %v823_v14, %v831_v63  ;;  %v6150_v19 = vsel %vm838_vm5, %v831_v63, %v823_v14  ;;  %v762_v54 = vpop.permute.xlu0 %761 }
 0x13b   : > { %11054 = vst [vmem:[#allocation39_spill] sm:$0xff] %v6150_v19  ;;  %v881_v7 = vmul.f32 %v873_v58, %v6146_v59  ;;  %v882_v44 = vmul.f32 %v874_v17, %v6150_v19  ;;  %v6159_v9 = vsel %vm763_vm4, %v5987_v46, %v762_v54  ;;  %v6164_v63 = vsel %vm763_vm4, %v762_v54, %v5987_v46 }
 0x13c   : > { %11055 = vst [vmem:[#allocation40_spill] sm:$0xff] %v6164_v63  ;;  %v812_v23 = vmul.f32 %v804_v38, %v6159_v9  ;;  %v813_v15 = vmul.f32 %v805_v18, %v6164_v63  ;;  %v878_v38 = vld [vmem:[#allocation11 + $0x1a8] sm:$0xff] }
 0x13d   : > { %v6166_v3 = vadd.f32 %v881_v7, %v814_v0  ;;  %v6168_v6 = vadd.f32 %v882_v44, %v815_v16  ;;  %v879_v0 = vld [vmem:[#allocation11 + $0x1b0] sm:$0xff]  ;;  %v880_v16 = vld [vmem:[#allocation11 + $0x1b8] sm:$0xff] }
 0x13e   : > { %v820_v46 = vadd.f32 %v812_v23, %v745_v22  ;;  %v821_v58 = vadd.f32 %v813_v15, %v746_v8 }
 0x13f   : > { %1170 = vrot.lane.b32.xlu1 %v6010_v56, %s5403_s16  ;;  %1172 = vrot.lane.b32.xlu2 %v6000_v36, %s5403_s16 }
 0x140   : > { %1168 = vrot.lane.b32.xlu0 %v5965_v12, %s5403_s16 }
 0x141   : > { %v829_v11 = vpop.permute.xlu1 %828  ;;  %v908_v17 = vpop.permute.xlu2 %907 }
 0x142   : > { %v6182_v62 = vsel %vm838_vm5, %v829_v11, %v837_v35  ;;  %v6186_v14 = vsel %vm838_vm5, %v837_v35, %v829_v11  ;;  %v827_v5 = vpop.permute.xlu0 %826  ;;  %v877_v35 = vld [vmem:[#allocation11 + $0x1a0] sm:$0xff] }
 0x143   : > { %11056 = vst [vmem:[#allocation41_spill] sm:$0xff] %v6186_v14  ;;  %v887_v4 = vmul.f32 %v879_v0, %v6182_v62  ;;  %v888_v54 = vmul.f32 %v880_v16, %v6186_v14  ;;  %v875_v0 = vld [vmem:[#allocation11 + $0x190] sm:$0xff]  ;;  %v876_v16 = vld [vmem:[#allocation11 + $0x198] sm:$0xff] }
 0x145   : > { %v6190_v7 = vadd.f32 %v887_v4, %v820_v46  ;;  %v6192_v44 = vadd.f32 %v888_v54, %v821_v58 }
 0x147   : > { %1209 = vrot.lane.b32.xlu1 %v5924_v13, %s5404_s11  ;;  %1211 = vrot.lane.b32.xlu2 %v5927_v10, %s5404_s11 }
 0x148   : > { %1174 = vrot.lane.b32.xlu0 %v6003_v29, %s5403_s16 }
 0x149   : > { %v835_v18 = vpop.permute.xlu1 %834  ;;  %v6200_v22 = vpop.permute.xlu2 %972 }
 0x14a   : > { %v6204_v8 = vsel %vm838_vm5, %v827_v5, %v835_v18  ;;  %v6208_v23 = vsel %vm838_vm5, %v835_v18, %v827_v5  ;;  %v833_v15 = vpop.permute.xlu0 %832 }
 0x14b   : > { %11057 = vst [vmem:[#allocation42_spill] sm:$0xff] %v6208_v23  ;;  %v885_v46 = vmul.f32 %v877_v35, %v6204_v8  ;;  %v886_v58 = vmul.f32 %v878_v38, %v6208_v23  ;;  %v6215_v11 = vsel %vm838_vm5, %v6040_v45, %v833_v15  ;;  %v6220_v4 = vsel %vm838_vm5, %v833_v15, %v6040_v45 }
 0x14c   : > { %11058 = vst [vmem:[#allocation43_spill] sm:$0xff] %v6220_v4  ;;  %v883_v35 = vmul.f32 %v875_v0, %v6215_v11  ;;  %v884_v38 = vmul.f32 %v876_v16, %v6220_v4 }
 0x14d   : > { %v893_v5 = vadd.f32 %v885_v46, %v6091_v57  ;;  %v894_v54 = vadd.f32 %v886_v58, %v6093_v47  ;;  %v950_v47 = vld [vmem:[#allocation11 + $0x1d0] sm:$0xff]  ;;  %v951_v57 = vld [vmem:[#allocation11 + $0x1d8] sm:$0xff] }
 0x14e   : > { %v891_v18 = vadd.f32 %v883_v35, %v6127_v2  ;;  %v892_v45 = vadd.f32 %v884_v38, %v6129_v39 }
 0x14f   : > { %1215 = vrot.lane.b32.xlu1 %v5962_v52, %s5404_s11  ;;  %1217 = vrot.lane.b32.xlu2 %v5965_v12, %s5404_s11 }
 0x150   : > { %1213 = vrot.lane.b32.xlu0 %v5974_v55, %s5404_s11 }
 0x151   : > { %v900_v15 = vpop.permute.xlu1 %899  ;;  %v6235_v46 = vpop.permute.xlu2 %978 }
 0x152   : > { %v6239_v58 = vsel %vm913_vm6, %v900_v15, %v908_v17  ;;  %v6243_v0 = vsel %vm913_vm6, %v908_v17, %v900_v15  ;;  %v898_v16 = vpop.permute.xlu0 %897  ;;  %v948_v17 = vld [vmem:[#allocation11 + $0x1c0] sm:$0xff]  ;;  %v949_v15 = vld [vmem:[#allocation11 + $0x1c8] sm:$0xff] }
 0x153   : > { %11059 = vst [vmem:[#allocation44_spill] sm:$0xff] %v6243_v0  ;;  %v958_v2 = vmul.f32 %v950_v47, %v6239_v58  ;;  %v959_v39 = vmul.f32 %v951_v57, %v6243_v0 }
 0x155   : > { %v6247_v35 = vadd.f32 %v958_v2, %v891_v18  ;;  %v6249_v38 = vadd.f32 %v959_v39, %v892_v45 }
 0x157   : > { %1221 = vrot.lane.b32.xlu1 %v6000_v36, %s5404_s11  ;;  %1223 = vrot.lane.b32.xlu2 %v6003_v29, %s5404_s11 }
 0x158   : > { %1219 = vrot.lane.b32.xlu0 %v6010_v56, %s5404_s11 }
 0x159   : > { %v906_v14 = vpop.permute.xlu1 %905  ;;  %v985_v63 = vpop.permute.xlu2 %984 }
 0x15a   : > { %v6259_v47 = vsel %vm913_vm6, %v898_v16, %v906_v14  ;;  %v6263_v18 = vsel %vm913_vm6, %v906_v14, %v898_v16  ;;  %v904_v45 = vpop.permute.xlu0 %903  ;;  %v954_v14 = vld [vmem:[#allocation11 + $0x1f0] sm:$0xff]  ;;  %v955_v16 = vld [vmem:[#allocation11 + $0x1f8] sm:$0xff] }
 0x15b   : > { %11060 = vst [vmem:[#allocation45_spill] sm:$0xff] %v6263_v18  ;;  %v956_v57 = vmul.f32 %v948_v17, %v6259_v47  ;;  %v957_v2 = vmul.f32 %v949_v15, %v6263_v18  ;;  %v953_v18 = vld [vmem:[#allocation11 + $0x1e8] sm:$0xff] }
 0x15d   : > { %v964_v39 = vadd.f32 %v956_v57, %v6166_v3  ;;  %v965_v0 = vadd.f32 %v957_v2, %v6168_v6  ;;  %v952_v2 = vld [vmem:[#allocation11 + $0x1e0] sm:$0xff] }
 0x15f   : > { %1285 = vrot.lane.b32.xlu1 %v5927_v10, %s5405_s29  ;;  %1287 = vrot.lane.b32.xlu2 %v5974_v55, %s5405_s29 }
 0x160   : > { %1283 = vrot.lane.b32.xlu0 %v5924_v13, %s5405_s29 }
 0x161   : > { %v912_v19 = vpop.permute.xlu1 %911  ;;  %v6275_v4 = vpop.permute.xlu2 %1065 }
 0x162   : > { %11061 = vst [vmem:[#allocation46_spill] sm:$0xff] %v6275_v4  ;;  %v6279_v17 = vsel %vm913_vm6, %v904_v45, %v912_v19  ;;  %v6283_v3 = vsel %vm913_vm6, %v912_v19, %v904_v45  ;;  %v910_v6 = vpop.permute.xlu0 %909 }
 0x163   : > { %11062 = vst [vmem:[#allocation47_spill] sm:$0xff] %v6283_v3  ;;  %v962_v15 = vmul.f32 %v954_v14, %v6279_v17  ;;  %v963_v57 = vmul.f32 %v955_v16, %v6283_v3  ;;  %v6290_v23 = vsel %vm913_vm6, %v6142_v20, %v910_v6  ;;  %v6295_v4 = vsel %vm913_vm6, %v910_v6, %v6142_v20  ;;  %v1027_v20 = vld [vmem:[#allocation11 + $0x220] sm:$0xff] }
 0x164   : > { %11063 = vst [vmem:[#allocation48_spill] sm:$0xff] %v6295_v4  ;;  %v960_v14 = vmul.f32 %v952_v2, %v6290_v23  ;;  %v961_v16 = vmul.f32 %v953_v18, %v6295_v4 }
 0x165   : > { %v970_v19 = vadd.f32 %v962_v15, %v6190_v7  ;;  %v971_v45 = vadd.f32 %v963_v57, %v6192_v44  ;;  %v1028_v7 = vld [vmem:[#allocation11 + $0x228] sm:$0xff] }
 0x166   : > { %v968_v3 = vadd.f32 %v960_v14, %v893_v5  ;;  %v969_v1 = vadd.f32 %v961_v16, %v894_v54  ;;  %v1026_v16 = vld [vmem:[#allocation11 + $0x218] sm:$0xff] }
 0x167   : > { %1291 = vrot.lane.b32.xlu1 %v5965_v12, %s5405_s29  ;;  %1293 = vrot.lane.b32.xlu2 %v6010_v56, %s5405_s29 }
 0x168   : > { %1289 = vrot.lane.b32.xlu0 %v5962_v52, %s5405_s29 }
 0x169   : > { %v977_v44 = vpop.permute.xlu1 %976  ;;  %v6308_v6 = vpop.permute.xlu2 %1071 }
 0x16a   : > { %11064 = vst [vmem:[#allocation49_spill] sm:$0xff] %v6308_v6  ;;  %v6312_v18 = vsel %vm988_vm7, %v977_v44, %v985_v63  ;;  %v6316_v15 = vsel %vm988_vm7, %v985_v63, %v977_v44  ;;  %v975_v57 = vpop.permute.xlu0 %974  ;;  %v1025_v63 = vld [vmem:[#allocation11 + $0x210] sm:$0xff] }
 0x16b   : > { %11065 = vst [vmem:[#allocation50_spill] sm:$0xff] %v6316_v15  ;;  %v1035_v5 = vmul.f32 %v1027_v20, %v6312_v18  ;;  %v1036_v54 = vmul.f32 %v1028_v7, %v6316_v15 }
 0x16d   : > { %v6320_v2 = vadd.f32 %v1035_v5, %v968_v3  ;;  %v6322_v14 = vadd.f32 %v1036_v54, %v969_v1  ;;  %v1023_v54 = vld [vmem:[#allocation11 + $0x200] sm:$0xff] }
 0x16f   : > { %11066 = vst [vmem:[#allocation51_spill] sm:$0xff] %v6320_v2  ;;  %1297 = vrot.lane.b32.xlu1 %v6003_v29, %s5405_s29  ;;  %1332 = vrot.lane.b32.xlu2 %v5924_v13, %s5406_s7 }
 0x170   : > { %11067 = vst [vmem:[#allocation52_spill] sm:$0xff] %v6322_v14  ;;  %1295 = vrot.lane.b32.xlu0 %v6000_v36, %s5405_s29  ;;  %v1024_v14 = vld [vmem:[#allocation11 + $0x208] sm:$0xff] }
 0x171   : > { %v983_v44 = vpop.permute.xlu1 %982  ;;  %v6330_v6 = vpop.permute.xlu2 %1077 }
 0x172   : > { %11068 = vst [vmem:[#allocation53_spill] sm:$0xff] %v6330_v6  ;;  %v6334_v3 = vsel %vm988_vm7, %v975_v57, %v983_v44  ;;  %v6338_v1 = vsel %vm988_vm7, %v983_v44, %v975_v57  ;;  %v981_v20 = vpop.permute.xlu0 %980 }
 0x173   : > { %11069 = vst [vmem:[#allocation54_spill] sm:$0xff] %v6334_v3  ;;  %v1033_v7 = vmul.f32 %v1025_v63, %v6334_v3  ;;  %v1034_v5 = vmul.f32 %v1026_v16, %v6338_v1  ;;  %v6345_v2 = vsel %vm988_vm7, %v6200_v22, %v981_v20  ;;  %v6350_v6 = vsel %vm988_vm7, %v981_v20, %v6200_v22  ;;  %v1029_v20 = vld [vmem:[#allocation11 + $0x230] sm:$0xff] }
 0x174   : > { %11070 = vst [vmem:[#allocation55_spill] sm:$0xff] %v6338_v1  ;;  %v1031_v63 = vmul.f32 %v1023_v54, %v6345_v2  ;;  %v1032_v16 = vmul.f32 %v1024_v14, %v6350_v6 }
 0x175   : > { %11071 = vst [vmem:[#allocation56_spill] sm:$0xff] %v6350_v6  ;;  %v6353_v57 = vadd.f32 %v1033_v7, %v6247_v35  ;;  %v6356_v44 = vadd.f32 %v1034_v5, %v6249_v38  ;;  %v1030_v7 = vld [vmem:[#allocation11 + $0x238] sm:$0xff] }
 0x176   : > { %v6364_v1 = vadd.f32 %v1031_v63, %v964_v39  ;;  %v6366_v22 = vadd.f32 %v1032_v16, %v965_v0 }
 0x177   : > { %11072 = vst [vmem:[#allocation57_spill] sm:$0xff] %v6353_v57  ;;  %1336 = vrot.lane.b32.xlu1 %v5974_v55, %s5406_s7  ;;  %1338 = vrot.lane.b32.xlu2 %v5962_v52, %s5406_s7  ;;  %v426_v57 = vld [vmem:[#allocation9 + $0x10] sm:$0xff] }
 0x178   : > { %11073 = vst [vmem:[#allocation58_spill] sm:$0xff] %v6356_v44  ;;  %1334 = vrot.lane.b32.xlu0 %v5927_v10, %s5406_s7 }
 0x179   : > { %11074 = vst [vmem:[#allocation59_spill] sm:$0xff] %v6364_v1  ;;  %v6370_v35 = vpop.permute.xlu1 %1063  ;;  %v6372_v38 = vpop.permute.xlu2 %1115  ;;  %v573_v1 = vld [vmem:[#allocation9 + $0x80] sm:$0xff] }
 0x17a   : > { %11075 = vst [vmem:[#allocation60_spill] sm:$0xff] %v6366_v22  ;;  %v987_v14 = vpop.permute.xlu0 %986  ;;  %v425_v22 = vld [vmem:[#allocation9 + $0x8] sm:$0xff]  ;;  %v581_v6 = vmul.f32 %v573_v1, %v5873_v27 }
 0x17b   : > { %11076 = vst [vmem:[#allocation61_spill] sm:$0xff] %v6370_v35  ;;  %v6377_v5 = vsel %vm988_vm7, %v6235_v46, %v987_v14  ;;  %v6382_v0 = vsel %vm988_vm7, %v987_v14, %v6235_v46  ;;  %v500_v35 = vld [vmem:[#allocation9 + $0x50] sm:$0xff]  ;;  %v433_v15 = vmul.f32 %v425_v22, %v5821_v48  ;;  %v436_v48 = vmul.f32 %v428_v21, %v5784_v25 }
 0x17c   : > { %11077 = vst [vmem:[#allocation62_spill] sm:$0xff] %v6372_v38  ;;  %v1037_v39 = vmul.f32 %v1029_v20, %v6377_v5  ;;  %v1038_v54 = vmul.f32 %v1030_v7, %v6382_v0  ;;  %v502_v38 = vld [vmem:[#allocation9 + $0x60] sm:$0xff]  ;;  %v439_v21 = vmul.f32 %v431_v53, %v5879_v33 }
 0x17d   : > { %11078 = vst [vmem:[#allocation63_spill] sm:$0xff] %v6377_v5  ;;  %v5075_v33 = vld [vmem:[%s5606_s12] sm:$0xff] }
 0x17e   : > { %11079 = vst [vmem:[#allocation64_spill] sm:$0xff] %v6382_v0  ;;  %v6386_v63 = vadd.f32 %v1037_v39, %v970_v19  ;;  %v6388_v16 = vadd.f32 %v1038_v54, %v971_v45  ;;  %v499_v0 = vld [vmem:[#allocation9 + $0x48] sm:$0xff] }
 0x17f   : > { %1342 = vrot.lane.b32.xlu1 %v6010_v56, %s5406_s7  ;;  %1344 = vrot.lane.b32.xlu2 %v6000_v36, %s5406_s7  ;;  %v507_v1 = vmul.f32 %v499_v0, %v5843_v60  ;;  %v11094_v0 = vld [vmem:[#allocation23_spill] sm:$0xff] }
 0x180   : > { %11080 = vst [vmem:[#allocation65_spill] sm:$0xff] %v6386_v63  ;;  %1340 = vrot.lane.b32.xlu0 %v5965_v12, %s5406_s7  ;;  %v424_v63 = vld [vmem:[#allocation9] sm:$0xff] }
 0x181   : > { %11081 = vst [vmem:[#allocation66_spill] sm:$0xff] %v6388_v16  ;;  %v6396_v44 = vpop.permute.xlu1 %1069  ;;  %v6398_v46 = vpop.permute.xlu2 %1121  ;;  %v498_v16 = vld [vmem:[#allocation9 + $0x40] sm:$0xff] }
 0x182   : > { %11082 = vst [vmem:[#allocation67_spill] sm:$0xff] %v6396_v44  ;;  %v6400_v20 = vpop.permute.xlu0 %1067  ;;  %v648_v44 = vld [vmem:[#allocation9 + $0xc0] sm:$0xff] }
 0x183   : > { %11083 = vst [vmem:[#allocation68_spill] sm:$0xff] %v6398_v46  ;;  %v656_v5 = vmul.f32 %v648_v44, %v6024_v37 }
 0x184   : > { %11084 = vst [vmem:[#allocation69_spill] sm:$0xff] %v6400_v20  ;;  %v430_v20 = vld [vmem:[#allocation9 + $0x30] sm:$0xff] }
 0x185   : > { %v438_v27 = vmul.f32 %v430_v20, %v5885_v34  ;;  %v701_v34 = vld [vmem:[#allocation9 + $0x118] sm:$0xff] }
 0x187   : > { %1381 = vrot.lane.b32.xlu1 %v5924_v13, %s5407_s9  ;;  %1383 = vrot.lane.b32.xlu2 %v5927_v10, %s5407_s9 }
 0x188   : > { %1346 = vrot.lane.b32.xlu0 %v6003_v29, %s5406_s7 }
 0x189   : > { %v6408_v19 = vpop.permute.xlu1 %1075  ;;  %v6410_v45 = vpop.permute.xlu2 %1160 }
 0x18a   : > { %11085 = vst [vmem:[#allocation70_spill] sm:$0xff] %v6408_v19  ;;  %v6412_v7 = vpop.permute.xlu0 %1073  ;;  %v503_v19 = vld [vmem:[#allocation9 + $0x68] sm:$0xff] }
 0x18b   : > { %11086 = vst [vmem:[#allocation71_spill] sm:$0xff] %v6410_v45  ;;  %v427_v45 = vld [vmem:[#allocation9 + $0x18] sm:$0xff] }
 0x18c   : > { %11087 = vst [vmem:[#allocation72_spill] sm:$0xff] %v6412_v7  ;;  %v435_v4 = vmul.f32 %v427_v45, %v5810_v41  ;;  %v654_v45 = vld [vmem:[#allocation9 + $0xf0] sm:$0xff] }
 0x18f   : > { %1387 = vrot.lane.b32.xlu1 %v5962_v52, %s5407_s9  ;;  %1389 = vrot.lane.b32.xlu2 %v5965_v12, %s5407_s9 }
 0x190   : > { %1385 = vrot.lane.b32.xlu0 %v5974_v55, %s5407_s9 }
 0x191   : > { %v6420_v14 = vpop.permute.xlu1 %1113  ;;  %v6422_v39 = vpop.permute.xlu2 %1166 }
 0x192   : > { %11088 = vst [vmem:[#allocation73_spill] sm:$0xff] %v6420_v14  ;;  %v6424_v54 = vpop.permute.xlu0 %1111  ;;  %v432_v14 = vmul.f32 %v424_v63, %v5826_v49  ;;  %v574_v49 = vld [vmem:[#allocation9 + $0x88] sm:$0xff]  ;;  %v504_v63 = vld [vmem:[#allocation9 + $0x70] sm:$0xff] }
 0x193   : > { %11089 = vst [vmem:[#allocation74_spill] sm:$0xff] %v6422_v39  ;;  %v506_v39 = vmul.f32 %v498_v16, %v5848_v61  ;;  %v434_v61 = vmul.f32 %v426_v57, %v5814_v42  ;;  %v429_v16 = vld [vmem:[#allocation9 + $0x28] sm:$0xff]  ;;  %v508_v42 = vmul.f32 %v500_v35, %v5834_v51  ;;  %v698_v57 = vld [vmem:[#allocation9 + $0x100] sm:$0xff]  ;;  %v582_v51 = vmul.f32 %v574_v49, %v5869_v26  ;;  %v5077_v49 = vld [vmem:[%s5606_s12 + $0x18] sm:$0xff] }
 0x194   : > { %11090 = vst [vmem:[#allocation75_spill] sm:$0xff] %v6424_v54  ;;  %v437_v41 = vmul.f32 %v429_v16, %v5780_v24  ;;  %v512_v60 = vmul.f32 %v504_v63, %v5897_v43  ;;  %v700_v24 = vld [vmem:[#allocation9 + $0x110] sm:$0xff]  ;;  %v706_v53 = vmul.f32 %v5075_v33, %v698_v57  ;;  %v515_v35 = vadd.f32 %v507_v1, %v433_v15  ;;  %v11097_v57 = vld [vmem:[#allocation34_spill] sm:$0xff] }
 0x195   : > { %v514_v3 = vadd.f32 %v506_v39, %v432_v14  ;;  %v516_v44 = vadd.f32 %v508_v42, %v434_v61  ;;  %v578_v14 = vld [vmem:[#allocation9 + $0xa8] sm:$0xff]  ;;  %v650_v39 = vld [vmem:[#allocation9 + $0xd0] sm:$0xff]  ;;  %v6478_v63 = vmul.f32 %v5077_v49, %v701_v34  ;;  %v576_v42 = vld [vmem:[#allocation9 + $0x98] sm:$0xff] }
 0x196   : > { %v6481_v15 = vadd.f32 %v582_v51, %v515_v35  ;;  %v11096_v1 = vld [vmem:[#allocation27_spill] sm:$0xff]  ;;  %v11101_v35 = vld [vmem:[#allocation26_spill] sm:$0xff] }
 0x197   : > { %1393 = vrot.lane.b32.xlu1 %v6000_v36, %s5407_s9  ;;  %1395 = vrot.lane.b32.xlu2 %v6003_v29, %s5407_s9  ;;  %v653_v49 = vld [vmem:[#allocation9 + $0xe8] sm:$0xff] }
 0x198   : > { %1391 = vrot.lane.b32.xlu0 %v6010_v56, %s5407_s9 }
 0x199   : > { %v6433_v7 = vpop.permute.xlu1 %1119  ;;  %v6435_v54 = vpop.permute.xlu2 %1172 }
 0x19a   : > { %11091 = vst [vmem:[#allocation76_spill] sm:$0xff] %v6433_v7  ;;  %v6437_v46 = vpop.permute.xlu0 %1117  ;;  %v510_v7 = vmul.f32 %v502_v38, %v5794_v31  ;;  %v505_v31 = vld [vmem:[#allocation9 + $0x78] sm:$0xff]  ;;  %v579_v38 = vld [vmem:[#allocation9 + $0xb0] sm:$0xff] }
 0x19b   : > { %11092 = vst [vmem:[#allocation77_spill] sm:$0xff] %v6435_v54  ;;  %v501_v54 = vld [vmem:[#allocation9 + $0x58] sm:$0xff]  ;;  %v587_v20 = vmul.f32 %v579_v38, %v11094_v0 }
 0x19c   : > { %11093 = vst [vmem:[#allocation78_spill] sm:$0xff] %v6437_v46  ;;  %v511_v46 = vmul.f32 %v503_v19, %v5790_v30  ;;  %v509_v22 = vmul.f32 %v501_v54, %v5830_v50  ;;  %v589_v30 = vadd.f32 %v581_v6, %v514_v3  ;;  %v577_v19 = vld [vmem:[#allocation9 + $0xa0] sm:$0xff]  ;;  %v518_v25 = vadd.f32 %v510_v7, %v436_v48  ;;  %v575_v6 = vld [vmem:[#allocation9 + $0x90] sm:$0xff] }
 0x19d   : > { %v773_v50 = vld [vmem:[#allocation9 + $0x140] sm:$0xff]  ;;  %v5076_v54 = vld [vmem:[%s5606_s12 + $0x10] sm:$0xff]  ;;  %v520_v48 = vadd.f32 %v512_v60, %v438_v27 }
 0x19e   : > { %v6462_v37 = vadd.f32 %v511_v46, %v437_v41  ;;  %v664_v3 = vadd.f32 %v656_v5, %v589_v30  ;;  %v848_v7 = vld [vmem:[#allocation9 + $0x180] sm:$0xff]  ;;  %v517_v5 = vadd.f32 %v509_v22, %v435_v4  ;;  %v6475_v16 = vmul.f32 %v5076_v54, %v700_v24  ;;  %v11098_v22 = vld [vmem:[#allocation32_spill] sm:$0xff]  ;;  %v699_v24 = vld [vmem:[#allocation9 + $0x108] sm:$0xff] }
 0x19f   : > { %1432 = vrot.lane.b32.xlu1 %v5927_v10, %s5408_s15  ;;  %1434 = vrot.lane.b32.xlu2 %v5974_v55, %s5408_s15  ;;  %v513_v10 = vmul.f32 %v505_v31, %v5892_v40  ;;  %v652_v55 = vld [vmem:[#allocation9 + $0xe0] sm:$0xff]  ;;  %v781_v61 = vmul.f32 %v773_v50, %v6120_v28  ;;  %v583_v31 = vmul.f32 %v575_v6, %v11096_v1  ;;  %v11099_v28 = vld [vmem:[#allocation24_spill] sm:$0xff]  ;;  %v704_v6 = vld [vmem:[#allocation9 + $0x130] sm:$0xff] }
 0x1a0   : > { %1430 = vrot.lane.b32.xlu0 %v5924_v13, %s5408_s15  ;;  %v11095_v13 = vld [vmem:[#allocation25_spill] sm:$0xff]  ;;  %v660_v41 = vmul.f32 %v652_v55, %v11097_v57  ;;  %v662_v38 = vmul.f32 %v654_v45, %v11098_v22  ;;  %v714_v33 = vadd.f32 %v706_v53, %v664_v3  ;;  %v856_v34 = vmul.f32 %v848_v7, %v6146_v59 }
 0x1a1   : > { %v6466_v26 = vpop.permute.xlu1 %1125  ;;  %v6468_v43 = vpop.permute.xlu2 %1211  ;;  %v585_v46 = vmul.f32 %v577_v19, %v11095_v13  ;;  %v923_v30 = vld [vmem:[#allocation9 + $0x1c0] sm:$0xff]  ;;  %v6485_v4 = vadd.f32 %v513_v10, %v439_v21  ;;  %v595_v0 = vadd.f32 %v587_v20, %v520_v48  ;;  %v586_v51 = vmul.f32 %v578_v14, %v11099_v28  ;;  %v651_v10 = vld [vmem:[#allocation9 + $0xd8] sm:$0xff]  ;;  %v703_v13 = vld [vmem:[#allocation9 + $0x128] sm:$0xff] }
 0x1a2   : > { %v6472_v40 = vpop.permute.xlu0 %1123  ;;  %v702_v19 = vld [vmem:[#allocation9 + $0x120] sm:$0xff]  ;;  %v584_v21 = vmul.f32 %v576_v42, %v11101_v35  ;;  %v789_v54 = vadd.f32 %v781_v61, %v714_v33  ;;  %v931_v3 = vmul.f32 %v923_v30, %v6259_v47  ;;  %v591_v59 = vadd.f32 %v583_v31, %v516_v44  ;;  %v779_v14 = vld [vmem:[#allocation9 + $0x170] sm:$0xff]  ;;  %v649_v47 = vld [vmem:[#allocation9 + $0xc8] sm:$0xff] }
 0x1a3   : > { %v593_v27 = vadd.f32 %v585_v46, %v518_v25  ;;  %v11100_v60 = vld [vmem:[#allocation29_spill] sm:$0xff]  ;;  %v5079_v46 = vld [vmem:[%s5606_s12 + $0x8] sm:$0xff]  ;;  %v775_v61 = vld [vmem:[#allocation9 + $0x150] sm:$0xff] }
 0x1a4   : > { %v658_v50 = vmul.f32 %v650_v39, %v11100_v60  ;;  %v998_v55 = vld [vmem:[#allocation9 + $0x200] sm:$0xff]  ;;  %v6499_v7 = vmul.f32 %v5079_v46, %v699_v24  ;;  %v670_v39 = vadd.f32 %v662_v38, %v595_v0  ;;  %v5080_v48 = vld [vmem:[%s5606_s12 + $0x30] sm:$0xff]  ;;  %v11102_v31 = vld [vmem:[#allocation28_spill] sm:$0xff]  ;;  %v592_v0 = vadd.f32 %v584_v21, %v517_v5 }
 0x1a5   : > { %v777_v45 = vld [vmem:[#allocation9 + $0x160] sm:$0xff]  ;;  %v668_v25 = vadd.f32 %v660_v41, %v593_v27  ;;  %v712_v42 = vmul.f32 %v5080_v48, %v704_v6  ;;  %v659_v57 = vmul.f32 %v651_v10, %v11102_v31  ;;  %v5081_v30 = vld [vmem:[%s5606_s12 + $0x28] sm:$0xff]  ;;  %v854_v24 = vld [vmem:[#allocation9 + $0x1b0] sm:$0xff]  ;;  %v783_v10 = vmul.f32 %v775_v61, %v6105_v32 }
 0x1a6   : > { %v5078_v53 = vld [vmem:[%s5606_s12 + $0x20] sm:$0xff]  ;;  %v666_v41 = vadd.f32 %v658_v50, %v591_v59  ;;  %v711_v22 = vmul.f32 %v5081_v30, %v703_v13  ;;  %v850_v28 = vld [vmem:[#allocation9 + $0x190] sm:$0xff]  ;;  %v11104_v60 = vld [vmem:[#allocation30_spill] sm:$0xff]  ;;  %v862_v59 = vmul.f32 %v854_v24, %v6182_v62 }
 0x1a7   : > { %1438 = vrot.lane.b32.xlu1 %v5965_v12, %s5408_s15  ;;  %1440 = vrot.lane.b32.xlu2 %v6010_v56, %s5408_s15  ;;  %v710_v20 = vmul.f32 %v5078_v53, %v702_v19  ;;  %v864_v12 = vadd.f32 %v856_v34, %v789_v54  ;;  %v1006_v56 = vmul.f32 %v998_v55, %v6345_v2  ;;  %v11103_v19 = vld [vmem:[#allocation35_spill] sm:$0xff]  ;;  %v852_v38 = vld [vmem:[#allocation9 + $0x1a0] sm:$0xff]  ;;  %v778_v32 = vld [vmem:[#allocation9 + $0x168] sm:$0xff] }
 0x1a8   : > { %1436 = vrot.lane.b32.xlu0 %v5962_v52, %s5408_s15  ;;  %v785_v52 = vmul.f32 %v777_v45, %v11103_v19  ;;  %v594_v34 = vadd.f32 %v586_v51, %v6462_v37  ;;  %v787_v2 = vmul.f32 %v779_v14, %v6159_v9  ;;  %v657_v6 = vmul.f32 %v649_v47, %v11104_v60  ;;  %v11105_v55 = vld [vmem:[#allocation33_spill] sm:$0xff]  ;;  %v929_v13 = vld [vmem:[#allocation9 + $0x1f0] sm:$0xff]  ;;  %v853_v19 = vld [vmem:[#allocation9 + $0x1a8] sm:$0xff] }
 0x1a9   : > { %v6505_v44 = vpop.permute.xlu1 %1164  ;;  %v6507_v1 = vpop.permute.xlu2 %1217  ;;  %v939_v27 = vadd.f32 %v931_v3, %v864_v12  ;;  %v661_v35 = vmul.f32 %v653_v49, %v11105_v55  ;;  %v718_v50 = vadd.f32 %v710_v20, %v668_v25  ;;  %v927_v45 = vld [vmem:[#allocation9 + $0x1e0] sm:$0xff]  ;;  %v720_v54 = vadd.f32 %v712_v42, %v670_v39  ;;  %v925_v37 = vld [vmem:[#allocation9 + $0x1d0] sm:$0xff]  ;;  %v580_v20 = vld [vmem:[#allocation9 + $0xb8] sm:$0xff] }
 0x1aa   : > { %v6512_v33 = vpop.permute.xlu0 %1162  ;;  %v860_v53 = vmul.f32 %v852_v38, %v6204_v8  ;;  %v667_v9 = vadd.f32 %v659_v57, %v592_v0  ;;  %v716_v21 = vadd.f32 %v6475_v16, %v666_v41  ;;  %v858_v3 = vmul.f32 %v850_v28, %v6215_v11  ;;  %v1002_v46 = vld [vmem:[#allocation9 + $0x220] sm:$0xff]  ;;  %v1004_v25 = vld [vmem:[#allocation9 + $0x230] sm:$0xff]  ;;  %v776_v11 = vld [vmem:[#allocation9 + $0x158] sm:$0xff] }
 0x1ab   : > { %v6521_v5 = vadd.f32 %v1006_v56, %v939_v27  ;;  %v793_v51 = vadd.f32 %v785_v52, %v718_v50  ;;  %v795_v14 = vadd.f32 %v787_v2, %v720_v54  ;;  %v937_v47 = vmul.f32 %v929_v13, %v6279_v17  ;;  %v1000_v39 = vld [vmem:[#allocation9 + $0x210] sm:$0xff]  ;;  %v774_v17 = vld [vmem:[#allocation9 + $0x148] sm:$0xff]  ;;  %v11109_v41 = vld [vmem:[#allocation36_spill] sm:$0xff] }
 0x1ac   : > { %v935_v62 = vmul.f32 %v927_v45, %v6290_v23  ;;  %v665_v8 = vadd.f32 %v657_v6, %v6481_v15  ;;  %v669_v16 = vadd.f32 %v661_v35, %v594_v34  ;;  %v791_v49 = vadd.f32 %v783_v10, %v716_v21  ;;  %v11107_v42 = vld [vmem:[#allocation63_spill] sm:$0xff]  ;;  %v11108_v15 = vld [vmem:[#allocation22_spill] sm:$0xff]  ;;  %v655_v34 = vld [vmem:[#allocation9 + $0xf8] sm:$0xff] }
 0x1ad   : > { %11106 = vst [vmem:[#allocation23_spill] sm:$0xff] %v6521_v5  ;;  %v933_v61 = vmul.f32 %v925_v37, %v6239_v58  ;;  %v870_v12 = vadd.f32 %v862_v59, %v795_v14  ;;  %v868_v23 = vadd.f32 %v860_v53, %v793_v51  ;;  %v1010_v48 = vmul.f32 %v1002_v46, %v6312_v18  ;;  %v851_v58 = vld [vmem:[#allocation9 + $0x198] sm:$0xff]  ;;  %v11110_v24 = vld [vmem:[#allocation54_spill] sm:$0xff]  ;;  %v11111_v0 = vld [vmem:[#allocation37_spill] sm:$0xff] }
 0x1ae   : > { %v588_v57 = vmul.f32 %v580_v20, %v11108_v15  ;;  %v786_v30 = vmul.f32 %v778_v32, %v11109_v41  ;;  %v866_v52 = vadd.f32 %v858_v3, %v791_v49  ;;  %v717_v18 = vadd.f32 %v6478_v63, %v667_v9  ;;  %v849_v28 = vld [vmem:[#allocation9 + $0x188] sm:$0xff]  ;;  %v926_v10 = vld [vmem:[#allocation9 + $0x1d8] sm:$0xff]  ;;  %v11114_v53 = vld [vmem:[#allocation43_spill] sm:$0xff] }
 0x1af   : > { %1444 = vrot.lane.b32.xlu1 %v6003_v29, %s5408_s15  ;;  %1479 = vrot.lane.b32.xlu2 %v6521_v5, %s5401_s27  ;;  %v1012_v29 = vmul.f32 %v1004_v25, %v11107_v42  ;;  %v784_v2 = vmul.f32 %v776_v11, %v11111_v0  ;;  %v945_v27 = vadd.f32 %v937_v47, %v870_v12  ;;  %v11112_v35 = vld [vmem:[#allocation38_spill] sm:$0xff]  ;;  %v11117_v9 = vld [vmem:[#allocation31_spill] sm:$0xff]  ;;  %v1001_v20 = vld [vmem:[#allocation9 + $0x218] sm:$0xff] }
 0x1b0   : > { %1442 = vrot.lane.b32.xlu0 %v6000_v36, %s5408_s15  ;;  %v1008_v36 = vmul.f32 %v1000_v39, %v11110_v24  ;;  %v943_v60 = vadd.f32 %v935_v62, %v868_v23  ;;  %v719_v6 = vadd.f32 %v711_v22, %v669_v16  ;;  %v715_v55 = vadd.f32 %v6499_v7, %v665_v8  ;;  %v928_v45 = vld [vmem:[#allocation9 + $0x1e8] sm:$0xff]  ;;  %v11118_v22 = vld [vmem:[#allocation39_spill] sm:$0xff]  ;;  %v705_v47 = vld [vmem:[#allocation9 + $0x138] sm:$0xff] }
 0x1b1   : > { %v6537_v56 = vpop.permute.xlu1 %1170  ;;  %v6539_v31 = vpop.permute.xlu2 %1223  ;;  %v782_v50 = vmul.f32 %v774_v17, %v11112_v35  ;;  %v941_v13 = vadd.f32 %v933_v61, %v866_v52  ;;  %v11113_v54 = vld [vmem:[#allocation42_spill] sm:$0xff]  ;;  %v859_v37 = vmul.f32 %v851_v58, %v11114_v53  ;;  %v6554_v63 = vadd.f32 %v1012_v29, %v945_v27  ;;  %v11120_v62 = vld [vmem:[#allocation44_spill] sm:$0xff]  ;;  %v11122_v17 = vld [vmem:[#allocation45_spill] sm:$0xff] }
 0x1b2   : > { %v6544_v38 = vpop.permute.xlu0 %1168  ;;  %v861_v59 = vmul.f32 %v853_v19, %v11113_v54  ;;  %v924_v51 = vld [vmem:[#allocation9 + $0x1c8] sm:$0xff]  ;;  %v6552_v21 = vadd.f32 %v1010_v48, %v943_v60  ;;  %v663_v3 = vmul.f32 %v655_v34, %v11117_v9  ;;  %v794_v46 = vadd.f32 %v786_v30, %v719_v6  ;;  %v11121_v8 = vld [vmem:[#allocation48_spill] sm:$0xff]  ;;  %v11124_v41 = vld [vmem:[#allocation55_spill] sm:$0xff] }
 0x1b3   : > { %11116 = vst [vmem:[#allocation27_spill] sm:$0xff] %v6554_v63  ;;  %v857_v25 = vmul.f32 %v849_v28, %v11118_v22  ;;  %v1003_v7 = vld [vmem:[#allocation9 + $0x228] sm:$0xff]  ;;  %v6558_v32 = vadd.f32 %v1008_v36, %v941_v13  ;;  %v792_v14 = vadd.f32 %v784_v2, %v717_v18  ;;  %v934_v39 = vmul.f32 %v926_v10, %v11120_v62  ;;  %v780_v23 = vld [vmem:[#allocation9 + $0x178] sm:$0xff]  ;;  %v11129_v13 = vld [vmem:[#allocation41_spill] sm:$0xff] }
 0x1b4   : > { %11115 = vst [vmem:[#allocation25_spill] sm:$0xff] %v6552_v21  ;;  %v936_v16 = vmul.f32 %v928_v45, %v11121_v8  ;;  %v999_v11 = vld [vmem:[#allocation9 + $0x208] sm:$0xff]  ;;  %v596_v49 = vadd.f32 %v588_v57, %v6485_v4  ;;  %v790_v61 = vadd.f32 %v782_v50, %v715_v55  ;;  %v932_v12 = vmul.f32 %v924_v51, %v11122_v17  ;;  %v5082_v4 = vld [vmem:[%s5606_s12 + $0x38] sm:$0xff] }
 0x1b5   : > { %11119 = vst [vmem:[#allocation34_spill] sm:$0xff] %v6558_v32  ;;  %v869_v48 = vadd.f32 %v861_v59, %v794_v46  ;;  %v867_v42 = vadd.f32 %v859_v37, %v792_v14  ;;  %v11123_v29 = vld [vmem:[#allocation50_spill] sm:$0xff]  ;;  %v1009_v30 = vmul.f32 %v1001_v20, %v11124_v41  ;;  %v713_v57 = vmul.f32 %v5082_v4, %v705_v47  ;;  %v11126_v36 = vld [vmem:[#allocation56_spill] sm:$0xff]  ;;  %v11131_v37 = vld [vmem:[#allocation47_spill] sm:$0xff] }
 0x1b6   : > { %v1011_v15 = vmul.f32 %v1003_v7, %v11123_v29  ;;  %v671_v52 = vadd.f32 %v663_v3, %v596_v49  ;;  %v865_v24 = vadd.f32 %v857_v25, %v790_v61  ;;  %v1007_v34 = vmul.f32 %v999_v11, %v11126_v36  ;;  %v855_v0 = vld [vmem:[#allocation9 + $0x1b8] sm:$0xff] }
 0x1b7   : > { %1483 = vrot.lane.b32.xlu1 %v6552_v21, %s5401_s27  ;;  %1485 = vrot.lane.b32.xlu2 %v6554_v63, %s5401_s27  ;;  %v942_v2 = vadd.f32 %v934_v39, %v867_v42  ;;  %v944_v28 = vadd.f32 %v936_v16, %v869_v48  ;;  %v11127_v27 = vld [vmem:[#allocation40_spill] sm:$0xff]  ;;  %v863_v45 = vmul.f32 %v855_v0, %v11129_v13 }
 0x1b8   : > { %1481 = vrot.lane.b32.xlu0 %v6558_v32, %s5401_s27  ;;  %v788_v60 = vmul.f32 %v780_v23, %v11127_v27  ;;  %v940_v6 = vadd.f32 %v932_v12, %v865_v24  ;;  %v930_v55 = vld [vmem:[#allocation9 + $0x1f8] sm:$0xff]  ;;  %v721_v10 = vadd.f32 %v713_v57, %v671_v52 }
 0x1b9   : > { %v6572_v19 = vpop.permute.xlu1 %1209  ;;  %v6574_v58 = vpop.permute.xlu2 %1287  ;;  %v6581_v35 = vadd.f32 %v1011_v15, %v944_v28  ;;  %v6583_v50 = vadd.f32 %v1009_v30, %v942_v2  ;;  %v1005_v59 = vld [vmem:[#allocation9 + $0x238] sm:$0xff]  ;;  %v938_v51 = vmul.f32 %v930_v55, %v11131_v37 }
 0x1ba   : > { %11125 = vst [vmem:[#allocation32_spill] sm:$0xff] %v6574_v58  ;;  %v6578_v18 = vpop.permute.xlu0 %1174  ;;  %v6586_v54 = vadd.f32 %v1007_v34, %v940_v6  ;;  %v796_v53 = vadd.f32 %v788_v60, %v721_v10  ;;  %v11132_v22 = vld [vmem:[#allocation64_spill] sm:$0xff] }
 0x1bb   : > { %11128 = vst [vmem:[#allocation24_spill] sm:$0xff] %v6581_v35  ;;  %v1013_v25 = vmul.f32 %v1005_v59, %v11132_v22 }
 0x1bc   : > { %11130 = vst [vmem:[#allocation29_spill] sm:$0xff] %v6586_v54  ;;  %v871_v46 = vadd.f32 %v863_v45, %v796_v53 }
 0x1be   : > { %v946_v20 = vadd.f32 %v938_v51, %v871_v46 }
 0x1bf   : > { %1489 = vrot.lane.b32.xlu1 %v6583_v50, %s5401_s27  ;;  %1491 = vrot.lane.b32.xlu2 %v6581_v35, %s5401_s27 }
 0x1c0   : > { %1487 = vrot.lane.b32.xlu0 %v6586_v54, %s5401_s27  ;;  %v6602_v14 = vadd.f32 %v1013_v25, %v946_v20 }
 0x1c1   : > { %v6595_v9 = vpop.permute.xlu1 %1215  ;;  %v6597_v3 = vpop.permute.xlu2 %1293 }
 0x1c2   : > { %v6600_v7 = vpop.permute.xlu0 %1213  ;;  %11133 = vst [vmem:[#allocation26_spill] sm:$0xff] %v6602_v14 }
 0x1c7   : > { %1531 = vrot.lane.b32.xlu1 %v6521_v5, %s5402_s18  ;;  %1533 = vrot.lane.b32.xlu2 %v6558_v32, %s5402_s18 }
 0x1c8   : > { %1493 = vrot.lane.b32.xlu0 %v6602_v14, %s5401_s27 }
 0x1c9   : > { %v6610_v47 = vpop.permute.xlu1 %1221  ;;  %v6612_v62 = vpop.permute.xlu2 %1332 }
 0x1ca   : > { %11134 = vst [vmem:[#allocation28_spill] sm:$0xff] %v6612_v62  ;;  %v6614_v39 = vpop.permute.xlu0 %1219 }
 0x1cf   : > { %1537 = vrot.lane.b32.xlu1 %v6554_v63, %s5402_s18  ;;  %1539 = vrot.lane.b32.xlu2 %v6586_v54, %s5402_s18 }
 0x1d0   : > { %1535 = vrot.lane.b32.xlu0 %v6552_v21, %s5402_s18 }
 0x1d1   : > { %v6622_v8 = vpop.permute.xlu1 %1285  ;;  %v6624_v16 = vpop.permute.xlu2 %1338 }
 0x1d2   : > { %11135 = vst [vmem:[#allocation35_spill] sm:$0xff] %v6624_v16  ;;  %v6626_v11 = vpop.permute.xlu0 %1283 }
 0x1d7   : > { %1543 = vrot.lane.b32.xlu1 %v6581_v35, %s5402_s18  ;;  %1545 = vrot.lane.b32.xlu2 %v6602_v14, %s5402_s18 }
 0x1d8   : > { %1541 = vrot.lane.b32.xlu0 %v6583_v50, %s5402_s18 }
 0x1d9   : > { %v6634_v49 = vpop.permute.xlu1 %1291  ;;  %v6636_v61 = vpop.permute.xlu2 %1344 }
 0x1da   : > { %11136 = vst [vmem:[#allocation30_spill] sm:$0xff] %v6636_v61  ;;  %v6638_v17 = vpop.permute.xlu0 %1289 }
 0x1db   : > { %11137 = vst [vmem:[#allocation33_spill] sm:$0xff] %v6638_v17 }
 0x1df   : > { %1585 = vrot.lane.b32.xlu1 %v6558_v32, %s5403_s16  ;;  %1587 = vrot.lane.b32.xlu2 %v6552_v21, %s5403_s16 }
 0x1e0   : > { %1583 = vrot.lane.b32.xlu0 %v6521_v5, %s5403_s16 }
 0x1e1   : > { %v6646_v12 = vpop.permute.xlu1 %1297  ;;  %v6648_v23 = vpop.permute.xlu2 %1383 }
 0x1e2   : > { %11138 = vst [vmem:[#allocation63_spill] sm:$0xff] %v6646_v12  ;;  %v6650_v48 = vpop.permute.xlu0 %1295 }
 0x1e3   : > { %11139 = vst [vmem:[#allocation22_spill] sm:$0xff] %v6648_v23  ;;  %v11196_v23 = vld [vmem:[#allocation78_spill] sm:$0xff] }
 0x1e4   : > { %11140 = vst [vmem:[#allocation36_spill] sm:$0xff] %v6650_v48 }
 0x1e7   : > { %1591 = vrot.lane.b32.xlu1 %v6586_v54, %s5403_s16  ;;  %1593 = vrot.lane.b32.xlu2 %v6583_v50, %s5403_s16 }
 0x1e8   : > { %1589 = vrot.lane.b32.xlu0 %v6554_v63, %s5403_s16 }
 0x1e9   : > { %v6658_v42 = vpop.permute.xlu1 %1336  ;;  %v6660_v29 = vpop.permute.xlu2 %1389 }
 0x1ea   : > { %11141 = vst [vmem:[#allocation54_spill] sm:$0xff] %v6658_v42  ;;  %v6662_v15 = vpop.permute.xlu0 %1334  ;;  %v11197_v42 = vld [vmem:[#allocation62_spill] sm:$0xff] }
 0x1eb   : > { %11142 = vst [vmem:[#allocation37_spill] sm:$0xff] %v6660_v29  ;;  %v1141_v29 = vld [vmem:[#allocation8 + $0x68] sm:$0xff] }
 0x1ec   : > { %11143 = vst [vmem:[#allocation38_spill] sm:$0xff] %v6662_v15 }
 0x1ef   : > { %1597 = vrot.lane.b32.xlu1 %v6602_v14, %s5403_s16  ;;  %1635 = vrot.lane.b32.xlu2 %v6521_v5, %s5404_s11 }
 0x1f0   : > { %1595 = vrot.lane.b32.xlu0 %v6581_v35, %s5403_s16 }
 0x1f1   : > { %v6670_v41 = vpop.permute.xlu1 %1342  ;;  %v6672_v30 = vpop.permute.xlu2 %1395 }
 0x1f2   : > { %11144 = vst [vmem:[#allocation42_spill] sm:$0xff] %v6670_v41  ;;  %v6674_v52 = vpop.permute.xlu0 %1340  ;;  %v1259_v41 = vld [vmem:[#allocation8 + $0x100] sm:$0xff] }
 0x1f3   : > { %11145 = vst [vmem:[#allocation43_spill] sm:$0xff] %v6672_v30  ;;  %v11193_v30 = vld [vmem:[#allocation75_spill] sm:$0xff] }
 0x1f4   : > { %11146 = vst [vmem:[#allocation31_spill] sm:$0xff] %v6674_v52 }
 0x1f7   : > { %1639 = vrot.lane.b32.xlu1 %v6552_v21, %s5404_s11  ;;  %1641 = vrot.lane.b32.xlu2 %v6554_v63, %s5404_s11 }
 0x1f8   : > { %1637 = vrot.lane.b32.xlu0 %v6558_v32, %s5404_s11 }
 0x1f9   : > { %v6682_v24 = vpop.permute.xlu1 %1381  ;;  %v6684_v4 = vpop.permute.xlu2 %1434 }
 0x1fa   : > { %11147 = vst [vmem:[#allocation39_spill] sm:$0xff] %v6682_v24  ;;  %v6686_v57 = vpop.permute.xlu0 %1346  ;;  %v1140_v24 = vld [vmem:[#allocation8 + $0x60] sm:$0xff] }
 0x1fb   : > { %11148 = vst [vmem:[#allocation44_spill] sm:$0xff] %v6684_v4 }
 0x1fc   : > { %11149 = vst [vmem:[#allocation48_spill] sm:$0xff] %v6686_v57  ;;  %v1142_v57 = vld [vmem:[#allocation8 + $0x70] sm:$0xff] }
 0x1ff   : > { %1645 = vrot.lane.b32.xlu1 %v6583_v50, %s5404_s11  ;;  %1647 = vrot.lane.b32.xlu2 %v6581_v35, %s5404_s11 }
 0x200   : > { %1643 = vrot.lane.b32.xlu0 %v6586_v54, %s5404_s11 }
 0x201   : > { %v6694_v36 = vpop.permute.xlu1 %1387  ;;  %v6696_v34 = vpop.permute.xlu2 %1440 }
 0x202   : > { %11150 = vst [vmem:[#allocation45_spill] sm:$0xff] %v6694_v36  ;;  %v6698_v0 = vpop.permute.xlu0 %1385  ;;  %v1139_v36 = vld [vmem:[#allocation8 + $0x58] sm:$0xff] }
 0x203   : > { %11151 = vst [vmem:[#allocation50_spill] sm:$0xff] %v6696_v34  ;;  %v11195_v34 = vld [vmem:[#allocation46_spill] sm:$0xff] }
 0x204   : > { %11152 = vst [vmem:[#allocation55_spill] sm:$0xff] %v6698_v0  ;;  %v11191_v0 = vld [vmem:[#allocation69_spill] sm:$0xff] }
 0x207   : > { %1713 = vrot.lane.b32.xlu1 %v6521_v5, %s5405_s29  ;;  %1715 = vrot.lane.b32.xlu2 %v6558_v32, %s5405_s29 }
 0x208   : > { %1649 = vrot.lane.b32.xlu0 %v6602_v14, %s5404_s11 }
 0x209   : > { %v6706_v2 = vpop.permute.xlu1 %1393  ;;  %v6708_v28 = vpop.permute.xlu2 %1479 }
 0x20a   : > { %11153 = vst [vmem:[#allocation56_spill] sm:$0xff] %v6706_v2  ;;  %v6710_v27 = vpop.permute.xlu0 %1391 }
 0x20b   : > { %11154 = vst [vmem:[#allocation40_spill] sm:$0xff] %v6708_v28 }
 0x20c   : > { %11155 = vst [vmem:[#allocation41_spill] sm:$0xff] %v6710_v27  ;;  %v1134_v27 = vsel %vm488_vm1, %v6466_v26, %v11196_v23 }
 0x20d   : > { %v1150_v15 = vmul.f32 %v1142_v57, %v1134_v27 }
 0x20f   : > { %1719 = vrot.lane.b32.xlu1 %v6554_v63, %s5405_s29  ;;  %1721 = vrot.lane.b32.xlu2 %v6586_v54, %s5405_s29 }
 0x210   : > { %1717 = vrot.lane.b32.xlu0 %v6552_v21, %s5405_s29 }
 0x211   : > { %v6718_v60 = vpop.permute.xlu1 %1432  ;;  %v6720_v6 = vpop.permute.xlu2 %1485 }
 0x212   : > { %11156 = vst [vmem:[#allocation47_spill] sm:$0xff] %v6718_v60  ;;  %v6722_v55 = vpop.permute.xlu0 %1430  ;;  %v11194_v60 = vld [vmem:[#allocation72_spill] sm:$0xff] }
 0x213   : > { %11157 = vst [vmem:[#allocation64_spill] sm:$0xff] %v6720_v6  ;;  %v1080_v16 = vsel %vm415_vm0, %v11195_v34, %v11194_v60 }
 0x214   : > { %11158 = vst [vmem:[#allocation79_spill] sm:$0xff] %v6722_v55 }
 0x217   : > { %1725 = vrot.lane.b32.xlu1 %v6581_v35, %s5405_s29  ;;  %1727 = vrot.lane.b32.xlu2 %v6602_v14, %s5405_s29 }
 0x218   : > { %1723 = vrot.lane.b32.xlu0 %v6583_v50, %s5405_s29 }
 0x219   : > { %v6730_v10 = vpop.permute.xlu1 %1438  ;;  %v6732_v13 = vpop.permute.xlu2 %1491 }
 0x21a   : > { %11159 = vst [vmem:[#allocation80_spill] sm:$0xff] %v6730_v10  ;;  %v6734_v45 = vpop.permute.xlu0 %1436  ;;  %v1090_v10 = vld [vmem:[#allocation8 + $0x18] sm:$0xff] }
 0x21b   : > { %11160 = vst [vmem:[#allocation81_spill] sm:$0xff] %v6732_v13  ;;  %v1098_v48 = vmul.f32 %v1090_v10, %v1080_v16  ;;  %v1189_v10 = vld [vmem:[#allocation8 + $0xa0] sm:$0xff] }
 0x21c   : > { %11161 = vst [vmem:[#allocation82_spill] sm:$0xff] %v6734_v45  ;;  %v11188_v45 = vld [vmem:[#allocation53_spill] sm:$0xff] }
 0x21f   : > { %1767 = vrot.lane.b32.xlu1 %v6558_v32, %s5406_s7  ;;  %1769 = vrot.lane.b32.xlu2 %v6552_v21, %s5406_s7 }
 0x220   : > { %1765 = vrot.lane.b32.xlu0 %v6521_v5, %s5406_s7 }
 0x221   : > { %v6742_v59 = vpop.permute.xlu1 %1444  ;;  %v6744_v53 = vpop.permute.xlu2 %1533 }
 0x222   : > { %11162 = vst [vmem:[#allocation83_spill] sm:$0xff] %v6742_v59  ;;  %v6746_v37 = vpop.permute.xlu0 %1442  ;;  %v11190_v59 = vld [vmem:[#allocation70_spill] sm:$0xff] }
 0x223   : > { %11163 = vst [vmem:[#allocation84_spill] sm:$0xff] %v6744_v53  ;;  %v1081_v2 = vsel %vm415_vm0, %v11191_v0, %v11190_v59 }
 0x224   : > { %11164 = vst [vmem:[#allocation85_spill] sm:$0xff] %v6746_v37  ;;  %v1093_v37 = vld [vmem:[#allocation8 + $0x30] sm:$0xff] }
 0x227   : > { %1773 = vrot.lane.b32.xlu1 %v6586_v54, %s5406_s7  ;;  %1775 = vrot.lane.b32.xlu2 %v6583_v50, %s5406_s7 }
 0x228   : > { %1771 = vrot.lane.b32.xlu0 %v6554_v63, %s5406_s7 }
 0x229   : > { %v6754_v51 = vpop.permute.xlu1 %1483  ;;  %v6756_v46 = vpop.permute.xlu2 %1539 }
 0x22a   : > { %11165 = vst [vmem:[#allocation86_spill] sm:$0xff] %v6754_v51  ;;  %v6758_v22 = vpop.permute.xlu0 %1481 }
 0x22b   : > { %11166 = vst [vmem:[#allocation87_spill] sm:$0xff] %v6756_v46 }
 0x22c   : > { %11167 = vst [vmem:[#allocation88_spill] sm:$0xff] %v6758_v22 }
 0x22f   : > { %1779 = vrot.lane.b32.xlu1 %v6602_v14, %s5406_s7  ;;  %1817 = vrot.lane.b32.xlu2 %v6521_v5, %s5407_s9 }
 0x230   : > { %1777 = vrot.lane.b32.xlu0 %v6581_v35, %s5406_s7 }
 0x231   : > { %v6766_v25 = vpop.permute.xlu1 %1489  ;;  %v6768_v20 = vpop.permute.xlu2 %1545 }
 0x232   : > { %11168 = vst [vmem:[#allocation89_spill] sm:$0xff] %v6766_v25  ;;  %v6770_v6 = vpop.permute.xlu0 %1487  ;;  %v1138_v25 = vld [vmem:[#allocation8 + $0x50] sm:$0xff] }
 0x233   : > { %11169 = vst [vmem:[#allocation90_spill] sm:$0xff] %v6768_v20 }
 0x234   : > { %11170 = vst [vmem:[#allocation91_spill] sm:$0xff] %v6770_v6 }
 0x237   : > { %1821 = vrot.lane.b32.xlu1 %v6552_v21, %s5407_s9  ;;  %1823 = vrot.lane.b32.xlu2 %v6554_v63, %s5407_s9 }
 0x238   : > { %1819 = vrot.lane.b32.xlu0 %v6558_v32, %s5407_s9 }
 0x239   : > { %v6778_v13 = vpop.permute.xlu1 %1531  ;;  %v6780_v51 = vpop.permute.xlu2 %1587 }
 0x23a   : > { %11171 = vst [vmem:[#allocation92_spill] sm:$0xff] %v6778_v13  ;;  %v6782_v46 = vpop.permute.xlu0 %1493 }
 0x23b   : > { %11172 = vst [vmem:[#allocation93_spill] sm:$0xff] %v6780_v51 }
 0x23c   : > { %11173 = vst [vmem:[#allocation94_spill] sm:$0xff] %v6782_v46 }
 0x23f   : > { %1827 = vrot.lane.b32.xlu1 %v6583_v50, %s5407_s9  ;;  %1829 = vrot.lane.b32.xlu2 %v6581_v35, %s5407_s9 }
 0x240   : > { %1825 = vrot.lane.b32.xlu0 %v6586_v54, %s5407_s9 }
 0x241   : > { %v6790_v20 = vpop.permute.xlu1 %1537  ;;  %v6792_v53 = vpop.permute.xlu2 %1593 }
 0x242   : > { %11174 = vst [vmem:[#allocation95_spill] sm:$0xff] %v6790_v20  ;;  %v6794_v28 = vpop.permute.xlu0 %1535  ;;  %v11180_v20 = vld [vmem:[#allocation61_spill] sm:$0xff] }
 0x243   : > { %11175 = vst [vmem:[#allocation96_spill] sm:$0xff] %v6792_v53  ;;  %v1087_v53 = vld [vmem:[#allocation8] sm:$0xff] }
 0x244   : > { %11176 = vst [vmem:[#allocation97_spill] sm:$0xff] %v6794_v28  ;;  %v11181_v28 = vld [vmem:[#allocation49_spill] sm:$0xff] }
 0x245   : > { %v1083_v22 = vsel %vm415_vm0, %v11181_v28, %v11180_v20 }
 0x246   : > { %v1095_v4 = vmul.f32 %v1087_v53, %v1083_v22  ;;  %v1136_v53 = vld [vmem:[#allocation8 + $0x40] sm:$0xff]  ;;  %v1137_v22 = vld [vmem:[#allocation8 + $0x48] sm:$0xff] }
 0x247   : > { %1869 = vrot.lane.b32.xlu1 %v6521_v5, %s5408_s15  ;;  %1871 = vrot.lane.b32.xlu2 %v6558_v32, %s5408_s15  ;;  %v11187_v5 = vld [vmem:[#allocation68_spill] sm:$0xff]  ;;  %v1088_v32 = vld [vmem:[#allocation8 + $0x8] sm:$0xff] }
 0x248   : > { %1831 = vrot.lane.b32.xlu0 %v6602_v14, %s5407_s9 }
 0x249   : > { %v6802_v51 = vpop.permute.xlu1 %1543  ;;  %v6804_v46 = vpop.permute.xlu2 %1635 }
 0x24a   : > { %11177 = vst [vmem:[#allocation98_spill] sm:$0xff] %v6802_v51  ;;  %v6806_v13 = vpop.permute.xlu0 %1541 }
 0x24b   : > { %11178 = vst [vmem:[#allocation99_spill] sm:$0xff] %v6804_v46 }
 0x24c   : > { %11179 = vst [vmem:[#allocation100_spill] sm:$0xff] %v6806_v13 }
 0x24f   : > { %1875 = vrot.lane.b32.xlu1 %v6554_v63, %s5408_s15  ;;  %1877 = vrot.lane.b32.xlu2 %v6586_v54, %s5408_s15  ;;  %v11186_v63 = vld [vmem:[#allocation73_spill] sm:$0xff] }
 0x250   : > { %1873 = vrot.lane.b32.xlu0 %v6552_v21, %s5408_s15  ;;  %v1132_v54 = vsel %vm488_vm1, %v11187_v5, %v11186_v63  ;;  %v1079_v21 = vsel %vm415_vm0, %v11180_v20, %v11181_v28  ;;  %v1128_v28 = vsel %vm488_vm1, %v11186_v63, %v11187_v5  ;;  %v11192_v20 = vld [vmem:[#allocation76_spill] sm:$0xff]  ;;  %v1084_v5 = vsel %vm415_vm0, %v11194_v60, %v11195_v34 }
 0x251   : > { %v6818_v51 = vpop.permute.xlu1 %1585  ;;  %v6820_v46 = vpop.permute.xlu2 %1641  ;;  %v1127_v55 = vsel %vm488_vm1, %v11193_v30, %v11192_v20  ;;  %v1146_v63 = vmul.f32 %v1138_v25, %v1132_v54  ;;  %v1129_v34 = vsel %vm488_vm1, %v11197_v42, %v6472_v40  ;;  %v1133_v54 = vsel %vm488_vm1, %v6472_v40, %v11197_v42  ;;  %v1094_v60 = vld [vmem:[#allocation8 + $0x38] sm:$0xff] }
 0x252   : > { %11183 = vst [vmem:[#allocation61_spill] sm:$0xff] %v6818_v51  ;;  %v6822_v13 = vpop.permute.xlu0 %1583  ;;  %v11189_v51 = vld [vmem:[#allocation67_spill] sm:$0xff]  ;;  %v1085_v25 = vsel %vm415_vm0, %v11190_v59, %v11191_v0  ;;  %v1147_v61 = vmul.f32 %v1139_v36, %v1128_v28  ;;  %v1145_v52 = vmul.f32 %v1137_v22, %v1127_v55  ;;  %v1096_v40 = vmul.f32 %v1088_v32, %v1079_v21  ;;  %v1260_v36 = vld [vmem:[#allocation8 + $0x108] sm:$0xff]  ;;  %v1185_v22 = vld [vmem:[#allocation8 + $0x80] sm:$0xff] }
 0x253   : > { %11184 = vst [vmem:[#allocation49_spill] sm:$0xff] %v6820_v46  ;;  %v1082_v46 = vsel %vm415_vm0, %v11189_v51, %v11188_v45  ;;  %v1148_v12 = vmul.f32 %v1140_v24, %v1133_v54  ;;  %v1149_v0 = vmul.f32 %v1141_v29, %v1129_v34  ;;  %v11198_v29 = vld [vmem:[#allocation77_spill] sm:$0xff] }
 0x254   : > { %11185 = vst [vmem:[#allocation101_spill] sm:$0xff] %v6822_v13  ;;  %v1086_v13 = vsel %vm415_vm0, %v11188_v45, %v11189_v51  ;;  %v1131_v45 = vsel %vm488_vm1, %v11192_v20, %v11193_v30  ;;  %v1089_v51 = vld [vmem:[#allocation8 + $0x10] sm:$0xff]  ;;  %v1143_v30 = vld [vmem:[#allocation8 + $0x78] sm:$0xff]  ;;  %v1130_v20 = vsel %vm488_vm1, %v11196_v23, %v6466_v26  ;;  %v1091_v26 = vld [vmem:[#allocation8 + $0x20] sm:$0xff]  ;;  %v1102_v59 = vmul.f32 %v1094_v60, %v1082_v46 }
 0x255   : > { %v1092_v23 = vld [vmem:[#allocation8 + $0x28] sm:$0xff]  ;;  %v1144_v62 = vmul.f32 %v1136_v53, %v1131_v45  ;;  %v1101_v42 = vmul.f32 %v1093_v37, %v1086_v13  ;;  %v1151_v17 = vmul.f32 %v1143_v30, %v1130_v20  ;;  %v1099_v28 = vmul.f32 %v1091_v26, %v1085_v25  ;;  %v5083_v37 = vld [vmem:[%s5614_s13] sm:$0xff]  ;;  %v11199_v46 = vld [vmem:[#allocation71_spill] sm:$0xff] }
 0x256   : > { %v1100_v21 = vmul.f32 %v1092_v23, %v1081_v2  ;;  %v6898_v57 = vadd.f32 %v1147_v61, %v1098_v48  ;;  %v1153_v13 = vadd.f32 %v1145_v52, %v1096_v40  ;;  %v6901_v53 = vmul.f32 %v5083_v37, %v1259_v41  ;;  %v5084_v61 = vld [vmem:[%s5614_s13 + $0x8] sm:$0xff]  ;;  %v1265_v2 = vld [vmem:[#allocation8 + $0x130] sm:$0xff]  ;;  %v1266_v30 = vld [vmem:[#allocation8 + $0x138] sm:$0xff] }
 0x257   : > { %1881 = vrot.lane.b32.xlu1 %v6581_v35, %s5408_s15  ;;  %1883 = vrot.lane.b32.xlu2 %v6602_v14, %s5408_s15  ;;  %v1097_v35 = vmul.f32 %v1089_v51, %v1084_v5  ;;  %v1152_v27 = vadd.f32 %v1144_v62, %v1095_v4  ;;  %v1158_v16 = vadd.f32 %v1150_v15, %v1101_v42  ;;  %v1186_v15 = vld [vmem:[#allocation8 + $0x88] sm:$0xff]  ;;  %v1234_v51 = vld [vmem:[#allocation8 + $0xc0] sm:$0xff]  ;;  %v11202_v20 = vld [vmem:[#allocation51_spill] sm:$0xff] }
 0x258   : > { %1879 = vrot.lane.b32.xlu0 %v6583_v50, %s5408_s15  ;;  %v1182_v24 = vsel %vm563_vm2, %v11198_v29, %v6505_v44  ;;  %v6912_v48 = vmul.f32 %v5084_v61, %v1260_v36  ;;  %v1159_v62 = vadd.f32 %v1151_v17, %v1102_v59  ;;  %v1156_v52 = vadd.f32 %v1148_v12, %v1099_v28  ;;  %v1191_v12 = vld [vmem:[#allocation8 + $0xb0] sm:$0xff]  ;;  %v11200_v5 = vld [vmem:[#allocation74_spill] sm:$0xff]  ;;  %v1192_v23 = vld [vmem:[#allocation8 + $0xb8] sm:$0xff] }
 0x259   : > { %v6890_v14 = vpop.permute.xlu1 %1591  ;;  %v6892_v58 = vpop.permute.xlu2 %1647  ;;  %v6896_v32 = vadd.f32 %v1146_v63, %v1097_v35  ;;  %v1180_v35 = vsel %vm563_vm2, %v6544_v38, %v11199_v46  ;;  %v6914_v41 = vadd.f32 %v1149_v0, %v1100_v21  ;;  %v1176_v4 = vsel %vm563_vm2, %v11199_v46, %v6544_v38  ;;  %v11201_v38 = vld [vmem:[#allocation57_spill] sm:$0xff]  ;;  %v1235_v60 = vld [vmem:[#allocation8 + $0xc8] sm:$0xff]  ;;  %v11203_v40 = vld [vmem:[#allocation59_spill] sm:$0xff] }
 0x25a   : > { %v6894_v55 = vpop.permute.xlu0 %1589  ;;  %v1178_v45 = vsel %vm563_vm2, %v6505_v44, %v11198_v29  ;;  %v1229_v17 = vsel %vm638_vm3, %v6507_v1, %v6572_v19  ;;  %v1183_v63 = vsel %vm563_vm2, %v6578_v18, %v11200_v5  ;;  %v1190_v44 = vld [vmem:[#allocation8 + $0xa8] sm:$0xff]  ;;  %v1197_v34 = vmul.f32 %v1189_v10, %v1182_v24  ;;  %v1187_v42 = vld [vmem:[#allocation8 + $0x90] sm:$0xff]  ;;  %v1241_v29 = vld [vmem:[#allocation8 + $0xf8] sm:$0xff] }
 0x25b   : > { %v1193_v54 = vmul.f32 %v1185_v22, %v1180_v35  ;;  %v1225_v26 = vsel %vm638_vm3, %v6572_v19, %v6507_v1  ;;  %v1179_v25 = vsel %vm563_vm2, %v11200_v5, %v6578_v18  ;;  %v1181_v0 = vsel %vm563_vm2, %v6537_v56, %v6512_v33  ;;  %v1240_v59 = vld [vmem:[#allocation8 + $0xf0] sm:$0xff]  ;;  %v5086_v22 = vld [vmem:[%s5614_s13 + $0x38] sm:$0xff] }
 0x25c   : > { %v1194_v36 = vmul.f32 %v1186_v15, %v1176_v4  ;;  %v1232_v1 = vsel %vm638_vm3, %v6539_v31, %v6595_v9  ;;  %v5085_v19 = vld [vmem:[%s5614_s13 + $0x30] sm:$0xff]  ;;  %v1242_v37 = vmul.f32 %v1234_v51, %v1229_v17  ;;  %v1199_v10 = vmul.f32 %v1191_v12, %v1183_v63  ;;  %v1188_v15 = vld [vmem:[#allocation8 + $0x98] sm:$0xff] }
 0x25d   : > { %v6955_v28 = vmul.f32 %v5085_v19, %v1265_v2  ;;  %v1228_v24 = vsel %vm638_vm3, %v6595_v9, %v6539_v31  ;;  %v6966_v46 = vmul.f32 %v5086_v22, %v1266_v30  ;;  %v1198_v61 = vmul.f32 %v1190_v44, %v1178_v45  ;;  %v1236_v9 = vld [vmem:[#allocation8 + $0xd0] sm:$0xff]  ;;  %v1237_v30 = vld [vmem:[#allocation8 + $0xd8] sm:$0xff] }
 0x25e   : > { %v1177_v4 = vsel %vm563_vm2, %v6512_v33, %v6537_v56  ;;  %v1243_v2 = vmul.f32 %v1235_v60, %v1225_v26  ;;  %v1200_v51 = vmul.f32 %v1192_v23, %v1179_v25  ;;  %v1205_v17 = vadd.f32 %v1197_v34, %v1156_v52  ;;  %v1238_v34 = vld [vmem:[#allocation8 + $0xe0] sm:$0xff]  ;;  %v1239_v23 = vld [vmem:[#allocation8 + $0xe8] sm:$0xff] }
 0x25f   : > { %2127 = vrot.lane.b32.xlu1 %v11201_v38, %s5401_s27  ;;  %2129 = vrot.lane.b32.xlu2 %v11202_v20, %s5401_s27  ;;  %v1195_v12 = vmul.f32 %v1187_v42, %v1181_v0  ;;  %v1201_v5 = vadd.f32 %v1193_v54, %v1152_v27  ;;  %v1248_v63 = vmul.f32 %v1240_v59, %v1232_v1  ;;  %v1262_v54 = vld [vmem:[#allocation8 + $0x118] sm:$0xff]  ;;  %v11206_v25 = vld [vmem:[#allocation58_spill] sm:$0xff]  ;;  %v11207_v1 = vld [vmem:[#allocation65_spill] sm:$0xff] }
 0x260   : > { %2125 = vrot.lane.b32.xlu0 %v11203_v40, %s5401_s27  ;;  %v1202_v19 = vadd.f32 %v1194_v36, %v1153_v13  ;;  %v1249_v31 = vmul.f32 %v1241_v29, %v1228_v24  ;;  %v1226_v45 = vsel %vm638_vm3, %v6468_v43, %v6614_v39  ;;  %v1230_v33 = vsel %vm638_vm3, %v6614_v39, %v6468_v43  ;;  %v1261_v13 = vld [vmem:[#allocation8 + $0x110] sm:$0xff]  ;;  %v1263_v39 = vld [vmem:[#allocation8 + $0x120] sm:$0xff]  ;;  %v1264_v59 = vld [vmem:[#allocation8 + $0x128] sm:$0xff] }
 0x261   : > { %v6957_v18 = vpop.permute.xlu1 %1597  ;;  %v6959_v21 = vpop.permute.xlu2 %1715  ;;  %v1196_v56 = vmul.f32 %v1188_v15, %v1177_v4  ;;  %v1250_v44 = vadd.f32 %v1242_v37, %v1201_v5  ;;  %v1207_v52 = vadd.f32 %v1199_v10, %v1158_v16  ;;  %v1231_v27 = vsel %vm638_vm3, %v6610_v47, %v6600_v7  ;;  %v11205_v16 = vld [vmem:[#allocation60_spill] sm:$0xff] }
 0x262   : > { %11204 = vst [vmem:[#allocation73_spill] sm:$0xff] %v6959_v21  ;;  %v6968_v35 = vpop.permute.xlu0 %1595  ;;  %v1251_v60 = vadd.f32 %v1243_v2, %v1202_v19  ;;  %v1208_v26 = vadd.f32 %v1200_v51, %v1159_v62  ;;  %v1227_v43 = vsel %vm638_vm3, %v6600_v7, %v6610_v47  ;;  %v1206_v42 = vadd.f32 %v1198_v61, %v6914_v41  ;;  %v5087_v7 = vld [vmem:[%s5614_s13 + $0x10] sm:$0xff]  ;;  %v5088_v29 = vld [vmem:[%s5614_s13 + $0x18] sm:$0xff]  ;;  %v5089_v2 = vld [vmem:[%s5614_s13 + $0x20] sm:$0xff] }
 0x263   : > { %v1256_v0 = vadd.f32 %v1248_v63, %v1207_v52  ;;  %v1244_v36 = vmul.f32 %v1236_v9, %v1230_v33  ;;  %v1245_v62 = vmul.f32 %v1237_v30, %v1226_v45  ;;  %v1246_v10 = vmul.f32 %v1238_v34, %v1231_v27  ;;  %v1310_v63 = vld [vmem:[#allocation8 + $0x150] sm:$0xff]  ;;  %v5090_v30 = vld [vmem:[%s5614_s13 + $0x28] sm:$0xff]  ;;  %v1308_v34 = vld [vmem:[#allocation8 + $0x140] sm:$0xff] }
 0x264   : > { %v1257_v37 = vadd.f32 %v1249_v31, %v1208_v26  ;;  %v1269_v47 = vmul.f32 %v5087_v7, %v1261_v13  ;;  %v1270_v24 = vmul.f32 %v5088_v29, %v1262_v54  ;;  %v1203_v41 = vadd.f32 %v1195_v12, %v6896_v32  ;;  %v1309_v27 = vld [vmem:[#allocation8 + $0x148] sm:$0xff] }
 0x265   : > { %v1204_v61 = vadd.f32 %v1196_v56, %v6898_v57  ;;  %v1247_v4 = vmul.f32 %v1239_v23, %v1227_v43  ;;  %v1271_v51 = vmul.f32 %v5089_v2, %v1263_v39  ;;  %v1300_v19 = vsel %vm763_vm4, %v6622_v8, %v6597_v3  ;;  %v1311_v57 = vld [vmem:[#allocation8 + $0x158] sm:$0xff]  ;;  %v1312_v43 = vld [vmem:[#allocation8 + $0x160] sm:$0xff]  ;;  %v1313_v39 = vld [vmem:[#allocation8 + $0x168] sm:$0xff] }
 0x266   : > { %v1275_v31 = vadd.f32 %v6901_v53, %v1250_v44  ;;  %v1276_v9 = vadd.f32 %v6912_v48, %v1251_v60  ;;  %v1272_v45 = vmul.f32 %v5090_v30, %v1264_v59  ;;  %v1252_v32 = vadd.f32 %v1244_v36, %v1203_v41  ;;  %v1359_v41 = vld [vmem:[#allocation8 + $0x190] sm:$0xff]  ;;  %v11217_v2 = vld [vmem:[#allocation38_spill] sm:$0xff] }
 0x267   : > { %2133 = vrot.lane.b32.xlu1 %v11205_v16, %s5401_s27  ;;  %2135 = vrot.lane.b32.xlu2 %v11206_v25, %s5401_s27  ;;  %v1253_v12 = vadd.f32 %v1245_v62, %v1204_v61  ;;  %v1304_v33 = vsel %vm763_vm4, %v6597_v3, %v6622_v8  ;;  %v1281_v56 = vadd.f32 %v6955_v28, %v1256_v0  ;;  %v1314_v3 = vld [vmem:[#allocation8 + $0x170] sm:$0xff]  ;;  %v1315_v8 = vld [vmem:[#allocation8 + $0x178] sm:$0xff]  ;;  %v11214_v0 = vld [vmem:[#allocation66_spill] sm:$0xff] }
 0x268   : > { %2131 = vrot.lane.b32.xlu0 %v11207_v1, %s5401_s27  ;;  %v1254_v52 = vadd.f32 %v1246_v10, %v1205_v17  ;;  %v1299_v53 = vsel %vm763_vm4, %v6626_v11, %v6634_v49  ;;  %v1303_v48 = vsel %vm763_vm4, %v6634_v49, %v6626_v11  ;;  %v1282_v44 = vadd.f32 %v6966_v46, %v1257_v37  ;;  %v11210_v28 = vld [vmem:[#allocation63_spill] sm:$0xff]  ;;  %v11211_v17 = vld [vmem:[#allocation33_spill] sm:$0xff]  ;;  %v11212_v11 = vld [vmem:[#allocation36_spill] sm:$0xff] }
 0x269   : > { %v6999_v22 = vpop.permute.xlu1 %1639  ;;  %v7001_v15 = vpop.permute.xlu2 %1721  ;;  %v1255_v13 = vadd.f32 %v1247_v4, %v1206_v42  ;;  %v1318_v54 = vmul.f32 %v1310_v63, %v1300_v19  ;;  %v1302_v60 = vsel %vm763_vm4, %v11211_v17, %v11210_v28  ;;  %v1306_v26 = vsel %vm763_vm4, %v11210_v28, %v11211_v17  ;;  %v11213_v49 = vld [vmem:[#allocation32_spill] sm:$0xff]  ;;  %v11216_v4 = vld [vmem:[#allocation42_spill] sm:$0xff] }
 0x26a   : > { %11208 = vst [vmem:[#allocation68_spill] sm:$0xff] %v6999_v22  ;;  %v7006_v5 = vpop.permute.xlu0 %1637  ;;  %v1319_v23 = vmul.f32 %v1311_v57, %v1304_v33  ;;  %v1301_v46 = vsel %vm763_vm4, %v11213_v49, %v11212_v11  ;;  %v1305_v42 = vsel %vm763_vm4, %v11212_v11, %v11213_v49  ;;  %v1277_v36 = vadd.f32 %v1269_v47, %v1252_v32  ;;  %v11215_v10 = vld [vmem:[#allocation52_spill] sm:$0xff]  ;;  %v1358_v57 = vld [vmem:[#allocation8 + $0x188] sm:$0xff]  ;;  %v11219_v33 = vld [vmem:[#allocation31_spill] sm:$0xff] }
 0x26b   : > { %11209 = vst [vmem:[#allocation53_spill] sm:$0xff] %v7001_v15  ;;  %v1278_v62 = vadd.f32 %v1270_v24, %v1253_v12  ;;  %v1316_v59 = vmul.f32 %v1308_v34, %v1299_v53  ;;  %v1317_v37 = vmul.f32 %v1309_v27, %v1303_v48  ;;  %v1322_v7 = vmul.f32 %v1314_v3, %v1302_v60  ;;  %v1360_v61 = vld [vmem:[#allocation8 + $0x198] sm:$0xff]  ;;  %v1357_v12 = vld [vmem:[#allocation8 + $0x180] sm:$0xff]  ;;  %v11239_v15 = vld [vmem:[#allocation55_spill] sm:$0xff] }
 0x26c   : > { %v1323_v29 = vmul.f32 %v1315_v8, %v1306_v26  ;;  %v1349_v63 = vsel %vm838_vm5, %v11217_v2, %v11216_v4  ;;  %v1353_v47 = vsel %vm838_vm5, %v11216_v4, %v11217_v2  ;;  %v1320_v30 = vmul.f32 %v1312_v43, %v1301_v46  ;;  %v11220_v34 = vld [vmem:[#allocation28_spill] sm:$0xff]  ;;  %v1361_v26 = vld [vmem:[#allocation8 + $0x1a0] sm:$0xff]  ;;  %v11221_v43 = vld [vmem:[#allocation30_spill] sm:$0xff] }
 0x26d   : > { %v1321_v32 = vmul.f32 %v1313_v39, %v1305_v42  ;;  %v1348_v27 = vsel %vm838_vm5, %v11220_v34, %v11219_v33  ;;  %v1352_v53 = vsel %vm838_vm5, %v11219_v33, %v11220_v34  ;;  %v1326_v3 = vadd.f32 %v1318_v54, %v1277_v36  ;;  %v11222_v39 = vld [vmem:[#allocation54_spill] sm:$0xff]  ;;  %v1406_v36 = vld [vmem:[#allocation8 + $0x1c0] sm:$0xff]  ;;  %v11227_v33 = vld [vmem:[#allocation48_spill] sm:$0xff] }
 0x26e   : > { %v1327_v8 = vadd.f32 %v1319_v23, %v1278_v62  ;;  %v1279_v28 = vadd.f32 %v1271_v51, %v1254_v52  ;;  %v1280_v17 = vadd.f32 %v1272_v45, %v1255_v13  ;;  %v1324_v60 = vadd.f32 %v1316_v59, %v1275_v31  ;;  %v1362_v4 = vld [vmem:[#allocation8 + $0x1a8] sm:$0xff]  ;;  %v11223_v59 = vld [vmem:[#allocation37_spill] sm:$0xff]  ;;  %v11228_v34 = vld [vmem:[#allocation35_spill] sm:$0xff] }
 0x26f   : > { %2139 = vrot.lane.b32.xlu1 %v11214_v0, %s5401_s27  ;;  %2177 = vrot.lane.b32.xlu2 %v11203_v40, %s5402_s18  ;;  %v1350_v11 = vsel %vm838_vm5, %v11222_v39, %v11221_v43  ;;  %v1367_v49 = vmul.f32 %v1359_v41, %v1349_v63  ;;  %v1368_v46 = vmul.f32 %v1360_v61, %v1353_v47  ;;  %v1407_v62 = vld [vmem:[#allocation8 + $0x1c8] sm:$0xff]  ;;  %v11224_v41 = vld [vmem:[#allocation39_spill] sm:$0xff]  ;;  %v11225_v61 = vld [vmem:[#allocation41_spill] sm:$0xff] }
 0x270   : > { %2137 = vrot.lane.b32.xlu0 %v11215_v10, %s5401_s27  ;;  %v1325_v42 = vadd.f32 %v1317_v37, %v1276_v9  ;;  %v1354_v2 = vsel %vm838_vm5, %v11221_v43, %v11222_v39  ;;  %v1365_v54 = vmul.f32 %v1357_v12, %v1348_v27  ;;  %v1366_v23 = vmul.f32 %v1358_v57, %v1352_v53  ;;  %v11226_v63 = vld [vmem:[#allocation22_spill] sm:$0xff]  ;;  %v1363_v12 = vld [vmem:[#allocation8 + $0x1b0] sm:$0xff]  ;;  %v1364_v57 = vld [vmem:[#allocation8 + $0x1b8] sm:$0xff] }
 0x271   : > { %v7059_v24 = vpop.permute.xlu1 %1645  ;;  %v7061_v19 = vpop.permute.xlu2 %1727  ;;  %v1330_v51 = vadd.f32 %v1322_v7, %v1281_v56  ;;  %v1331_v45 = vadd.f32 %v1323_v29, %v1282_v44  ;;  %v7081_v31 = vadd.f32 %v1320_v30, %v1279_v28  ;;  %v7083_v52 = vadd.f32 %v1321_v32, %v1280_v17  ;;  %v1408_v29 = vld [vmem:[#allocation8 + $0x1d0] sm:$0xff] }
 0x272   : > { %11218 = vst [vmem:[#allocation67_spill] sm:$0xff] %v7061_v19  ;;  %v7071_v48 = vpop.permute.xlu0 %1643  ;;  %v1369_v13 = vmul.f32 %v1361_v26, %v1350_v11  ;;  %v1397_v9 = vsel %vm913_vm6, %v11224_v41, %v11223_v59  ;;  %v1401_v37 = vsel %vm913_vm6, %v11223_v59, %v11224_v41  ;;  %v1370_v56 = vmul.f32 %v1362_v4, %v1354_v2  ;;  %v11231_v26 = vld [vmem:[#allocation50_spill] sm:$0xff]  ;;  %v11232_v43 = vld [vmem:[#allocation47_spill] sm:$0xff]  ;;  %v1455_v11 = vld [vmem:[#allocation8 + $0x200] sm:$0xff] }
 0x273   : > { %v1375_v44 = vadd.f32 %v1367_v49, %v1326_v3  ;;  %v1376_v7 = vadd.f32 %v1368_v46, %v1327_v8  ;;  %v1398_v47 = vsel %vm913_vm6, %v11226_v63, %v11225_v61  ;;  %v1373_v30 = vadd.f32 %v1365_v54, %v1324_v60  ;;  %v1457_v60 = vld [vmem:[#allocation8 + $0x210] sm:$0xff]  ;;  %v11233_v49 = vld [vmem:[#allocation80_spill] sm:$0xff]  ;;  %v11237_v59 = vld [vmem:[#allocation45_spill] sm:$0xff] }
 0x274   : > { %v1374_v32 = vadd.f32 %v1366_v23, %v1325_v42  ;;  %v1351_v27 = vsel %vm838_vm5, %v11228_v34, %v11227_v33  ;;  %v1355_v53 = vsel %vm838_vm5, %v11227_v33, %v11228_v34  ;;  %v1414_v28 = vmul.f32 %v1406_v36, %v1397_v9  ;;  %v11234_v46 = vld [vmem:[#allocation79_spill] sm:$0xff]  ;;  %v1413_v54 = vld [vmem:[#allocation8 + $0x1f8] sm:$0xff]  ;;  %v1411_v19 = vld [vmem:[#allocation8 + $0x1e8] sm:$0xff] }
 0x275   : > { %v1415_v17 = vmul.f32 %v1407_v62, %v1401_v37  ;;  %v1447_v39 = vsel %vm988_vm7, %v11232_v43, %v11231_v26  ;;  %v1446_v42 = vsel %vm988_vm7, %v11234_v46, %v11233_v49  ;;  %v1412_v2 = vld [vmem:[#allocation8 + $0x1f0] sm:$0xff]  ;;  %v1409_v41 = vld [vmem:[#allocation8 + $0x1d8] sm:$0xff]  ;;  %v1402_v9 = vsel %vm913_vm6, %v11225_v61, %v11226_v63  ;;  %v1456_v63 = vld [vmem:[#allocation8 + $0x208] sm:$0xff] }
 0x276   : > { %v11236_v23 = vld [vmem:[#allocation43_spill] sm:$0xff]  ;;  %v1416_v37 = vmul.f32 %v1408_v29, %v1398_v47  ;;  %v1371_v33 = vmul.f32 %v1363_v12, %v1351_v27  ;;  %v1372_v34 = vmul.f32 %v1364_v57, %v1355_v53  ;;  %v1451_v29 = vsel %vm988_vm7, %v11231_v26, %v11232_v43 }
 0x277   : > { %2181 = vrot.lane.b32.xlu1 %v11202_v20, %s5402_s18  ;;  %2183 = vrot.lane.b32.xlu2 %v11207_v1, %s5402_s18  ;;  %v1400_v36 = vsel %vm913_vm6, %v11237_v59, %v11236_v23  ;;  %v1404_v62 = vsel %vm913_vm6, %v11236_v23, %v11237_v59  ;;  %v1458_v59 = vld [vmem:[#allocation8 + $0x218] sm:$0xff]  ;;  %v1465_v61 = vmul.f32 %v1457_v60, %v1447_v39 }
 0x278   : > { %2179 = vrot.lane.b32.xlu0 %v11201_v38, %s5402_s18  ;;  %v1450_v47 = vsel %vm988_vm7, %v11233_v49, %v11234_v46  ;;  %v1463_v12 = vmul.f32 %v1455_v11, %v1446_v42  ;;  %v1422_v57 = vadd.f32 %v1414_v28, %v1373_v30  ;;  %v1420_v27 = vmul.f32 %v1412_v2, %v1400_v36  ;;  %v11242_v36 = vld [vmem:[#allocation85_spill] sm:$0xff] }
 0x279   : > { %v7111_v3 = vpop.permute.xlu1 %1713  ;;  %v7113_v8 = vpop.permute.xlu2 %1769  ;;  %v1421_v53 = vmul.f32 %v1413_v54, %v1404_v62  ;;  %v1379_v60 = vadd.f32 %v1371_v33, %v1330_v51  ;;  %v1380_v26 = vadd.f32 %v1372_v34, %v1331_v45  ;;  %v1466_v43 = vmul.f32 %v1458_v59, %v1451_v29  ;;  %v1461_v54 = vld [vmem:[#allocation8 + $0x230] sm:$0xff]  ;;  %v11243_v62 = vld [vmem:[#allocation44_spill] sm:$0xff]  ;;  %v11246_v59 = vld [vmem:[#allocation89_spill] sm:$0xff] }
 0x27a   : > { %11229 = vst [vmem:[#allocation70_spill] sm:$0xff] %v7111_v3  ;;  %v7123_v4 = vpop.permute.xlu0 %1649  ;;  %v11238_v3 = vld [vmem:[#allocation56_spill] sm:$0xff]  ;;  %v1464_v39 = vmul.f32 %v1456_v63, %v1450_v47  ;;  %v1377_v30 = vadd.f32 %v1369_v13, %v7081_v31  ;;  %v1378_v28 = vadd.f32 %v1370_v56, %v7083_v52  ;;  %v1423_v11 = vadd.f32 %v1415_v17, %v1374_v32  ;;  %v11240_v31 = vld [vmem:[#allocation83_spill] sm:$0xff]  ;;  %v11241_v13 = vld [vmem:[#allocation82_spill] sm:$0xff] }
 0x27b   : > { %11230 = vst [vmem:[#allocation69_spill] sm:$0xff] %v7113_v8  ;;  %v1410_v8 = vld [vmem:[#allocation8 + $0x1e0] sm:$0xff]  ;;  %v1399_v21 = vsel %vm913_vm6, %v11239_v15, %v11238_v3  ;;  %v1403_v23 = vsel %vm913_vm6, %v11238_v3, %v11239_v15  ;;  %v1424_v3 = vadd.f32 %v1416_v37, %v1375_v44  ;;  %v1428_v51 = vadd.f32 %v1420_v27, %v1379_v60  ;;  %v11244_v37 = vld [vmem:[#allocation34_spill] sm:$0xff]  ;;  %v11245_v34 = vld [vmem:[#allocation23_spill] sm:$0xff] }
 0x27c   : > { %11235 = vst [vmem:[#allocation76_spill] sm:$0xff] %v7123_v4  ;;  %v1417_v4 = vmul.f32 %v1409_v41, %v1402_v9  ;;  %v1418_v22 = vmul.f32 %v1410_v8, %v1399_v21  ;;  %v1419_v15 = vmul.f32 %v1411_v19, %v1403_v23  ;;  %v7163_v19 = vadd.f32 %v1463_v12, %v1422_v57  ;;  %v1459_v56 = vld [vmem:[#allocation8 + $0x220] sm:$0xff]  ;;  %v11247_v29 = vld [vmem:[#allocation88_spill] sm:$0xff]  ;;  %v11248_v57 = vld [vmem:[#allocation91_spill] sm:$0xff] }
 0x27d   : > { %v7161_v21 = vadd.f32 %v1465_v61, %v1424_v3  ;;  %v1429_v45 = vadd.f32 %v1421_v53, %v1380_v26  ;;  %v1449_v52 = vsel %vm988_vm7, %v11241_v13, %v11240_v31  ;;  %v1448_v41 = vsel %vm988_vm7, %v11243_v62, %v11242_v36  ;;  %v11249_v27 = vld [vmem:[#allocation40_spill] sm:$0xff] }
 0x27e   : > { %v1425_v49 = vadd.f32 %v1417_v4, %v1376_v7  ;;  %v1426_v42 = vadd.f32 %v1418_v22, %v1377_v30  ;;  %v1427_v2 = vadd.f32 %v1419_v15, %v1378_v28  ;;  %v7181_v17 = vadd.f32 %v1464_v39, %v1423_v11  ;;  %v1462_v7 = vld [vmem:[#allocation8 + $0x238] sm:$0xff]  ;;  %v1460_v4 = vld [vmem:[#allocation8 + $0x228] sm:$0xff]  ;;  %v11252_v28 = vld [vmem:[#allocation29_spill] sm:$0xff] }
 0x27f   : > { %2187 = vrot.lane.b32.xlu1 %v11206_v25, %s5402_s18  ;;  %2189 = vrot.lane.b32.xlu2 %v11215_v10, %s5402_s18  ;;  %v1453_v22 = vsel %vm988_vm7, %v11240_v31, %v11241_v13  ;;  %v1452_v9 = vsel %vm988_vm7, %v11242_v36, %v11243_v62  ;;  %v1689_v33 = vmul.f32 %v7161_v21, %v11244_v37  ;;  %v11250_v26 = vld [vmem:[#allocation84_spill] sm:$0xff] }
 0x280   : > { %2185 = vrot.lane.b32.xlu0 %v11205_v16, %s5402_s18  ;;  %v7179_v32 = vadd.f32 %v1466_v43, %v1425_v49  ;;  %v1687_v23 = vmul.f32 %v7163_v19, %v11245_v34  ;;  %v1496_v61 = vsel %vm415_vm0, %v11247_v29, %v11246_v59  ;;  %v1500_v63 = vsel %vm415_vm0, %v11246_v59, %v11247_v29  ;;  %v11251_v43 = vld [vmem:[#allocation100_spill] sm:$0xff]  ;;  %v11256_v29 = vld [vmem:[#allocation86_spill] sm:$0xff] }
 0x281   : > { %v7165_v44 = vpop.permute.xlu1 %1719  ;;  %v7167_v8 = vpop.permute.xlu2 %1775  ;;  %v1469_v47 = vmul.f32 %v1461_v54, %v1449_v52  ;;  %v1467_v12 = vmul.f32 %v1459_v56, %v1448_v41  ;;  %v1495_v53 = vsel %vm415_vm0, %v11249_v27, %v11248_v57  ;;  %v1499_v15 = vsel %vm415_vm0, %v11248_v57, %v11249_v27  ;;  %v11253_v52 = vld [vmem:[#allocation92_spill] sm:$0xff]  ;;  %v11254_v56 = vld [vmem:[#allocation87_spill] sm:$0xff] }
 0x282   : > { %v7169_v46 = vpop.permute.xlu0 %1717  ;;  %v1470_v3 = vmul.f32 %v1462_v7, %v1453_v22  ;;  %v1468_v60 = vmul.f32 %v1460_v4, %v1452_v9  ;;  %v1552_v39 = vsel %vm488_vm1, %v11251_v43, %v11250_v26  ;;  %v1690_v30 = vmul.f32 %v7179_v32, %v6583_v50 }
 0x283   : > { %v1688_v11 = vmul.f32 %v7181_v17, %v11252_v28  ;;  %v1505_v49 = vmul.f32 %v1500_v63, %v7161_v21  ;;  %v1506_v54 = vmul.f32 %v1496_v61, %v7179_v32  ;;  %v1503_v31 = vmul.f32 %v1499_v15, %v7163_v19  ;;  %v11257_v61 = vld [vmem:[#allocation81_spill] sm:$0xff]  ;;  %v11261_v15 = vld [vmem:[#allocation98_spill] sm:$0xff] }
 0x284   : > { %v1504_v13 = vmul.f32 %v1495_v53, %v7181_v17  ;;  %v1551_v36 = vsel %vm488_vm1, %v11254_v56, %v11253_v52  ;;  %v1548_v50 = vsel %vm488_vm1, %v11250_v26, %v11251_v43  ;;  %v1695_v7 = vadd.f32 %v1689_v33, %v1687_v23  ;;  %v11258_v33 = vld [vmem:[#allocation64_spill] sm:$0xff]  ;;  %v11260_v53 = vld [vmem:[#allocation97_spill] sm:$0xff] }
 0x285   : > { %v7241_v22 = vadd.f32 %v1469_v47, %v1428_v51  ;;  %v7243_v4 = vadd.f32 %v1467_v12, %v1426_v42  ;;  %v1557_v9 = vmul.f32 %v1552_v39, %v7161_v21  ;;  %v7248_v34 = vadd.f32 %v1470_v3, %v1429_v45  ;;  %v11259_v45 = vld [vmem:[#allocation94_spill] sm:$0xff] }
 0x286   : > { %v7250_v59 = vadd.f32 %v1468_v60, %v1427_v2  ;;  %v1501_v63 = vsel %vm415_vm0, %v11257_v61, %v11256_v29  ;;  %v1547_v51 = vsel %vm488_vm1, %v11253_v52, %v11254_v56  ;;  %v1497_v42 = vsel %vm415_vm0, %v11256_v29, %v11257_v61  ;;  %v11262_v60 = vld [vmem:[#allocation25_spill] sm:$0xff] }
 0x287   : > { %2227 = vrot.lane.b32.xlu1 %v11203_v40, %s5403_s16  ;;  %2229 = vrot.lane.b32.xlu2 %v11201_v38, %s5403_s16  ;;  %v1502_v2 = vsel %vm415_vm0, %v11259_v45, %v11258_v33  ;;  %v1555_v23 = vmul.f32 %v1551_v36, %v7163_v19  ;;  %v1558_v47 = vmul.f32 %v1548_v50, %v7179_v32  ;;  %v11263_v36 = vld [vmem:[#allocation101_spill] sm:$0xff] }
 0x288   : > { %2191 = vrot.lane.b32.xlu0 %v11214_v0, %s5402_s18  ;;  %v1511_v12 = vadd.f32 %v1505_v49, %v1503_v31  ;;  %v1520_v57 = vadd.f32 %v1506_v54, %v1504_v13  ;;  %v1498_v27 = vsel %vm415_vm0, %v11258_v33, %v11259_v45  ;;  %v1553_v3 = vsel %vm488_vm1, %v11261_v15, %v11260_v53 }
 0x289   : > { %v7237_v62 = vpop.permute.xlu1 %1725  ;;  %v7239_v41 = vpop.permute.xlu2 %1817  ;;  %v1691_v26 = vmul.f32 %v7243_v4, %v11262_v60  ;;  %v1507_v43 = vmul.f32 %v1501_v63, %v7243_v4  ;;  %v1556_v39 = vmul.f32 %v1547_v51, %v7181_v17  ;;  %v1563_v28 = vadd.f32 %v1557_v9, %v1555_v23  ;;  %v11264_v9 = vld [vmem:[#allocation24_spill] sm:$0xff]  ;;  %v11265_v51 = vld [vmem:[#allocation95_spill] sm:$0xff] }
 0x28a   : > { %11255 = vst [vmem:[#allocation75_spill] sm:$0xff] %v7239_v41  ;;  %v7246_v37 = vpop.permute.xlu0 %1723  ;;  %v1508_v49 = vmul.f32 %v1497_v42, %v7250_v59  ;;  %v1509_v54 = vmul.f32 %v1502_v2, %v7241_v22  ;;  %v1549_v31 = vsel %vm488_vm1, %v11260_v53, %v11261_v15  ;;  %v1510_v13 = vmul.f32 %v1498_v27, %v7248_v34  ;;  %v11266_v42 = vld [vmem:[#allocation90_spill] sm:$0xff]  ;;  %v11268_v27 = vld [vmem:[#allocation61_spill] sm:$0xff]  ;;  %v11269_v53 = vld [vmem:[#allocation96_spill] sm:$0xff] }
 0x28b   : > { %v1572_v52 = vadd.f32 %v1558_v47, %v1556_v39  ;;  %v1559_v56 = vmul.f32 %v1553_v3, %v7243_v4  ;;  %v1603_v50 = vsel %vm563_vm2, %v6890_v14, %v11263_v36  ;;  %v1692_v29 = vmul.f32 %v7250_v59, %v11264_v9  ;;  %v11270_v3 = vld [vmem:[#allocation93_spill] sm:$0xff] }
 0x28c   : > { %v1512_v61 = vadd.f32 %v1511_v12, %v1507_v43  ;;  %v1521_v63 = vadd.f32 %v1520_v57, %v1508_v49  ;;  %v1554_v33 = vsel %vm488_vm1, %v11266_v42, %v11265_v51  ;;  %v1560_v23 = vmul.f32 %v1549_v31, %v7250_v59 }
 0x28d   : > { %v1564_v47 = vadd.f32 %v1563_v28, %v1559_v56  ;;  %v1604_v15 = vsel %vm563_vm2, %v11269_v53, %v11268_v27  ;;  %v1605_v12 = vsel %vm563_vm2, %v6968_v35, %v11270_v3  ;;  %v1704_v60 = vadd.f32 %v1690_v30, %v1688_v11 }
 0x28e   : > { %v1513_v43 = vadd.f32 %v1512_v61, %v1509_v54  ;;  %v1550_v39 = vsel %vm488_vm1, %v11265_v51, %v11266_v42  ;;  %v1607_v28 = vmul.f32 %v1603_v50, %v7163_v19  ;;  %v1522_v49 = vadd.f32 %v1521_v63, %v1510_v13 }
 0x28f   : > { %2233 = vrot.lane.b32.xlu1 %v11207_v1, %s5403_s16  ;;  %2235 = vrot.lane.b32.xlu2 %v11205_v16, %s5403_s16  ;;  %v1561_v31 = vmul.f32 %v1554_v33, %v7241_v22  ;;  %v1573_v56 = vadd.f32 %v1572_v52, %v1560_v23  ;;  %v1599_v9 = vsel %vm563_vm2, %v11263_v36, %v6890_v14  ;;  %v11271_v14 = vld [vmem:[#allocation27_spill] sm:$0xff] }
 0x290   : > { %2231 = vrot.lane.b32.xlu0 %v11202_v20, %s5403_s16  ;;  %v1705_v41 = vadd.f32 %v1704_v60, %v1692_v29  ;;  %v1609_v30 = vmul.f32 %v1604_v15, %v7161_v21  ;;  %v1611_v11 = vmul.f32 %v1605_v12, %v7243_v4  ;;  %v1562_v54 = vmul.f32 %v1550_v39, %v7248_v34  ;;  %v11272_v29 = vld [vmem:[#allocation26_spill] sm:$0xff] }
 0x291   : > { %v7306_v45 = vpop.permute.xlu1 %1767  ;;  %v7308_v2 = vpop.permute.xlu2 %1823  ;;  %v1565_v61 = vadd.f32 %v1564_v47, %v1561_v31  ;;  %v1600_v13 = vsel %vm563_vm2, %v11268_v27, %v11269_v53  ;;  %v1601_v52 = vsel %vm563_vm2, %v11270_v3, %v6968_v35  ;;  %v1608_v36 = vmul.f32 %v1599_v9, %v7181_v17 }
 0x292   : > { %11267 = vst [vmem:[#allocation72_spill] sm:$0xff] %v7308_v2  ;;  %v7319_v57 = vpop.permute.xlu0 %1765  ;;  %v1696_v2 = vadd.f32 %v1695_v7, %v1691_v26  ;;  %v1693_v7 = vmul.f32 %v7241_v22, %v11271_v14  ;;  %v1514_v26 = vrot.slane %v1513_v43, 4  ;;  %v1615_v50 = vadd.f32 %v1609_v30, %v1607_v28 }
 0x293   : > { %v1694_v63 = vmul.f32 %v7248_v34, %v11272_v29  ;;  %v1523_v51 = vrot.slane %v1522_v49, 4  ;;  %v1574_v42 = vadd.f32 %v1573_v56, %v1562_v54  ;;  %v1606_v35 = vsel %vm563_vm2, %v6957_v18, %v6894_v55 }
 0x294   : > { %v1697_v33 = vadd.f32 %v1696_v2, %v1693_v7  ;;  %v1610_v23 = vmul.f32 %v1600_v13, %v7179_v32  ;;  %v1612_v47 = vmul.f32 %v1601_v52, %v7250_v59  ;;  %v1616_v27 = vadd.f32 %v1615_v50, %v1611_v11  ;;  %v11273_v7 = vld [vmem:[#allocation99_spill] sm:$0xff] }
 0x295   : > { %v1706_v3 = vadd.f32 %v1705_v41, %v1694_v63  ;;  %v1566_v12 = vrot.slane %v1565_v61, 4  ;;  %v1515_v39 = vadd.f32 %v1514_v26, %v1513_v43  ;;  %v1602_v2 = vsel %vm563_vm2, %v6894_v55, %v6957_v18 }
 0x296   : > { %v1624_v28 = vadd.f32 %v1610_v23, %v1608_v36  ;;  %v1613_v31 = vmul.f32 %v1606_v35, %v7241_v22  ;;  %v1524_v56 = vadd.f32 %v1523_v51, %v1522_v49  ;;  %v1575_v9 = vrot.slane %v1574_v42, 4 }
 0x297   : > { %2239 = vrot.lane.b32.xlu1 %v11215_v10, %s5403_s16  ;;  %2241 = vrot.lane.b32.xlu2 %v11214_v0, %s5403_s16  ;;  %v1698_v30 = vrot.slane %v1697_v33, 4  ;;  %v1707_v13 = vrot.slane %v1706_v3, 4  ;;  %v1567_v52 = vadd.f32 %v1566_v12, %v1565_v61  ;;  %v1614_v41 = vmul.f32 %v1602_v2, %v7248_v34  ;;  %v11274_v2 = vld [vmem:[#allocation68_spill] sm:$0xff] }
 0x298   : > { %2237 = vrot.lane.b32.xlu0 %v11206_v25, %s5403_s16  ;;  %v1625_v11 = vadd.f32 %v1624_v28, %v1612_v47  ;;  %v1617_v54 = vadd.f32 %v1616_v27, %v1613_v31  ;;  %v1652_v43 = vsel %vm638_vm3, %v7006_v5, %v7059_v24  ;;  %v1516_v14 = vrot.slane %v1515_v39, 2 }
 0x299   : > { %v7359_v53 = vpop.permute.xlu1 %1773  ;;  %v7361_v15 = vpop.permute.xlu2 %1829  ;;  %v1651_v55 = vsel %vm638_vm3, %v11273_v7, %v7071_v48  ;;  %v1655_v18 = vsel %vm638_vm3, %v7071_v48, %v11273_v7  ;;  %v1656_v49 = vsel %vm638_vm3, %v7059_v24, %v7006_v5  ;;  %v1525_v61 = vrot.slane %v1524_v56, 2 }
 0x29a   : > { %v7363_v60 = vpop.permute.xlu0 %1771  ;;  %v1576_v26 = vadd.f32 %v1575_v9, %v1574_v42  ;;  %v1618_v36 = vrot.slane %v1617_v54, 4  ;;  %v1626_v50 = vadd.f32 %v1625_v11, %v1614_v41  ;;  %v1659_v63 = vmul.f32 %v1655_v18, %v7163_v19 }
 0x29b   : > { %v1660_v5 = vmul.f32 %v1651_v55, %v7181_v17  ;;  %v1661_v24 = vmul.f32 %v1656_v49, %v7161_v21  ;;  %v1662_v51 = vmul.f32 %v1652_v43, %v7179_v32  ;;  %v7401_v23 = vadd.f32 %v1698_v30, %v1697_v33  ;;  %v11275_v30 = vld [vmem:[#allocation76_spill] sm:$0xff]  ;;  %v11277_v43 = vld [vmem:[#allocation73_spill] sm:$0xff] }
 0x29c   : > { %v7403_v42 = vadd.f32 %v1707_v13, %v1706_v3  ;;  %v7405_v47 = vadd.f32 %v1516_v14, %v1515_v39  ;;  %v1568_v27 = vrot.slane %v1567_v52, 2  ;;  %v7407_v12 = vadd.f32 %v1525_v61, %v1524_v56  ;;  %v11276_v39 = vld [vmem:[#allocation49_spill] sm:$0xff] }
 0x29d   : > { %v1577_v28 = vrot.slane %v1576_v26, 2  ;;  %v1653_v31 = vsel %vm638_vm3, %v11274_v2, %v6892_v58  ;;  %v1657_v9 = vsel %vm638_vm3, %v6892_v58, %v11274_v2  ;;  %v7417_v33 = vadd.f32 %v1618_v36, %v1617_v54  ;;  %v11278_v61 = vld [vmem:[#allocation53_spill] sm:$0xff]  ;;  %v11279_v36 = vld [vmem:[#allocation70_spill] sm:$0xff] }
 0x29e   : > { %v1627_v3 = vrot.slane %v1626_v50, 4  ;;  %v1654_v56 = vsel %vm638_vm3, %v11276_v39, %v11275_v30  ;;  %v1658_v11 = vsel %vm638_vm3, %v11275_v30, %v11276_v39  ;;  %v1667_v13 = vadd.f32 %v1661_v24, %v1659_v63 }
 0x29f   : > { %2279 = vrot.lane.b32.xlu1 %v11201_v38, %s5404_s11  ;;  %2281 = vrot.lane.b32.xlu2 %v11202_v20, %s5404_s11  ;;  %v1676_v41 = vadd.f32 %v1662_v51, %v1660_v5  ;;  %v1730_v58 = vsel %vm763_vm4, %v11277_v43, %v7246_v37  ;;  %v1734_v54 = vsel %vm763_vm4, %v7246_v37, %v11277_v43 }
 0x2a0   : > { %2277 = vrot.lane.b32.xlu0 %v11203_v40, %s5404_s11  ;;  %v7435_v14 = vadd.f32 %v1568_v27, %v1567_v52  ;;  %v1663_v7 = vmul.f32 %v1657_v9, %v7243_v4  ;;  %v1664_v55 = vmul.f32 %v1653_v31, %v7250_v59  ;;  %v1665_v18 = vmul.f32 %v1658_v11, %v7241_v22 }
 0x2a1   : > { %v7393_v29 = vpop.permute.xlu1 %1779  ;;  %v7395_v48 = vpop.permute.xlu2 %1871  ;;  %v1666_v49 = vmul.f32 %v1654_v56, %v7248_v34  ;;  %v1729_v37 = vsel %vm763_vm4, %v11279_v36, %v11278_v61  ;;  %v1733_v52 = vsel %vm763_vm4, %v11278_v61, %v11279_v36  ;;  %v7455_v63 = vadd.f32 %v1577_v28, %v1576_v26  ;;  %v11281_v61 = vld [vmem:[#allocation69_spill] sm:$0xff] }
 0x2a2   : > { %v1778_v35 = vpop.permute.xlu0 %1777  ;;  %v7457_v5 = vadd.f32 %v1627_v3, %v1626_v50  ;;  %v1739_v24 = vmul.f32 %v1730_v58, %v7161_v21  ;;  %v1740_v51 = vmul.f32 %v1734_v54, %v7179_v32  ;;  %v1620_v31 = vrot.slane %v7417_v33, 2 }
 0x2a3   : > { %v1668_v9 = vadd.f32 %v1667_v13, %v1663_v7  ;;  %v1677_v30 = vadd.f32 %v1676_v41, %v1664_v55  ;;  %v1731_v26 = vsel %vm763_vm4, %v7169_v46, %v7237_v62  ;;  %v1737_v50 = vmul.f32 %v1729_v37, %v7163_v19  ;;  %v11280_v41 = vld [vmem:[#allocation67_spill] sm:$0xff] }
 0x2a4   : > { %v1738_v3 = vmul.f32 %v1733_v52, %v7181_v17  ;;  %v1735_v39 = vsel %vm763_vm4, %v7237_v62, %v7169_v46  ;;  %v1781_v56 = vsel %vm838_vm5, %v7319_v57, %v7359_v53  ;;  %v1732_v43 = vsel %vm763_vm4, %v7165_v44, %v11280_v41 }
 0x2a5   : > { %v1669_v11 = vadd.f32 %v1668_v9, %v1665_v18  ;;  %v1678_v13 = vadd.f32 %v1677_v30, %v1666_v49  ;;  %v1785_v58 = vsel %vm838_vm5, %v7359_v53, %v7319_v57  ;;  %v1736_v46 = vsel %vm763_vm4, %v11280_v41, %v7165_v44 }
 0x2a6   : > { %v1745_v62 = vadd.f32 %v1739_v24, %v1737_v50  ;;  %v1754_v54 = vadd.f32 %v1740_v51, %v1738_v3  ;;  %v1741_v7 = vmul.f32 %v1731_v26, %v7243_v4  ;;  %v1742_v55 = vmul.f32 %v1735_v39, %v7250_v59 }
 0x2a7   : > { %2285 = vrot.lane.b32.xlu1 %v11205_v16, %s5404_s11  ;;  %2287 = vrot.lane.b32.xlu2 %v11206_v25, %s5404_s11  ;;  %v1782_v18 = vsel %vm838_vm5, %v7306_v45, %v7167_v8  ;;  %v1786_v57 = vsel %vm838_vm5, %v7167_v8, %v7306_v45  ;;  %v1789_v53 = vmul.f32 %v1781_v56, %v7163_v19  ;;  %v1629_v44 = vrot.slane %v7457_v5, 2 }
 0x2a8   : > { %2283 = vrot.lane.b32.xlu0 %v11207_v1, %s5404_s11  ;;  %v1790_v49 = vmul.f32 %v1785_v58, %v7181_v17  ;;  %v1783_v36 = vsel %vm838_vm5, %v11281_v61, %v1778_v35  ;;  %v1787_v37 = vsel %vm838_vm5, %v1778_v35, %v11281_v61  ;;  %v1670_v8 = vrot.slane %v1669_v11, 4 }
 0x2a9   : > { %v7461_v27 = vpop.permute.xlu1 %1821  ;;  %v7463_v2 = vpop.permute.xlu2 %1877  ;;  %v1679_v45 = vrot.slane %v1678_v13, 4  ;;  %v1743_v52 = vmul.f32 %v1732_v43, %v7241_v22  ;;  %v1744_v24 = vmul.f32 %v1736_v46, %v7248_v34  ;;  %v1746_v51 = vadd.f32 %v1745_v62, %v1741_v7  ;;  %v11282_v62 = vld [vmem:[#allocation75_spill] sm:$0xff] }
 0x2aa   : > { %v1820_v28 = vpop.permute.xlu0 %1819  ;;  %v1755_v9 = vadd.f32 %v1754_v54, %v1742_v55  ;;  %v1791_v30 = vmul.f32 %v1782_v18, %v7161_v21  ;;  %v1792_v35 = vmul.f32 %v1786_v57, %v7179_v32  ;;  %v1793_v3 = vmul.f32 %v1783_v36, %v7243_v4 }
 0x2ab   : > { %v1794_v39 = vmul.f32 %v1787_v37, %v7250_v59  ;;  %v1747_v36 = vadd.f32 %v1746_v51, %v1743_v52  ;;  %v1570_v37 = vrot.slane %v7435_v14, 1  ;;  %v1835_v52 = vsel %vm913_vm6, %v7461_v27, %v7361_v15 }
 0x2ac   : > { %v1797_v58 = vadd.f32 %v1791_v30, %v1789_v53  ;;  %v1806_v46 = vadd.f32 %v1792_v35, %v1790_v49  ;;  %v1784_v53 = vsel %vm838_vm5, %v7363_v60, %v7393_v29  ;;  %v1788_v49 = vsel %vm838_vm5, %v7393_v29, %v7363_v60 }
 0x2ad   : > { %v1671_v30 = vadd.f32 %v1670_v8, %v1669_v11  ;;  %v1795_v60 = vmul.f32 %v1784_v53, %v7241_v22  ;;  %v1796_v29 = vmul.f32 %v1788_v49, %v7248_v34  ;;  %v1621_v8 = vadd.f32 %v1620_v31, %v7417_v33 }
 0x2ae   : > { %v1798_v35 = vadd.f32 %v1797_v58, %v1793_v3 }
 0x2af   : > { %2291 = vrot.lane.b32.xlu1 %v11214_v0, %s5404_s11  ;;  %2347 = vrot.lane.b32.xlu2 %v11203_v40, %s5405_s29 }
 0x2b0   : > { %2289 = vrot.lane.b32.xlu0 %v11215_v10, %s5404_s11  ;;  %v1799_v3 = vadd.f32 %v1798_v35, %v1795_v60  ;;  %v1518_v60 = vrot.slane %v7405_v47, 1 }
 0x2b1   : > { %v1828_v26 = vpop.permute.xlu1 %1827  ;;  %v7521_v50 = vpop.permute.xlu2 %1883 }
 0x2b2   : > { %v1826_v56 = vpop.permute.xlu0 %1825  ;;  %v1834_v41 = vsel %vm913_vm6, %v1820_v28, %v1828_v26  ;;  %v1838_v43 = vsel %vm913_vm6, %v1828_v26, %v1820_v28  ;;  %v1756_v28 = vadd.f32 %v1755_v9, %v1744_v24  ;;  %v1807_v26 = vadd.f32 %v1806_v46, %v1794_v39 }
 0x2b3   : > { %v1833_v54 = vsel %vm913_vm6, %v11282_v62, %v1826_v56  ;;  %v1837_v7 = vsel %vm913_vm6, %v1826_v56, %v11282_v62  ;;  %v1843_v57 = vmul.f32 %v1834_v41, %v7161_v21  ;;  %v1844_v61 = vmul.f32 %v1838_v43, %v7179_v32 }
 0x2b4   : > { %v1841_v55 = vmul.f32 %v1833_v54, %v7163_v19  ;;  %v1842_v18 = vmul.f32 %v1837_v7, %v7181_v17  ;;  %v1579_v56 = vrot.slane %v7455_v63, 1  ;;  %v1680_v41 = vadd.f32 %v1679_v45, %v1678_v13  ;;  %v11283_v7 = vld [vmem:[#allocation72_spill] sm:$0xff] }
 0x2b5   : > { %v1839_v24 = vsel %vm913_vm6, %v7361_v15, %v7461_v27  ;;  %v1630_v15 = vadd.f32 %v1629_v44, %v7457_v5  ;;  %v1748_v27 = vrot.slane %v1747_v36, 4  ;;  %v1757_v45 = vrot.slane %v1756_v28, 4 }
 0x2b6   : > { %v1849_v11 = vadd.f32 %v1843_v57, %v1841_v55  ;;  %v1858_v13 = vadd.f32 %v1844_v61, %v1842_v18  ;;  %v1808_v39 = vadd.f32 %v1807_v26, %v1796_v29  ;;  %v1845_v43 = vmul.f32 %v1835_v52, %v7243_v4 }
 0x2b7   : > { %2351 = vrot.lane.b32.xlu1 %v11202_v20, %s5405_s29  ;;  %2353 = vrot.lane.b32.xlu2 %v11207_v1, %s5405_s29  ;;  %v1846_v58 = vmul.f32 %v1839_v24, %v7250_v59  ;;  %v1672_v62 = vrot.slane %v1671_v30, 2  ;;  %v1681_v54 = vrot.slane %v1680_v41, 2  ;;  %v1700_v57 = vrot.slane %v7401_v23, 2 }
 0x2b8   : > { %2349 = vrot.lane.b32.xlu0 %v11201_v38, %s5405_s29  ;;  %v1850_v31 = vadd.f32 %v1849_v11, %v1845_v43  ;;  %v1709_v61 = vrot.slane %v7403_v42, 2  ;;  %v1749_v53 = vadd.f32 %v1748_v27, %v1747_v36  ;;  %v1758_v49 = vadd.f32 %v1757_v45, %v1756_v28 }
 0x2b9   : > { %v7569_v51 = vpop.permute.xlu1 %1869  ;;  %v7571_v9 = vpop.permute.xlu2 %2129  ;;  %v1859_v44 = vadd.f32 %v1858_v13, %v1846_v58  ;;  %v1800_v35 = vrot.slane %v1799_v3, 4  ;;  %v1809_v26 = vrot.slane %v1808_v39, 4  ;;  %v1527_v29 = vrot.slane %v7407_v12, 1 }
 0x2ba   : > { %v1832_v46 = vpop.permute.xlu0 %1831  ;;  %v1571_v11 = vadd.f32 %v1570_v37, %v7435_v14  ;;  %v1580_v13 = vadd.f32 %v1579_v56, %v7455_v63  ;;  %v1622_v36 = vrot.slane %v1621_v8, 1  ;;  %v1631_v28 = vrot.slane %v1630_v15, 1 }
 0x2bb   : > { %v1836_v33 = vsel %vm913_vm6, %v11283_v7, %v1832_v46  ;;  %v1840_v5 = vsel %vm913_vm6, %v1832_v46, %v11283_v7  ;;  %v1673_v27 = vadd.f32 %v1672_v62, %v1671_v30  ;;  %v1682_v45 = vadd.f32 %v1681_v54, %v1680_v41  ;;  %v7603_v46 = vld [vmem:[#allocation12] sm:$0xff]  ;;  %v7605_v7 = vld [vmem:[#allocation12 + $0x8] sm:$0xff] }
 0x2bc   : > { %v1847_v55 = vmul.f32 %v1836_v33, %v7241_v22  ;;  %v1848_v18 = vmul.f32 %v1840_v5, %v7248_v34  ;;  %v7596_v43 = vadd.f32 %v1709_v61, %v7403_v42  ;;  %v7599_v14 = vadd.f32 %v1700_v57, %v7401_v23 }
 0x2bd   : > { %v1750_v30 = vrot.slane %v1749_v53, 2  ;;  %v1759_v41 = vrot.slane %v1758_v49, 2  ;;  %v1801_v62 = vadd.f32 %v1800_v35, %v1799_v3  ;;  %v1810_v54 = vadd.f32 %v1809_v26, %v1808_v39 }
 0x2be   : > { %v1851_v52 = vadd.f32 %v1850_v31, %v1847_v55  ;;  %v1860_v24 = vadd.f32 %v1859_v44, %v1848_v18  ;;  %v1519_v42 = vadd.f32 %v1518_v60, %v7405_v47  ;;  %v1528_v5 = vadd.f32 %v1527_v29, %v7407_v12 }
 0x2bf   : > { %2357 = vrot.lane.b32.xlu1 %v11206_v25, %s5405_s29  ;;  %2359 = vrot.lane.b32.xlu2 %v11215_v10, %s5405_s29  ;;  %v7610_v23 = vmul.f32 %v1571_v11, %v7603_v46  ;;  %v7613_v31 = vmul.f32 %v1580_v13, %v7605_v7  ;;  %v1623_v44 = vadd.f32 %v1622_v36, %v1621_v8  ;;  %v1674_v18 = vrot.slane %v1673_v27, 1 }
 0x2c0   : > { %2355 = vrot.lane.b32.xlu0 %v11205_v16, %s5405_s29  ;;  %v1852_v63 = vrot.slane %v1851_v52, 4  ;;  %v1861_v37 = vrot.slane %v1860_v24, 4  ;;  %v1632_v55 = vadd.f32 %v1631_v28, %v1630_v15  ;;  %v1683_v57 = vrot.slane %v1682_v45, 1 }
 0x2c1   : > { %v1876_v56 = vpop.permute.xlu1 %1875  ;;  %v7601_v58 = vpop.permute.xlu2 %2135  ;;  %v1711_v61 = vrot.slane %v7596_v43, 1  ;;  %v1751_v26 = vadd.f32 %v1750_v30, %v1749_v53  ;;  %v1760_v47 = vadd.f32 %v1759_v41, %v1758_v49  ;;  %v1802_v60 = vrot.slane %v1801_v62, 2 }
 0x2c2   : > { %v1874_v33 = vpop.permute.xlu0 %1873  ;;  %v1853_v39 = vadd.f32 %v1852_v63, %v1851_v52  ;;  %v1862_v35 = vadd.f32 %v1861_v37, %v1860_v24  ;;  %v1811_v12 = vrot.slane %v1810_v54, 2  ;;  %v7618_v29 = vmul.f32 %v1519_v42, %v7603_v46 }
 0x2c3   : > { %v7621_v11 = vmul.f32 %v1528_v5, %v7605_v7  ;;  %v1923_v8 = vrot.slane %v7610_v23, 1  ;;  %v1924_v15 = vrot.slane %v7613_v31, 1  ;;  %v7630_v53 = vmul.f32 %v1623_v44, %v7603_v46 }
 0x2c4   : > { %v7633_v49 = vmul.f32 %v1632_v55, %v7605_v7  ;;  %v1675_v52 = vadd.f32 %v1674_v18, %v1673_v27  ;;  %v1684_v24 = vadd.f32 %v1683_v57, %v1682_v45  ;;  %v1854_v13 = vrot.slane %v1853_v39, 2 }
 0x2c5   : > { %v1863_v36 = vrot.slane %v1862_v35, 2  ;;  %v1885_v28 = vsel %vm988_vm7, %v7569_v51, %v7463_v2  ;;  %v1889_v63 = vsel %vm988_vm7, %v7463_v2, %v7569_v51  ;;  %v1752_v27 = vrot.slane %v1751_v26, 1 }
 0x2c6   : > { %v1761_v45 = vrot.slane %v1760_v47, 1  ;;  %v1803_v41 = vadd.f32 %v1802_v60, %v1801_v62  ;;  %v1812_v42 = vadd.f32 %v1811_v12, %v1810_v54  ;;  %v1893_v51 = vmul.f32 %v1885_v28, %v7163_v19 }
 0x2c7   : > { %2397 = vrot.lane.b32.xlu1 %v11203_v40, %s5406_s7  ;;  %2399 = vrot.lane.b32.xlu2 %v11201_v38, %s5406_s7  ;;  %v1894_v62 = vmul.f32 %v1889_v63, %v7181_v17  ;;  %v1855_v60 = vadd.f32 %v1854_v13, %v1853_v39  ;;  %v1864_v12 = vadd.f32 %v1863_v36, %v1862_v35 }
 0x2c8   : > { %2361 = vrot.lane.b32.xlu0 %v11214_v0, %s5405_s29  ;;  %v1804_v39 = vrot.slane %v1803_v41, 1  ;;  %v1813_v35 = vrot.slane %v1812_v42, 1  ;;  %v1753_v13 = vadd.f32 %v1752_v27, %v1751_v26 }
 0x2c9   : > { %v1882_v37 = vpop.permute.xlu1 %1881  ;;  %v7645_v30 = vpop.permute.xlu2 %2177  ;;  %v1856_v36 = vrot.slane %v1855_v60, 1 }
 0x2ca   : > { %v1880_v5 = vpop.permute.xlu0 %1879  ;;  %v1887_v18 = vsel %vm988_vm7, %v1874_v33, %v1882_v37  ;;  %v1891_v2 = vsel %vm988_vm7, %v1882_v37, %v1874_v33  ;;  %v1762_v37 = vadd.f32 %v1761_v45, %v1760_v47  ;;  %v1814_v27 = vadd.f32 %v1813_v35, %v1812_v42 }
 0x2cb   : > { %v1886_v44 = vsel %vm988_vm7, %v7395_v48, %v1880_v5  ;;  %v1890_v55 = vsel %vm988_vm7, %v1880_v5, %v7395_v48  ;;  %v1888_v48 = vsel %vm988_vm7, %v1876_v56, %v7521_v50  ;;  %v1892_v5 = vsel %vm988_vm7, %v7521_v50, %v1876_v56 }
 0x2cc   : > { %v1895_v54 = vmul.f32 %v1886_v44, %v7161_v21  ;;  %v1896_v57 = vmul.f32 %v1890_v55, %v7179_v32  ;;  %v1897_v19 = vmul.f32 %v1887_v18, %v7243_v4  ;;  %v1898_v17 = vmul.f32 %v1891_v2, %v7250_v59 }
 0x2cd   : > { %v7670_v21 = vmul.f32 %v1675_v52, %v7603_v46  ;;  %v7673_v32 = vmul.f32 %v1684_v24, %v7605_v7  ;;  %v1899_v50 = vmul.f32 %v1888_v48, %v7241_v22  ;;  %v1900_v4 = vmul.f32 %v1892_v5, %v7248_v34 }
 0x2ce   : > { %v1901_v3 = vadd.f32 %v1895_v54, %v1893_v51  ;;  %v1910_v33 = vadd.f32 %v1896_v57, %v1894_v62  ;;  %v1931_v52 = vrot.slane %v7630_v53, 2  ;;  %v1932_v24 = vrot.slane %v7633_v49, 2 }
 0x2cf   : > { %2403 = vrot.lane.b32.xlu1 %v11207_v1, %s5406_s7  ;;  %2405 = vrot.lane.b32.xlu2 %v11205_v16, %s5406_s7  ;;  %v1865_v44 = vrot.slane %v1864_v12, 1  ;;  %v1928_v18 = vmax.f32 %v7621_v11, %v1924_v15  ;;  %v1939_v2 = vrot.slane %v7670_v21, 3  ;;  %v1805_v51 = vadd.f32 %v1804_v39, %v1803_v41 }
 0x2d0   : > { %v1902_v56 = vadd.f32 %v1901_v3, %v1897_v19  ;;  %v1911_v59 = vadd.f32 %v1910_v33, %v1898_v17  ;;  %2401 = vrot.lane.b32.xlu0 %v11202_v20, %s5406_s7  ;;  %v1927_v3 = vmax.f32 %v7618_v29, %v1923_v8  ;;  %v1940_v26 = vrot.slane %v7673_v32, 3 }
 0x2d1   : > { %v7685_v28 = vpop.permute.xlu1 %2127  ;;  %v7687_v63 = vpop.permute.xlu2 %2183  ;;  %v1936_v48 = vmax.f32 %v1928_v18, %v1932_v24  ;;  %v7696_v47 = vmul.f32 %v1753_v13, %v7603_v46  ;;  %v1857_v45 = vadd.f32 %v1856_v36, %v1855_v60  ;;  %v7699_v5 = vmul.f32 %v1762_v37, %v7605_v7 }
 0x2d2   : > { %v1903_v22 = vadd.f32 %v1902_v56, %v1899_v50  ;;  %v1912_v55 = vadd.f32 %v1911_v59, %v1900_v4  ;;  %v7689_v34 = vpop.permute.xlu0 %2125  ;;  %v1935_v57 = vmax.f32 %v1927_v3, %v1931_v52  ;;  %v1866_v8 = vadd.f32 %v1865_v44, %v1864_v12 }
 0x2d3   : > { %v7702_v41 = vmul.f32 %v1805_v51, %v7603_v46  ;;  %v1944_v42 = vmax.f32 %v1936_v48, %v1940_v26  ;;  %v7709_v17 = vmul.f32 %v1814_v27, %v7605_v7  ;;  %v7716_v12 = vadd.f32 %v1711_v61, %v7596_v43  ;;  %v7742_v51 = vld [vmem:[#allocation12 + $0x10] sm:$0x1]  ;;  %v7744_v26 = vld [vmem:[#allocation12 + $0x18] sm:$0x1] }
 0x2d4   : > { %v1904_v62 = vrot.slane %v1903_v22, 4  ;;  %v1913_v54 = vrot.slane %v1912_v55, 4  ;;  %v1943_v19 = vmax.f32 %v1935_v57, %v1939_v2  ;;  %v11284_v35 = vrot.slane %v7599_v14, 1  ;;  %11285 = vst [vmem:[#allocation46_spill] sm:$0xff] %v7742_v51 }
 0x2d5   : > { %v1949_v4 = vrot.slane %v7696_v47, 5  ;;  %v7725_v56 = vmul.f32 %v1857_v45, %v7603_v46  ;;  %v1950_v24 = vrot.slane %v7699_v5, 5  ;;  %v7733_v13 = vmul.f32 %v1866_v8, %v7605_v7  ;;  %11286 = vst [vmem:[#allocation78_spill] sm:$0xff] %v7744_v26 }
 0x2d6   : > { %v1905_v33 = vadd.f32 %v1904_v62, %v1903_v22  ;;  %v1914_v15 = vadd.f32 %v1913_v54, %v1912_v55  ;;  %v7721_v50 = vadd.f32 %v11284_v35, %v7599_v14  ;;  %v1957_v37 = vrot.slane %v7702_v41, 6 }
 0x2d7   : > { %2409 = vrot.lane.b32.xlu1 %v11215_v10, %s5406_s7  ;;  %2411 = vrot.lane.b32.xlu2 %v11214_v0, %s5406_s7  ;;  %v1946_v44 = vmax.f32 %v1944_v42, %v7716_v12  ;;  %v1958_v22 = vrot.slane %v7709_v17, 6  ;;  %v1965_v2 = vrot.slane %v7725_v56, 7  ;;  %v1966_v62 = vrot.slane %v7733_v13, 7 }
 0x2d8   : > { %v1906_v60 = vrot.slane %v1905_v33, 2  ;;  %v1915_v39 = vrot.slane %v1914_v15, 2  ;;  %2407 = vrot.lane.b32.xlu0 %v11206_v25, %s5406_s7  ;;  %v1945_v14 = vmax.f32 %v1943_v19, %v7721_v50 }
 0x2d9   : > { %v7727_v59 = vpop.permute.xlu1 %2133  ;;  %v7729_v52 = vpop.permute.xlu2 %2189  ;;  %v1954_v27 = vmax.f32 %v1946_v44, %v1950_v24 }
 0x2da   : > { %v1907_v43 = vadd.f32 %v1906_v60, %v1905_v33  ;;  %v1916_v61 = vadd.f32 %v1915_v39, %v1914_v15  ;;  %v7735_v36 = vpop.permute.xlu0 %2131  ;;  %v1953_v18 = vmax.f32 %v1945_v14, %v1949_v4 }
 0x2db   : > { %v1962_v45 = vmax.f32 %v1954_v27, %v1958_v22 }
 0x2dc   : > { %v1908_v55 = vrot.slane %v1907_v43, 1  ;;  %v1917_v3 = vrot.slane %v1916_v61, 1  ;;  %v1961_v48 = vmax.f32 %v1953_v18, %v1957_v37 }
 0x2dd   : > { %v1970_v60 = vmax.f32 %v1962_v45, %v1966_v62 }
 0x2de   : > { %v1909_v54 = vadd.f32 %v1908_v55, %v1907_v43  ;;  %v1918_v57 = vadd.f32 %v1917_v3, %v1916_v61  ;;  %v1969_v15 = vmax.f32 %v1961_v48, %v1965_v2 }
 0x2df   : > { %2449 = vrot.lane.b32.xlu1 %v11201_v38, %s5407_s9  ;;  %2451 = vrot.lane.b32.xlu2 %v11202_v20, %s5407_s9 }
 0x2e0   : > { %v7752_v8 = vmul.f32 %v1909_v54, %v7742_v51  ;;  %v7755_v33 = vmul.f32 %v1918_v57, %v7744_v26  ;;  %2447 = vrot.lane.b32.xlu0 %v11203_v40, %s5407_s9 }
 0x2e1   : > { %v7759_v19 = vpop.permute.xlu1 %2139  ;;  %v7761_v42 = vpop.permute.xlu2 %2229 }
 0x2e2   : > { %v7763_v39 = vpop.permute.xlu0 %2137  ;;  %v7766_v35 = vmax.f32 %v1969_v15, %v7752_v8  ;;  %v7769_v4 = vmax.f32 %v1970_v60, %v7755_v33 }
 0x2e4   : > { %v1981_v24 = vrot.slane %v7766_v35, 7  ;;  %v1982_v43 = vrot.slane %v7769_v4, 7  ;;  %v1991_v55 = vrot.slane %v7766_v35, 6  ;;  %v1992_v3 = vrot.slane %v7769_v4, 6 }
 0x2e5   : > { %v1973_v18 = vsub.f32 %v7618_v29, %v7766_v35  ;;  %v1974_v27 = vsub.f32 %v7621_v11, %v7769_v4  ;;  %v2002_v48 = vrot.slane %v7769_v4, 5  ;;  %v2038_v26 = vrot.slane %v7769_v4, 1 }
 0x2e6   : > { %v1985_v44 = vsub.f32 %v7610_v23, %v1981_v24  ;;  %v1986_v22 = vsub.f32 %v7613_v31, %v1982_v43  ;;  %v1995_v23 = vsub.f32 %v7630_v53, %v1991_v55  ;;  %v2001_v31 = vrot.slane %v7766_v35, 5 }
 0x2e7   : > { %2455 = vrot.lane.b32.xlu1 %v11205_v16, %s5407_s9  ;;  %2457 = vrot.lane.b32.xlu2 %v11206_v25, %s5407_s9  ;;  %v1996_v57 = vsub.f32 %v7633_v49, %v1992_v3  ;;  %v1975_v45 = vmul.f32 1.442695, %v1973_v18  ;;  %v1977_v15 = vmul.f32 1.442695, %v1974_v27  ;;  %v2006_v43 = vsub.f32 %v7673_v32, %v2002_v48 }
 0x2e8   : > { %2453 = vrot.lane.b32.xlu0 %v11207_v1, %s5407_s9  ;;  %v1987_v2 = vmul.f32 1.442695, %v1985_v44  ;;  %v1989_v62 = vmul.f32 1.442695, %v1986_v22  ;;  %v1997_v60 = vmul.f32 1.442695, %v1995_v23  ;;  %v2005_v24 = vsub.f32 %v7670_v21, %v2001_v31 }
 0x2e9   : > { %v7779_v61 = vpop.permute.xlu1 %2181  ;;  %v7781_v14 = vpop.permute.xlu2 %2235  ;;  %v1999_v53 = vmul.f32 1.442695, %v1996_v57  ;;  %v2017_v21 = vrot.slane %v7766_v35, 3  ;;  %v2009_v3 = vmul.f32 1.442695, %v2006_v43  ;;  %v2018_v18 = vrot.slane %v7769_v4, 3 }
 0x2ea   : > { %v7783_v37 = vpop.permute.xlu0 %2179  ;;  %4995 = vpow2.f32 %v1987_v2  ;;  %v2007_v44 = vmul.f32 1.442695, %v2005_v24  ;;  %v2011_v27 = vsub.f32 %v7721_v50, %v7766_v35  ;;  %v2027_v48 = vrot.slane %v7766_v35, 2 }
 0x2eb   : > { %4997 = vpow2.f32 %v1989_v62  ;;  %v2012_v62 = vsub.f32 %v7716_v12, %v7769_v4  ;;  %v2021_v57 = vsub.f32 %v7696_v47, %v2017_v21  ;;  %v2028_v50 = vrot.slane %v7769_v4, 2 }
 0x2ec   : > { %4999 = vpow2.f32 %v1975_v45  ;;  %v2013_v12 = vmul.f32 1.442695, %v2011_v27  ;;  %v2037_v21 = vrot.slane %v7766_v35, 1 }
 0x2ed   : > { %5001 = vpow2.f32 %v1977_v15  ;;  %v2015_v47 = vmul.f32 1.442695, %v2012_v62 }
 0x2ee   : > { %5003 = vpow2.f32 %v1997_v60  ;;  %v2022_v60 = vsub.f32 %v7699_v5, %v2018_v18  ;;  %v2023_v5 = vmul.f32 1.442695, %v2021_v57 }
 0x2ef   : > { %2461 = vrot.lane.b32.xlu1 %v11214_v0, %s5407_s9  ;;  %2493 = vrot.lane.b32.xlu2 %v11203_v40, %s5408_s15  ;;  %5005 = vpow2.f32 %v1999_v53  ;;  %v2042_v40 = vsub.f32 %v7733_v13, %v2038_v26 }
 0x2f0   : > { %2459 = vrot.lane.b32.xlu0 %v11215_v10, %s5407_s9  ;;  %v7817_v49 = vpop.eup %4995  ;;  %5007 = vpow2.f32 %v2007_v44  ;;  %v2031_v44 = vsub.f32 %v7702_v41, %v2027_v48  ;;  %v2025_v62 = vmul.f32 1.442695, %v2022_v60 }
 0x2f1   : > { %v7801_v54 = vpop.permute.xlu1 %2187  ;;  %v7803_v29 = vpop.permute.xlu2 %2241  ;;  %v2055_v23 = vrot.slane %v7817_v49, 1  ;;  %5009 = vpow2.f32 %v2009_v3 }
 0x2f2   : > { %v7807_v11 = vpop.permute.xlu0 %2185  ;;  %v7824_v55 = vpop.eup %4997  ;;  %5011 = vpow2.f32 %v2013_v12  ;;  %v2033_v60 = vmul.f32 1.442695, %v2031_v44 }
 0x2f3   : > { %v7834_v31 = vpop.eup %4999  ;;  %v2056_v45 = vrot.slane %v7824_v55, 1  ;;  %5013 = vpow2.f32 %v2015_v47 }
 0x2f4   : > { %v7839_v15 = vpop.eup %5001  ;;  %v2059_v43 = vadd.f32 %v7834_v31, %v2055_v23  ;;  %v2032_v23 = vsub.f32 %v7709_v17, %v2028_v50  ;;  %5015 = vpow2.f32 %v2023_v5  ;;  %v2041_v17 = vsub.f32 %v7725_v56, %v2037_v21 }
 0x2f5   : > { %v7843_v24 = vpop.eup %5003  ;;  %v2060_v3 = vadd.f32 %v7839_v15, %v2056_v45  ;;  %5017 = vpow2.f32 %v2025_v62 }
 0x2f6   : > { %v7847_v53 = vpop.eup %5005  ;;  %v2063_v51 = vrot.slane %v7843_v24, 2  ;;  %5019 = vpow2.f32 %v2033_v60  ;;  %v2043_v13 = vmul.f32 1.442695, %v2041_v17  ;;  %v7909_v60 = vld [vmem:[%s5606_s12 + $0x60] sm:$0xff] }
 0x2f7   : > { %2497 = vrot.lane.b32.xlu1 %v11202_v20, %s5408_s15  ;;  %2499 = vrot.lane.b32.xlu2 %v11207_v1, %s5408_s15  ;;  %v7866_v41 = vpop.eup %5007  ;;  %v2064_v48 = vrot.slane %v7847_v53, 2  ;;  %11293 = vst [vmem:[#allocation36_spill] sm:$0xff] %v7909_v60 }
 0x2f8   : > { %2495 = vrot.lane.b32.xlu0 %v11201_v38, %s5408_s15  ;;  %v7869_v45 = vpop.eup %5009  ;;  %v2067_v1 = vadd.f32 %v2063_v51, %v2059_v43  ;;  %v7876_v38 = vld [vmem:[%s5606_s12 + $0x50] sm:$0xff]  ;;  %v2071_v12 = vrot.slane %v7866_v41, 3 }
 0x2f9   : > { %v7820_v22 = vpop.permute.xlu1 %2227  ;;  %v7822_v32 = vpop.permute.xlu2 %2281  ;;  %v2068_v50 = vadd.f32 %v2064_v48, %v2060_v3 }
 0x2fa   : > { %11287 = vst [vmem:[#allocation62_spill] sm:$0xff] %v7822_v32  ;;  %v7827_v2 = vpop.permute.xlu0 %2191  ;;  %v2075_v51 = vadd.f32 %v2071_v12, %v2067_v1  ;;  %v7887_v56 = vpop.eup %5011  ;;  %v2045_v1 = vmul.f32 1.442695, %v2042_v40  ;;  %v2048_v40 = vsub.f32 %v7755_v33, %v7769_v4 }
 0x2fb   : > { %11288 = vst [vmem:[#allocation77_spill] sm:$0xff] %v7887_v56  ;;  %v7893_v5 = vpop.eup %5013 }
 0x2fc   : > { %11290 = vst [vmem:[#allocation74_spill] sm:$0xff] %v7893_v5  ;;  %v7897_v21 = vpop.eup %5015  ;;  %v2077_v62 = vadd.f32 %v7887_v56, %v2075_v51 }
 0x2fd   : > { %11291 = vst [vmem:[#allocation63_spill] sm:$0xff] %v7897_v21  ;;  %v7899_v3 = vpop.eup %5017  ;;  %v2081_v17 = vrot.slane %v7897_v21, 5 }
 0x2fe   : > { %11292 = vst [vmem:[#allocation33_spill] sm:$0xff] %v7899_v3  ;;  %v2082_v12 = vrot.slane %v7899_v3, 5  ;;  %v7941_v3 = vld [vmem:[%s5606_s12 + $0x68] sm:$0xff] }
 0x2ff   : > { %2503 = vrot.lane.b32.xlu1 %v11206_v25, %s5408_s15  ;;  %2505 = vrot.lane.b32.xlu2 %v11215_v10, %s5408_s15  ;;  %v7872_v25 = vld [vmem:[%s5606_s12 + $0x40] sm:$0xff]  ;;  %v2072_v10 = vrot.slane %v7869_v45, 3  ;;  %11300 = vst [vmem:[#allocation54_spill] sm:$0xff] %v7941_v3 }
 0x300   : > { %2501 = vrot.lane.b32.xlu0 %v11205_v16, %s5408_s15  ;;  %v2035_v16 = vmul.f32 1.442695, %v2032_v23  ;;  %v7903_v23 = vld [vmem:[%s5606_s12 + $0x70] sm:$0xff] }
 0x301   : > { %v7857_v18 = vpop.permute.xlu1 %2233  ;;  %v7859_v27 = vpop.permute.xlu2 %2287  ;;  %v2076_v26 = vadd.f32 %v2072_v10, %v2068_v50  ;;  %v2047_v10 = vsub.f32 %v7752_v8, %v7766_v35  ;;  %v2085_v35 = vadd.f32 %v2081_v17, %v2077_v62 }
 0x302   : > { %v7864_v57 = vpop.permute.xlu0 %2231  ;;  %5021 = vpow2.f32 %v2035_v16  ;;  %v7912_v16 = vld [vmem:[%s5606_s12 + $0x48] sm:$0xff]  ;;  %v7917_v50 = vpop.eup %5019 }
 0x303   : > { %5023 = vpow2.f32 %v2043_v13  ;;  %v2078_v48 = vadd.f32 %v7893_v5, %v2076_v26  ;;  %11294 = vst [vmem:[#allocation32_spill] sm:$0xff] %v7912_v16  ;;  %v2049_v33 = vmul.f32 1.442695, %v2047_v10  ;;  %v2051_v26 = vmul.f32 1.442695, %v2048_v40 }
 0x304   : > { %5025 = vpow2.f32 %v2045_v1  ;;  %11295 = vst [vmem:[#allocation42_spill] sm:$0xff] %v7917_v50  ;;  %v2089_v1 = vrot.slane %v7917_v50, 6 }
 0x305   : > { %v2086_v4 = vadd.f32 %v2082_v12, %v2078_v48  ;;  %5027 = vpow2.f32 %v2049_v33  ;;  %v7944_v48 = vld [vmem:[%s5606_s12 + $0x58] sm:$0xff] }
 0x306   : > { %v2093_v20 = vadd.f32 %v2089_v1, %v2085_v35  ;;  %11301 = vst [vmem:[#allocation37_spill] sm:$0xff] %v7944_v48  ;;  %5029 = vpow2.f32 %v2051_v26  ;;  %v7948_v12 = vld [vmem:[%s5606_s12 + $0x78] sm:$0xff] }
 0x307   : > { %2560 = vrot.lane.b32.xlu1 %v7872_v25, %s5401_s27  ;;  %2562 = vrot.lane.b32.xlu2 %v7876_v38, %s5401_s27 }
 0x308   : > { %2507 = vrot.lane.b32.xlu0 %v11214_v0, %s5408_s15  ;;  %v7922_v8 = vpop.eup %5021 }
 0x309   : > { %v7889_v47 = vpop.permute.xlu1 %2239  ;;  %v7891_v43 = vpop.permute.xlu2 %2347  ;;  %11296 = vst [vmem:[#allocation38_spill] sm:$0xff] %v7922_v8  ;;  %v2090_v17 = vrot.slane %v7922_v8, 6 }
 0x30a   : > { %11289 = vst [vmem:[#allocation71_spill] sm:$0xff] %v7891_v43  ;;  %v7895_v44 = vpop.permute.xlu0 %2237  ;;  %v7935_v62 = vpop.eup %5023 }
 0x30b   : > { %11298 = vst [vmem:[#allocation28_spill] sm:$0xff] %v7935_v62  ;;  %v7938_v0 = vpop.eup %5025  ;;  %v2094_v10 = vadd.f32 %v2090_v17, %v2086_v4  ;;  %v2097_v40 = vrot.slane %v7935_v62, 7 }
 0x30c   : > { %11299 = vst [vmem:[#allocation30_spill] sm:$0xff] %v7938_v0  ;;  %v7963_v1 = vpop.eup %5027 }
 0x30d   : > { %v2101_v8 = vadd.f32 %v2097_v40, %v2093_v20  ;;  %11304 = vst [vmem:[#allocation22_spill] sm:$0xff] %v7963_v1  ;;  %v7965_v17 = vpop.eup %5029 }
 0x30e   : > { %11305 = vst [vmem:[#allocation48_spill] sm:$0xff] %v7965_v17 }
 0x30f   : > { %2566 = vrot.lane.b32.xlu1 %v7903_v23, %s5401_s27  ;;  %2568 = vrot.lane.b32.xlu2 %v7912_v16, %s5401_s27 }
 0x310   : > { %2564 = vrot.lane.b32.xlu0 %v7909_v60, %s5401_s27 }
 0x311   : > { %v7928_v51 = vpop.permute.xlu1 %2279  ;;  %v7930_v13 = vpop.permute.xlu2 %2353 }
 0x312   : > { %11297 = vst [vmem:[#allocation31_spill] sm:$0xff] %v7930_v13  ;;  %v7933_v43 = vpop.permute.xlu0 %2277  ;;  %v2098_v13 = vrot.slane %v7938_v0, 7  ;;  %v2103_v0 = vadd.f32 %v7963_v1, %v2101_v8 }
 0x314   : > { %v2102_v35 = vadd.f32 %v2098_v13, %v2094_v10  ;;  %5031 = vrcp.f32 %v2103_v0 }
 0x316   : > { %v2104_v20 = vadd.f32 %v7965_v17, %v2102_v35 }
 0x317   : > { %2572 = vrot.lane.b32.xlu1 %v7941_v3, %s5401_s27  ;;  %2574 = vrot.lane.b32.xlu2 %v7948_v12, %s5401_s27 }
 0x318   : > { %2570 = vrot.lane.b32.xlu0 %v7944_v48, %s5401_s27  ;;  %5033 = vrcp.f32 %v2104_v20 }
 0x319   : > { %v7957_v33 = vpop.permute.xlu1 %2285  ;;  %v7959_v4 = vpop.permute.xlu2 %2359 }
 0x31a   : > { %11302 = vst [vmem:[#allocation39_spill] sm:$0xff] %v7959_v4  ;;  %v7961_v26 = vpop.permute.xlu0 %2283  ;;  %v5032_v8 = vpop.eup %5031 }
 0x31b   : > { %11303 = vst [vmem:[#allocation41_spill] sm:$0xff] %v7961_v26  ;;  %v2107_v35 = vmul.f32 %v5032_v8, %v2103_v0 }
 0x31d   : > { %v2109_v4 = vsub.f32 2.0, %v2107_v35 }
 0x31e   : > { %v5034_v1 = vpop.eup %5033 }
 0x31f   : > { %2634 = vrot.lane.b32.xlu1 %v7876_v38, %s5402_s18  ;;  %2636 = vrot.lane.b32.xlu2 %v7909_v60, %s5402_s18  ;;  %v2108_v50 = vmul.f32 %v5034_v1, %v2104_v20  ;;  %v7997_v5 = vmul.f32 %v5032_v8, %v2109_v4  ;;  %v2142_v8 = vsel %vm415_vm0, %v7685_v28, %v7601_v58 }
 0x320   : > { %2632 = vrot.lane.b32.xlu0 %v7872_v25, %s5402_s18 }
 0x321   : > { %v7975_v13 = vpop.permute.xlu1 %2291  ;;  %v7977_v10 = vpop.permute.xlu2 %2399  ;;  %v2110_v21 = vsub.f32 2.0, %v2108_v50  ;;  %v2169_v50 = vrot.slane %v7997_v5, 7  ;;  %v2113_v4 = vmul.f32 %v7834_v31, %v7997_v5  ;;  %v2141_v31 = vsel %vm415_vm0, %v7689_v34, %v7727_v59 }
 0x322   : > { %11306 = vst [vmem:[#allocation35_spill] sm:$0xff] %v7975_v13  ;;  %v7979_v40 = vpop.permute.xlu0 %2289 }
 0x323   : > { %11307 = vst [vmem:[#allocation50_spill] sm:$0xff] %v7977_v10  ;;  %v8005_v20 = vmul.f32 %v5034_v1, %v2110_v21  ;;  %v2146_v21 = vsel %vm415_vm0, %v7601_v58, %v7685_v28  ;;  %v2115_v56 = vmul.f32 %v2113_v4, %v7603_v46  ;;  %v2197_v4 = vsel %vm488_vm1, %v7807_v11, %v7645_v30 }
 0x324   : > { %11308 = vst [vmem:[#allocation47_spill] sm:$0xff] %v7979_v40 }
 0x325   : > { %v2170_v35 = vrot.slane %v8005_v20, 7  ;;  %v2114_v1 = vmul.f32 %v7839_v15, %v8005_v20  ;;  %v8046_v15 = vsel %vm415_vm0, %v7571_v9, %v7763_v39 }
 0x327   : > { %2640 = vrot.lane.b32.xlu1 %v7912_v16, %s5402_s18  ;;  %2642 = vrot.lane.b32.xlu2 %v7944_v48, %s5402_s18 }
 0x328   : > { %2638 = vrot.lane.b32.xlu0 %v7903_v23, %s5402_s18 }
 0x329   : > { %v7987_v17 = vpop.permute.xlu1 %2351  ;;  %v7989_v62 = vpop.permute.xlu2 %2405 }
 0x32a   : > { %11309 = vst [vmem:[#allocation80_spill] sm:$0xff] %v7987_v17  ;;  %v7991_v10 = vpop.permute.xlu0 %2349 }
 0x32b   : > { %11310 = vst [vmem:[#allocation79_spill] sm:$0xff] %v7989_v62 }
 0x32c   : > { %11311 = vst [vmem:[#allocation43_spill] sm:$0xff] %v7991_v10  ;;  %v2220_v10 = vrot.slane %v8005_v20, 6 }
 0x32f   : > { %2646 = vrot.lane.b32.xlu1 %v7948_v12, %s5402_s18  ;;  %2704 = vrot.lane.b32.xlu2 %v7872_v25, %s5403_s16 }
 0x330   : > { %2644 = vrot.lane.b32.xlu0 %v7941_v3, %s5402_s18 }
 0x331   : > { %v8001_v0 = vpop.permute.xlu1 %2357  ;;  %v8003_v17 = vpop.permute.xlu2 %2411 }
 0x332   : > { %11312 = vst [vmem:[#allocation45_spill] sm:$0xff] %v8001_v0  ;;  %v8007_v62 = vpop.permute.xlu0 %2355  ;;  %v2269_v0 = vrot.slane %v7997_v5, 5 }
 0x333   : > { %11313 = vst [vmem:[#allocation56_spill] sm:$0xff] %v8003_v17  ;;  %v2145_v17 = vsel %vm415_vm0, %v7727_v59, %v7689_v34  ;;  %v8052_v34 = vsel %vm415_vm0, %v7735_v36, %v7759_v19  ;;  %v2148_v59 = vsel %vm415_vm0, %v7759_v19, %v7735_v36  ;;  %v2195_v36 = vsel %vm488_vm1, %v7779_v61, %v7729_v52 }
 0x334   : > { %11314 = vst [vmem:[#allocation55_spill] sm:$0xff] %v8007_v62  ;;  %v2173_v62 = vmul.f32 %v7817_v49, %v2169_v50  ;;  %v2174_v49 = vmul.f32 %v7824_v55, %v2170_v35  ;;  %v2199_v19 = vsel %vm488_vm1, %v7729_v52, %v7779_v61  ;;  %v2193_v35 = vsel %vm488_vm1, %v7645_v30, %v7807_v11 }
 0x335   : > { %v2194_v52 = vsel %vm488_vm1, %v7783_v37, %v7801_v54  ;;  %v2198_v61 = vsel %vm488_vm1, %v7801_v54, %v7783_v37  ;;  %v2196_v30 = vsel %vm488_vm1, %v7687_v63, %v7827_v2  ;;  %v2149_v37 = vperm.slane %v2115_v56, 0 }
 0x336   : > { %v2175_v55 = vmul.f32 %v2173_v62, %v7603_v46  ;;  %v8101_v62 = vsel %vm563_vm2, %v7820_v22, %v7781_v14  ;;  %v2200_v54 = vsel %vm488_vm1, %v7827_v2, %v7687_v63  ;;  %v2246_v56 = vsel %vm563_vm2, %v7857_v18, %v7803_v29 }
 0x337   : > { %2708 = vrot.lane.b32.xlu1 %v7909_v60, %s5403_s16  ;;  %2710 = vrot.lane.b32.xlu2 %v7903_v23, %s5403_s16  ;;  %v2247_v60 = vsel %vm563_vm2, %v7781_v14, %v7820_v22  ;;  %v2250_v63 = vsel %vm563_vm2, %v7803_v29, %v7857_v18  ;;  %v2244_v2 = vsel %vm563_vm2, %v7761_v42, %v7895_v44 }
 0x338   : > { %2706 = vrot.lane.b32.xlu0 %v7876_v38, %s5403_s16  ;;  %v2249_v29 = vsel %vm563_vm2, %v7889_v47, %v7864_v57 }
 0x339   : > { %v8038_v58 = vpop.permute.xlu1 %2397  ;;  %v8040_v28 = vpop.permute.xlu2 %2451 }
 0x33a   : > { %11315 = vst [vmem:[#allocation83_spill] sm:$0xff] %v8038_v58  ;;  %v8059_v50 = vpop.permute.xlu0 %2361  ;;  %v2147_v58 = vsel %vm415_vm0, %v7763_v39, %v7571_v9  ;;  %v2270_v9 = vrot.slane %v8005_v20, 5  ;;  %v2116_v39 = vmul.f32 %v2114_v1, %v7605_v7  ;;  %v2224_v1 = vmul.f32 %v7847_v53, %v2220_v10 }
 0x33b   : > { %11316 = vst [vmem:[#allocation82_spill] sm:$0xff] %v8040_v28  ;;  %v2219_v28 = vrot.slane %v7997_v5, 6 }
 0x33c   : > { %11317 = vst [vmem:[#allocation85_spill] sm:$0xff] %v8059_v50  ;;  %v2176_v50 = vmul.f32 %v2174_v49, %v7605_v7  ;;  %v2273_v49 = vmul.f32 %v7866_v41, %v2269_v0  ;;  %v2150_v53 = vperm.slane %v2116_v39, 0  ;;  %v2201_v41 = vperm.slane %v2175_v55, 1 }
 0x33d   : > { %v2223_v11 = vmul.f32 %v7843_v24, %v2219_v28  ;;  %v2274_v24 = vmul.f32 %v7869_v45, %v2270_v9  ;;  %v2245_v45 = vsel %vm563_vm2, %v7864_v57, %v7889_v47  ;;  %v2226_v28 = vmul.f32 %v2224_v1, %v7605_v7 }
 0x33e   : > { %v2202_v22 = vperm.slane %v2176_v50, 1  ;;  %v2248_v50 = vsel %vm563_vm2, %v7895_v44, %v7761_v42  ;;  %v2275_v9 = vmul.f32 %v2273_v49, %v7603_v46  ;;  %v2153_v39 = vmul.f32 %v2149_v37, %v2146_v21 }
 0x33f   : > { %2714 = vrot.lane.b32.xlu1 %v7944_v48, %s5403_s16  ;;  %2716 = vrot.lane.b32.xlu2 %v7941_v3, %s5403_s16  ;;  %v2225_v0 = vmul.f32 %v2223_v11, %v7603_v46  ;;  %v2151_v55 = vmul.f32 %v2149_v37, %v2145_v17  ;;  %v2276_v57 = vmul.f32 %v2274_v24, %v7605_v7  ;;  %v2252_v17 = vperm.slane %v2226_v28, 2 }
 0x340   : > { %2712 = vrot.lane.b32.xlu0 %v7912_v16, %s5403_s16  ;;  %v2154_v47 = vmul.f32 %v2150_v53, %v2142_v8  ;;  %v2157_v48 = vmul.f32 %v2149_v37, %v2148_v59  ;;  %v2207_v3 = vmul.f32 %v2201_v41, %v2199_v19  ;;  %v2204_v11 = vmul.f32 %v2202_v22, %v2193_v35 }
 0x341   : > { %v8133_v14 = vpop.permute.xlu1 %2403  ;;  %v8149_v10 = vpop.permute.xlu2 %2457  ;;  %v2209_v16 = vmul.f32 %v2201_v41, %v2200_v54  ;;  %v2210_v1 = vmul.f32 %v2202_v22, %v2196_v30  ;;  %v2208_v13 = vmul.f32 %v2202_v22, %v2195_v36  ;;  %v2205_v26 = vmul.f32 %v2201_v41, %v2198_v61 }
 0x342   : > { %11318 = vst [vmem:[#allocation44_spill] sm:$0xff] %v8133_v14  ;;  %v8147_v18 = vpop.permute.xlu0 %2401  ;;  %v2155_v14 = vmul.f32 %v2149_v37, %v2147_v58  ;;  %v2206_v32 = vmul.f32 %v2202_v22, %v2194_v52  ;;  %v2251_v40 = vperm.slane %v2225_v0, 2  ;;  %v2156_v42 = vmul.f32 %v2150_v53, %v8046_v15 }
 0x343   : > { %11319 = vst [vmem:[#allocation34_spill] sm:$0xff] %v8147_v18  ;;  %v2152_v18 = vmul.f32 %v2150_v53, %v2141_v31  ;;  %v2158_v44 = vmul.f32 %v2150_v53, %v8052_v34  ;;  %v2294_v8 = vsel %vm638_vm3, %v7928_v51, %v7859_v27  ;;  %v2298_v31 = vsel %vm638_vm3, %v7859_v27, %v7928_v51 }
 0x344   : > { %11320 = vst [vmem:[#allocation23_spill] sm:$0xff] %v8149_v10  ;;  %v2203_v10 = vmul.f32 %v2201_v41, %v2197_v4  ;;  %v2301_v58 = vperm.slane %v2275_v9, 3  ;;  %v2302_v59 = vperm.slane %v2276_v57, 3  ;;  %v2215_v34 = vadd.f32 %v2207_v3, %v2155_v14 }
 0x345   : > { %v2212_v36 = vadd.f32 %v2204_v11, %v2152_v18  ;;  %v2217_v19 = vadd.f32 %v2209_v16, %v2157_v48  ;;  %v2218_v35 = vadd.f32 %v2210_v1, %v2158_v44  ;;  %v2216_v61 = vadd.f32 %v2208_v13, %v2156_v42  ;;  %v11328_v11 = vld [vmem:[#allocation74_spill] sm:$0xff]  ;;  %v11329_v42 = vld [vmem:[#allocation63_spill] sm:$0xff] }
 0x346   : > { %v2211_v21 = vadd.f32 %v2203_v10, %v2151_v55  ;;  %v2213_v30 = vadd.f32 %v2205_v26, %v2153_v39  ;;  %v2214_v49 = vadd.f32 %v2206_v32, %v2154_v47  ;;  %v2253_v37 = vmul.f32 %v2251_v40, %v2247_v60  ;;  %v11327_v39 = vld [vmem:[#allocation32_spill] sm:$0xff] }
 0x347   : > { %2776 = vrot.lane.b32.xlu1 %v7872_v25, %s5404_s11  ;;  %2778 = vrot.lane.b32.xlu2 %v7876_v38, %s5404_s11  ;;  %v2254_v27 = vmul.f32 %v2252_v17, %v8101_v62  ;;  %v2259_v51 = vmul.f32 %v2251_v40, %v2250_v63  ;;  %v2260_v54 = vmul.f32 %v2252_v17, %v2246_v56  ;;  %v2339_v18 = vrot.slane %v7997_v5, 3  ;;  %v11322_v62 = vld [vmem:[#allocation62_spill] sm:$0xff] }
 0x348   : > { %2718 = vrot.lane.b32.xlu0 %v7948_v12, %s5403_s16  ;;  %v2255_v24 = vmul.f32 %v2251_v40, %v2248_v50  ;;  %v2261_v53 = vadd.f32 %v2253_v37, %v2211_v21  ;;  %v2256_v41 = vmul.f32 %v2252_v17, %v2244_v2  ;;  %v2257_v22 = vmul.f32 %v2251_v40, %v2249_v29  ;;  %v11321_v40 = vld [vmem:[#allocation47_spill] sm:$0xff]  ;;  %v11323_v2 = vld [vmem:[#allocation41_spill] sm:$0xff] }
 0x349   : > { %v8175_v15 = vpop.permute.xlu1 %2409  ;;  %v8179_v52 = vpop.permute.xlu2 %2493  ;;  %v2258_v3 = vmul.f32 %v2252_v17, %v2245_v45  ;;  %v2262_v14 = vadd.f32 %v2254_v27, %v2212_v36  ;;  %v2267_v16 = vadd.f32 %v2259_v51, %v2217_v19  ;;  %v2268_v48 = vadd.f32 %v2260_v54, %v2218_v35  ;;  %v11324_v45 = vld [vmem:[#allocation35_spill] sm:$0xff]  ;;  %v11326_v50 = vld [vmem:[#allocation77_spill] sm:$0xff] }
 0x34a   : > { %v8177_v4 = vpop.permute.xlu0 %2407  ;;  %v2263_v10 = vadd.f32 %v2255_v24, %v2213_v30  ;;  %v2293_v32 = vsel %vm638_vm3, %v7933_v43, %v7957_v33  ;;  %v2297_v60 = vsel %vm638_vm3, %v7957_v33, %v7933_v43  ;;  %v2340_v26 = vrot.slane %v8005_v20, 3  ;;  %v11325_v33 = vld [vmem:[#allocation36_spill] sm:$0xff]  ;;  %v11330_v19 = vld [vmem:[#allocation33_spill] sm:$0xff] }
 0x34b   : > { %v2264_v13 = vadd.f32 %v2256_v41, %v2214_v49  ;;  %v2295_v56 = vsel %vm638_vm3, %v11322_v62, %v11321_v40  ;;  %v2299_v63 = vsel %vm638_vm3, %v11321_v40, %v11322_v62  ;;  %v2300_v43 = vsel %vm638_vm3, %v11324_v45, %v11323_v2 }
 0x34c   : > { %v2305_v29 = vmul.f32 %v2301_v58, %v2298_v31  ;;  %v2306_v0 = vmul.f32 %v2302_v59, %v2294_v8  ;;  %v2296_v28 = vsel %vm638_vm3, %v11323_v2, %v11324_v45  ;;  %v2319_v9 = vmul.f32 %v11326_v50, %v7997_v5 }
 0x34d   : > { %v2303_v57 = vmul.f32 %v2301_v58, %v2297_v60  ;;  %v2304_v47 = vmul.f32 %v2302_v59, %v2293_v32  ;;  %v2320_v1 = vmul.f32 %v11328_v11, %v8005_v20  ;;  %v2343_v44 = vmul.f32 %v11329_v42, %v2339_v18 }
 0x34e   : > { %v2307_v21 = vmul.f32 %v2301_v58, %v2299_v63  ;;  %v2308_v31 = vmul.f32 %v2302_v59, %v2295_v56  ;;  %v2309_v36 = vmul.f32 %v2301_v58, %v2300_v43  ;;  %v2344_v35 = vmul.f32 %v11330_v19, %v2340_v26  ;;  %v11338_v43 = vld [vmem:[#allocation52_spill] sm:$0xff] }
 0x34f   : > { %2782 = vrot.lane.b32.xlu1 %v7903_v23, %s5404_s11  ;;  %2784 = vrot.lane.b32.xlu2 %v11327_v39, %s5404_s11  ;;  %v2265_v30 = vadd.f32 %v2257_v22, %v2215_v34  ;;  %v2266_v49 = vadd.f32 %v2258_v3, %v2216_v61  ;;  %v2310_v37 = vmul.f32 %v2302_v59, %v2296_v28  ;;  %v2389_v27 = vrot.slane %v7997_v5, 2  ;;  %v11331_v34 = vld [vmem:[#allocation54_spill] sm:$0xff]  ;;  %v11332_v61 = vld [vmem:[#allocation39_spill] sm:$0xff]  ;;  %v11333_v22 = vld [vmem:[#allocation80_spill] sm:$0xff] }
 0x350   : > { %2780 = vrot.lane.b32.xlu0 %v11325_v33, %s5404_s11  ;;  %v2313_v51 = vadd.f32 %v2305_v29, %v2263_v10  ;;  %v2314_v54 = vadd.f32 %v2306_v0, %v2264_v13  ;;  %v2321_v24 = vperm.slane %v2319_v9, 0  ;;  %v2390_v41 = vrot.slane %v8005_v20, 2  ;;  %v11337_v13 = vld [vmem:[#allocation38_spill] sm:$0xff]  ;;  %v11339_v28 = vld [vmem:[#allocation59_spill] sm:$0xff]  ;;  %v11340_v9 = vld [vmem:[#allocation60_spill] sm:$0xff] }
 0x351   : > { %v8216_v55 = vpop.permute.xlu1 %2449  ;;  %v8223_v8 = vpop.permute.xlu2 %2499  ;;  %v2311_v18 = vadd.f32 %v2303_v57, %v2261_v53  ;;  %v2312_v32 = vadd.f32 %v2304_v47, %v2262_v14  ;;  %v2322_v60 = vperm.slane %v2320_v1, 0  ;;  %v2345_v40 = vmul.f32 %v2343_v44, %v7603_v46  ;;  %v11334_v53 = vld [vmem:[#allocation42_spill] sm:$0xff]  ;;  %v11341_v44 = vld [vmem:[#allocation57_spill] sm:$0xff] }
 0x352   : > { %v8221_v17 = vpop.permute.xlu0 %2447  ;;  %v2315_v62 = vadd.f32 %v2307_v21, %v2265_v30  ;;  %v2316_v56 = vadd.f32 %v2308_v31, %v2266_v49  ;;  %v2317_v58 = vadd.f32 %v2309_v36, %v2267_v16  ;;  %v2346_v26 = vmul.f32 %v2344_v35, %v7605_v7  ;;  %v11335_v16 = vld [vmem:[#allocation37_spill] sm:$0xff]  ;;  %v11336_v7 = vld [vmem:[#allocation51_spill] sm:$0xff]  ;;  %v11342_v31 = vld [vmem:[#allocation58_spill] sm:$0xff] }
 0x353   : > { %v8232_v59 = vadd.f32 %v2310_v37, %v2268_v48  ;;  %v2365_v3 = vsel %vm763_vm4, %v11333_v22, %v11332_v61  ;;  %v2369_v46 = vsel %vm763_vm4, %v11332_v61, %v11333_v22  ;;  %v2393_v14 = vmul.f32 %v11334_v53, %v2389_v27  ;;  %v11344_v61 = vld [vmem:[#allocation30_spill] sm:$0xff]  ;;  %v11346_v53 = vld [vmem:[#allocation43_spill] sm:$0xff] }
 0x354   : > { %v2327_v10 = vmul.f32 %v2321_v24, %v11336_v7  ;;  %v2394_v48 = vmul.f32 %v11337_v13, %v2390_v41  ;;  %v2439_v63 = vrot.slane %v7997_v5, 1  ;;  %v2440_v2 = vrot.slane %v8005_v20, 1  ;;  %v11343_v41 = vld [vmem:[#allocation28_spill] sm:$0xff]  ;;  %v11348_v13 = vld [vmem:[#allocation66_spill] sm:$0xff] }
 0x355   : > { %v2328_v29 = vmul.f32 %v2322_v60, %v11338_v43  ;;  %v8254_v0 = vperm.slane %v2345_v40, 5  ;;  %v2323_v50 = vmul.f32 %v2321_v24, %v11339_v28  ;;  %v2324_v57 = vmul.f32 %v2322_v60, %v11340_v9 }
 0x356   : > { %v2335_v1 = vadd.f32 %v2327_v10, %v2315_v62  ;;  %v8262_v42 = vperm.slane %v2346_v26, 5  ;;  %v2325_v21 = vmul.f32 %v2321_v24, %v11341_v44  ;;  %v2326_v36 = vmul.f32 %v2322_v60, %v11342_v31  ;;  %v11345_v26 = vld [vmem:[#allocation45_spill] sm:$0xff] }
 0x357   : > { %2788 = vrot.lane.b32.xlu1 %v11331_v34, %s5404_s11  ;;  %2790 = vrot.lane.b32.xlu2 %v7948_v12, %s5404_s11  ;;  %v2336_v19 = vadd.f32 %v2328_v29, %v2316_v56  ;;  %v2377_v35 = vmul.f32 %v8254_v0, %v2365_v3  ;;  %v2331_v30 = vadd.f32 %v2323_v50, %v2311_v18  ;;  %v11347_v10 = vld [vmem:[#allocation65_spill] sm:$0xff]  ;;  %v11349_v18 = vld [vmem:[#allocation55_spill] sm:$0xff]  ;;  %v11351_v29 = vld [vmem:[#allocation22_spill] sm:$0xff] }
 0x358   : > { %2786 = vrot.lane.b32.xlu0 %v11335_v16, %s5404_s11  ;;  %v8267_v49 = vadd.f32 %v2324_v57, %v2312_v32  ;;  %v2378_v37 = vmul.f32 %v8262_v42, %v2369_v46  ;;  %v2333_v27 = vadd.f32 %v2325_v21, %v2313_v51  ;;  %v2443_v40 = vmul.f32 %v11343_v41, %v2439_v63  ;;  %v11350_v32 = vld [vmem:[#allocation71_spill] sm:$0xff]  ;;  %v5091_v46 = vld [vmem:[#allocation12] sm:$0xff]  ;;  %v11352_v50 = vld [vmem:[#allocation48_spill] sm:$0xff] }
 0x359   : > { %v8251_v45 = vpop.permute.xlu1 %2455  ;;  %v8260_v11 = vpop.permute.xlu2 %2505  ;;  %v2444_v22 = vmul.f32 %v11344_v61, %v2440_v2  ;;  %v2334_v62 = vadd.f32 %v2326_v36, %v2314_v54  ;;  %v2364_v7 = vsel %vm763_vm4, %v11346_v53, %v11345_v26  ;;  %v2329_v56 = vmul.f32 %v2321_v24, %v11347_v10  ;;  %v5092_v2 = vld [vmem:[#allocation12 + $0x8] sm:$0xff] }
 0x35a   : > { %v8258_v47 = vpop.permute.xlu0 %2453  ;;  %v8278_v3 = vmul.f32 %v2322_v60, %v11348_v13  ;;  %v2363_v51 = vsel %vm763_vm4, %v11350_v32, %v11349_v18  ;;  %v2368_v54 = vsel %vm763_vm4, %v11345_v26, %v11346_v53  ;;  %v2395_v63 = vmul.f32 %v5091_v46, %v2393_v14  ;;  %v11353_v36 = vld [vmem:[#allocation34_spill] sm:$0xff] }
 0x35b   : > { %v2396_v43 = vmul.f32 %v5092_v2, %v2394_v48  ;;  %v2385_v24 = vadd.f32 %v2377_v35, %v2335_v1  ;;  %v2367_v60 = vsel %vm763_vm4, %v11349_v18, %v11350_v32  ;;  %v2489_v28 = vmul.f32 %v11351_v29, %v7997_v5  ;;  %v11356_v10 = vld [vmem:[#allocation78_spill] sm:$0xff] }
 0x35c   : > { %v2490_v14 = vmul.f32 %v11352_v50, %v8005_v20  ;;  %v2386_v9 = vadd.f32 %v2378_v37, %v2336_v19  ;;  %v2375_v48 = vmul.f32 %v8254_v0, %v2364_v7  ;;  %v2445_v57 = vmul.f32 %v5091_v46, %v2443_v40 }
 0x35d   : > { %v2446_v44 = vmul.f32 %v5092_v2, %v2444_v22  ;;  %v2373_v21 = vmul.f32 %v8254_v0, %v2363_v51  ;;  %v2376_v31 = vmul.f32 %v8262_v42, %v2368_v54  ;;  %v2415_v5 = vsel %vm838_vm5, %v11353_v36, %v8175_v15  ;;  %v11354_v22 = vld [vmem:[#allocation82_spill] sm:$0xff] }
 0x35e   : > { %v2419_v20 = vsel %vm838_vm5, %v8175_v15, %v11353_v36  ;;  %v2374_v37 = vmul.f32 %v8262_v42, %v2367_v60  ;;  %v8318_v41 = vadd.f32 %v2329_v56, %v2317_v58  ;;  %v8320_v40 = vperm.slane %v2395_v63, 6  ;;  %v11355_v15 = vld [vmem:[#allocation46_spill] sm:$0xff]  ;;  %v11359_v60 = vld [vmem:[#allocation83_spill] sm:$0xff] }
 0x35f   : > { %2898 = vrot.lane.b32.xlu1 %v7876_v38, %s5405_s29  ;;  %2900 = vrot.lane.b32.xlu2 %v11325_v33, %s5405_s29  ;;  %v8322_v61 = vperm.slane %v2396_v43, 6  ;;  %v2491_v7 = vmul.f32 %v2489_v28, %v11355_v15  ;;  %v2492_v13 = vmul.f32 %v2490_v14, %v11356_v10  ;;  %v8334_v56 = vperm.slane %v2445_v57, 7  ;;  %v11357_v63 = vld [vmem:[#allocation50_spill] sm:$0xff]  ;;  %v11358_v43 = vld [vmem:[#allocation79_spill] sm:$0xff] }
 0x360   : > { %2896 = vrot.lane.b32.xlu0 %v7872_v25, %s5405_s29  ;;  %v2427_v18 = vmul.f32 %v8320_v40, %v2415_v5  ;;  %v8336_v32 = vperm.slane %v2446_v44, 7  ;;  %v2381_v51 = vadd.f32 %v2373_v21, %v2331_v30  ;;  %v2383_v54 = vadd.f32 %v2375_v48, %v2333_v27  ;;  %v11360_v27 = vld [vmem:[#allocation85_spill] sm:$0xff]  ;;  %v11362_v5 = vld [vmem:[#allocation23_spill] sm:$0xff] }
 0x361   : > { %v8303_v1 = vpop.permute.xlu1 %2461  ;;  %v8315_v35 = vpop.permute.xlu2 %2562  ;;  %v2428_v58 = vmul.f32 %v8322_v61, %v2419_v20  ;;  %v2384_v46 = vadd.f32 %v2376_v31, %v2334_v62  ;;  %v2414_v2 = vsel %vm838_vm5, %v11357_v63, %v8177_v4  ;;  %v2413_v29 = vsel %vm838_vm5, %v11359_v60, %v11358_v43  ;;  %v11361_v62 = vld [vmem:[#allocation31_spill] sm:$0xff] }
 0x362   : > { %v2460_v19 = vpop.permute.xlu0 %2459  ;;  %v2417_v28 = vsel %vm838_vm5, %v11358_v43, %v11359_v60  ;;  %v2366_v14 = vsel %vm763_vm4, %v11361_v62, %v11360_v27  ;;  %v2418_v48 = vsel %vm838_vm5, %v8177_v4, %v11357_v63  ;;  %v8364_v57 = vperm.slane %v2491_v7, 0 }
 0x363   : > { %v2465_v26 = vsel %vm913_vm6, %v11354_v22, %v2460_v19  ;;  %v2469_v53 = vsel %vm913_vm6, %v2460_v19, %v11354_v22  ;;  %v8366_v44 = vperm.slane %v2492_v13, 0  ;;  %v2425_v21 = vmul.f32 %v8320_v40, %v2414_v2 }
 0x364   : > { %v2477_v50 = vmul.f32 %v8334_v56, %v2465_v26  ;;  %v2478_v30 = vmul.f32 %v8336_v32, %v2469_v53  ;;  %v2435_v31 = vadd.f32 %v2427_v18, %v2385_v24  ;;  %v2436_v36 = vadd.f32 %v2428_v58, %v2386_v9 }
 0x365   : > { %v2464_v20 = vsel %vm913_vm6, %v8216_v55, %v11362_v5  ;;  %v2468_v19 = vsel %vm913_vm6, %v11362_v5, %v8216_v55  ;;  %v2463_v24 = vsel %vm913_vm6, %v8221_v17, %v8251_v45  ;;  %v2370_v13 = vsel %vm763_vm4, %v11360_v27, %v11361_v62 }
 0x366   : > { %v2485_v15 = vadd.f32 %v2477_v50, %v2435_v31  ;;  %v2486_v7 = vadd.f32 %v2478_v30, %v2436_v36  ;;  %v2423_v18 = vmul.f32 %v8320_v40, %v2413_v29  ;;  %v2424_v58 = vmul.f32 %v8322_v61, %v2417_v28  ;;  %v5094_v36 = vld [vmem:[%s5614_s13 + $0x28] sm:$0xff] }
 0x367   : > { %2904 = vrot.lane.b32.xlu1 %v11327_v39, %s5405_s29  ;;  %2906 = vrot.lane.b32.xlu2 %v11335_v16, %s5405_s29  ;;  %v2475_v63 = vmul.f32 %v8334_v56, %v2464_v20  ;;  %v2467_v2 = vsel %vm913_vm6, %v8251_v45, %v8221_v17  ;;  %v2382_v50 = vadd.f32 %v2374_v37, %v8267_v49  ;;  %v11363_v37 = vld [vmem:[#allocation56_spill] sm:$0xff] }
 0x368   : > { %2902 = vrot.lane.b32.xlu0 %v7903_v23, %s5405_s29  ;;  %v2379_v30 = vmul.f32 %v8254_v0, %v2366_v14  ;;  %v2476_v27 = vmul.f32 %v8336_v32, %v2468_v19  ;;  %v2473_v29 = vmul.f32 %v8334_v56, %v2463_v24  ;;  %v2380_v28 = vmul.f32 %v8262_v42, %v2370_v13  ;;  %v11364_v14 = vld [vmem:[#allocation44_spill] sm:$0xff] }
 0x369   : > { %v2498_v4 = vpop.permute.xlu1 %2497  ;;  %v8389_v53 = vpop.permute.xlu2 %2568  ;;  %v2433_v62 = vadd.f32 %v2425_v21, %v2383_v54  ;;  %v2431_v17 = vadd.f32 %v2423_v18, %v2381_v51  ;;  %v2432_v45 = vadd.f32 %v2424_v58, %v2382_v50  ;;  %v2474_v0 = vmul.f32 %v8336_v32, %v2467_v2 }
 0x36a   : > { %v2496_v9 = vpop.permute.xlu0 %2495  ;;  %v2511_v22 = vsel %vm988_vm7, %v2498_v4, %v8260_v11  ;;  %v2515_v26 = vsel %vm988_vm7, %v8260_v11, %v2498_v4  ;;  %v2426_v11 = vmul.f32 %v8322_v61, %v2418_v48  ;;  %v5093_v48 = vld [vmem:[%s5614_s13 + $0x20] sm:$0xff]  ;;  %v2416_v42 = vsel %vm838_vm5, %v11364_v14, %v11363_v37 }
 0x36b   : > { %v2523_v55 = vmul.f32 %v8364_v57, %v2511_v22  ;;  %v2524_v10 = vmul.f32 %v8366_v44, %v2515_v26  ;;  %v2420_v54 = vsel %vm838_vm5, %v11363_v37, %v11364_v14  ;;  %v2483_v21 = vadd.f32 %v2475_v63, %v2433_v62 }
 0x36c   : > { %v2434_v49 = vadd.f32 %v2426_v11, %v2384_v46  ;;  %v2481_v20 = vadd.f32 %v2473_v29, %v2431_v17  ;;  %v2470_v58 = vsel %vm913_vm6, %v8303_v1, %v8258_v47  ;;  %v2429_v2 = vmul.f32 %v8320_v40, %v2416_v42 }
 0x36d   : > { %v2531_v43 = vadd.f32 %v2523_v55, %v2485_v15  ;;  %v2532_v60 = vadd.f32 %v2524_v10, %v2486_v7  ;;  %v2482_v10 = vadd.f32 %v2474_v0, %v2432_v45 }
 0x36e   : > { %v2484_v46 = vadd.f32 %v2476_v27, %v2434_v49  ;;  %v2387_v27 = vadd.f32 %v2379_v30, %v8318_v41 }
 0x36f   : > { %v2539_v31 = vadd.f32 %v5093_v48, %v2531_v43  ;;  %v2540_v5 = vadd.f32 %v5094_v36, %v2532_v60  ;;  %2910 = vrot.lane.b32.xlu1 %v7948_v12, %s5405_s29  ;;  %2968 = vrot.lane.b32.xlu2 %v7872_v25, %s5406_s7  ;;  %v2430_v43 = vmul.f32 %v8322_v61, %v2420_v54  ;;  %v5097_v61 = vld [vmem:[%s5614_s13 + $0x8] sm:$0xff]  ;;  %v5099_v54 = vld [vmem:[%s5614_s13 + $0x30] sm:$0xff] }
 0x370   : > { %2908 = vrot.lane.b32.xlu0 %v11331_v34, %s5405_s29 }
 0x371   : > { %2547 = vst [vmem:[%s8426_s4 + $0x20] sm:$0xff] %v2539_v31  ;;  %v2504_v51 = vpop.permute.xlu1 %2503  ;;  %v8444_v55 = vpop.permute.xlu2 %2574  ;;  %v5098_v31 = vld [vmem:[%s5614_s13 + $0x18] sm:$0xff] }
 0x372   : > { %2548 = vst [vmem:[%s8426_s4 + $0x28] sm:$0xff] %v2540_v5  ;;  %v2502_v4 = vpop.permute.xlu0 %2501  ;;  %v2510_v19 = vsel %vm988_vm7, %v2496_v9, %v2504_v51  ;;  %v2514_v24 = vsel %vm988_vm7, %v2504_v51, %v2496_v9  ;;  %v2466_v9 = vsel %vm913_vm6, %v8258_v47, %v8303_v1  ;;  %v2480_v47 = vmul.f32 %v8336_v32, %v2470_v58  ;;  %v5096_v1 = vld [vmem:[%s5614_s13] sm:$0xff]  ;;  %v5100_v51 = vld [vmem:[%s5614_s13 + $0x38] sm:$0xff] }
 0x373   : > { %v2509_v22 = vsel %vm988_vm7, %v8179_v52, %v2502_v4  ;;  %v2513_v26 = vsel %vm988_vm7, %v2502_v4, %v8179_v52  ;;  %v2521_v15 = vmul.f32 %v8364_v57, %v2510_v19  ;;  %v2522_v7 = vmul.f32 %v8366_v44, %v2514_v24  ;;  %v2610_v24 = vld [vmem:[#allocation11 + $0x10] sm:$0xff] }
 0x374   : > { %v2519_v13 = vmul.f32 %v8364_v57, %v2509_v22  ;;  %v2520_v18 = vmul.f32 %v8366_v44, %v2513_v26  ;;  %v2338_v52 = vadd.f32 %v8278_v3, %v8232_v59  ;;  %v2479_v59 = vmul.f32 %v8334_v56, %v2466_v9  ;;  %v5095_v3 = vld [vmem:[%s5614_s13 + $0x10] sm:$0xff]  ;;  %v2611_v22 = vld [vmem:[#allocation11 + $0x18] sm:$0xff] }
 0x375   : > { %v2529_v11 = vadd.f32 %v2521_v15, %v2483_v21  ;;  %v2530_v63 = vadd.f32 %v2522_v7, %v2484_v46  ;;  %v2437_v56 = vadd.f32 %v2429_v2, %v2387_v27  ;;  %v2682_v7 = vld [vmem:[#allocation11 + $0x50] sm:$0xff]  ;;  %v2609_v27 = vld [vmem:[#allocation11 + $0x8] sm:$0xff] }
 0x376   : > { %v2527_v60 = vadd.f32 %v2519_v13, %v2481_v20  ;;  %v2528_v50 = vadd.f32 %v2520_v18, %v2482_v10  ;;  %v2388_v29 = vadd.f32 %v2380_v28, %v2338_v52  ;;  %v2683_v10 = vld [vmem:[#allocation11 + $0x58] sm:$0xff] }
 0x377   : > { %v2537_v62 = vadd.f32 %v5095_v3, %v2529_v11  ;;  %2972 = vrot.lane.b32.xlu1 %v11325_v33, %s5406_s7  ;;  %v2538_v36 = vadd.f32 %v5098_v31, %v2530_v63  ;;  %2974 = vrot.lane.b32.xlu2 %v7903_v23, %s5406_s7  ;;  %v2487_v45 = vadd.f32 %v2479_v59, %v2437_v56  ;;  %v2680_v3 = vld [vmem:[#allocation11 + $0x40] sm:$0xff] }
 0x378   : > { %v2535_v40 = vadd.f32 %v5096_v1, %v2527_v60  ;;  %v2536_v48 = vadd.f32 %v5097_v61, %v2528_v50  ;;  %2970 = vrot.lane.b32.xlu0 %v7876_v38, %s5406_s7  ;;  %v2438_v30 = vadd.f32 %v2430_v43, %v2388_v29  ;;  %v2608_v50 = vld [vmem:[#allocation11] sm:$0xff] }
 0x379   : > { %2545 = vst [vmem:[%s8426_s4 + $0x10] sm:$0xff] %v2537_v62  ;;  %v2561_v41 = vpop.permute.xlu1 %2560  ;;  %v8482_v17 = vpop.permute.xlu2 %2636  ;;  %v2681_v62 = vld [vmem:[#allocation11 + $0x48] sm:$0xff] }
 0x37a   : > { %2543 = vst [vmem:[%s8426_s4] sm:$0xff] %v2535_v40  ;;  %v2508_v32 = vpop.permute.xlu0 %2507  ;;  %v2488_v49 = vadd.f32 %v2480_v47, %v2438_v30  ;;  %v8546_v29 = vsel %vm415_vm0, %v2561_v41, %v8389_v53  ;;  %v8551_v59 = vsel %vm415_vm0, %v8389_v53, %v2561_v41 }
 0x37b   : > { %2544 = vst [vmem:[%s8426_s4 + $0x8] sm:$0xff] %v2536_v48  ;;  %v2512_v28 = vsel %vm988_vm7, %v8223_v8, %v2508_v32  ;;  %v2516_v5 = vsel %vm988_vm7, %v2508_v32, %v8223_v8  ;;  %v2616_v53 = vmul.f32 %v2608_v50, %v8551_v59  ;;  %v2617_v48 = vmul.f32 %v2609_v27, %v8546_v29  ;;  %v2614_v32 = vld [vmem:[#allocation11 + $0x30] sm:$0xff] }
 0x37c   : > { %2546 = vst [vmem:[%s8426_s4 + $0x18] sm:$0xff] %v2538_v36  ;;  %v2525_v0 = vmul.f32 %v8364_v57, %v2512_v28  ;;  %v2526_v37 = vmul.f32 %v8366_v44, %v2516_v5  ;;  %v2612_v28 = vld [vmem:[#allocation11 + $0x20] sm:$0xff]  ;;  %v2613_v5 = vld [vmem:[#allocation11 + $0x28] sm:$0xff] }
 0x37e   : > { %v2533_v14 = vadd.f32 %v2525_v0, %v2487_v45  ;;  %v2534_v42 = vadd.f32 %v2526_v37, %v2488_v49  ;;  %v2684_v0 = vld [vmem:[#allocation11 + $0x60] sm:$0xff]  ;;  %v2685_v37 = vld [vmem:[#allocation11 + $0x68] sm:$0xff] }
 0x37f   : > { %2978 = vrot.lane.b32.xlu1 %v11335_v16, %s5406_s7  ;;  %2980 = vrot.lane.b32.xlu2 %v11331_v34, %s5406_s7 }
 0x380   : > { %v2541_v21 = vadd.f32 %v5099_v54, %v2533_v14  ;;  %v2542_v8 = vadd.f32 %v5100_v51, %v2534_v42  ;;  %2976 = vrot.lane.b32.xlu0 %v11327_v39, %s5406_s7  ;;  %v2615_v14 = vld [vmem:[#allocation11 + $0x38] sm:$0xff] }
 0x381   : > { %v8495_v46 = vpop.permute.xlu1 %2566  ;;  %v2643_v44 = vpop.permute.xlu2 %2642  ;;  %v2687_v51 = vld [vmem:[#allocation11 + $0x78] sm:$0xff] }
 0x382   : > { %2549 = vst [vmem:[%s8426_s4 + $0x30] sm:$0xff] %v2541_v21  ;;  %v2565_v57 = vpop.permute.xlu0 %2564  ;;  %v8597_v42 = vsel %vm415_vm0, %v8444_v55, %v8495_v46  ;;  %v2686_v21 = vld [vmem:[#allocation11 + $0x70] sm:$0xff] }
 0x383   : > { %2550 = vst [vmem:[%s8426_s4 + $0x38] sm:$0xff] %v2542_v8 }
 0x387   : > { %3040 = vrot.lane.b32.xlu1 %v7872_v25, %s5407_s9  ;;  %3042 = vrot.lane.b32.xlu2 %v7876_v38, %s5407_s9 }
 0x388   : > { %2982 = vrot.lane.b32.xlu0 %v7948_v12, %s5406_s7 }
 0x389   : > { %v2573_v20 = vpop.permute.xlu1 %2572  ;;  %v8505_v19 = vpop.permute.xlu2 %2704 }
 0x38a   : > { %v2571_v4 = vpop.permute.xlu0 %2570  ;;  %v8579_v45 = vsel %vm415_vm0, %v2565_v57, %v2573_v20  ;;  %v8583_v49 = vsel %vm415_vm0, %v2573_v20, %v2565_v57 }
 0x38b   : > { %v8512_v26 = vsel %vm415_vm0, %v8315_v35, %v2571_v4  ;;  %v8517_v15 = vsel %vm415_vm0, %v2571_v4, %v8315_v35  ;;  %v2621_v20 = vmul.f32 %v2613_v5, %v8579_v45 }
 0x38c   : > { %v2618_v35 = vmul.f32 %v2610_v24, %v8517_v15  ;;  %v2619_v58 = vmul.f32 %v2611_v22, %v8512_v26  ;;  %v2622_v22 = vmul.f32 %v2614_v32, %v8597_v42  ;;  %v2754_v32 = vld [vmem:[#allocation11 + $0x90] sm:$0xff] }
 0x38f   : > { %3046 = vrot.lane.b32.xlu1 %v7903_v23, %s5407_s9  ;;  %3048 = vrot.lane.b32.xlu2 %v11327_v39, %s5407_s9 }
 0x390   : > { %3044 = vrot.lane.b32.xlu0 %v11325_v33, %s5407_s9 }
 0x391   : > { %v2635_v9 = vpop.permute.xlu1 %2634  ;;  %v8535_v2 = vpop.permute.xlu2 %2710 }
 0x392   : > { %v2633_v13 = vpop.permute.xlu0 %2632  ;;  %v8525_v18 = vsel %vm488_vm1, %v2635_v9, %v2643_v44  ;;  %v8529_v52 = vsel %vm488_vm1, %v2643_v44, %v2635_v9  ;;  %v2620_v44 = vmul.f32 %v2612_v28, %v8583_v49  ;;  %v2755_v28 = vld [vmem:[#allocation11 + $0x98] sm:$0xff] }
 0x393   : > { %v2690_v11 = vmul.f32 %v2682_v7, %v8529_v52  ;;  %v2691_v63 = vmul.f32 %v2683_v10, %v8525_v18 }
 0x395   : > { %v8537_v43 = vadd.f32 %v2690_v11, %v2618_v35  ;;  %v8539_v60 = vadd.f32 %v2691_v63, %v2619_v58  ;;  %v2756_v11 = vld [vmem:[#allocation11 + $0xa0] sm:$0xff]  ;;  %v2757_v63 = vld [vmem:[#allocation11 + $0xa8] sm:$0xff] }
 0x397   : > { %3052 = vrot.lane.b32.xlu1 %v11331_v34, %s5407_s9  ;;  %3054 = vrot.lane.b32.xlu2 %v7948_v12, %s5407_s9 }
 0x398   : > { %3050 = vrot.lane.b32.xlu0 %v11335_v16, %s5407_s9 }
 0x399   : > { %v2641_v47 = vpop.permute.xlu1 %2640  ;;  %v2717_v41 = vpop.permute.xlu2 %2716 }
 0x39a   : > { %v2639_v1 = vpop.permute.xlu0 %2638  ;;  %v8559_v40 = vsel %vm488_vm1, %v2633_v13, %v2641_v47  ;;  %v8563_v61 = vsel %vm488_vm1, %v2641_v47, %v2633_v13 }
 0x39b   : > { %v2688_v31 = vmul.f32 %v2680_v3, %v8563_v61  ;;  %v2689_v36 = vmul.f32 %v2681_v62, %v8559_v40 }
 0x39d   : > { %v8569_v56 = vadd.f32 %v2688_v31, %v2616_v53  ;;  %v8571_v30 = vadd.f32 %v2689_v36, %v2617_v48  ;;  %v2752_v48 = vld [vmem:[#allocation11 + $0x80] sm:$0xff]  ;;  %v2753_v31 = vld [vmem:[#allocation11 + $0x88] sm:$0xff] }
 0x39f   : > { %3114 = vrot.lane.b32.xlu1 %v7876_v38, %s5408_s15  ;;  %3116 = vrot.lane.b32.xlu2 %v11325_v33, %s5408_s15 }
 0x3a0   : > { %3112 = vrot.lane.b32.xlu0 %v7872_v25, %s5408_s15  ;;  %v8591_v25 = vsel %vm415_vm0, %v8495_v46, %v8444_v55 }
 0x3a1   : > { %v2647_v38 = vpop.permute.xlu1 %2646  ;;  %v8617_v46 = vpop.permute.xlu2 %2778  ;;  %v2623_v7 = vmul.f32 %v2615_v14, %v8591_v25 }
 0x3a2   : > { %v2645_v54 = vpop.permute.xlu0 %2644  ;;  %v8601_v33 = vsel %vm488_vm1, %v2639_v1, %v2647_v38  ;;  %v8605_v8 = vsel %vm488_vm1, %v2647_v38, %v2639_v1 }
 0x3a3   : > { %v8610_v57 = vsel %vm488_vm1, %v8482_v17, %v2645_v54  ;;  %v8615_v55 = vsel %vm488_vm1, %v2645_v54, %v8482_v17  ;;  %v2694_v10 = vmul.f32 %v2686_v21, %v8605_v8  ;;  %v2695_v9 = vmul.f32 %v2687_v51, %v8601_v33  ;;  %v8677_v54 = vld [vmem:[%s5614_s13 + $0x60] sm:$0xff] }
 0x3a4   : > { %v2692_v4 = vmul.f32 %v2684_v0, %v8615_v55  ;;  %v2693_v24 = vmul.f32 %v2685_v37, %v8610_v57 }
 0x3a5   : > { %v2702_v35 = vadd.f32 %v2694_v10, %v2622_v22  ;;  %v2703_v58 = vadd.f32 %v2695_v9, %v2623_v7  ;;  %v2758_v7 = vld [vmem:[#allocation11 + $0xb0] sm:$0xff]  ;;  %v2824_v9 = vld [vmem:[#allocation11 + $0xc0] sm:$0xff] }
 0x3a6   : > { %v2700_v17 = vadd.f32 %v2692_v4, %v2620_v44  ;;  %v2701_v13 = vadd.f32 %v2693_v24, %v2621_v20  ;;  %v8682_v44 = vld [vmem:[%s5614_s13 + $0x50] sm:$0xff] }
 0x3a7   : > { %3120 = vrot.lane.b32.xlu1 %v11327_v39, %s5408_s15  ;;  %3122 = vrot.lane.b32.xlu2 %v11335_v16, %s5408_s15  ;;  %v8648_v16 = vld [vmem:[%s5614_s13 + $0x40] sm:$0xff]  ;;  %v8687_v24 = vld [vmem:[%s5614_s13 + $0x70] sm:$0xff] }
 0x3a8   : > { %3118 = vrot.lane.b32.xlu0 %v7903_v23, %s5408_s15 }
 0x3a9   : > { %v2709_v50 = vpop.permute.xlu1 %2708  ;;  %v2785_v23 = vpop.permute.xlu2 %2784 }
 0x3aa   : > { %v2707_v27 = vpop.permute.xlu0 %2706  ;;  %v8635_v3 = vsel %vm563_vm2, %v2709_v50, %v2717_v41  ;;  %v8639_v62 = vsel %vm563_vm2, %v2717_v41, %v2709_v50 }
 0x3ab   : > { %11365 = vst [vmem:[#allocation89_spill] sm:$0xff] %v8635_v3  ;;  %v2764_v39 = vmul.f32 %v2756_v11, %v8639_v62  ;;  %v2765_v47 = vmul.f32 %v2757_v63, %v8635_v3 }
 0x3ad   : > { %v8643_v1 = vadd.f32 %v2764_v39, %v2700_v17  ;;  %v8645_v53 = vadd.f32 %v2765_v47, %v2701_v13  ;;  %v8720_v39 = vld [vmem:[%s5614_s13 + $0x58] sm:$0xff] }
 0x3af   : > { %3126 = vrot.lane.b32.xlu1 %v7948_v12, %s5408_s15  ;;  %3201 = vrot.lane.b32.xlu2 %v8648_v16, %s5401_s27 }
 0x3b0   : > { %3124 = vrot.lane.b32.xlu0 %v11331_v34, %s5408_s15 }
 0x3b1   : > { %v2715_v36 = vpop.permute.xlu1 %2714  ;;  %v2791_v37 = vpop.permute.xlu2 %2790 }
 0x3b2   : > { %v2713_v41 = vpop.permute.xlu0 %2712  ;;  %v8658_v5 = vsel %vm563_vm2, %v2707_v27, %v2715_v36  ;;  %v8662_v12 = vsel %vm563_vm2, %v2715_v36, %v2707_v27 }
 0x3b3   : > { %11366 = vst [vmem:[#allocation88_spill] sm:$0xff] %v8658_v5  ;;  %v8667_v34 = vsel %vm563_vm2, %v8505_v19, %v2713_v41  ;;  %v8672_v0 = vsel %vm563_vm2, %v2713_v41, %v8505_v19  ;;  %v2762_v21 = vmul.f32 %v2754_v32, %v8662_v12  ;;  %v2763_v51 = vmul.f32 %v2755_v28, %v8658_v5  ;;  %v8728_v41 = vld [vmem:[%s5614_s13 + $0x68] sm:$0xff]  ;;  %v2830_v28 = vld [vmem:[#allocation11 + $0xf0] sm:$0xff] }
 0x3b4   : > { %11367 = vst [vmem:[#allocation91_spill] sm:$0xff] %v8667_v34  ;;  %v2760_v38 = vmul.f32 %v2752_v48, %v8672_v0  ;;  %v2761_v14 = vmul.f32 %v2753_v31, %v8667_v34  ;;  %v8725_v48 = vld [vmem:[%s5614_s13 + $0x48] sm:$0xff] }
 0x3b5   : > { %v2770_v19 = vadd.f32 %v2762_v21, %v8537_v43  ;;  %v2771_v22 = vadd.f32 %v2763_v51, %v8539_v60  ;;  %v2825_v43 = vld [vmem:[#allocation11 + $0xc8] sm:$0xff] }
 0x3b6   : > { %v2768_v20 = vadd.f32 %v2760_v38, %v8569_v56  ;;  %v2769_v4 = vadd.f32 %v2761_v14, %v8571_v30  ;;  %v2759_v56 = vld [vmem:[#allocation11 + $0xb8] sm:$0xff] }
 0x3b7   : > { %3205 = vrot.lane.b32.xlu1 %v8677_v54, %s5401_s27  ;;  %3207 = vrot.lane.b32.xlu2 %v8687_v24, %s5401_s27  ;;  %v2831_v38 = vld [vmem:[#allocation11 + $0xf8] sm:$0xff] }
 0x3b8   : > { %3203 = vrot.lane.b32.xlu0 %v8682_v44, %s5401_s27 }
 0x3b9   : > { %v2777_v30 = vpop.permute.xlu1 %2776  ;;  %v8715_v63 = vpop.permute.xlu2 %2900 }
 0x3ba   : > { %v2719_v10 = vpop.permute.xlu0 %2718  ;;  %v8699_v60 = vsel %vm638_vm3, %v2777_v30, %v2785_v23  ;;  %v8703_v17 = vsel %vm638_vm3, %v2785_v23, %v2777_v30  ;;  %v8755_v30 = vld [vmem:[%s5614_s13 + $0x78] sm:$0xff] }
 0x3bb   : > { %11368 = vst [vmem:[#allocation40_spill] sm:$0xff] %v8699_v60  ;;  %v8708_v13 = vsel %vm563_vm2, %v8535_v2, %v2719_v10  ;;  %v8713_v11 = vsel %vm563_vm2, %v2719_v10, %v8535_v2  ;;  %v2832_v47 = vmul.f32 %v2824_v9, %v8703_v17  ;;  %v2833_v23 = vmul.f32 %v2825_v43, %v8699_v60  ;;  %v2827_v10 = vld [vmem:[#allocation11 + $0xd8] sm:$0xff]  ;;  %v8826_v60 = vld [vmem:[%s5606_s12 + $0x40] sm:$0xff] }
 0x3bc   : > { %11369 = vst [vmem:[#allocation84_spill] sm:$0xff] %v8703_v17  ;;  %v2766_v50 = vmul.f32 %v2758_v7, %v8713_v11  ;;  %v2767_v27 = vmul.f32 %v2759_v56, %v8708_v13 }
 0x3bd   : > { %11370 = vst [vmem:[#allocation100_spill] sm:$0xff] %v8708_v13  ;;  %v8730_v2 = vadd.f32 %v2832_v47, %v2768_v20  ;;  %v8732_v32 = vadd.f32 %v2833_v23, %v2769_v4 }
 0x3be   : > { %11371 = vst [vmem:[#allocation29_spill] sm:$0xff] %v8713_v11  ;;  %v2774_v31 = vadd.f32 %v2766_v50, %v2702_v35  ;;  %v2775_v36 = vadd.f32 %v2767_v27, %v2703_v58  ;;  %v2828_v50 = vld [vmem:[#allocation11 + $0xe0] sm:$0xff]  ;;  %v2829_v27 = vld [vmem:[#allocation11 + $0xe8] sm:$0xff] }
 0x3bf   : > { %3211 = vrot.lane.b32.xlu1 %v8720_v39, %s5401_s27  ;;  %3213 = vrot.lane.b32.xlu2 %v8728_v41, %s5401_s27  ;;  %11382 = vst [vmem:[#allocation24_spill] sm:$0xff] %v8826_v60 }
 0x3c0   : > { %3209 = vrot.lane.b32.xlu0 %v8725_v48, %s5401_s27 }
 0x3c1   : > { %v2783_v35 = vpop.permute.xlu1 %2782  ;;  %v2907_v4 = vpop.permute.xlu2 %2906 }
 0x3c2   : > { %v2781_v58 = vpop.permute.xlu0 %2780  ;;  %v8742_v14 = vsel %vm638_vm3, %v2783_v35, %v2791_v37  ;;  %v8746_v21 = vsel %vm638_vm3, %v2791_v37, %v2783_v35  ;;  %v2826_v37 = vld [vmem:[#allocation11 + $0xd0] sm:$0xff] }
 0x3c3   : > { %11372 = vst [vmem:[#allocation92_spill] sm:$0xff] %v8742_v14  ;;  %v2838_v51 = vmul.f32 %v2830_v28, %v8746_v21  ;;  %v2839_v20 = vmul.f32 %v2831_v38, %v8742_v14 }
 0x3c4   : > { %11373 = vst [vmem:[#allocation87_spill] sm:$0xff] %v8746_v21 }
 0x3c5   : > { %v8750_v7 = vadd.f32 %v2838_v51, %v2774_v31  ;;  %v8752_v56 = vadd.f32 %v2839_v20, %v2775_v36  ;;  %v2874_v51 = vld [vmem:[#allocation11 + $0x110] sm:$0xff] }
 0x3c7   : > { %3249 = vrot.lane.b32.xlu1 %v8648_v16, %s5402_s18  ;;  %3251 = vrot.lane.b32.xlu2 %v8682_v44, %s5402_s18 }
 0x3c8   : > { %3215 = vrot.lane.b32.xlu0 %v8755_v30, %s5401_s27 }
 0x3c9   : > { %v2789_v9 = vpop.permute.xlu1 %2788  ;;  %v8781_v28 = vpop.permute.xlu2 %2968 }
 0x3ca   : > { %v2787_v43 = vpop.permute.xlu0 %2786  ;;  %v8765_v47 = vsel %vm638_vm3, %v2781_v58, %v2789_v9  ;;  %v8769_v23 = vsel %vm638_vm3, %v2789_v9, %v2781_v58  ;;  %v2875_v58 = vld [vmem:[#allocation11 + $0x118] sm:$0xff] }
 0x3cb   : > { %11374 = vst [vmem:[#allocation86_spill] sm:$0xff] %v8765_v47  ;;  %v8774_v31 = vsel %vm638_vm3, %v8617_v46, %v2787_v43  ;;  %v8779_v36 = vsel %vm638_vm3, %v2787_v43, %v8617_v46  ;;  %v2836_v20 = vmul.f32 %v2828_v50, %v8769_v23  ;;  %v2837_v9 = vmul.f32 %v2829_v27, %v8765_v47  ;;  %v8800_v43 = vld [vmem:[%s5606_s12 + $0x58] sm:$0xff]  ;;  %v2872_v47 = vld [vmem:[#allocation11 + $0x100] sm:$0xff] }
 0x3cc   : > { %11375 = vst [vmem:[#allocation81_spill] sm:$0xff] %v8769_v23  ;;  %v2834_v38 = vmul.f32 %v2826_v37, %v8779_v36  ;;  %v2835_v35 = vmul.f32 %v2827_v10, %v8774_v31  ;;  %v8796_v37 = vld [vmem:[%s5606_s12 + $0x50] sm:$0xff]  ;;  %v2883_v50 = vmul.f32 %v8800_v43, %v2875_v58 }
 0x3cd   : > { %11376 = vst [vmem:[#allocation64_spill] sm:$0xff] %v8774_v31  ;;  %v8788_v13 = vadd.f32 %v2836_v20, %v8643_v1  ;;  %v8791_v46 = vadd.f32 %v2837_v9, %v8645_v53  ;;  %v2882_v10 = vmul.f32 %v8796_v37, %v2874_v51  ;;  %v2947_v1 = vld [vmem:[#allocation11 + $0x158] sm:$0xff]  ;;  %v2873_v31 = vld [vmem:[#allocation11 + $0x108] sm:$0xff] }
 0x3ce   : > { %11377 = vst [vmem:[#allocation94_spill] sm:$0xff] %v8779_v36  ;;  %v2842_v14 = vadd.f32 %v2834_v38, %v2770_v19  ;;  %v2843_v21 = vadd.f32 %v2835_v35, %v2771_v22  ;;  %v2946_v19 = vld [vmem:[#allocation11 + $0x150] sm:$0xff] }
 0x3cf   : > { %3255 = vrot.lane.b32.xlu1 %v8687_v24, %s5402_s18  ;;  %11378 = vst [vmem:[#allocation97_spill] sm:$0xff] %v8796_v37  ;;  %3257 = vrot.lane.b32.xlu2 %v8725_v48, %s5402_s18 }
 0x3d0   : > { %11379 = vst [vmem:[#allocation98_spill] sm:$0xff] %v8800_v43  ;;  %3253 = vrot.lane.b32.xlu0 %v8677_v54, %s5402_s18  ;;  %v2890_v35 = vadd.f32 %v2882_v10, %v2842_v14  ;;  %v2891_v51 = vadd.f32 %v2883_v50, %v2843_v21  ;;  %v2880_v14 = vmul.f32 %v8826_v60, %v2872_v47  ;;  %v8830_v21 = vld [vmem:[%s5606_s12 + $0x48] sm:$0xff]  ;;  %v2944_v10 = vld [vmem:[#allocation11 + $0x140] sm:$0xff] }
 0x3d1   : > { %v2899_v53 = vpop.permute.xlu1 %2898  ;;  %v8817_v9 = vpop.permute.xlu2 %2974  ;;  %11383 = vst [vmem:[#allocation95_spill] sm:$0xff] %v8830_v21  ;;  %v2945_v50 = vld [vmem:[#allocation11 + $0x148] sm:$0xff] }
 0x3d2   : > { %v2897_v22 = vpop.permute.xlu0 %2896  ;;  %v8809_v27 = vsel %vm763_vm4, %v2899_v53, %v2907_v4  ;;  %v8813_v38 = vsel %vm763_vm4, %v2907_v4, %v2899_v53  ;;  %v2881_v4 = vmul.f32 %v8830_v21, %v2873_v31  ;;  %v2888_v31 = vadd.f32 %v2880_v14, %v8730_v2  ;;  %v2877_v60 = vld [vmem:[#allocation11 + $0x128] sm:$0xff]  ;;  %v8858_v2 = vld [vmem:[%s5606_s12 + $0x60] sm:$0xff] }
 0x3d3   : > { %11380 = vst [vmem:[#allocation25_spill] sm:$0xff] %v8809_v27  ;;  %v2954_v58 = vmul.f32 %v2946_v19, %v8809_v27  ;;  %v2955_v20 = vmul.f32 %v2947_v1, %v8813_v38  ;;  %v2876_v27 = vld [vmem:[#allocation11 + $0x120] sm:$0xff]  ;;  %v8862_v14 = vld [vmem:[%s5606_s12 + $0x68] sm:$0xff] }
 0x3d4   : > { %11381 = vst [vmem:[#allocation101_spill] sm:$0xff] %v8813_v38 }
 0x3d5   : > { %v8819_v43 = vadd.f32 %v2954_v58, %v2890_v35  ;;  %v8821_v37 = vadd.f32 %v2955_v20, %v2891_v51  ;;  %v2889_v35 = vadd.f32 %v2881_v4, %v8732_v32  ;;  %11386 = vst [vmem:[#allocation96_spill] sm:$0xff] %v8858_v2  ;;  %v2884_v32 = vmul.f32 %v8858_v2, %v2876_v27  ;;  %v2950_v27 = vld [vmem:[#allocation11 + $0x170] sm:$0xff]  ;;  %v2951_v2 = vld [vmem:[#allocation11 + $0x178] sm:$0xff] }
 0x3d6   : > { %11387 = vst [vmem:[#allocation93_spill] sm:$0xff] %v8862_v14  ;;  %v2885_v4 = vmul.f32 %v8862_v14, %v2877_v60 }
 0x3d7   : > { %3261 = vrot.lane.b32.xlu1 %v8728_v41, %s5402_s18  ;;  %3263 = vrot.lane.b32.xlu2 %v8755_v30, %s5402_s18 }
 0x3d8   : > { %3259 = vrot.lane.b32.xlu0 %v8720_v39, %s5402_s18  ;;  %v2893_v11 = vadd.f32 %v2885_v4, %v8791_v46  ;;  %v3021_v46 = vld [vmem:[#allocation11 + $0x1a8] sm:$0xff] }
 0x3d9   : > { %v2905_v19 = vpop.permute.xlu1 %2904  ;;  %v2981_v20 = vpop.permute.xlu2 %2980  ;;  %v3017_v4 = vld [vmem:[#allocation11 + $0x188] sm:$0xff] }
 0x3da   : > { %v2903_v1 = vpop.permute.xlu0 %2902  ;;  %v8839_v53 = vsel %vm763_vm4, %v2897_v22, %v2905_v19  ;;  %v8843_v47 = vsel %vm763_vm4, %v2905_v19, %v2897_v22  ;;  %v2878_v22 = vld [vmem:[#allocation11 + $0x130] sm:$0xff]  ;;  %v2879_v19 = vld [vmem:[#allocation11 + $0x138] sm:$0xff] }
 0x3db   : > { %11384 = vst [vmem:[#allocation90_spill] sm:$0xff] %v8839_v53  ;;  %v2952_v51 = vmul.f32 %v2944_v10, %v8839_v53  ;;  %v2953_v58 = vmul.f32 %v2945_v50, %v8843_v47  ;;  %v2948_v10 = vld [vmem:[#allocation11 + $0x160] sm:$0xff]  ;;  %v2949_v50 = vld [vmem:[#allocation11 + $0x168] sm:$0xff] }
 0x3dc   : > { %11385 = vst [vmem:[#allocation61_spill] sm:$0xff] %v8843_v47 }
 0x3dd   : > { %v8849_v38 = vadd.f32 %v2952_v51, %v2888_v31  ;;  %v8851_v21 = vadd.f32 %v2953_v58, %v2889_v35  ;;  %v8868_v31 = vld [vmem:[%s5606_s12 + $0x70] sm:$0xff]  ;;  %v8872_v51 = vld [vmem:[%s5606_s12 + $0x78] sm:$0xff]  ;;  %s5325_s12 = sshra.s32 %s4699_s5, 4  ;;  %s5326_s12 = int_to_ptr.hbm [resolvable:$true] %s5325_s12 }
 0x3de   : > { %11388 = vst [vmem:[#allocation27_spill] sm:$0xff] %v8868_v31  ;;  %v2886_v35 = vmul.f32 %v8868_v31, %v2878_v22  ;;  %v2887_v58 = vmul.f32 %v8872_v51, %v2879_v19  ;;  %v2892_v31 = vadd.f32 %v2884_v32, %v8788_v13  ;;  %v3020_v13 = vld [vmem:[#allocation11 + $0x1a0] sm:$0xff]  ;;  %s5327_s2 = scalar_lea.hbm %s5326_s12, 128  ;;  %p5332_p2 = scmp.lt.s32.totalorder %s5326_s12, %s10753_s6 }
 0x3df   : > { %3299 = vrot.lane.b32.xlu1 %v8682_v44, %s5403_s16  ;;  %3301 = vrot.lane.b32.xlu2 %v8677_v54, %s5403_s16  ;;  %11389 = vst [vmem:[#allocation26_spill] sm:$0xff] %v8872_v51  ;;  %p5328_p1 = scmp.ne.s32.totalorder %s5326_s12, %s5327_s2 }
 0x3e0   : > { %3297 = vrot.lane.b32.xlu0 %v8648_v16, %s5403_s16  ;;  %v2895_v17 = vadd.f32 %v2887_v58, %v8752_v56 }
 0x3e1   : > { %v2911_v47 = vpop.permute.xlu1 %2910  ;;  %v8893_v51 = vpop.permute.xlu2 %3042  ;;  %p5329_p4 = pnand %p5328_p1, %p5541_p3 }
 0x3e2   : > { %v2909_v53 = vpop.permute.xlu0 %2908  ;;  %v8877_v60 = vsel %vm763_vm4, %v2903_v1, %v2911_v47  ;;  %v8881_v14 = vsel %vm763_vm4, %v2911_v47, %v2903_v1  ;;  %v2894_v47 = vadd.f32 %v2886_v35, %v8750_v7  ;;  %v3019_v35 = vld [vmem:[#allocation11 + $0x198] sm:$0xff] }
 0x3e3   : > { %11390 = vst [vmem:[#allocation99_spill] sm:$0xff] %v8881_v14  ;;  %v8886_v22 = vsel %vm763_vm4, %v8715_v63, %v2909_v53  ;;  %v8891_v19 = vsel %vm763_vm4, %v2909_v53, %v8715_v63  ;;  %v2958_v5 = vmul.f32 %v2950_v27, %v8877_v60  ;;  %v2959_v34 = vmul.f32 %v2951_v2, %v8881_v14  ;;  %p5330_p8 = pneg %p5329_p4 }
 0x3e4   : > { %11391 = vst [vmem:[#allocation68_spill] sm:$0xff] %v8891_v19  ;;  %v2956_v23 = vmul.f32 %v2948_v10, %v8886_v22  ;;  %v2957_v1 = vmul.f32 %v2949_v50, %v8891_v19 }
 0x3e5   : > { %v2966_v36 = vadd.f32 %v2958_v5, %v2894_v47  ;;  %v2967_v3 = vadd.f32 %v2959_v34, %v2895_v17 }
 0x3e6   : > { %v2964_v63 = vadd.f32 %v2956_v23, %v2892_v31  ;;  %v2965_v53 = vadd.f32 %v2957_v1, %v2893_v11  ;;  %v3018_v31 = vld [vmem:[#allocation11 + $0x190] sm:$0xff] }
 0x3e7   : > { %3305 = vrot.lane.b32.xlu1 %v8725_v48, %s5403_s16  ;;  %3307 = vrot.lane.b32.xlu2 %v8720_v39, %s5403_s16 }
 0x3e8   : > { %3303 = vrot.lane.b32.xlu0 %v8687_v24, %s5403_s16 }
 0x3e9   : > { %v2973_v7 = vpop.permute.xlu1 %2972  ;;  %v3049_v11 = vpop.permute.xlu2 %3048 }
 0x3ea   : > { %v2971_v56 = vpop.permute.xlu0 %2970  ;;  %v8911_v2 = vsel %vm838_vm5, %v2973_v7, %v2981_v20  ;;  %v8915_v5 = vsel %vm838_vm5, %v2981_v20, %v2973_v7  ;;  %v3016_v20 = vld [vmem:[#allocation11 + $0x180] sm:$0xff] }
 0x3eb   : > { %11392 = vst [vmem:[#allocation76_spill] sm:$0xff] %v8915_v5  ;;  %v3028_v34 = vmul.f32 %v3020_v13, %v8911_v2  ;;  %v3029_v17 = vmul.f32 %v3021_v46, %v8915_v5 }
 0x3ed   : > { %v8919_v23 = vadd.f32 %v3028_v34, %v2964_v63  ;;  %v8921_v32 = vadd.f32 %v3029_v17, %v2965_v53 }
 0x3ef   : > { %3311 = vrot.lane.b32.xlu1 %v8755_v30, %s5403_s16  ;;  %3345 = vrot.lane.b32.xlu2 %v8648_v16, %s5404_s11 }
 0x3f0   : > { %3309 = vrot.lane.b32.xlu0 %v8728_v41, %s5403_s16 }
 0x3f1   : > { %v2979_v10 = vpop.permute.xlu1 %2978  ;;  %v3055_v63 = vpop.permute.xlu2 %3054 }
 0x3f2   : > { %v2977_v50 = vpop.permute.xlu0 %2976  ;;  %v8931_v58 = vsel %vm838_vm5, %v2971_v56, %v2979_v10  ;;  %v8935_v27 = vsel %vm838_vm5, %v2979_v10, %v2971_v56 }
 0x3f3   : > { %11393 = vst [vmem:[#allocation49_spill] sm:$0xff] %v8935_v27  ;;  %v8940_v1 = vsel %vm838_vm5, %v8781_v28, %v2977_v50  ;;  %v8945_v47 = vsel %vm838_vm5, %v2977_v50, %v8781_v28  ;;  %v3026_v46 = vmul.f32 %v3018_v31, %v8931_v58  ;;  %v3027_v7 = vmul.f32 %v3019_v35, %v8935_v27  ;;  %v3022_v28 = vld [vmem:[#allocation11 + $0x1b0] sm:$0xff]  ;;  %v3089_v31 = vld [vmem:[#allocation11 + $0x1c8] sm:$0xff] }
 0x3f4   : > { %v3024_v53 = vmul.f32 %v3016_v20, %v8940_v1  ;;  %v3025_v13 = vmul.f32 %v3017_v4, %v8945_v47  ;;  %v3023_v20 = vld [vmem:[#allocation11 + $0x1b8] sm:$0xff] }
 0x3f5   : > { %v3034_v17 = vadd.f32 %v3026_v46, %v8819_v43  ;;  %v3035_v10 = vadd.f32 %v3027_v7, %v8821_v37 }
 0x3f6   : > { %v3032_v56 = vadd.f32 %v3024_v53, %v8849_v38  ;;  %v3033_v34 = vadd.f32 %v3025_v13, %v8851_v21  ;;  %v3088_v38 = vld [vmem:[#allocation11 + $0x1c0] sm:$0xff] }
 0x3f7   : > { %3349 = vrot.lane.b32.xlu1 %v8677_v54, %s5404_s11  ;;  %3351 = vrot.lane.b32.xlu2 %v8687_v24, %s5404_s11 }
 0x3f8   : > { %3347 = vrot.lane.b32.xlu0 %v8682_v44, %s5404_s11 }
 0x3f9   : > { %v3041_v4 = vpop.permute.xlu1 %3040  ;;  %v8979_v53 = vpop.permute.xlu2 %3116 }
 0x3fa   : > { %v2983_v50 = vpop.permute.xlu0 %2982  ;;  %v8963_v43 = vsel %vm913_vm6, %v3041_v4, %v3049_v11  ;;  %v8967_v37 = vsel %vm913_vm6, %v3049_v11, %v3041_v4 }
 0x3fb   : > { %11394 = vst [vmem:[#allocation73_spill] sm:$0xff] %v8967_v37  ;;  %v8972_v21 = vsel %vm838_vm5, %v8817_v9, %v2983_v50  ;;  %v8977_v35 = vsel %vm838_vm5, %v2983_v50, %v8817_v9  ;;  %v3096_v7 = vmul.f32 %v3088_v38, %v8963_v43  ;;  %v3097_v11 = vmul.f32 %v3089_v31, %v8967_v37  ;;  %v3094_v9 = vld [vmem:[#allocation11 + $0x1f0] sm:$0xff] }
 0x3fc   : > { %11395 = vst [vmem:[#allocation53_spill] sm:$0xff] %v8972_v21  ;;  %v3030_v13 = vmul.f32 %v3022_v28, %v8972_v21  ;;  %v3031_v46 = vmul.f32 %v3023_v20, %v8977_v35  ;;  %v3095_v28 = vld [vmem:[#allocation11 + $0x1f8] sm:$0xff] }
 0x3fd   : > { %11396 = vst [vmem:[#allocation70_spill] sm:$0xff] %v8977_v35  ;;  %v8985_v19 = vadd.f32 %v3096_v7, %v3032_v56  ;;  %v8987_v14 = vadd.f32 %v3097_v11, %v3033_v34 }
 0x3fe   : > { %v3038_v4 = vadd.f32 %v3030_v13, %v2966_v36  ;;  %v3039_v5 = vadd.f32 %v3031_v46, %v2967_v3  ;;  %v3091_v46 = vld [vmem:[#allocation11 + $0x1d8] sm:$0xff] }
 0x3ff   : > { %3355 = vrot.lane.b32.xlu1 %v8720_v39, %s5404_s11  ;;  %3357 = vrot.lane.b32.xlu2 %v8728_v41, %s5404_s11 }
 0x400   : > { %3353 = vrot.lane.b32.xlu0 %v8725_v48, %s5404_s11 }
 0x401   : > { %v3047_v20 = vpop.permute.xlu1 %3046  ;;  %v3123_v38 = vpop.permute.xlu2 %3122 }
 0x402   : > { %v3045_v50 = vpop.permute.xlu0 %3044  ;;  %v8997_v3 = vsel %vm913_vm6, %v3047_v20, %v3055_v63  ;;  %v9001_v36 = vsel %vm913_vm6, %v3055_v63, %v3047_v20  ;;  %v3090_v63 = vld [vmem:[#allocation11 + $0x1d0] sm:$0xff] }
 0x403   : > { %11397 = vst [vmem:[#allocation67_spill] sm:$0xff] %v8997_v3  ;;  %v3102_v56 = vmul.f32 %v3094_v9, %v8997_v3  ;;  %v3103_v34 = vmul.f32 %v3095_v28, %v9001_v36  ;;  %v3092_v9 = vld [vmem:[#allocation11 + $0x1e0] sm:$0xff]  ;;  %v3093_v28 = vld [vmem:[#allocation11 + $0x1e8] sm:$0xff] }
 0x404   : > { %11398 = vst [vmem:[#allocation69_spill] sm:$0xff] %v9001_v36 }
 0x405   : > { %v9005_v31 = vadd.f32 %v3102_v56, %v3038_v4  ;;  %v9007_v13 = vadd.f32 %v3103_v34, %v3039_v5 }
 0x407   : > { %3417 = vrot.lane.b32.xlu1 %v8648_v16, %s5405_s29  ;;  %3419 = vrot.lane.b32.xlu2 %v8682_v44, %s5405_s29 }
 0x408   : > { %3359 = vrot.lane.b32.xlu0 %v8755_v30, %s5404_s11 }
 0x409   : > { %v3053_v7 = vpop.permute.xlu1 %3052  ;;  %v9033_v34 = vpop.permute.xlu2 %3201 }
 0x40a   : > { %v3051_v11 = vpop.permute.xlu0 %3050  ;;  %v9017_v4 = vsel %vm913_vm6, %v3045_v50, %v3053_v7  ;;  %v9021_v5 = vsel %vm913_vm6, %v3053_v7, %v3045_v50  ;;  %11400 = vst [vmem:[#allocation72_spill] sm:$0xff] %v9033_v34 }
 0x40b   : > { %11399 = vst [vmem:[#allocation75_spill] sm:$0xff] %v9021_v5  ;;  %v9026_v20 = vsel %vm913_vm6, %v8893_v51, %v3051_v11  ;;  %v9031_v56 = vsel %vm913_vm6, %v3051_v11, %v8893_v51  ;;  %v3100_v3 = vmul.f32 %v3092_v9, %v9017_v4  ;;  %v3101_v50 = vmul.f32 %v3093_v28, %v9021_v5  ;;  %v3162_v51 = vld [vmem:[#allocation11 + $0x210] sm:$0xff]  ;;  %v3160_v9 = vld [vmem:[#allocation11 + $0x200] sm:$0xff]  ;;  %v3161_v28 = vld [vmem:[#allocation11 + $0x208] sm:$0xff] }
 0x40c   : > { %v3098_v36 = vmul.f32 %v3090_v63, %v9026_v20  ;;  %v3099_v35 = vmul.f32 %v3091_v46, %v9031_v56  ;;  %v3163_v63 = vld [vmem:[#allocation11 + $0x218] sm:$0xff] }
 0x40d   : > { %v3108_v27 = vadd.f32 %v3100_v3, %v8919_v23  ;;  %v3109_v21 = vadd.f32 %v3101_v50, %v8921_v32 }
 0x40e   : > { %v3106_v7 = vadd.f32 %v3098_v36, %v3034_v17  ;;  %v3107_v37 = vadd.f32 %v3099_v35, %v3035_v10 }
 0x40f   : > { %3423 = vrot.lane.b32.xlu1 %v8687_v24, %s5405_s29  ;;  %3425 = vrot.lane.b32.xlu2 %v8725_v48, %s5405_s29 }
 0x410   : > { %3421 = vrot.lane.b32.xlu0 %v8677_v54, %s5405_s29 }
 0x411   : > { %v3115_v46 = vpop.permute.xlu1 %3114  ;;  %v9057_v35 = vpop.permute.xlu2 %3207 }
 0x412   : > { %v3113_v11 = vpop.permute.xlu0 %3112  ;;  %v9049_v17 = vsel %vm988_vm7, %v3115_v46, %v3123_v38  ;;  %v9053_v23 = vsel %vm988_vm7, %v3123_v38, %v3115_v46  ;;  %11402 = vst [vmem:[#allocation62_spill] sm:$0xff] %v9057_v35 }
 0x413   : > { %11401 = vst [vmem:[#allocation47_spill] sm:$0xff] %v9053_v23  ;;  %v3170_v32 = vmul.f32 %v3162_v51, %v9049_v17  ;;  %v3171_v10 = vmul.f32 %v3163_v63, %v9053_v23  ;;  %v2663_v23 = vld [vmem:[#allocation9 + $0x78] sm:$0xff] }
 0x415   : > { %v9059_v3 = vadd.f32 %v3170_v32, %v3106_v7  ;;  %v9061_v36 = vadd.f32 %v3171_v10, %v3107_v37 }
 0x417   : > { %11403 = vst [vmem:[#allocation41_spill] sm:$0xff] %v9059_v3  ;;  %3429 = vrot.lane.b32.xlu1 %v8728_v41, %s5405_s29  ;;  %3431 = vrot.lane.b32.xlu2 %v8755_v30, %s5405_s29  ;;  %v3167_v3 = vld [vmem:[#allocation11 + $0x238] sm:$0xff] }
 0x418   : > { %11404 = vst [vmem:[#allocation35_spill] sm:$0xff] %v9061_v36  ;;  %3427 = vrot.lane.b32.xlu0 %v8720_v39, %s5405_s29  ;;  %v3166_v36 = vld [vmem:[#allocation11 + $0x230] sm:$0xff] }
 0x419   : > { %v3121_v38 = vpop.permute.xlu1 %3120  ;;  %v9079_v46 = vpop.permute.xlu2 %3213 }
 0x41a   : > { %v3119_v50 = vpop.permute.xlu0 %3118  ;;  %v9071_v51 = vsel %vm988_vm7, %v3113_v11, %v3121_v38  ;;  %v9075_v37 = vsel %vm988_vm7, %v3121_v38, %v3113_v11  ;;  %11405 = vst [vmem:[#allocation36_spill] sm:$0xff] %v9079_v46  ;;  %v3164_v11 = vld [vmem:[#allocation11 + $0x220] sm:$0xff] }
 0x41b   : > { %v3168_v7 = vmul.f32 %v3160_v9, %v9071_v51  ;;  %v3169_v63 = vmul.f32 %v3161_v28, %v9075_v37  ;;  %v3165_v9 = vld [vmem:[#allocation11 + $0x228] sm:$0xff] }
 0x41d   : > { %v9082_v32 = vadd.f32 %v3168_v7, %v8985_v19  ;;  %v9085_v10 = vadd.f32 %v3169_v63, %v8987_v14 }
 0x41f   : > { %11406 = vst [vmem:[#allocation77_spill] sm:$0xff] %v9082_v32  ;;  %3467 = vrot.lane.b32.xlu1 %v8682_v44, %s5406_s7  ;;  %3469 = vrot.lane.b32.xlu2 %v8677_v54, %s5406_s7 }
 0x420   : > { %11407 = vst [vmem:[#allocation32_spill] sm:$0xff] %v9085_v10  ;;  %3465 = vrot.lane.b32.xlu0 %v8648_v16, %s5406_s7 }
 0x421   : > { %v3127_v28 = vpop.permute.xlu1 %3126  ;;  %v9111_v10 = vpop.permute.xlu2 %3251 }
 0x422   : > { %v3125_v38 = vpop.permute.xlu0 %3124  ;;  %v9095_v19 = vsel %vm988_vm7, %v3119_v50, %v3127_v28  ;;  %v9099_v14 = vsel %vm988_vm7, %v3127_v28, %v3119_v50  ;;  %11411 = vst [vmem:[#allocation54_spill] sm:$0xff] %v9111_v10  ;;  %v2659_v10 = vld [vmem:[#allocation9 + $0x58] sm:$0xff] }
 0x423   : > { %11408 = vst [vmem:[#allocation74_spill] sm:$0xff] %v9095_v19  ;;  %v9104_v7 = vsel %vm988_vm7, %v8979_v53, %v3125_v38  ;;  %v9109_v63 = vsel %vm988_vm7, %v3125_v38, %v8979_v53  ;;  %v3174_v34 = vmul.f32 %v3166_v36, %v9095_v19  ;;  %v3175_v50 = vmul.f32 %v3167_v3, %v9099_v14  ;;  %v2584_v38 = vld [vmem:[#allocation9] sm:$0xff]  ;;  %v2730_v19 = vld [vmem:[#allocation9 + $0x90] sm:$0xff] }
 0x424   : > { %11409 = vst [vmem:[#allocation63_spill] sm:$0xff] %v9099_v14  ;;  %v3172_v32 = vmul.f32 %v3164_v11, %v9104_v7  ;;  %v3173_v35 = vmul.f32 %v3165_v9, %v9109_v63  ;;  %v2661_v14 = vld [vmem:[#allocation9 + $0x68] sm:$0xff] }
 0x425   : > { %11410 = vst [vmem:[#allocation33_spill] sm:$0xff] %v9109_v63  ;;  %v9122_v5 = vadd.f32 %v3174_v34, %v9005_v31  ;;  %v9125_v53 = vadd.f32 %v3175_v50, %v9007_v13  ;;  %v2585_v50 = vld [vmem:[#allocation9 + $0x8] sm:$0xff] }
 0x426   : > { %v9117_v28 = vadd.f32 %v3172_v32, %v3108_v27  ;;  %v9119_v46 = vadd.f32 %v3173_v35, %v3109_v21 }
 0x427   : > { %11414 = vst [vmem:[#allocation42_spill] sm:$0xff] %v9122_v5  ;;  %3473 = vrot.lane.b32.xlu1 %v8725_v48, %s5406_s7  ;;  %3475 = vrot.lane.b32.xlu2 %v8720_v39, %s5406_s7  ;;  %v2658_v5 = vld [vmem:[#allocation9 + $0x50] sm:$0xff] }
 0x428   : > { %11412 = vst [vmem:[#allocation39_spill] sm:$0xff] %v9117_v28  ;;  %3471 = vrot.lane.b32.xlu0 %v8687_v24, %s5406_s7  ;;  %v2591_v28 = vld [vmem:[#allocation9 + $0x38] sm:$0xff] }
 0x429   : > { %11413 = vst [vmem:[#allocation80_spill] sm:$0xff] %v9119_v46  ;;  %v9133_v3 = vpop.permute.xlu1 %3205  ;;  %v9137_v21 = vpop.permute.xlu2 %3257  ;;  %v2590_v46 = vld [vmem:[#allocation9 + $0x30] sm:$0xff] }
 0x42a   : > { %11415 = vst [vmem:[#allocation37_spill] sm:$0xff] %v9125_v53  ;;  %v9135_v27 = vpop.permute.xlu0 %3203  ;;  %v2598_v6 = vmul.f32 %v2590_v46, %v8597_v42  ;;  %v2728_v42 = vld [vmem:[#allocation9 + $0x80] sm:$0xff] }
 0x42b   : > { %11416 = vst [vmem:[#allocation51_spill] sm:$0xff] %v9133_v3  ;;  %v2667_v3 = vmul.f32 %v2659_v10, %v8525_v18 }
 0x42c   : > { %11417 = vst [vmem:[#allocation38_spill] sm:$0xff] %v9135_v27  ;;  %v2588_v27 = vld [vmem:[#allocation9 + $0x20] sm:$0xff] }
 0x42d   : > { %11418 = vst [vmem:[#allocation52_spill] sm:$0xff] %v9137_v21  ;;  %v2662_v21 = vld [vmem:[#allocation9 + $0x70] sm:$0xff]  ;;  %v2596_v46 = vmul.f32 %v2588_v27, %v8583_v49  ;;  %v2736_v27 = vmul.f32 %v2728_v42, %v8672_v0 }
 0x42f   : > { %3479 = vrot.lane.b32.xlu1 %v8755_v30, %s5406_s7  ;;  %3513 = vrot.lane.b32.xlu2 %v8648_v16, %s5407_s9 }
 0x430   : > { %3477 = vrot.lane.b32.xlu0 %v8728_v41, %s5406_s7 }
 0x431   : > { %v9145_v31 = vpop.permute.xlu1 %3211  ;;  %v9149_v34 = vpop.permute.xlu2 %3263 }
 0x432   : > { %11419 = vst [vmem:[#allocation59_spill] sm:$0xff] %v9145_v31  ;;  %v9147_v13 = vpop.permute.xlu0 %3209  ;;  %v2589_v31 = vld [vmem:[#allocation9 + $0x28] sm:$0xff] }
 0x433   : > { %11420 = vst [vmem:[#allocation60_spill] sm:$0xff] %v9147_v13  ;;  %v2592_v13 = vmul.f32 %v2584_v38, %v8551_v59  ;;  %v2597_v10 = vmul.f32 %v2589_v31, %v8579_v45  ;;  %v2804_v31 = vld [vmem:[#allocation9 + $0xe0] sm:$0xff] }
 0x434   : > { %11421 = vst [vmem:[#allocation57_spill] sm:$0xff] %v9149_v34  ;;  %v2656_v34 = vld [vmem:[#allocation9 + $0x40] sm:$0xff] }
 0x435   : > { %v2664_v63 = vmul.f32 %v2656_v34, %v8563_v61  ;;  %v2671_v34 = vmul.f32 %v2663_v23, %v8601_v33  ;;  %v11430_v38 = vld [vmem:[#allocation89_spill] sm:$0xff]  ;;  %v2801_v33 = vld [vmem:[#allocation9 + $0xc8] sm:$0xff] }
 0x436   : > { %v11431_v23 = vld [vmem:[#allocation94_spill] sm:$0xff] }
 0x437   : > { %3517 = vrot.lane.b32.xlu1 %v8677_v54, %s5407_s9  ;;  %3519 = vrot.lane.b32.xlu2 %v8687_v24, %s5407_s9  ;;  %v2672_v45 = vadd.f32 %v2664_v63, %v2592_v13  ;;  %v11434_v63 = vld [vmem:[#allocation84_spill] sm:$0xff] }
 0x438   : > { %3515 = vrot.lane.b32.xlu0 %v8682_v44, %s5407_s9 }
 0x439   : > { %v9157_v35 = vpop.permute.xlu1 %3249  ;;  %v9161_v32 = vpop.permute.xlu2 %3301 }
 0x43a   : > { %11422 = vst [vmem:[#allocation58_spill] sm:$0xff] %v9157_v35  ;;  %v9159_v36 = vpop.permute.xlu0 %3215  ;;  %v2657_v35 = vld [vmem:[#allocation9 + $0x48] sm:$0xff] }
 0x43b   : > { %11423 = vst [vmem:[#allocation28_spill] sm:$0xff] %v9159_v36  ;;  %v2587_v36 = vld [vmem:[#allocation9 + $0x18] sm:$0xff] }
 0x43c   : > { %11424 = vst [vmem:[#allocation30_spill] sm:$0xff] %v9161_v32  ;;  %v2586_v32 = vld [vmem:[#allocation9 + $0x10] sm:$0xff]  ;;  %v2595_v61 = vmul.f32 %v2587_v36, %v8512_v26  ;;  %v2800_v26 = vld [vmem:[#allocation9 + $0xc0] sm:$0xff] }
 0x43d   : > { %v2594_v59 = vmul.f32 %v2586_v32, %v8517_v15  ;;  %v2733_v15 = vld [vmem:[#allocation9 + $0xa8] sm:$0xff]  ;;  %v2738_v32 = vmul.f32 %v2730_v19, %v8662_v12  ;;  %v11432_v12 = vld [vmem:[#allocation91_spill] sm:$0xff]  ;;  %v2808_v13 = vmul.f32 %v2800_v26, %v11434_v63  ;;  %v2920_v26 = vld [vmem:[#allocation9 + $0x140] sm:$0xff] }
 0x43e   : > { %v2675_v49 = vadd.f32 %v2667_v3, %v2595_v61  ;;  %v2735_v3 = vld [vmem:[#allocation9 + $0xb8] sm:$0xff]  ;;  %v2744_v61 = vadd.f32 %v2736_v27, %v2672_v45 }
 0x43f   : > { %3523 = vrot.lane.b32.xlu1 %v8720_v39, %s5407_s9  ;;  %3525 = vrot.lane.b32.xlu2 %v8728_v41, %s5407_s9 }
 0x440   : > { %3521 = vrot.lane.b32.xlu0 %v8725_v48, %s5407_s9 }
 0x441   : > { %v9169_v11 = vpop.permute.xlu1 %3255  ;;  %v9173_v53 = vpop.permute.xlu2 %3307 }
 0x442   : > { %11425 = vst [vmem:[#allocation45_spill] sm:$0xff] %v9169_v11  ;;  %v9171_v9 = vpop.permute.xlu0 %3253  ;;  %v2666_v11 = vmul.f32 %v2658_v5, %v8529_v52  ;;  %v2599_v52 = vmul.f32 %v2591_v28, %v8591_v25  ;;  %v2732_v5 = vld [vmem:[#allocation9 + $0xa0] sm:$0xff]  ;;  %v2802_v28 = vld [vmem:[#allocation9 + $0xd0] sm:$0xff] }
 0x443   : > { %11426 = vst [vmem:[#allocation43_spill] sm:$0xff] %v9171_v9  ;;  %v2660_v9 = vld [vmem:[#allocation9 + $0x60] sm:$0xff] }
 0x444   : > { %11427 = vst [vmem:[#allocation65_spill] sm:$0xff] %v9173_v53  ;;  %v2593_v53 = vmul.f32 %v2585_v50, %v8546_v29  ;;  %v2670_v29 = vmul.f32 %v2662_v21, %v8605_v8  ;;  %v2668_v25 = vmul.f32 %v2660_v9, %v8615_v55  ;;  %v2674_v8 = vadd.f32 %v2666_v11, %v2594_v59 }
 0x445   : > { %v2669_v21 = vmul.f32 %v2661_v14, %v8610_v57  ;;  %v2740_v55 = vmul.f32 %v2732_v5, %v8639_v62  ;;  %v2741_v57 = vmul.f32 %v2733_v15, %v11430_v38  ;;  %v2734_v14 = vld [vmem:[#allocation9 + $0xb0] sm:$0xff]  ;;  %v2810_v50 = vmul.f32 %v2802_v28, %v11431_v23  ;;  %v11437_v15 = vld [vmem:[#allocation40_spill] sm:$0xff] }
 0x446   : > { %v2678_v11 = vadd.f32 %v2670_v29, %v2598_v6  ;;  %v2676_v59 = vadd.f32 %v2668_v25, %v2596_v46  ;;  %v2850_v62 = vld [vmem:[#allocation9 + $0x110] sm:$0xff]  ;;  %v2679_v0 = vadd.f32 %v2671_v34, %v2599_v52  ;;  %v2746_v42 = vadd.f32 %v2738_v32, %v2674_v8  ;;  %v11436_v46 = vld [vmem:[#allocation29_spill] sm:$0xff]  ;;  %v11440_v38 = vld [vmem:[#allocation24_spill] sm:$0xff] }
 0x447   : > { %3561 = vrot.lane.b32.xlu1 %v8648_v16, %s5408_s15  ;;  %v2665_v16 = vmul.f32 %v2657_v35, %v8559_v40  ;;  %3563 = vrot.lane.b32.xlu2 %v8682_v44, %s5408_s15  ;;  %v2729_v44 = vld [vmem:[#allocation9 + $0x88] sm:$0xff]  ;;  %v2731_v35 = vld [vmem:[#allocation9 + $0x98] sm:$0xff]  ;;  %v2677_v5 = vadd.f32 %v2669_v21, %v2597_v10  ;;  %v2742_v25 = vmul.f32 %v2734_v14, %v11436_v46  ;;  %v2806_v21 = vld [vmem:[#allocation9 + $0xf0] sm:$0xff] }
 0x448   : > { %3527 = vrot.lane.b32.xlu0 %v8755_v30, %s5407_s9  ;;  %v2737_v19 = vmul.f32 %v2729_v44, %v11432_v12  ;;  %v2748_v29 = vadd.f32 %v2740_v55, %v2676_v59  ;;  %v2809_v28 = vmul.f32 %v2801_v33, %v11437_v15  ;;  %v2922_v44 = vld [vmem:[#allocation9 + $0x150] sm:$0xff]  ;;  %v11438_v10 = vld [vmem:[#allocation100_spill] sm:$0xff]  ;;  %v2818_v34 = vadd.f32 %v2810_v50, %v2746_v42  ;;  %v11439_v32 = vld [vmem:[#allocation97_spill] sm:$0xff] }
 0x449   : > { %v9191_v18 = vpop.permute.xlu1 %3261  ;;  %v9202_v36 = vpop.permute.xlu2 %3345  ;;  %v2673_v9 = vadd.f32 %v2665_v16, %v2593_v53  ;;  %v11435_v53 = vld [vmem:[#allocation81_spill] sm:$0xff]  ;;  %v9218_v52 = vadd.f32 %v2741_v57, %v2677_v5  ;;  %v2743_v8 = vmul.f32 %v2735_v3, %v11438_v10  ;;  %v2994_v57 = vld [vmem:[#allocation9 + $0x190] sm:$0xff]  ;;  %v2803_v23 = vld [vmem:[#allocation9 + $0xd8] sm:$0xff] }
 0x44a   : > { %11428 = vst [vmem:[#allocation66_spill] sm:$0xff] %v9191_v18  ;;  %v9197_v40 = vpop.permute.xlu0 %3259  ;;  %v11433_v18 = vld [vmem:[#allocation88_spill] sm:$0xff]  ;;  %v2812_v6 = vmul.f32 %v2804_v31, %v11435_v53  ;;  %v2848_v16 = vld [vmem:[#allocation9 + $0x100] sm:$0xff]  ;;  %v2816_v31 = vadd.f32 %v2808_v13, %v2744_v61  ;;  %v11441_v50 = vld [vmem:[#allocation98_spill] sm:$0xff] }
 0x44b   : > { %11429 = vst [vmem:[#allocation55_spill] sm:$0xff] %v9202_v36  ;;  %v2739_v36 = vmul.f32 %v2731_v35, %v11433_v18  ;;  %v2851_v18 = vld [vmem:[#allocation9 + $0x118] sm:$0xff]  ;;  %v2852_v35 = vld [vmem:[#allocation9 + $0x120] sm:$0xff]  ;;  %v2745_v55 = vadd.f32 %v2737_v19, %v2673_v9  ;;  %v2856_v14 = vmul.f32 %v11440_v38, %v2848_v16  ;;  %v11444_v19 = vld [vmem:[#allocation87_spill] sm:$0xff] }
 0x44c   : > { %v2820_v59 = vadd.f32 %v2812_v6, %v2748_v29  ;;  %v9230_v12 = vmul.f32 %v11441_v50, %v2851_v18  ;;  %v11442_v3 = vld [vmem:[#allocation25_spill] sm:$0xff]  ;;  %v2814_v13 = vmul.f32 %v2806_v21, %v11444_v19  ;;  %v11445_v53 = vld [vmem:[#allocation90_spill] sm:$0xff]  ;;  %v3066_v46 = vld [vmem:[#allocation9 + $0x1d0] sm:$0xff]  ;;  %v9238_v6 = vadd.f32 %v2743_v8, %v2679_v0 }
 0x44d   : > { %v2747_v27 = vadd.f32 %v2739_v36, %v2675_v49  ;;  %v2930_v63 = vmul.f32 %v2922_v44, %v11442_v3  ;;  %v2992_v42 = vld [vmem:[#allocation9 + $0x180] sm:$0xff]  ;;  %v2750_v36 = vadd.f32 %v2742_v25, %v2678_v11  ;;  %v2817_v49 = vadd.f32 %v2809_v28, %v2745_v55  ;;  %v2854_v18 = vld [vmem:[#allocation9 + $0x130] sm:$0xff]  ;;  %v11446_v10 = vld [vmem:[#allocation64_spill] sm:$0xff] }
 0x44e   : > { %v2928_v16 = vmul.f32 %v2920_v26, %v11445_v53  ;;  %v2996_v61 = vld [vmem:[#allocation9 + $0x1a0] sm:$0xff]  ;;  %v3002_v44 = vmul.f32 %v2994_v57, %v8931_v58  ;;  %v11447_v38 = vld [vmem:[#allocation95_spill] sm:$0xff]  ;;  %v2864_v25 = vadd.f32 %v2856_v14, %v2816_v31  ;;  %v3000_v28 = vmul.f32 %v2992_v42, %v8940_v1  ;;  %v2807_v14 = vld [vmem:[#allocation9 + $0xf8] sm:$0xff] }
 0x44f   : > { %3567 = vrot.lane.b32.xlu1 %v8687_v24, %s5408_s15  ;;  %v2858_v24 = vmul.f32 %v11439_v32, %v2850_v62  ;;  %3569 = vrot.lane.b32.xlu2 %v8725_v48, %s5408_s15  ;;  %v2849_v62 = vld [vmem:[#allocation9 + $0x108] sm:$0xff]  ;;  %v11443_v48 = vld [vmem:[#allocation96_spill] sm:$0xff]  ;;  %v2811_v32 = vmul.f32 %v2803_v23, %v11446_v10  ;;  %v3068_v21 = vld [vmem:[#allocation9 + $0x1e0] sm:$0xff]  ;;  %v3004_v0 = vmul.f32 %v2996_v61, %v8911_v2 }
 0x450   : > { %3565 = vrot.lane.b32.xlu0 %v8677_v54, %s5408_s15  ;;  %v2924_v54 = vld [vmem:[#allocation9 + $0x160] sm:$0xff]  ;;  %v2860_v5 = vmul.f32 %v11443_v48, %v2852_v35  ;;  %v2857_v11 = vmul.f32 %v11447_v38, %v2849_v62  ;;  %v3138_v26 = vld [vmem:[#allocation9 + $0x210] sm:$0xff]  ;;  %v3074_v8 = vmul.f32 %v3066_v46, %v9026_v20  ;;  %v2822_v58 = vadd.f32 %v2814_v13, %v2750_v36  ;;  %v2923_v62 = vld [vmem:[#allocation9 + $0x158] sm:$0xff] }
 0x451   : > { %v9224_v45 = vpop.permute.xlu1 %3299  ;;  %v9234_v9 = vpop.permute.xlu2 %3351  ;;  %v2866_v29 = vadd.f32 %v2858_v24, %v2818_v34  ;;  %v2932_v15 = vmul.f32 %v2924_v54, %v8886_v22  ;;  %v3064_v35 = vld [vmem:[#allocation9 + $0x1c0] sm:$0xff]  ;;  %v2921_v34 = vld [vmem:[#allocation9 + $0x148] sm:$0xff]  ;;  %v2936_v24 = vadd.f32 %v2928_v16, %v2864_v25  ;;  %v11448_v54 = vld [vmem:[#allocation27_spill] sm:$0xff]  ;;  %v3076_v20 = vmul.f32 %v3068_v21, %v9017_v4 }
 0x452   : > { %v9227_v33 = vpop.permute.xlu0 %3297  ;;  %v2868_v50 = vadd.f32 %v2860_v5, %v2820_v59  ;;  %v3136_v22 = vld [vmem:[#allocation9 + $0x200] sm:$0xff]  ;;  %v2862_v57 = vmul.f32 %v11448_v54, %v2854_v18  ;;  %v3072_v31 = vmul.f32 %v3064_v35, %v8963_v43  ;;  %v2926_v2 = vld [vmem:[#allocation9 + $0x170] sm:$0xff]  ;;  %v3146_v3 = vmul.f32 %v3138_v26, %v9049_v17  ;;  %v2993_v48 = vld [vmem:[#allocation9 + $0x188] sm:$0xff] }
 0x453   : > { %v2938_v55 = vadd.f32 %v2930_v63, %v2866_v29  ;;  %v3140_v1 = vld [vmem:[#allocation9 + $0x220] sm:$0xff]  ;;  %v2819_v63 = vadd.f32 %v2811_v32, %v2747_v27  ;;  %v2865_v43 = vadd.f32 %v2857_v11, %v2817_v49  ;;  %v3008_v5 = vadd.f32 %v3000_v28, %v2936_v24  ;;  %v2805_v36 = vld [vmem:[#allocation9 + $0xe8] sm:$0xff]  ;;  %v2998_v53 = vld [vmem:[#allocation9 + $0x1b0] sm:$0xff] }
 0x454   : > { %v2940_v23 = vadd.f32 %v2932_v15, %v2868_v50  ;;  %v11449_v19 = vld [vmem:[#allocation61_spill] sm:$0xff]  ;;  %v3148_v16 = vmul.f32 %v3140_v1, %v9104_v7  ;;  %v11450_v61 = vld [vmem:[#allocation92_spill] sm:$0xff]  ;;  %v2870_v46 = vadd.f32 %v2862_v57, %v2822_v58  ;;  %v2934_v49 = vmul.f32 %v2926_v2, %v8877_v60  ;;  %v3065_v15 = vld [vmem:[#allocation9 + $0x1c8] sm:$0xff] }
 0x455   : > { %v3010_v59 = vadd.f32 %v3002_v44, %v2938_v55  ;;  %v2929_v13 = vmul.f32 %v2921_v34, %v11449_v19  ;;  %v2815_v27 = vmul.f32 %v2807_v14, %v11450_v61  ;;  %v2995_v29 = vld [vmem:[#allocation9 + $0x198] sm:$0xff]  ;;  %v11451_v18 = vld [vmem:[#allocation101_spill] sm:$0xff]  ;;  %v3001_v10 = vmul.f32 %v2993_v48, %v8945_v47  ;;  %v3070_v32 = vld [vmem:[#allocation9 + $0x1f0] sm:$0xff] }
 0x456   : > { %v3012_v4 = vadd.f32 %v3004_v0, %v2940_v23  ;;  %v2931_v44 = vmul.f32 %v2923_v62, %v11451_v18  ;;  %v2855_v35 = vld [vmem:[#allocation9 + $0x138] sm:$0xff]  ;;  %v11453_v7 = vld [vmem:[#allocation86_spill] sm:$0xff]  ;;  %v2867_v28 = vadd.f32 %v9230_v12, %v2819_v63  ;;  %v11454_v21 = vld [vmem:[#allocation53_spill] sm:$0xff]  ;;  %v2942_v14 = vadd.f32 %v2934_v49, %v2870_v46 }
 0x457   : > { %3573 = vrot.lane.b32.xlu1 %v8728_v41, %s5408_s15  ;;  %3575 = vrot.lane.b32.xlu2 %v8755_v30, %s5408_s15  ;;  %v3082_v17 = vadd.f32 %v3074_v8, %v3010_v59  ;;  %v2813_v25 = vmul.f32 %v2805_v36, %v11453_v7  ;;  %v3006_v26 = vmul.f32 %v2998_v53, %v11454_v21  ;;  %v3067_v55 = vld [vmem:[#allocation9 + $0x1d8] sm:$0xff]  ;;  %v3137_v60 = vld [vmem:[#allocation9 + $0x208] sm:$0xff]  ;;  %v11456_v34 = vld [vmem:[#allocation73_spill] sm:$0xff] }
 0x458   : > { %3571 = vrot.lane.b32.xlu0 %v8720_v39, %s5408_s15  ;;  %v3144_v39 = vmul.f32 %v3136_v22, %v9071_v51  ;;  %v3080_v51 = vadd.f32 %v3072_v31, %v3008_v5  ;;  %v3084_v38 = vadd.f32 %v3076_v20, %v3012_v4  ;;  %v2937_v0 = vadd.f32 %v2929_v13, %v2865_v43  ;;  %v2853_v8 = vld [vmem:[#allocation9 + $0x128] sm:$0xff]  ;;  %v11455_v22 = vld [vmem:[#allocation49_spill] sm:$0xff]  ;;  %v3142_v54 = vld [vmem:[#allocation9 + $0x230] sm:$0xff] }
 0x459   : > { %v9257_v41 = vpop.permute.xlu1 %3305  ;;  %v9264_v30 = vpop.permute.xlu2 %3357  ;;  %v9270_v11 = vadd.f32 %v3146_v3, %v3082_v17  ;;  %v3003_v58 = vmul.f32 %v2995_v29, %v11455_v22  ;;  %v3073_v47 = vmul.f32 %v3065_v15, %v11456_v34  ;;  %v2823_v12 = vadd.f32 %v2815_v27, %v9238_v6  ;;  %v11457_v57 = vld [vmem:[#allocation26_spill] sm:$0xff]  ;;  %v2927_v1 = vld [vmem:[#allocation9 + $0x178] sm:$0xff]  ;;  %v11458_v23 = vld [vmem:[#allocation67_spill] sm:$0xff] }
 0x45a   : > { %v9260_v42 = vpop.permute.xlu0 %3303  ;;  %v9275_v50 = vadd.f32 %v3144_v39, %v3080_v51  ;;  %v9279_v24 = vadd.f32 %v3148_v16, %v3084_v38  ;;  %v2863_v31 = vmul.f32 %v11457_v57, %v2855_v35  ;;  %v3078_v2 = vmul.f32 %v3070_v32, %v11458_v23  ;;  %v3139_v59 = vld [vmem:[#allocation9 + $0x218] sm:$0xff]  ;;  %v2925_v3 = vld [vmem:[#allocation9 + $0x168] sm:$0xff]  ;;  %v11459_v5 = vld [vmem:[#allocation93_spill] sm:$0xff] }
 0x45b   : > { %11452 = vst [vmem:[#allocation71_spill] sm:$0xff] %v9270_v11  ;;  %v2939_v20 = vadd.f32 %v2931_v44, %v2867_v28  ;;  %v3009_v63 = vadd.f32 %v3001_v10, %v2937_v0  ;;  %v3075_v62 = vmul.f32 %v3067_v55, %v9031_v56  ;;  %v3145_v43 = vmul.f32 %v3137_v60, %v9075_v37  ;;  %v2999_v36 = vld [vmem:[#allocation9 + $0x1b8] sm:$0xff]  ;;  %v11460_v13 = vld [vmem:[#allocation74_spill] sm:$0xff]  ;;  %v11461_v17 = vld [vmem:[#allocation99_spill] sm:$0xff] }
 0x45c   : > { %v2821_v48 = vadd.f32 %v2813_v25, %v9218_v52  ;;  %v2861_v39 = vmul.f32 %v11459_v5, %v2853_v8  ;;  %v3014_v19 = vadd.f32 %v3006_v26, %v2942_v14  ;;  %v3150_v4 = vmul.f32 %v3142_v54, %v11460_v13  ;;  %v2997_v56 = vld [vmem:[#allocation9 + $0x1a8] sm:$0xff]  ;;  %v11462_v27 = vld [vmem:[#allocation47_spill] sm:$0xff]  ;;  %v11463_v29 = vld [vmem:[#allocation68_spill] sm:$0xff] }
 0x45d   : > { %v2935_v16 = vmul.f32 %v2927_v1, %v11461_v17  ;;  %v3011_v61 = vadd.f32 %v3003_v58, %v2939_v20  ;;  %v3081_v37 = vadd.f32 %v3073_v47, %v3009_v63  ;;  %v3147_v46 = vmul.f32 %v3139_v59, %v11462_v27  ;;  %v3071_v52 = vld [vmem:[#allocation9 + $0x1f8] sm:$0xff]  ;;  %v11464_v44 = vld [vmem:[#allocation70_spill] sm:$0xff]  ;;  %v11466_v60 = vld [vmem:[#allocation69_spill] sm:$0xff] }
 0x45e   : > { %v2933_v15 = vmul.f32 %v2925_v3, %v11463_v29  ;;  %v3086_v51 = vadd.f32 %v3078_v2, %v3014_v19  ;;  %v2871_v18 = vadd.f32 %v2863_v31, %v2823_v12  ;;  %v3007_v35 = vmul.f32 %v2999_v36, %v11464_v44  ;;  %v3069_v32 = vld [vmem:[#allocation9 + $0x1e8] sm:$0xff]  ;;  %v11465_v25 = vld [vmem:[#allocation76_spill] sm:$0xff]  ;;  %v11467_v34 = vld [vmem:[#allocation75_spill] sm:$0xff] }
 0x45f   : > { %3611 = vrot.lane.b32.xlu1 %v9270_v11, %s5401_s27  ;;  %3613 = vrot.lane.b32.xlu2 %v9279_v24, %s5401_s27  ;;  %v3083_v10 = vadd.f32 %v3075_v62, %v3011_v61  ;;  %v9305_v38 = vadd.f32 %v3145_v43, %v3081_v37  ;;  %v2869_v7 = vadd.f32 %v2861_v39, %v2821_v48  ;;  %v3143_v21 = vld [vmem:[#allocation9 + $0x238] sm:$0xff]  ;;  %v3141_v22 = vld [vmem:[#allocation9 + $0x228] sm:$0xff]  ;;  %v11468_v12 = vld [vmem:[#allocation63_spill] sm:$0xff] }
 0x460   : > { %3609 = vrot.lane.b32.xlu0 %v9275_v50, %s5401_s27  ;;  %v3005_v28 = vmul.f32 %v2997_v56, %v11465_v25  ;;  %v9308_v26 = vadd.f32 %v3150_v4, %v3086_v51  ;;  %v2943_v55 = vadd.f32 %v2935_v16, %v2871_v18  ;;  %v3079_v0 = vmul.f32 %v3071_v52, %v11466_v60  ;;  %v11469_v14 = vld [vmem:[#allocation33_spill] sm:$0xff]  ;;  %v3230_v27 = vld [vmem:[#allocation8 + $0x28] sm:$0xff]  ;;  %v11475_v29 = vld [vmem:[#allocation51_spill] sm:$0xff] }
 0x461   : > { %v9292_v6 = vpop.permute.xlu1 %3311  ;;  %v9301_v49 = vpop.permute.xlu2 %3419  ;;  %v9311_v8 = vadd.f32 %v3147_v46, %v3083_v10  ;;  %v2941_v58 = vadd.f32 %v2933_v15, %v2869_v7  ;;  %v3077_v47 = vmul.f32 %v3069_v32, %v11467_v34  ;;  %v3151_v57 = vmul.f32 %v3143_v21, %v11468_v12  ;;  %v3229_v37 = vld [vmem:[#allocation8 + $0x20] sm:$0xff]  ;;  %v11474_v46 = vld [vmem:[#allocation36_spill] sm:$0xff]  ;;  %v3227_v18 = vld [vmem:[#allocation8 + $0x10] sm:$0xff] }
 0x462   : > { %v9297_v53 = vpop.permute.xlu0 %3309  ;;  %v3015_v54 = vadd.f32 %v3007_v35, %v2943_v55  ;;  %v3149_v23 = vmul.f32 %v3141_v22, %v11469_v14  ;;  %v3219_v52 = vsel %vm415_vm0, %v11475_v29, %v11474_v46  ;;  %v3223_v51 = vsel %vm415_vm0, %v11474_v46, %v11475_v29  ;;  %v3228_v44 = vld [vmem:[#allocation8 + $0x18] sm:$0xff]  ;;  %v11477_v35 = vld [vmem:[#allocation59_spill] sm:$0xff]  ;;  %v11478_v10 = vld [vmem:[#allocation38_spill] sm:$0xff] }
 0x463   : > { %v3013_v1 = vadd.f32 %v3005_v28, %v2941_v58  ;;  %v3218_v32 = vsel %vm415_vm0, %v11478_v10, %v11477_v35  ;;  %v3222_v7 = vsel %vm415_vm0, %v11477_v35, %v11478_v10  ;;  %v3225_v25 = vld [vmem:[#allocation8] sm:$0xff]  ;;  %v3226_v28 = vld [vmem:[#allocation8 + $0x8] sm:$0xff]  ;;  %v11479_v21 = vld [vmem:[#allocation60_spill] sm:$0xff]  ;;  %v9408_v22 = vmul.f32 %v3229_v37, %v3223_v51 }
 0x464   : > { %v3087_v59 = vadd.f32 %v3079_v0, %v3015_v54  ;;  %v11480_v55 = vld [vmem:[#allocation72_spill] sm:$0xff]  ;;  %v9410_v58 = vmul.f32 %v3230_v27, %v3219_v52  ;;  %v3273_v34 = vld [vmem:[#allocation8 + $0x40] sm:$0xff]  ;;  %v11482_v12 = vld [vmem:[#allocation58_spill] sm:$0xff] }
 0x465   : > { %v3085_v3 = vadd.f32 %v3077_v47, %v3013_v1  ;;  %v3217_v60 = vsel %vm415_vm0, %v11480_v55, %v11479_v21  ;;  %v3221_v0 = vsel %vm415_vm0, %v11479_v21, %v11480_v55  ;;  %v3274_v47 = vld [vmem:[#allocation8 + $0x48] sm:$0xff]  ;;  %v11481_v54 = vld [vmem:[#allocation52_spill] sm:$0xff]  ;;  %v3279_v21 = vld [vmem:[#allocation8 + $0x70] sm:$0xff] }
 0x466   : > { %v9328_v63 = vadd.f32 %v3151_v57, %v3087_v59  ;;  %v3265_v57 = vsel %vm488_vm1, %v11482_v12, %v11481_v54  ;;  %v3269_v1 = vsel %vm488_vm1, %v11481_v54, %v11482_v12  ;;  %v3236_v59 = vmul.f32 %v3228_v44, %v3218_v32  ;;  %v3232_v37 = vld [vmem:[#allocation8 + $0x38] sm:$0xff]  ;;  %v11485_v46 = vld [vmem:[#allocation62_spill] sm:$0xff]  ;;  %v11488_v44 = vld [vmem:[#allocation45_spill] sm:$0xff] }
 0x467   : > { %3617 = vrot.lane.b32.xlu1 %v9305_v38, %s5401_s27  ;;  %3619 = vrot.lane.b32.xlu2 %v9311_v8, %s5401_s27  ;;  %v9330_v62 = vadd.f32 %v3149_v23, %v3085_v3  ;;  %v3235_v23 = vmul.f32 %v3227_v18, %v3222_v7  ;;  %v3231_v3 = vld [vmem:[#allocation8 + $0x30] sm:$0xff]  ;;  %v11484_v27 = vld [vmem:[#allocation28_spill] sm:$0xff]  ;;  %v3233_v35 = vmul.f32 %v3225_v25, %v3221_v0  ;;  %v11487_v18 = vld [vmem:[#allocation57_spill] sm:$0xff] }
 0x468   : > { %3615 = vrot.lane.b32.xlu0 %v9308_v26, %s5401_s27  ;;  %v3220_v29 = vsel %vm415_vm0, %v11485_v46, %v11484_v27  ;;  %v3224_v52 = vsel %vm415_vm0, %v11484_v27, %v11485_v46  ;;  %v3234_v10 = vmul.f32 %v3226_v28, %v3217_v60  ;;  %v3280_v55 = vld [vmem:[#allocation8 + $0x78] sm:$0xff]  ;;  %v3268_v32 = vsel %vm488_vm1, %v11488_v44, %v11487_v18  ;;  %v3275_v46 = vld [vmem:[#allocation8 + $0x50] sm:$0xff]  ;;  %v11490_v25 = vld [vmem:[#allocation54_spill] sm:$0xff] }
 0x469   : > { %v9321_v31 = vpop.permute.xlu1 %3349  ;;  %v9326_v20 = vpop.permute.xlu2 %3425  ;;  %v3272_v7 = vsel %vm488_vm1, %v11487_v18, %v11488_v44  ;;  %v3281_v12 = vmul.f32 %v3273_v34, %v3269_v1  ;;  %v3282_v27 = vmul.f32 %v3274_v47, %v3265_v57  ;;  %v3266_v28 = vsel %vm488_vm1, %v11490_v25, %v9197_v40  ;;  %v3278_v18 = vld [vmem:[#allocation8 + $0x68] sm:$0xff] }
 0x46a   : > { %v9324_v2 = vpop.permute.xlu0 %3347  ;;  %v3270_v60 = vsel %vm488_vm1, %v9197_v40, %v11490_v25  ;;  %v3239_v0 = vmul.f32 %v3231_v3, %v3224_v52  ;;  %v11491_v44 = vld [vmem:[#allocation66_spill] sm:$0xff]  ;;  %v3287_v57 = vmul.f32 %v3279_v21, %v3272_v7  ;;  %v3288_v1 = vmul.f32 %v3280_v55, %v3268_v32  ;;  %v3321_v52 = vld [vmem:[#allocation8 + $0x80] sm:$0xff] }
 0x46b   : > { %v3322_v25 = vld [vmem:[#allocation8 + $0x88] sm:$0xff]  ;;  %v3313_v21 = vsel %vm563_vm2, %v9227_v33, %v9257_v41  ;;  %v3317_v55 = vsel %vm563_vm2, %v9257_v41, %v9227_v33  ;;  %v3289_v33 = vadd.f32 %v3281_v12, %v3233_v35  ;;  %v3290_v41 = vadd.f32 %v3282_v27, %v3234_v10 }
 0x46f   : > { %3623 = vrot.lane.b32.xlu1 %v9328_v63, %s5401_s27  ;;  %3661 = vrot.lane.b32.xlu2 %v9275_v50, %s5402_s18 }
 0x470   : > { %3621 = vrot.lane.b32.xlu0 %v9330_v62, %s5401_s27 }
 0x471   : > { %v9338_v43 = vpop.permute.xlu1 %3355  ;;  %v9342_v5 = vpop.permute.xlu2 %3431 }
 0x472   : > { %v9340_v48 = vpop.permute.xlu0 %3353  ;;  %11470 = vst [vmem:[#allocation22_spill] sm:$0xff] %v9342_v5  ;;  %v3323_v5 = vld [vmem:[#allocation8 + $0x90] sm:$0xff] }
 0x477   : > { %3665 = vrot.lane.b32.xlu1 %v9279_v24, %s5402_s18  ;;  %3667 = vrot.lane.b32.xlu2 %v9308_v26, %s5402_s18 }
 0x478   : > { %3663 = vrot.lane.b32.xlu0 %v9270_v11, %s5402_s18 }
 0x479   : > { %v9350_v39 = vpop.permute.xlu1 %3417  ;;  %v9354_v19 = vpop.permute.xlu2 %3469 }
 0x47a   : > { %v9352_v36 = vpop.permute.xlu0 %3359 }
 0x47f   : > { %3671 = vrot.lane.b32.xlu1 %v9311_v8, %s5402_s18  ;;  %3673 = vrot.lane.b32.xlu2 %v9330_v62, %s5402_s18 }
 0x480   : > { %3669 = vrot.lane.b32.xlu0 %v9305_v38, %s5402_s18 }
 0x481   : > { %v9362_v13 = vpop.permute.xlu1 %3423  ;;  %v9366_v17 = vpop.permute.xlu2 %3475 }
 0x482   : > { %11471 = vst [vmem:[#allocation48_spill] sm:$0xff] %v9362_v13  ;;  %v9364_v4 = vpop.permute.xlu0 %3421  ;;  %v3277_v13 = vld [vmem:[#allocation8 + $0x60] sm:$0xff] }
 0x483   : > { %11472 = vst [vmem:[#allocation34_spill] sm:$0xff] %v9366_v17  ;;  %v11493_v17 = vld [vmem:[#allocation65_spill] sm:$0xff] }
 0x484   : > { %v3314_v40 = vsel %vm563_vm2, %v9224_v45, %v11493_v17  ;;  %v3318_v3 = vsel %vm563_vm2, %v11493_v17, %v9224_v45  ;;  %v3325_v45 = vld [vmem:[#allocation8 + $0xa0] sm:$0xff]  ;;  %v3326_v17 = vld [vmem:[#allocation8 + $0xa8] sm:$0xff] }
 0x487   : > { %3713 = vrot.lane.b32.xlu1 %v9275_v50, %s5403_s16  ;;  %3715 = vrot.lane.b32.xlu2 %v9270_v11, %s5403_s16 }
 0x488   : > { %3675 = vrot.lane.b32.xlu0 %v9328_v63, %s5402_s18 }
 0x489   : > { %v9374_v16 = vpop.permute.xlu1 %3429  ;;  %v9378_v61 = vpop.permute.xlu2 %3513 }
 0x48a   : > { %v9376_v56 = vpop.permute.xlu0 %3427  ;;  %11473 = vst [vmem:[#allocation82_spill] sm:$0xff] %v9378_v61  ;;  %v3276_v61 = vld [vmem:[#allocation8 + $0x58] sm:$0xff] }
 0x48f   : > { %3719 = vrot.lane.b32.xlu1 %v9308_v26, %s5403_s16  ;;  %3721 = vrot.lane.b32.xlu2 %v9305_v38, %s5403_s16 }
 0x490   : > { %3717 = vrot.lane.b32.xlu0 %v9279_v24, %s5403_s16 }
 0x491   : > { %v9422_v14 = vpop.permute.xlu1 %3467  ;;  %v9442_v54 = vpop.permute.xlu2 %3519 }
 0x492   : > { %11483 = vst [vmem:[#allocation46_spill] sm:$0xff] %v9422_v14  ;;  %v9432_v51 = vpop.permute.xlu0 %3465  ;;  %v3324_v14 = vld [vmem:[#allocation8 + $0x98] sm:$0xff] }
 0x493   : > { %11486 = vst [vmem:[#allocation78_spill] sm:$0xff] %v9432_v51  ;;  %v3240_v51 = vmul.f32 %v3232_v37, %v3220_v29  ;;  %v3283_v37 = vmul.f32 %v3275_v46, %v3270_v60  ;;  %v3284_v29 = vmul.f32 %v3276_v61, %v3266_v28  ;;  %v11494_v61 = vld [vmem:[#allocation30_spill] sm:$0xff]  ;;  %v3331_v28 = vmul.f32 %v3323_v5, %v3318_v3 }
 0x494   : > { %11489 = vst [vmem:[#allocation50_spill] sm:$0xff] %v9442_v54  ;;  %v11492_v54 = vld [vmem:[#allocation43_spill] sm:$0xff]  ;;  %v3319_v46 = vsel %vm563_vm2, %v9297_v53, %v11494_v61  ;;  %v3367_v5 = vsel %vm638_vm3, %v9264_v30, %v9321_v31  ;;  %v3394_v3 = vld [vmem:[#allocation8 + $0x108] sm:$0xff] }
 0x495   : > { %v3267_v34 = vsel %vm488_vm1, %v11492_v54, %v11491_v44  ;;  %v3271_v47 = vsel %vm488_vm1, %v11491_v44, %v11492_v54  ;;  %v3315_v54 = vsel %vm563_vm2, %v11494_v61, %v9297_v53  ;;  %v3330_v44 = vmul.f32 %v3322_v25, %v3313_v21 }
 0x496   : > { %v3285_v32 = vmul.f32 %v3277_v13, %v3271_v47  ;;  %v3286_v7 = vmul.f32 %v3278_v18, %v3267_v34  ;;  %v3332_v13 = vmul.f32 %v3324_v14, %v3314_v40  ;;  %v3329_v18 = vmul.f32 %v3321_v52, %v3317_v55  ;;  %v3373_v34 = vld [vmem:[#allocation8 + $0xe0] sm:$0xff]  ;;  %v3374_v47 = vld [vmem:[#allocation8 + $0xe8] sm:$0xff] }
 0x497   : > { %3725 = vrot.lane.b32.xlu1 %v9330_v62, %s5403_s16  ;;  %3727 = vrot.lane.b32.xlu2 %v9328_v63, %s5403_s16  ;;  %v3363_v53 = vsel %vm638_vm3, %v9321_v31, %v9264_v30  ;;  %v3291_v35 = vadd.f32 %v3283_v37, %v3235_v23  ;;  %v3292_v10 = vadd.f32 %v3284_v29, %v3236_v59  ;;  %v3393_v40 = vld [vmem:[#allocation8 + $0x100] sm:$0xff] }
 0x498   : > { %3723 = vrot.lane.b32.xlu0 %v9311_v8, %s5403_s16  ;;  %v3333_v12 = vmul.f32 %v3325_v45, %v3319_v46  ;;  %v3334_v27 = vmul.f32 %v3326_v17, %v3315_v54  ;;  %v9504_v25 = vadd.f32 %v3287_v57, %v3239_v0  ;;  %v9506_v21 = vadd.f32 %v3288_v1, %v3240_v51  ;;  %v5109_v17 = vld [vmem:[%s5614_s13 + $0x40] sm:$0xff]  ;;  %v5110_v0 = vld [vmem:[%s5614_s13 + $0x48] sm:$0xff]  ;;  %v3372_v54 = vld [vmem:[#allocation8 + $0xd8] sm:$0xff] }
 0x499   : > { %v9490_v60 = vpop.permute.xlu1 %3473  ;;  %v9502_v52 = vpop.permute.xlu2 %3525  ;;  %v3293_v55 = vadd.f32 %v3285_v32, %v9408_v22  ;;  %v3294_v30 = vadd.f32 %v3286_v7, %v9410_v58  ;;  %v9510_v31 = vadd.f32 %v3331_v28, %v3291_v35  ;;  %v9512_v23 = vadd.f32 %v3332_v13, %v3292_v10  ;;  %v3397_v57 = vld [vmem:[#allocation8 + $0x120] sm:$0xff]  ;;  %v3398_v22 = vld [vmem:[#allocation8 + $0x128] sm:$0xff]  ;;  %v3327_v32 = vld [vmem:[#allocation8 + $0xb0] sm:$0xff] }
 0x49a   : > { %v9500_v14 = vpop.permute.xlu0 %3471  ;;  %v3381_v59 = vmul.f32 %v3373_v34, %v3367_v5  ;;  %v3382_v37 = vmul.f32 %v3374_v47, %v3363_v53  ;;  %v9514_v29 = vadd.f32 %v3329_v18, %v3289_v33  ;;  %v9516_v45 = vadd.f32 %v3330_v44, %v3290_v41  ;;  %v3371_v7 = vld [vmem:[#allocation8 + $0xd0] sm:$0xff]  ;;  %v3328_v41 = vld [vmem:[#allocation8 + $0xb8] sm:$0xff]  ;;  %v3369_v18 = vld [vmem:[#allocation8 + $0xc0] sm:$0xff] }
 0x49b   : > { %v9519_v61 = vmul.f32 %v5109_v17, %v3393_v40  ;;  %v9522_v51 = vmul.f32 %v5110_v0, %v3394_v3  ;;  %v3341_v1 = vadd.f32 %v3333_v12, %v3293_v55  ;;  %v3342_v58 = vadd.f32 %v3334_v27, %v3294_v30  ;;  %v3370_v44 = vld [vmem:[#allocation8 + $0xc8] sm:$0xff]  ;;  %v11495_v34 = vld [vmem:[#allocation55_spill] sm:$0xff]  ;;  %v3400_v35 = vld [vmem:[#allocation8 + $0x138] sm:$0xff] }
 0x49c   : > { %v3362_v46 = vsel %vm638_vm3, %v9324_v2, %v9338_v43  ;;  %v3366_v33 = vsel %vm638_vm3, %v9338_v43, %v9324_v2  ;;  %v3316_v28 = vsel %vm563_vm2, %v9260_v42, %v9292_v6  ;;  %v3320_v13 = vsel %vm563_vm2, %v9292_v6, %v9260_v42  ;;  %v3399_v5 = vld [vmem:[#allocation8 + $0x130] sm:$0xff]  ;;  %v5111_v6 = vld [vmem:[%s5614_s13 + $0x60] sm:$0xff]  ;;  %v5112_v12 = vld [vmem:[%s5614_s13 + $0x68] sm:$0xff] }
 0x49d   : > { %v3361_v2 = vsel %vm638_vm3, %v11495_v34, %v9340_v48  ;;  %v3365_v43 = vsel %vm638_vm3, %v9340_v48, %v11495_v34  ;;  %v3389_v47 = vadd.f32 %v3381_v59, %v3341_v1  ;;  %v3390_v53 = vadd.f32 %v3382_v37, %v3342_v58  ;;  %v3395_v42 = vld [vmem:[#allocation8 + $0x110] sm:$0xff]  ;;  %v3396_v55 = vld [vmem:[#allocation8 + $0x118] sm:$0xff]  ;;  %v3445_v30 = vld [vmem:[#allocation8 + $0x160] sm:$0xff] }
 0x49e   : > { %v3405_v10 = vmul.f32 %v5111_v6, %v3397_v57  ;;  %v3406_v27 = vmul.f32 %v5112_v12, %v3398_v22  ;;  %v3379_v48 = vmul.f32 %v3371_v7, %v3366_v33  ;;  %v3380_v3 = vmul.f32 %v3372_v54, %v3362_v46  ;;  %v3446_v59 = vld [vmem:[#allocation8 + $0x168] sm:$0xff]  ;;  %v5113_v54 = vld [vmem:[%s5614_s13 + $0x70] sm:$0xff]  ;;  %v5114_v33 = vld [vmem:[%s5614_s13 + $0x78] sm:$0xff] }
 0x49f   : > { %3767 = vrot.lane.b32.xlu1 %v9270_v11, %s5404_s11  ;;  %3769 = vrot.lane.b32.xlu2 %v9279_v24, %s5404_s11  ;;  %v3435_v37 = vsel %vm763_vm4, %v9364_v4, %v9374_v16  ;;  %v3439_v17 = vsel %vm763_vm4, %v9374_v16, %v9364_v4  ;;  %v9566_v57 = vmul.f32 %v3327_v32, %v3320_v13  ;;  %v3493_v6 = vld [vmem:[#allocation8 + $0x1a0] sm:$0xff]  ;;  %v3494_v12 = vld [vmem:[#allocation8 + $0x1a8] sm:$0xff]  ;;  %v5115_v32 = vld [vmem:[%s5614_s13 + $0x50] sm:$0xff] }
 0x4a0   : > { %3765 = vrot.lane.b32.xlu0 %v9275_v50, %s5404_s11  ;;  %v9568_v22 = vmul.f32 %v3328_v41, %v3316_v28  ;;  %v3377_v1 = vmul.f32 %v3369_v18, %v3365_v43  ;;  %v3378_v58 = vmul.f32 %v3370_v44, %v3361_v2  ;;  %v9573_v46 = vmul.f32 %v5113_v54, %v3399_v5  ;;  %v5116_v28 = vld [vmem:[%s5614_s13 + $0x58] sm:$0xff] }
 0x4a1   : > { %v9556_v40 = vpop.permute.xlu1 %3479  ;;  %v9570_v7 = vpop.permute.xlu2 %3563  ;;  %v9576_v34 = vmul.f32 %v5114_v33, %v3400_v35  ;;  %v3403_v41 = vmul.f32 %v5115_v32, %v3395_v42  ;;  %v3404_v13 = vmul.f32 %v5116_v28, %v3396_v55  ;;  %v3453_v18 = vmul.f32 %v3445_v30, %v3435_v37  ;;  %v11498_v55 = vld [vmem:[#allocation46_spill] sm:$0xff]  ;;  %v3441_v28 = vld [vmem:[#allocation8 + $0x140] sm:$0xff] }
 0x4a2   : > { %v3478_v0 = vpop.permute.xlu0 %3477  ;;  %11496 = vst [vmem:[#allocation79_spill] sm:$0xff] %v9570_v7  ;;  %v3454_v44 = vmul.f32 %v3446_v59, %v3439_v17  ;;  %v3387_v2 = vadd.f32 %v3379_v48, %v9510_v31  ;;  %v3388_v43 = vadd.f32 %v3380_v3, %v9512_v23  ;;  %v3413_v5 = vadd.f32 %v3405_v10, %v3389_v47  ;;  %v3542_v47 = vld [vmem:[#allocation8 + $0x1e8] sm:$0xff]  ;;  %v3443_v10 = vld [vmem:[#allocation8 + $0x150] sm:$0xff] }
 0x4a3   : > { %v3483_v4 = vsel %vm838_vm5, %v9354_v19, %v3478_v0  ;;  %v3487_v16 = vsel %vm838_vm5, %v3478_v0, %v9354_v19  ;;  %v3414_v35 = vadd.f32 %v3406_v27, %v3390_v53  ;;  %v3385_v54 = vadd.f32 %v3377_v1, %v9514_v29  ;;  %v3375_v19 = vld [vmem:[#allocation8 + $0xf0] sm:$0xff]  ;;  %v3376_v53 = vld [vmem:[#allocation8 + $0xf8] sm:$0xff]  ;;  %v11497_v3 = vld [vmem:[#allocation34_spill] sm:$0xff] }
 0x4a4   : > { %v3386_v33 = vadd.f32 %v3378_v58, %v9516_v45  ;;  %v3501_v7 = vmul.f32 %v3493_v6, %v3483_v4  ;;  %v3502_v11 = vmul.f32 %v3494_v12, %v3487_v16  ;;  %v3364_v42 = vsel %vm638_vm3, %v9234_v9, %v9352_v36  ;;  %v3541_v45 = vld [vmem:[#allocation8 + $0x1e0] sm:$0xff]  ;;  %v3444_v27 = vld [vmem:[#allocation8 + $0x158] sm:$0xff]  ;;  %v3491_v17 = vld [vmem:[#allocation8 + $0x190] sm:$0xff] }
 0x4a5   : > { %v3368_v31 = vsel %vm638_vm3, %v9352_v36, %v9234_v9  ;;  %v3433_v23 = vsel %vm763_vm4, %v9350_v39, %v9326_v20  ;;  %v3437_v29 = vsel %vm763_vm4, %v9326_v20, %v9350_v39  ;;  %v3434_v9 = vsel %vm763_vm4, %v9301_v49, %v9376_v56  ;;  %v3492_v0 = vld [vmem:[#allocation8 + $0x198] sm:$0xff] }
 0x4a6   : > { %v3438_v36 = vsel %vm763_vm4, %v9376_v56, %v9301_v49  ;;  %v3461_v48 = vadd.f32 %v3453_v18, %v3413_v5  ;;  %v3462_v20 = vadd.f32 %v3454_v44, %v3414_v35  ;;  %v3482_v30 = vsel %vm838_vm5, %v11498_v55, %v11497_v3  ;;  %v3442_v18 = vld [vmem:[#allocation8 + $0x148] sm:$0xff] }
 0x4a7   : > { %3773 = vrot.lane.b32.xlu1 %v9305_v38, %s5404_s11  ;;  %3775 = vrot.lane.b32.xlu2 %v9311_v8, %s5404_s11  ;;  %v3486_v59 = vsel %vm838_vm5, %v11497_v3, %v11498_v55  ;;  %v3383_v16 = vmul.f32 %v3375_v19, %v3368_v31  ;;  %v3384_v32 = vmul.f32 %v3376_v53, %v3364_v42 }
 0x4a8   : > { %3771 = vrot.lane.b32.xlu0 %v9308_v26, %s5404_s11  ;;  %v3509_v1 = vadd.f32 %v3501_v7, %v3461_v48  ;;  %v3510_v58 = vadd.f32 %v3502_v11, %v3462_v20  ;;  %v3451_v44 = vmul.f32 %v3443_v10, %v3434_v9  ;;  %v3452_v5 = vmul.f32 %v3444_v27, %v3438_v36 }
 0x4a9   : > { %v3518_v39 = vpop.permute.xlu1 %3517  ;;  %v9634_v4 = vpop.permute.xlu2 %3569  ;;  %v3343_v35 = vadd.f32 %v9566_v57, %v9504_v25  ;;  %v3411_v11 = vadd.f32 %v3403_v41, %v3387_v2  ;;  %v3500_v48 = vmul.f32 %v3492_v0, %v3486_v59  ;;  %v3409_v19 = vadd.f32 %v9519_v61, %v3385_v54  ;;  %v3539_v41 = vld [vmem:[#allocation8 + $0x1d0] sm:$0xff]  ;;  %v3448_v2 = vld [vmem:[#allocation8 + $0x178] sm:$0xff] }
 0x4aa   : > { %v3516_v37 = vpop.permute.xlu0 %3515  ;;  %v3531_v49 = vsel %vm913_vm6, %v3518_v39, %v9502_v52  ;;  %v3535_v56 = vsel %vm913_vm6, %v9502_v52, %v3518_v39  ;;  %v3344_v52 = vadd.f32 %v9568_v22, %v9506_v21  ;;  %v3410_v42 = vadd.f32 %v9522_v51, %v3386_v33  ;;  %v3447_v21 = vld [vmem:[#allocation8 + $0x170] sm:$0xff]  ;;  %v11500_v61 = vld [vmem:[#allocation48_spill] sm:$0xff]  ;;  %v3489_v33 = vld [vmem:[#allocation8 + $0x180] sm:$0xff] }
 0x4ab   : > { %v3549_v6 = vmul.f32 %v3541_v45, %v3531_v49  ;;  %v3550_v12 = vmul.f32 %v3542_v47, %v3535_v56  ;;  %v3412_v45 = vadd.f32 %v3404_v13, %v3388_v43  ;;  %v3499_v47 = vmul.f32 %v3491_v17, %v3482_v30  ;;  %v3540_v13 = vld [vmem:[#allocation8 + $0x1d8] sm:$0xff]  ;;  %v11499_v43 = vld [vmem:[#allocation22_spill] sm:$0xff]  ;;  %v3537_v49 = vld [vmem:[#allocation8 + $0x1c0] sm:$0xff] }
 0x4ac   : > { %v3449_v31 = vmul.f32 %v3441_v28, %v3433_v23  ;;  %v3450_v53 = vmul.f32 %v3442_v18, %v3437_v29  ;;  %v3391_v25 = vadd.f32 %v3383_v16, %v3343_v35  ;;  %v3392_v57 = vadd.f32 %v3384_v32, %v3344_v52  ;;  %v3490_v23 = vld [vmem:[#allocation8 + $0x188] sm:$0xff]  ;;  %v3495_v18 = vld [vmem:[#allocation8 + $0x1b0] sm:$0xff] }
 0x4ad   : > { %v9640_v39 = vadd.f32 %v3549_v6, %v3509_v1  ;;  %v9642_v7 = vadd.f32 %v3550_v12, %v3510_v58  ;;  %v3459_v22 = vadd.f32 %v3451_v44, %v3411_v11  ;;  %v3460_v10 = vadd.f32 %v3452_v5, %v3412_v45  ;;  %v11501_v29 = vld [vmem:[#allocation78_spill] sm:$0xff]  ;;  %v3496_v44 = vld [vmem:[#allocation8 + $0x1b8] sm:$0xff] }
 0x4ae   : > { %v3436_v51 = vsel %vm763_vm4, %v11500_v61, %v11499_v43  ;;  %v3440_v54 = vsel %vm763_vm4, %v11499_v43, %v11500_v61  ;;  %v3481_v27 = vsel %vm838_vm5, %v11501_v29, %v9490_v60  ;;  %v3485_v9 = vsel %vm838_vm5, %v9490_v60, %v11501_v29  ;;  %v3538_v56 = vld [vmem:[#allocation8 + $0x1c8] sm:$0xff] }
 0x4af   : > { %3779 = vrot.lane.b32.xlu1 %v9328_v63, %s5404_s11  ;;  %3843 = vrot.lane.b32.xlu2 %v9275_v50, %s5405_s29  ;;  %v3507_v20 = vadd.f32 %v3499_v47, %v3459_v22  ;;  %v3508_v3 = vadd.f32 %v3500_v48, %v3460_v10  ;;  %v11502_v17 = vld [vmem:[#allocation82_spill] sm:$0xff]  ;;  %v3455_v12 = vmul.f32 %v3447_v21, %v3436_v51 }
 0x4b0   : > { %3777 = vrot.lane.b32.xlu0 %v9330_v62, %s5404_s11  ;;  %v3456_v16 = vmul.f32 %v3448_v2, %v3440_v54  ;;  %v3497_v32 = vmul.f32 %v3489_v33, %v3481_v27  ;;  %v3498_v28 = vmul.f32 %v3490_v23, %v3485_v9  ;;  %v3488_v5 = vsel %vm838_vm5, %v9556_v40, %v9500_v14  ;;  %v3586_v43 = vld [vmem:[#allocation8 + $0x208] sm:$0xff] }
 0x4b1   : > { %v3524_v36 = vpop.permute.xlu1 %3523  ;;  %v3576_v6 = vpop.permute.xlu2 %3575  ;;  %v3457_v11 = vadd.f32 %v3449_v31, %v3409_v19  ;;  %v3458_v45 = vadd.f32 %v3450_v53, %v3410_v42  ;;  %v3415_v21 = vadd.f32 %v9573_v46, %v3391_v25  ;;  %v3416_v22 = vadd.f32 %v9576_v34, %v3392_v57  ;;  %v3543_v46 = vld [vmem:[#allocation8 + $0x1f0] sm:$0xff]  ;;  %v3544_v31 = vld [vmem:[#allocation8 + $0x1f8] sm:$0xff]  ;;  %v11504_v54 = vld [vmem:[#allocation50_spill] sm:$0xff] }
 0x4b2   : > { %v3522_v55 = vpop.permute.xlu0 %3521  ;;  %v3530_v30 = vsel %vm913_vm6, %v3516_v37, %v3524_v36  ;;  %v3534_v59 = vsel %vm913_vm6, %v3524_v36, %v3516_v37  ;;  %v3484_v37 = vsel %vm838_vm5, %v9500_v14, %v9556_v40  ;;  %v3504_v2 = vmul.f32 %v3496_v44, %v3488_v5  ;;  %v11503_v14 = vld [vmem:[#allocation71_spill] sm:$0xff]  ;;  %v3585_v40 = vld [vmem:[#allocation8 + $0x200] sm:$0xff] }
 0x4b3   : > { %v3529_v0 = vsel %vm913_vm6, %v11502_v17, %v3522_v55  ;;  %v3533_v60 = vsel %vm913_vm6, %v3522_v55, %v11502_v17  ;;  %v3547_v1 = vmul.f32 %v3539_v41, %v3530_v30  ;;  %v3548_v58 = vmul.f32 %v3540_v13, %v3534_v59  ;;  %v3592_v17 = vld [vmem:[#allocation8 + $0x238] sm:$0xff]  ;;  %v3589_v44 = vld [vmem:[#allocation8 + $0x220] sm:$0xff]  ;;  %v3587_v5 = vld [vmem:[#allocation8 + $0x210] sm:$0xff] }
 0x4b4   : > { %v3545_v47 = vmul.f32 %v3537_v49, %v3529_v0  ;;  %v3546_v48 = vmul.f32 %v3538_v56, %v3533_v60  ;;  %v3505_v10 = vadd.f32 %v3497_v32, %v3457_v11  ;;  %v3506_v41 = vadd.f32 %v3498_v28, %v3458_v45  ;;  %v3591_v56 = vld [vmem:[#allocation8 + $0x230] sm:$0xff] }
 0x4b5   : > { %v9686_v35 = vadd.f32 %v3547_v1, %v3507_v20  ;;  %v9688_v52 = vadd.f32 %v3548_v58, %v3508_v3  ;;  %v3503_v13 = vmul.f32 %v3495_v18, %v3484_v37  ;;  %v3463_v19 = vadd.f32 %v3455_v12, %v3415_v21  ;;  %v3590_v37 = vld [vmem:[#allocation8 + $0x228] sm:$0xff]  ;;  %v11505_v21 = vld [vmem:[#allocation79_spill] sm:$0xff] }
 0x4b6   : > { %v3464_v42 = vadd.f32 %v3456_v16, %v3416_v22  ;;  %v3553_v53 = vadd.f32 %v3545_v47, %v3505_v10  ;;  %v3554_v25 = vadd.f32 %v3546_v48, %v3506_v41 }
 0x4b7   : > { %3847 = vrot.lane.b32.xlu1 %v9279_v24, %s5405_s29  ;;  %3849 = vrot.lane.b32.xlu2 %v9308_v26, %s5405_s29  ;;  %v3511_v36 = vadd.f32 %v3503_v13, %v3463_v19 }
 0x4b8   : > { %3845 = vrot.lane.b32.xlu0 %v11503_v14, %s5405_s29  ;;  %v3512_v20 = vadd.f32 %v3504_v2, %v3464_v42 }
 0x4b9   : > { %v3562_v34 = vpop.permute.xlu1 %3561  ;;  %v9710_v9 = vpop.permute.xlu2 %3613 }
 0x4ba   : > { %v3528_v57 = vpop.permute.xlu0 %3527  ;;  %v3577_v61 = vsel %vm988_vm7, %v3562_v34, %v9634_v4  ;;  %v3581_v51 = vsel %vm988_vm7, %v9634_v4, %v3562_v34 }
 0x4bb   : > { %v3532_v33 = vsel %vm913_vm6, %v11504_v54, %v3528_v57  ;;  %v3536_v23 = vsel %vm913_vm6, %v3528_v57, %v11504_v54  ;;  %v3593_v29 = vmul.f32 %v3585_v40, %v3577_v61  ;;  %v3594_v27 = vmul.f32 %v3586_v43, %v3581_v51 }
 0x4bc   : > { %v3551_v3 = vmul.f32 %v3543_v46, %v3532_v33  ;;  %v3552_v55 = vmul.f32 %v3544_v31, %v3536_v23 }
 0x4bd   : > { %v9712_v30 = vadd.f32 %v3593_v29, %v3553_v53  ;;  %v9714_v59 = vadd.f32 %v3594_v27, %v3554_v25 }
 0x4be   : > { %v3559_v4 = vadd.f32 %v3551_v3, %v3511_v36  ;;  %v3560_v49 = vadd.f32 %v3552_v55, %v3512_v20 }
 0x4bf   : > { %3853 = vrot.lane.b32.xlu1 %v9311_v8, %s5405_s29  ;;  %3855 = vrot.lane.b32.xlu2 %v9330_v62, %s5405_s29  ;;  %v3817_v34 = vmul.f32 %v9712_v30, %v9275_v50  ;;  %v3818_v53 = vmul.f32 %v9714_v59, %v9305_v38 }
 0x4c0   : > { %3851 = vrot.lane.b32.xlu0 %v9305_v38, %s5405_s29 }
 0x4c1   : > { %v3568_v0 = vpop.permute.xlu1 %3567  ;;  %v3620_v32 = vpop.permute.xlu2 %3619 }
 0x4c2   : > { %v3566_v60 = vpop.permute.xlu0 %3565  ;;  %v3580_v1 = vsel %vm988_vm7, %v3568_v0, %v3576_v6  ;;  %v3584_v58 = vsel %vm988_vm7, %v3576_v6, %v3568_v0  ;;  %v3588_v6 = vld [vmem:[#allocation8 + $0x218] sm:$0xff] }
 0x4c3   : > { %v3599_v12 = vmul.f32 %v3591_v56, %v3580_v1  ;;  %v3600_v16 = vmul.f32 %v3592_v17, %v3584_v58 }
 0x4c5   : > { %v9726_v28 = vadd.f32 %v3599_v12, %v3559_v4  ;;  %v9728_v18 = vadd.f32 %v3600_v16, %v3560_v49 }
 0x4c7   : > { %3895 = vrot.lane.b32.xlu1 %v9275_v50, %s5406_s7  ;;  %3897 = vrot.lane.b32.xlu2 %v11503_v14, %s5406_s7  ;;  %v3823_v36 = vmul.f32 %v9726_v28, %v9308_v26  ;;  %v3824_v20 = vmul.f32 %v9728_v18, %v9328_v63 }
 0x4c8   : > { %3857 = vrot.lane.b32.xlu0 %v9328_v63, %s5405_s29 }
 0x4c9   : > { %v3574_v11 = vpop.permute.xlu1 %3573  ;;  %v9746_v2 = vpop.permute.xlu2 %3661 }
 0x4ca   : > { %v3572_v45 = vpop.permute.xlu0 %3571  ;;  %v3579_v47 = vsel %vm988_vm7, %v3566_v60, %v3574_v11  ;;  %v3583_v48 = vsel %vm988_vm7, %v3574_v11, %v3566_v60 }
 0x4cb   : > { %v3578_v22 = vsel %vm988_vm7, %v11505_v21, %v3572_v45  ;;  %v3582_v10 = vsel %vm988_vm7, %v3572_v45, %v11505_v21  ;;  %v3597_v41 = vmul.f32 %v3589_v44, %v3579_v47  ;;  %v3598_v13 = vmul.f32 %v3590_v37, %v3583_v48 }
 0x4cc   : > { %v3595_v40 = vmul.f32 %v3587_v5, %v3578_v22  ;;  %v3596_v43 = vmul.f32 %v3588_v6, %v3582_v10 }
 0x4cd   : > { %v9749_v19 = vadd.f32 %v3597_v41, %v9640_v39  ;;  %v9752_v42 = vadd.f32 %v3598_v13, %v9642_v7 }
 0x4ce   : > { %v9755_v46 = vadd.f32 %v3595_v40, %v9686_v35  ;;  %v9758_v31 = vadd.f32 %v3596_v43, %v9688_v52 }
 0x4cf   : > { %3901 = vrot.lane.b32.xlu1 %v9308_v26, %s5406_s7  ;;  %v3821_v35 = vmul.f32 %v9749_v19, %v9279_v24  ;;  %v3822_v52 = vmul.f32 %v9752_v42, %v9330_v62  ;;  %3903 = vrot.lane.b32.xlu2 %v9305_v38, %s5406_s7 }
 0x4d0   : > { %v3819_v39 = vmul.f32 %v9755_v46, %v11503_v14  ;;  %v3820_v7 = vmul.f32 %v9758_v31, %v9311_v8  ;;  %3899 = vrot.lane.b32.xlu0 %v9279_v24, %s5406_s7 }
 0x4d1   : > { %v3612_v25 = vpop.permute.xlu1 %3611  ;;  %v9784_v27 = vpop.permute.xlu2 %3667 }
 0x4d2   : > { %v3825_v57 = vadd.f32 %v3819_v39, %v3817_v34  ;;  %v3834_v61 = vadd.f32 %v3820_v7, %v3818_v53  ;;  %v3610_v51 = vpop.permute.xlu0 %3609  ;;  %v3626_v54 = vsel %vm415_vm0, %v3612_v25, %v3620_v32  ;;  %v3630_v33 = vsel %vm415_vm0, %v3620_v32, %v3612_v25 }
 0x4d3   : > { %v3635_v23 = vmul.f32 %v3630_v33, %v9755_v46  ;;  %v3636_v29 = vmul.f32 %v3626_v54, %v9758_v31 }
 0x4d4   : > { %v3826_v3 = vadd.f32 %v3825_v57, %v3821_v35  ;;  %v3835_v55 = vadd.f32 %v3834_v61, %v3822_v52 }
 0x4d6   : > { %v9790_v4 = vadd.f32 %v3826_v3, %v3823_v36  ;;  %v9792_v49 = vadd.f32 %v3835_v55, %v3824_v20 }
 0x4d7   : > { %3907 = vrot.lane.b32.xlu1 %v9330_v62, %s5406_s7  ;;  %3909 = vrot.lane.b32.xlu2 %v9328_v63, %s5406_s7 }
 0x4d8   : > { %3905 = vrot.lane.b32.xlu0 %v9311_v8, %s5406_s7 }
 0x4d9   : > { %v3618_v56 = vpop.permute.xlu1 %3617  ;;  %v3674_v12 = vpop.permute.xlu2 %3673 }
 0x4da   : > { %v3616_v17 = vpop.permute.xlu0 %3615  ;;  %v3625_v0 = vsel %vm415_vm0, %v3610_v51, %v3618_v56  ;;  %v3629_v60 = vsel %vm415_vm0, %v3618_v56, %v3610_v51 }
 0x4db   : > { %v3633_v1 = vmul.f32 %v3629_v60, %v9712_v30  ;;  %v3634_v58 = vmul.f32 %v3625_v0, %v9714_v59 }
 0x4dd   : > { %v3641_v16 = vadd.f32 %v3635_v23, %v3633_v1  ;;  %v3650_v32 = vadd.f32 %v3636_v29, %v3634_v58 }
 0x4df   : > { %3949 = vrot.lane.b32.xlu1 %v11503_v14, %s5407_s9  ;;  %3951 = vrot.lane.b32.xlu2 %v9279_v24, %s5407_s9 }
 0x4e0   : > { %3947 = vrot.lane.b32.xlu0 %v9275_v50, %s5407_s9 }
 0x4e1   : > { %v3624_v44 = vpop.permute.xlu1 %3623  ;;  %v9824_v21 = vpop.permute.xlu2 %3715 }
 0x4e2   : > { %v3622_v37 = vpop.permute.xlu0 %3621  ;;  %v3628_v5 = vsel %vm415_vm0, %v3616_v17, %v3624_v44  ;;  %v3632_v6 = vsel %vm415_vm0, %v3624_v44, %v3616_v17 }
 0x4e3   : > { %v3627_v11 = vsel %vm415_vm0, %v9710_v9, %v3622_v37  ;;  %v3631_v45 = vsel %vm415_vm0, %v3622_v37, %v9710_v9  ;;  %v3639_v47 = vmul.f32 %v3632_v6, %v9726_v28  ;;  %v3640_v48 = vmul.f32 %v3628_v5, %v9728_v18 }
 0x4e4   : > { %v3637_v22 = vmul.f32 %v3631_v45, %v9749_v19  ;;  %v3638_v10 = vmul.f32 %v3627_v11, %v9752_v42 }
 0x4e6   : > { %v3642_v41 = vadd.f32 %v3641_v16, %v3637_v22  ;;  %v3651_v13 = vadd.f32 %v3650_v32, %v3638_v10 }
 0x4e7   : > { %3955 = vrot.lane.b32.xlu1 %v9305_v38, %s5407_s9  ;;  %3957 = vrot.lane.b32.xlu2 %v9311_v8, %s5407_s9 }
 0x4e8   : > { %v3643_v40 = vadd.f32 %v3642_v41, %v3639_v47  ;;  %v3652_v43 = vadd.f32 %v3651_v13, %v3640_v48  ;;  %3953 = vrot.lane.b32.xlu0 %v9308_v26, %s5407_s9 }
 0x4e9   : > { %v3666_v9 = vpop.permute.xlu1 %3665  ;;  %v3722_v52 = vpop.permute.xlu2 %3721 }
 0x4ea   : > { %v3664_v34 = vpop.permute.xlu0 %3663  ;;  %v3679_v53 = vsel %vm488_vm1, %v3666_v9, %v3674_v12  ;;  %v3683_v39 = vsel %vm488_vm1, %v3674_v12, %v3666_v9  ;;  %v3644_v3 = vrot.slane %v3643_v40, 4  ;;  %v3653_v55 = vrot.slane %v3652_v43, 4 }
 0x4eb   : > { %v3689_v7 = vmul.f32 %v3683_v39, %v9749_v19  ;;  %v3690_v35 = vmul.f32 %v3679_v53, %v9752_v42 }
 0x4ec   : > { %v3654_v1 = vadd.f32 %v3653_v55, %v3652_v43 }
 0x4ee   : > { %v3655_v45 = vrot.slane %v3654_v1, 2 }
 0x4ef   : > { %3961 = vrot.lane.b32.xlu1 %v9328_v63, %s5407_s9  ;;  %3999 = vrot.lane.b32.xlu2 %v9275_v50, %s5408_s15 }
 0x4f0   : > { %3959 = vrot.lane.b32.xlu0 %v9330_v62, %s5407_s9  ;;  %v3656_v41 = vadd.f32 %v3655_v45, %v3654_v1  ;;  %v9914_v1 = vld [vmem:[#allocation12] sm:$0xff] }
 0x4f1   : > { %v3672_v25 = vpop.permute.xlu1 %3671  ;;  %v3728_v29 = vpop.permute.xlu2 %3727 }
 0x4f2   : > { %v3670_v57 = vpop.permute.xlu0 %3669  ;;  %v3678_v61 = vsel %vm488_vm1, %v3664_v34, %v3672_v25  ;;  %v3682_v51 = vsel %vm488_vm1, %v3672_v25, %v3664_v34  ;;  %v3657_v25 = vrot.slane %v3656_v41, 1 }
 0x4f3   : > { %v3677_v54 = vsel %vm488_vm1, %v9746_v2, %v3670_v57  ;;  %v3681_v33 = vsel %vm488_vm1, %v3670_v57, %v9746_v2  ;;  %v3687_v23 = vmul.f32 %v3682_v51, %v9755_v46  ;;  %v3688_v50 = vmul.f32 %v3678_v61, %v9758_v31  ;;  %v11506_v61 = vld [vmem:[#allocation77_spill] sm:$0xff] }
 0x4f4   : > { %v3685_v36 = vmul.f32 %v3681_v33, %v9712_v30  ;;  %v3686_v20 = vmul.f32 %v3677_v54, %v9714_v59  ;;  %v3645_v2 = vadd.f32 %v3644_v3, %v3643_v40 }
 0x4f6   : > { %v3693_v56 = vadd.f32 %v3687_v23, %v3685_v36  ;;  %v3702_v17 = vadd.f32 %v3688_v50, %v3686_v20  ;;  %v3646_v11 = vrot.slane %v3645_v2, 2  ;;  %v3658_v23 = vadd.f32 %v3657_v25, %v3656_v41  ;;  %v11507_v50 = vld [vmem:[#allocation41_spill] sm:$0xff]  ;;  %v11509_v41 = vld [vmem:[#allocation39_spill] sm:$0xff] }
 0x4f7   : > { %4003 = vrot.lane.b32.xlu1 %v9279_v24, %s5408_s15  ;;  %4005 = vrot.lane.b32.xlu2 %v9308_v26, %s5408_s15 }
 0x4f8   : > { %v3694_v0 = vadd.f32 %v3693_v56, %v3689_v7  ;;  %v3703_v60 = vadd.f32 %v3702_v17, %v3690_v35  ;;  %4001 = vrot.lane.b32.xlu0 %v11503_v14, %s5408_s15 }
 0x4f9   : > { %v3714_v58 = vpop.permute.xlu1 %3713  ;;  %v9878_v37 = vpop.permute.xlu2 %3769 }
 0x4fa   : > { %v3676_v12 = vpop.permute.xlu0 %3675  ;;  %v3729_v16 = vsel %vm563_vm2, %v3714_v58, %v3722_v52  ;;  %v3733_v32 = vsel %vm563_vm2, %v3722_v52, %v3714_v58 }
 0x4fb   : > { %v3680_v24 = vsel %vm488_vm1, %v9784_v27, %v3676_v12  ;;  %v3684_v14 = vsel %vm488_vm1, %v3676_v12, %v9784_v27  ;;  %v3737_v44 = vmul.f32 %v3733_v32, %v9712_v30  ;;  %v3738_v26 = vmul.f32 %v3729_v16, %v9714_v59  ;;  %v9919_v12 = vld [vmem:[#allocation12 + $0x8] sm:$0xff] }
 0x4fc   : > { %v3691_v5 = vmul.f32 %v3684_v14, %v9726_v28  ;;  %v3692_v6 = vmul.f32 %v3680_v24, %v9728_v18  ;;  %v3647_v27 = vadd.f32 %v3646_v11, %v3645_v2  ;;  %v9930_v14 = vmul.f32 %v9919_v12, %v3658_v23 }
 0x4fe   : > { %v3695_v47 = vadd.f32 %v3694_v0, %v3691_v5  ;;  %v3704_v48 = vadd.f32 %v3703_v60, %v3692_v6  ;;  %v3648_v52 = vrot.slane %v3647_v27, 1 }
 0x4ff   : > { %4009 = vrot.lane.b32.xlu1 %v9311_v8, %s5408_s15  ;;  %4011 = vrot.lane.b32.xlu2 %v9330_v62, %s5408_s15 }
 0x500   : > { %v3696_v22 = vrot.slane %v3695_v47, 4  ;;  %v3705_v10 = vrot.slane %v3704_v48, 4  ;;  %4007 = vrot.lane.b32.xlu0 %v9305_v38, %s5408_s15  ;;  %v3649_v33 = vadd.f32 %v3648_v52, %v3647_v27 }
 0x501   : > { %v3720_v13 = vpop.permute.xlu1 %3719  ;;  %v3776_v38 = vpop.permute.xlu2 %3775 }
 0x502   : > { %v3697_v40 = vadd.f32 %v3696_v22, %v3695_v47  ;;  %v3706_v43 = vadd.f32 %v3705_v10, %v3704_v48  ;;  %v3718_v9 = vpop.permute.xlu0 %3717  ;;  %v3732_v34 = vsel %vm563_vm2, %v3720_v13, %v3728_v29  ;;  %v3736_v8 = vsel %vm563_vm2, %v3728_v29, %v3720_v13  ;;  %v11508_v47 = vld [vmem:[#allocation42_spill] sm:$0xff]  ;;  %v11510_v13 = vld [vmem:[#allocation32_spill] sm:$0xff] }
 0x503   : > { %v3743_v53 = vmul.f32 %v3736_v8, %v9726_v28  ;;  %v3744_v39 = vmul.f32 %v3732_v34, %v9728_v18  ;;  %v9927_v24 = vmul.f32 %v9914_v1, %v3649_v33 }
 0x504   : > { %v3698_v7 = vrot.slane %v3697_v40, 2  ;;  %v3707_v35 = vrot.slane %v3706_v43, 2 }
 0x506   : > { %v3699_v62 = vadd.f32 %v3698_v7, %v3697_v40  ;;  %v3708_v57 = vadd.f32 %v3707_v35, %v3706_v43 }
 0x507   : > { %4255 = vrot.lane.b32.xlu1 %v11506_v61, %s5401_s27  ;;  %4257 = vrot.lane.b32.xlu2 %v11507_v50, %s5401_s27 }
 0x508   : > { %v3700_v51 = vrot.slane %v3699_v62, 1  ;;  %v3709_v54 = vrot.slane %v3708_v57, 1  ;;  %4013 = vrot.lane.b32.xlu0 %v9328_v63, %s5408_s15 }
 0x509   : > { %v3726_v29 = vpop.permute.xlu1 %3725  ;;  %v9912_v2 = vpop.permute.xlu2 %3843 }
 0x50a   : > { %v3701_v36 = vadd.f32 %v3700_v51, %v3699_v62  ;;  %v3710_v20 = vadd.f32 %v3709_v54, %v3708_v57  ;;  %v3724_v3 = vpop.permute.xlu0 %3723  ;;  %v3731_v55 = vsel %vm563_vm2, %v3718_v9, %v3726_v29  ;;  %v3735_v56 = vsel %vm563_vm2, %v3726_v29, %v3718_v9  ;;  %v11512_v54 = vld [vmem:[#allocation35_spill] sm:$0xff] }
 0x50b   : > { %v3730_v17 = vsel %vm563_vm2, %v9824_v21, %v3724_v3  ;;  %v3734_v63 = vsel %vm563_vm2, %v3724_v3, %v9824_v21  ;;  %v3741_v0 = vmul.f32 %v3735_v56, %v9749_v19  ;;  %v3742_v60 = vmul.f32 %v3731_v55, %v9752_v42 }
 0x50c   : > { %v9917_v58 = vmul.f32 %v9914_v1, %v3701_v36  ;;  %v9922_v16 = vmul.f32 %v9919_v12, %v3710_v20  ;;  %v3739_v32 = vmul.f32 %v3734_v63, %v9755_v46  ;;  %v3740_v21 = vmul.f32 %v3730_v17, %v9758_v31 }
 0x50e   : > { %v4053_v5 = vrot.slane %v9917_v58, 1  ;;  %v4054_v6 = vrot.slane %v9922_v16, 1  ;;  %v3745_v11 = vadd.f32 %v3739_v32, %v3737_v44  ;;  %v3754_v45 = vadd.f32 %v3740_v21, %v3738_v26 }
 0x50f   : > { %4261 = vrot.lane.b32.xlu1 %v11508_v47, %s5401_s27  ;;  %4263 = vrot.lane.b32.xlu2 %v11510_v13, %s5401_s27 }
 0x510   : > { %v4057_v48 = vmax.f32 %v9927_v24, %v4053_v5  ;;  %v4058_v22 = vmax.f32 %v9930_v14, %v4054_v6  ;;  %v3746_v10 = vadd.f32 %v3745_v11, %v3741_v0  ;;  %v3755_v27 = vadd.f32 %v3754_v45, %v3742_v60  ;;  %4259 = vrot.lane.b32.xlu0 %v11509_v41, %s5401_s27 }
 0x511   : > { %v3768_v40 = vpop.permute.xlu1 %3767  ;;  %v9948_v35 = vpop.permute.xlu2 %3849 }
 0x512   : > { %v3747_v43 = vadd.f32 %v3746_v10, %v3743_v53  ;;  %v3756_v9 = vadd.f32 %v3755_v27, %v3744_v39  ;;  %v3766_v44 = vpop.permute.xlu0 %3765  ;;  %v3782_v26 = vsel %vm638_vm3, %v3768_v40, %v3776_v38  ;;  %v3786_v34 = vsel %vm638_vm3, %v3776_v38, %v3768_v40  ;;  %v11511_v53 = vld [vmem:[#allocation80_spill] sm:$0xff]  ;;  %v11513_v38 = vld [vmem:[#allocation37_spill] sm:$0xff] }
 0x513   : > { %v3791_v8 = vmul.f32 %v3786_v34, %v9755_v46  ;;  %v3792_v7 = vmul.f32 %v3782_v26, %v9758_v31 }
 0x514   : > { %v3748_v52 = vrot.slane %v3747_v43, 4  ;;  %v3757_v25 = vrot.slane %v3756_v9, 4 }
 0x516   : > { %v3749_v62 = vadd.f32 %v3748_v52, %v3747_v43  ;;  %v3758_v57 = vadd.f32 %v3757_v25, %v3756_v9 }
 0x517   : > { %4267 = vrot.lane.b32.xlu1 %v11511_v53, %s5401_s27  ;;  %4269 = vrot.lane.b32.xlu2 %v11513_v38, %s5401_s27 }
 0x518   : > { %v3750_v39 = vrot.slane %v3749_v62, 2  ;;  %v3759_v51 = vrot.slane %v3758_v57, 2  ;;  %4265 = vrot.lane.b32.xlu0 %v11512_v54, %s5401_s27 }
 0x519   : > { %v3774_v33 = vpop.permute.xlu1 %3773  ;;  %v3856_v17 = vpop.permute.xlu2 %3855 }
 0x51a   : > { %v3751_v23 = vadd.f32 %v3750_v39, %v3749_v62  ;;  %v3760_v29 = vadd.f32 %v3759_v51, %v3758_v57  ;;  %v3772_v36 = vpop.permute.xlu0 %3771  ;;  %v3781_v20 = vsel %vm638_vm3, %v3766_v44, %v3774_v33  ;;  %v3785_v3 = vsel %vm638_vm3, %v3774_v33, %v3766_v44 }
 0x51b   : > { %v3789_v55 = vmul.f32 %v3785_v3, %v9712_v30  ;;  %v3790_v56 = vmul.f32 %v3781_v20, %v9714_v59  ;;  %v3828_v39 = vrot.slane %v9790_v4, 4  ;;  %v3837_v51 = vrot.slane %v9792_v49, 4 }
 0x51c   : > { %v3752_v63 = vrot.slane %v3751_v23, 1  ;;  %v3761_v0 = vrot.slane %v3760_v29, 1 }
 0x51d   : > { %v3797_v60 = vadd.f32 %v3791_v8, %v3789_v55  ;;  %v3806_v32 = vadd.f32 %v3792_v7, %v3790_v56 }
 0x51e   : > { %v3753_v21 = vadd.f32 %v3752_v63, %v3751_v23  ;;  %v3762_v5 = vadd.f32 %v3761_v0, %v3760_v29 }
 0x51f   : > { %4309 = vrot.lane.b32.xlu1 %v11507_v50, %s5402_s18  ;;  %4311 = vrot.lane.b32.xlu2 %v11509_v41, %s5402_s18 }
 0x520   : > { %v9965_v6 = vmul.f32 %v9914_v1, %v3753_v21  ;;  %v9968_v11 = vmul.f32 %v9919_v12, %v3762_v5  ;;  %4307 = vrot.lane.b32.xlu0 %v11506_v61, %s5402_s18 }
 0x521   : > { %v3780_v45 = vpop.permute.xlu1 %3779  ;;  %v9988_v7 = vpop.permute.xlu2 %3897 }
 0x522   : > { %v4061_v10 = vrot.slane %v9965_v6, 2  ;;  %v4062_v27 = vrot.slane %v9968_v11, 2  ;;  %v3778_v40 = vpop.permute.xlu0 %3777  ;;  %v3784_v43 = vsel %vm638_vm3, %v3772_v36, %v3780_v45  ;;  %v3788_v9 = vsel %vm638_vm3, %v3780_v45, %v3772_v36 }
 0x523   : > { %v3783_v44 = vsel %vm638_vm3, %v9878_v37, %v3778_v40  ;;  %v3787_v26 = vsel %vm638_vm3, %v3778_v40, %v9878_v37  ;;  %v3795_v34 = vmul.f32 %v3788_v9, %v9726_v28  ;;  %v3796_v8 = vmul.f32 %v3784_v43, %v9728_v18 }
 0x524   : > { %v3793_v52 = vmul.f32 %v3787_v26, %v9749_v19  ;;  %v3794_v25 = vmul.f32 %v3783_v44, %v9752_v42  ;;  %v9992_v62 = vmax.f32 %v4057_v48, %v4061_v10  ;;  %v9994_v57 = vmax.f32 %v4058_v22, %v4062_v27 }
 0x525   : > { %v3829_v36 = vadd.f32 %v3828_v39, %v9790_v4  ;;  %v3838_v48 = vadd.f32 %v3837_v51, %v9792_v49 }
 0x526   : > { %v3798_v33 = vadd.f32 %v3797_v60, %v3793_v52  ;;  %v3807_v37 = vadd.f32 %v3806_v32, %v3794_v25 }
 0x527   : > { %4315 = vrot.lane.b32.xlu1 %v11510_v13, %s5402_s18  ;;  %4317 = vrot.lane.b32.xlu2 %v11512_v54, %s5402_s18  ;;  %v3830_v21 = vrot.slane %v3829_v36, 2  ;;  %v3839_v5 = vrot.slane %v3838_v48, 2 }
 0x528   : > { %v3799_v23 = vadd.f32 %v3798_v33, %v3795_v34  ;;  %v3808_v29 = vadd.f32 %v3807_v37, %v3796_v8  ;;  %4313 = vrot.lane.b32.xlu0 %v11508_v47, %s5402_s18 }
 0x529   : > { %v3848_v22 = vpop.permute.xlu1 %3847  ;;  %v3904_v4 = vpop.permute.xlu2 %3903  ;;  %v3831_v43 = vadd.f32 %v3830_v21, %v3829_v36  ;;  %v3840_v9 = vadd.f32 %v3839_v5, %v3838_v48 }
 0x52a   : > { %v3800_v20 = vrot.slane %v3799_v23, 4  ;;  %v3809_v3 = vrot.slane %v3808_v29, 4  ;;  %v3846_v55 = vpop.permute.xlu0 %3845  ;;  %v3861_v56 = vsel %vm763_vm4, %v3848_v22, %v3856_v17  ;;  %v3865_v63 = vsel %vm763_vm4, %v3856_v17, %v3848_v22 }
 0x52b   : > { %v3871_v0 = vmul.f32 %v3861_v56, %v9749_v19  ;;  %v3872_v60 = vmul.f32 %v3865_v63, %v9752_v42  ;;  %v3832_v22 = vrot.slane %v3831_v43, 1 }
 0x52c   : > { %v3801_v32 = vadd.f32 %v3800_v20, %v3799_v23  ;;  %v3810_v49 = vadd.f32 %v3809_v3, %v3808_v29  ;;  %v3841_v20 = vrot.slane %v3840_v9, 1 }
 0x52d   : > { %v10046_v5 = vadd.f32 %v3832_v22, %v3831_v43 }
 0x52e   : > { %v3802_v45 = vrot.slane %v3801_v32, 2  ;;  %v3811_v10 = vrot.slane %v3810_v49, 2 }
 0x52f   : > { %4321 = vrot.lane.b32.xlu1 %v11513_v38, %s5402_s18  ;;  %4357 = vrot.lane.b32.xlu2 %v11506_v61, %s5403_s16 }
 0x530   : > { %v3803_v27 = vadd.f32 %v3802_v45, %v3801_v32  ;;  %v3812_v40 = vadd.f32 %v3811_v10, %v3810_v49  ;;  %4319 = vrot.lane.b32.xlu0 %v11511_v53, %s5402_s18  ;;  %v10048_v45 = vadd.f32 %v3841_v20, %v3840_v9 }
 0x531   : > { %v3854_v17 = vpop.permute.xlu1 %3853  ;;  %v3910_v37 = vpop.permute.xlu2 %3909 }
 0x532   : > { %v3804_v44 = vrot.slane %v3803_v27, 1  ;;  %v3813_v26 = vrot.slane %v3812_v40, 1  ;;  %v3852_v34 = vpop.permute.xlu0 %3851  ;;  %v3860_v8 = vsel %vm763_vm4, %v3846_v55, %v3854_v17  ;;  %v3864_v52 = vsel %vm763_vm4, %v3854_v17, %v3846_v55 }
 0x533   : > { %v3859_v25 = vsel %vm763_vm4, %v9912_v2, %v3852_v34  ;;  %v3863_v39 = vsel %vm763_vm4, %v3852_v34, %v9912_v2  ;;  %v3869_v51 = vmul.f32 %v3860_v8, %v9755_v46  ;;  %v3870_v33 = vmul.f32 %v3864_v52, %v9758_v31 }
 0x534   : > { %v3805_v23 = vadd.f32 %v3804_v44, %v3803_v27  ;;  %v3814_v29 = vadd.f32 %v3813_v26, %v3812_v40  ;;  %v3867_v36 = vmul.f32 %v3859_v25, %v9712_v30  ;;  %v3868_v48 = vmul.f32 %v3863_v39, %v9714_v59 }
 0x536   : > { %v10033_v3 = vmul.f32 %v9914_v1, %v3805_v23  ;;  %v10036_v55 = vmul.f32 %v9919_v12, %v3814_v29  ;;  %v3875_v2 = vadd.f32 %v3869_v51, %v3867_v36  ;;  %v3884_v56 = vadd.f32 %v3870_v33, %v3868_v48 }
 0x537   : > { %4361 = vrot.lane.b32.xlu1 %v11509_v41, %s5403_s16  ;;  %4363 = vrot.lane.b32.xlu2 %v11508_v47, %s5403_s16 }
 0x538   : > { %v4069_v63 = vrot.slane %v10033_v3, 3  ;;  %v4070_v32 = vrot.slane %v10036_v55, 3  ;;  %v3876_v49 = vadd.f32 %v3875_v2, %v3871_v0  ;;  %v3885_v21 = vadd.f32 %v3884_v56, %v3872_v60  ;;  %4359 = vrot.lane.b32.xlu0 %v11507_v50, %s5403_s16 }
 0x539   : > { %v3896_v10 = vpop.permute.xlu1 %3895 }
 0x53a   : > { %v4073_v27 = vmax.f32 %v9992_v62, %v4069_v63  ;;  %v4074_v40 = vmax.f32 %v9994_v57, %v4070_v32  ;;  %v3858_v17 = vpop.permute.xlu0 %3857  ;;  %v3911_v0 = vsel %vm838_vm5, %v3896_v10, %v3904_v4  ;;  %v3915_v60 = vsel %vm838_vm5, %v3904_v4, %v3896_v10  ;;  %v10064_v57 = vpop.permute.xlu2 %3951 }
 0x53b   : > { %v3862_v44 = vsel %vm763_vm4, %v9948_v35, %v3858_v17  ;;  %v3866_v43 = vsel %vm763_vm4, %v3858_v17, %v9948_v35  ;;  %v3919_v9 = vmul.f32 %v3911_v0, %v9712_v30  ;;  %v3920_v62 = vmul.f32 %v3915_v60, %v9714_v59 }
 0x53c   : > { %v3873_v26 = vmul.f32 %v3862_v44, %v9726_v28  ;;  %v3874_v34 = vmul.f32 %v3866_v43, %v9728_v18  ;;  %v4075_v4 = vmax.f32 %v4073_v27, %v10046_v5  ;;  %v4076_v8 = vmax.f32 %v4074_v40, %v10048_v45 }
 0x53e   : > { %v3877_v52 = vadd.f32 %v3876_v49, %v3873_v26  ;;  %v3886_v25 = vadd.f32 %v3885_v21, %v3874_v34 }
 0x53f   : > { %4367 = vrot.lane.b32.xlu1 %v11512_v54, %s5403_s16  ;;  %4369 = vrot.lane.b32.xlu2 %v11511_v53, %s5403_s16 }
 0x540   : > { %v3878_v35 = vrot.slane %v3877_v52, 4  ;;  %v3887_v39 = vrot.slane %v3886_v25, 4  ;;  %4365 = vrot.lane.b32.xlu0 %v11510_v13, %s5403_s16 }
 0x541   : > { %v3902_v51 = vpop.permute.xlu1 %3901 }
 0x542   : > { %v3879_v33 = vadd.f32 %v3878_v35, %v3877_v52  ;;  %v3888_v23 = vadd.f32 %v3887_v39, %v3886_v25  ;;  %v3900_v29 = vpop.permute.xlu0 %3899  ;;  %v3914_v36 = vsel %vm838_vm5, %v3902_v51, %v3910_v37  ;;  %v3918_v48 = vsel %vm838_vm5, %v3910_v37, %v3902_v51  ;;  %v3958_v2 = vpop.permute.xlu2 %3957 }
 0x543   : > { %v3925_v22 = vmul.f32 %v3914_v36, %v9726_v28  ;;  %v3926_v20 = vmul.f32 %v3918_v48, %v9728_v18 }
 0x544   : > { %v3880_v56 = vrot.slane %v3879_v33, 2  ;;  %v3889_v63 = vrot.slane %v3888_v23, 2 }
 0x546   : > { %v3881_v32 = vadd.f32 %v3880_v56, %v3879_v33  ;;  %v3890_v49 = vadd.f32 %v3889_v63, %v3888_v23 }
 0x547   : > { %4407 = vrot.lane.b32.xlu1 %v11506_v61, %s5404_s11  ;;  %4409 = vrot.lane.b32.xlu2 %v11507_v50, %s5404_s11 }
 0x548   : > { %v3882_v21 = vrot.slane %v3881_v32, 1  ;;  %v3891_v10 = vrot.slane %v3890_v49, 1  ;;  %4371 = vrot.lane.b32.xlu0 %v11513_v38, %s5403_s16  ;;  %s5331_s16 = scalar_lea.hbm %s10753_s6, 256 }
 0x549   : > { %v3908_v37 = vpop.permute.xlu1 %3907  ;;  %p5333_p10 = scmp.lt.s32.totalorder %s5331_s16, %s5327_s2 }
 0x54a   : > { %v3883_v27 = vadd.f32 %v3882_v21, %v3881_v32  ;;  %v3892_v40 = vadd.f32 %v3891_v10, %v3890_v49  ;;  %v3906_v17 = vpop.permute.xlu0 %3905  ;;  %v3913_v0 = vsel %vm838_vm5, %v3900_v29, %v3908_v37  ;;  %v3917_v60 = vsel %vm838_vm5, %v3908_v37, %v3900_v29  ;;  %v10100_v52 = vpop.permute.xlu2 %3999 }
 0x54b   : > { %v3912_v44 = vsel %vm838_vm5, %v9988_v7, %v3906_v17  ;;  %v3916_v43 = vsel %vm838_vm5, %v3906_v17, %v9988_v7  ;;  %v3923_v26 = vmul.f32 %v3913_v0, %v9749_v19  ;;  %v3924_v34 = vmul.f32 %v3917_v60, %v9752_v42  ;;  %p5334_p9 = por %p5333_p10, %p5332_p2 }
 0x54c   : > { %v10103_v25 = vmul.f32 %v9914_v1, %v3883_v27  ;;  %v10106_v35 = vmul.f32 %v9919_v12, %v3892_v40  ;;  %v3921_v39 = vmul.f32 %v3912_v44, %v9755_v46  ;;  %v3922_v51 = vmul.f32 %v3916_v43, %v9758_v31 }
 0x54d   : > { %p5335_p11 = pnand %p5334_p9, %p5330_p8 }
 0x54e   : > { %v4079_v33 = vrot.slane %v10103_v25, 5  ;;  %v4080_v7 = vrot.slane %v10106_v35, 5  ;;  %v3927_v23 = vadd.f32 %v3921_v39, %v3919_v9  ;;  %v3936_v29 = vadd.f32 %v3922_v51, %v3920_v62 }
 0x54f   : > { %4413 = vrot.lane.b32.xlu1 %v11508_v47, %s5404_s11  ;;  %4415 = vrot.lane.b32.xlu2 %v11510_v13, %s5404_s11 }
 0x550   : > { %v4083_v36 = vmax.f32 %v4075_v4, %v4079_v33  ;;  %v4084_v48 = vmax.f32 %v4076_v8, %v4080_v7  ;;  %v3928_v56 = vadd.f32 %v3927_v23, %v3923_v26  ;;  %v3937_v63 = vadd.f32 %v3936_v29, %v3924_v34  ;;  %4411 = vrot.lane.b32.xlu0 %v11509_v41, %s5404_s11 }
 0x551   : > { %v3950_v32 = vpop.permute.xlu1 %3949 }
 0x552   : > { %v3929_v49 = vadd.f32 %v3928_v56, %v3925_v22  ;;  %v3938_v21 = vadd.f32 %v3937_v63, %v3926_v20  ;;  %v3948_v10 = vpop.permute.xlu0 %3947  ;;  %v3964_v9 = vsel %vm913_vm6, %v3950_v32, %v3958_v2  ;;  %v3968_v62 = vsel %vm913_vm6, %v3958_v2, %v3950_v32  ;;  %v10124_v37 = vpop.permute.xlu2 %4005 }
 0x553   : > { %v3973_v4 = vmul.f32 %v3964_v9, %v9755_v46  ;;  %v3974_v8 = vmul.f32 %v3968_v62, %v9758_v31 }
 0x554   : > { %v3930_v27 = vrot.slane %v3929_v49, 4  ;;  %v3939_v40 = vrot.slane %v3938_v21, 4 }
 0x556   : > { %v3931_v17 = vadd.f32 %v3930_v27, %v3929_v49  ;;  %v3940_v0 = vadd.f32 %v3939_v40, %v3938_v21 }
 0x557   : > { %4419 = vrot.lane.b32.xlu1 %v11511_v53, %s5404_s11  ;;  %4421 = vrot.lane.b32.xlu2 %v11513_v38, %s5404_s11 }
 0x558   : > { %v3932_v22 = vrot.slane %v3931_v17, 2  ;;  %v3941_v20 = vrot.slane %v3940_v0, 2  ;;  %4417 = vrot.lane.b32.xlu0 %v11512_v54, %s5404_s11 }
 0x559   : > { %v3956_v2 = vpop.permute.xlu1 %3955 }
 0x55a   : > { %v3933_v60 = vadd.f32 %v3932_v22, %v3931_v17  ;;  %v3942_v44 = vadd.f32 %v3941_v20, %v3940_v0  ;;  %v3954_v43 = vpop.permute.xlu0 %3953  ;;  %v3963_v26 = vsel %vm913_vm6, %v3948_v10, %v3956_v2  ;;  %v3967_v34 = vsel %vm913_vm6, %v3956_v2, %v3948_v10  ;;  %v4012_v33 = vpop.permute.xlu2 %4011 }
 0x55b   : > { %v3971_v39 = vmul.f32 %v3963_v26, %v9712_v30  ;;  %v3972_v51 = vmul.f32 %v3967_v34, %v9714_v59 }
 0x55c   : > { %v3934_v7 = vrot.slane %v3933_v60, 1  ;;  %v3943_v23 = vrot.slane %v3942_v44, 1 }
 0x55d   : > { %v3979_v29 = vadd.f32 %v3973_v4, %v3971_v39  ;;  %v3988_v56 = vadd.f32 %v3974_v8, %v3972_v51 }
 0x55e   : > { %v3935_v63 = vadd.f32 %v3934_v7, %v3933_v60  ;;  %v3944_v32 = vadd.f32 %v3943_v23, %v3942_v44 }
 0x55f   : > { %4479 = vrot.lane.b32.xlu1 %v11507_v50, %s5405_s29  ;;  %4481 = vrot.lane.b32.xlu2 %v11509_v41, %s5405_s29 }
 0x560   : > { %v10141_v49 = vmul.f32 %v9914_v1, %v3935_v63  ;;  %v10144_v21 = vmul.f32 %v9919_v12, %v3944_v32  ;;  %4477 = vrot.lane.b32.xlu0 %v11506_v61, %s5405_s29 }
 0x561   : > { %v3962_v10 = vpop.permute.xlu1 %3961 }
 0x562   : > { %v4087_v9 = vrot.slane %v10141_v49, 6  ;;  %v4088_v62 = vrot.slane %v10144_v21, 6  ;;  %v3960_v4 = vpop.permute.xlu0 %3959  ;;  %v3966_v8 = vsel %vm913_vm6, %v3954_v43, %v3962_v10  ;;  %v3970_v27 = vsel %vm913_vm6, %v3962_v10, %v3954_v43  ;;  %v10166_v26 = vpop.permute.xlu2 %4257 }
 0x563   : > { %v3965_v40 = vsel %vm913_vm6, %v10064_v57, %v3960_v4  ;;  %v3969_v17 = vsel %vm913_vm6, %v3960_v4, %v10064_v57  ;;  %v3977_v0 = vmul.f32 %v3966_v8, %v9726_v28  ;;  %v3978_v22 = vmul.f32 %v3970_v27, %v9728_v18 }
 0x564   : > { %v3975_v20 = vmul.f32 %v3965_v40, %v9749_v19  ;;  %v3976_v2 = vmul.f32 %v3969_v17, %v9752_v42  ;;  %v4091_v60 = vmax.f32 %v4083_v36, %v4087_v9  ;;  %v4092_v44 = vmax.f32 %v4084_v48, %v4088_v62 }
 0x566   : > { %v3980_v43 = vadd.f32 %v3979_v29, %v3975_v20  ;;  %v3989_v34 = vadd.f32 %v3988_v56, %v3976_v2 }
 0x567   : > { %4485 = vrot.lane.b32.xlu1 %v11510_v13, %s5405_s29  ;;  %4487 = vrot.lane.b32.xlu2 %v11512_v54, %s5405_s29 }
 0x568   : > { %v3981_v39 = vadd.f32 %v3980_v43, %v3977_v0  ;;  %v3990_v51 = vadd.f32 %v3989_v34, %v3978_v22  ;;  %4483 = vrot.lane.b32.xlu0 %v11508_v47, %s5405_s29 }
 0x569   : > { %v4004_v57 = vpop.permute.xlu1 %4003 }
 0x56a   : > { %v3982_v7 = vrot.slane %v3981_v39, 4  ;;  %v3991_v23 = vrot.slane %v3990_v51, 4  ;;  %v4002_v36 = vpop.permute.xlu0 %4001  ;;  %v4017_v48 = vsel %vm988_vm7, %v4004_v57, %v4012_v33  ;;  %v4021_v29 = vsel %vm988_vm7, %v4012_v33, %v4004_v57  ;;  %v4264_v4 = vpop.permute.xlu2 %4263 }
 0x56b   : > { %v4027_v56 = vmul.f32 %v4017_v48, %v9749_v19  ;;  %v4028_v63 = vmul.f32 %v4021_v29, %v9752_v42 }
 0x56c   : > { %v3983_v32 = vadd.f32 %v3982_v7, %v3981_v39  ;;  %v3992_v10 = vadd.f32 %v3991_v23, %v3990_v51 }
 0x56e   : > { %v3984_v9 = vrot.slane %v3983_v32, 2  ;;  %v3993_v62 = vrot.slane %v3992_v10, 2 }
 0x56f   : > { %4491 = vrot.lane.b32.xlu1 %v11513_v38, %s5405_s29  ;;  %4527 = vrot.lane.b32.xlu2 %v11506_v61, %s5406_s7 }
 0x570   : > { %v3985_v8 = vadd.f32 %v3984_v9, %v3983_v32  ;;  %v3994_v27 = vadd.f32 %v3993_v62, %v3992_v10  ;;  %4489 = vrot.lane.b32.xlu0 %v11511_v53, %s5405_s29 }
 0x571   : > { %v4010_v33 = vpop.permute.xlu1 %4009 }
 0x572   : > { %v3986_v19 = vrot.slane %v3985_v8, 1  ;;  %v3995_v40 = vrot.slane %v3994_v27, 1  ;;  %v4008_v42 = vpop.permute.xlu0 %4007  ;;  %v4016_v17 = vsel %vm988_vm7, %v4002_v36, %v4010_v33  ;;  %v4020_v0 = vsel %vm988_vm7, %v4010_v33, %v4002_v36 }
 0x573   : > { %v4015_v22 = vsel %vm988_vm7, %v10100_v52, %v4008_v42  ;;  %v4019_v20 = vsel %vm988_vm7, %v4008_v42, %v10100_v52  ;;  %v4025_v2 = vmul.f32 %v4016_v17, %v9755_v46  ;;  %v4026_v43 = vmul.f32 %v4020_v0, %v9758_v31 }
 0x574   : > { %v3987_v34 = vadd.f32 %v3986_v19, %v3985_v8  ;;  %v3996_v39 = vadd.f32 %v3995_v40, %v3994_v27  ;;  %v4023_v51 = vmul.f32 %v4015_v22, %v9712_v30  ;;  %v4024_v57 = vmul.f32 %v4019_v20, %v9714_v59  ;;  %v4270_v30 = vpop.permute.xlu2 %4269 }
 0x576   : > { %v10201_v7 = vmul.f32 %v9914_v1, %v3987_v34  ;;  %v10204_v23 = vmul.f32 %v9919_v12, %v3996_v39  ;;  %v4031_v36 = vadd.f32 %v4025_v2, %v4023_v51  ;;  %v4040_v48 = vadd.f32 %v4026_v43, %v4024_v57  ;;  %v10256_v57 = vld [vmem:[#allocation12 + $0x10] sm:$0x1] }
 0x577   : > { %4531 = vrot.lane.b32.xlu1 %v11509_v41, %s5406_s7  ;;  %4533 = vrot.lane.b32.xlu2 %v11508_v47, %s5406_s7  ;;  %11514 = vst [vmem:[#allocation83_spill] sm:$0xff] %v10256_v57 }
 0x578   : > { %v4095_v46 = vrot.slane %v10201_v7, 7  ;;  %v4096_v31 = vrot.slane %v10204_v23, 7  ;;  %v4032_v52 = vadd.f32 %v4031_v36, %v4027_v56  ;;  %v4041_v29 = vadd.f32 %v4040_v48, %v4028_v63  ;;  %4529 = vrot.lane.b32.xlu0 %v11507_v50, %s5406_s7  ;;  %v10261_v48 = vld [vmem:[#allocation12 + $0x18] sm:$0x1] }
 0x579   : > { %11515 = vst [vmem:[#allocation85_spill] sm:$0xff] %v10261_v48 }
 0x57a   : > { %v4099_v59 = vmax.f32 %v4091_v60, %v4095_v46  ;;  %v4100_v1 = vmax.f32 %v4092_v44, %v4096_v31  ;;  %v4014_v12 = vpop.permute.xlu0 %4013 }
 0x57b   : > { %v4018_v32 = vsel %vm988_vm7, %v10124_v37, %v4014_v12  ;;  %v4022_v10 = vsel %vm988_vm7, %v4014_v12, %v10124_v37  ;;  %v4256_v37 = vpop.permute.xlu1 %4255 }
 0x57c   : > { %v4029_v56 = vmul.f32 %v4018_v32, %v9726_v28  ;;  %v4030_v63 = vmul.f32 %v4022_v10, %v9728_v18  ;;  %v10228_v33 = vpop.permute.xlu2 %4311  ;;  %v10232_v28 = vsel %vm415_vm0, %v4256_v37, %v4264_v4  ;;  %v10236_v18 = vsel %vm415_vm0, %v4264_v4, %v4256_v37 }
 0x57e   : > { %v4033_v9 = vadd.f32 %v4032_v52, %v4029_v56  ;;  %v4042_v62 = vadd.f32 %v4041_v29, %v4030_v63 }
 0x57f   : > { %4537 = vrot.lane.b32.xlu1 %v11512_v54, %s5406_s7  ;;  %4539 = vrot.lane.b32.xlu2 %v11511_v53, %s5406_s7 }
 0x580   : > { %v4034_v60 = vrot.slane %v4033_v9, 4  ;;  %v4043_v44 = vrot.slane %v4042_v62, 4  ;;  %4535 = vrot.lane.b32.xlu0 %v11510_v13, %s5406_s7 }
 0x582   : > { %v4035_v8 = vadd.f32 %v4034_v60, %v4033_v9  ;;  %v4044_v27 = vadd.f32 %v4043_v44, %v4042_v62  ;;  %v10244_v43 = vpop.permute.xlu0 %4259 }
 0x583   : > { %v4262_v4 = vpop.permute.xlu1 %4261 }
 0x584   : > { %v4036_v19 = vrot.slane %v4035_v8, 2  ;;  %v4045_v40 = vrot.slane %v4044_v27, 2  ;;  %v10248_v34 = vsel %vm415_vm0, %v4262_v4, %v4270_v30  ;;  %v10252_v39 = vsel %vm415_vm0, %v4270_v30, %v4262_v4  ;;  %v10254_v51 = vpop.permute.xlu2 %4317 }
 0x586   : > { %v4037_v42 = vadd.f32 %v4036_v19, %v4035_v8  ;;  %v4046_v17 = vadd.f32 %v4045_v40, %v4044_v27 }
 0x587   : > { %4577 = vrot.lane.b32.xlu1 %v11506_v61, %s5407_s9  ;;  %4579 = vrot.lane.b32.xlu2 %v11507_v50, %s5407_s9 }
 0x588   : > { %v4038_v0 = vrot.slane %v4037_v42, 1  ;;  %v4047_v22 = vrot.slane %v4046_v17, 1  ;;  %4541 = vrot.lane.b32.xlu0 %v11513_v38, %s5406_s7 }
 0x58a   : > { %v4039_v20 = vadd.f32 %v4038_v0, %v4037_v42  ;;  %v4048_v2 = vadd.f32 %v4047_v22, %v4046_v17  ;;  %v10290_v62 = vpop.permute.xlu0 %4265 }
 0x58b   : > { %v10292_v60 = vpop.permute.xlu1 %4267 }
 0x58c   : > { %v10259_v36 = vmul.f32 %v10256_v57, %v4039_v20  ;;  %v10264_v46 = vmul.f32 %v10261_v48, %v4048_v2  ;;  %v10298_v19 = vpop.permute.xlu2 %4357 }
 0x58e   : > { %v10267_v31 = vmax.f32 %v4099_v59, %v10259_v36  ;;  %v10270_v52 = vmax.f32 %v4100_v1, %v10264_v46 }
 0x58f   : > { %4583 = vrot.lane.b32.xlu1 %v11508_v47, %s5407_s9  ;;  %4585 = vrot.lane.b32.xlu2 %v11510_v13, %s5407_s9 }
 0x590   : > { %v4103_v29 = vsub.f32 %v9927_v24, %v10267_v31  ;;  %v4104_v30 = vsub.f32 %v9930_v14, %v10270_v52  ;;  %v4111_v12 = vrot.slane %v10267_v31, 7  ;;  %v4112_v32 = vrot.slane %v10270_v52, 7  ;;  %4581 = vrot.lane.b32.xlu0 %v11509_v41, %s5407_s9 }
 0x591   : > { %v4121_v59 = vrot.slane %v10267_v31, 6  ;;  %v4122_v1 = vrot.slane %v10270_v52, 6  ;;  %v4131_v10 = vrot.slane %v10267_v31, 5  ;;  %v4132_v56 = vrot.slane %v10270_v52, 5 }
 0x592   : > { %v4105_v24 = vmul.f32 1.442695, %v4103_v29  ;;  %v4107_v14 = vmul.f32 1.442695, %v4104_v30  ;;  %v4115_v63 = vsub.f32 %v9917_v58, %v4111_v12  ;;  %v4116_v9 = vsub.f32 %v9922_v16, %v4112_v32 }
 0x593   : > { %v4125_v44 = vsub.f32 %v9965_v6, %v4121_v59  ;;  %v4126_v8 = vsub.f32 %v9968_v11, %v4122_v1  ;;  %v4135_v27 = vsub.f32 %v10033_v3, %v4131_v10  ;;  %v4136_v37 = vsub.f32 %v10036_v55, %v4132_v56  ;;  %v4308_v10 = vpop.permute.xlu0 %4307  ;;  %v4310_v56 = vpop.permute.xlu1 %4309 }
 0x594   : > { %5035 = vpow2.f32 %v4105_v24  ;;  %v4117_v40 = vmul.f32 1.442695, %v4115_v63  ;;  %v4119_v42 = vmul.f32 1.442695, %v4116_v9  ;;  %v4141_v58 = vsub.f32 %v10046_v5, %v10267_v31 }
 0x595   : > { %5037 = vpow2.f32 %v4107_v14  ;;  %v4127_v16 = vmul.f32 1.442695, %v4125_v44  ;;  %v4129_v17 = vmul.f32 1.442695, %v4126_v8  ;;  %v4137_v0 = vmul.f32 1.442695, %v4135_v27  ;;  %v10325_v14 = vpop.permute.xlu2 %4363 }
 0x596   : > { %5039 = vpow2.f32 %v4117_v40  ;;  %v4139_v6 = vmul.f32 1.442695, %v4136_v37  ;;  %v4142_v11 = vsub.f32 %v10048_v45, %v10270_v52  ;;  %v4143_v3 = vmul.f32 1.442695, %v4141_v58 }
 0x597   : > { %5041 = vpow2.f32 %v4119_v42  ;;  %v4147_v55 = vrot.slane %v10267_v31, 3  ;;  %v4148_v22 = vrot.slane %v10270_v52, 3  ;;  %v4157_v20 = vrot.slane %v10267_v31, 2  ;;  %4589 = vrot.lane.b32.xlu1 %v11511_v53, %s5407_s9  ;;  %4591 = vrot.lane.b32.xlu2 %v11513_v38, %s5407_s9 }
 0x598   : > { %5043 = vpow2.f32 %v4127_v16  ;;  %v4145_v5 = vmul.f32 1.442695, %v4142_v11  ;;  %v4158_v2 = vrot.slane %v10270_v52, 2  ;;  %v4167_v4 = vrot.slane %v10267_v31, 1  ;;  %4587 = vrot.lane.b32.xlu0 %v11512_v54, %s5407_s9 }
 0x599   : > { %5045 = vpow2.f32 %v4129_v17  ;;  %v4151_v45 = vsub.f32 %v10103_v25, %v4147_v55  ;;  %v4152_v29 = vsub.f32 %v10106_v35, %v4148_v22  ;;  %v4161_v30 = vsub.f32 %v10141_v49, %v4157_v20 }
 0x59a   : > { %v10318_v12 = vpop.eup %5035  ;;  %5047 = vpow2.f32 %v4137_v0  ;;  %v4162_v32 = vsub.f32 %v10144_v21, %v4158_v2  ;;  %v4168_v59 = vrot.slane %v10270_v52, 1  ;;  %v4171_v1 = vsub.f32 %v10201_v7, %v4167_v4 }
 0x59b   : > { %v10323_v24 = vpop.eup %5037  ;;  %5049 = vpow2.f32 %v4139_v6  ;;  %v4153_v25 = vmul.f32 1.442695, %v4151_v45  ;;  %v4155_v35 = vmul.f32 1.442695, %v4152_v29  ;;  %v4163_v49 = vmul.f32 1.442695, %v4161_v30  ;;  %v4314_v45 = vpop.permute.xlu0 %4313 }
 0x59c   : > { %v10327_v63 = vpop.eup %5039  ;;  %5051 = vpow2.f32 %v4143_v3  ;;  %v4165_v9 = vmul.f32 1.442695, %v4162_v32  ;;  %v4172_v21 = vsub.f32 %v10204_v23, %v4168_v59  ;;  %v4173_v44 = vmul.f32 1.442695, %v4171_v1  ;;  %v4316_v29 = vpop.permute.xlu1 %4315 }
 0x59d   : > { %v10330_v8 = vpop.eup %5041  ;;  %5053 = vpow2.f32 %v4145_v5  ;;  %v4177_v7 = vsub.f32 %v10259_v36, %v10267_v31  ;;  %v4178_v27 = vsub.f32 %v10264_v46, %v10270_v52  ;;  %v4185_v37 = vrot.slane %v10327_v63, 1  ;;  %v4370_v59 = vpop.permute.xlu2 %4369 }
 0x59e   : > { %v10337_v40 = vpop.eup %5043  ;;  %5055 = vpow2.f32 %v4153_v25  ;;  %v4175_v42 = vmul.f32 1.442695, %v4172_v21  ;;  %v4186_v58 = vrot.slane %v10330_v8, 1  ;;  %v10344_v23 = vsel %vm415_vm0, %v10166_v26, %v10290_v62 }
 0x59f   : > { %v10346_v16 = vpop.eup %5045  ;;  %5057 = vpow2.f32 %v4155_v35  ;;  %v4179_v36 = vmul.f32 1.442695, %v4177_v7  ;;  %v4181_v31 = vmul.f32 1.442695, %v4178_v27  ;;  %v4189_v46 = vadd.f32 %v10318_v12, %v4185_v37  ;;  %4625 = vrot.lane.b32.xlu1 %v11507_v50, %s5408_s15  ;;  %4627 = vrot.lane.b32.xlu2 %v11509_v41, %s5408_s15 }
 0x5a0   : > { %v10351_v52 = vpop.eup %5047  ;;  %5059 = vpow2.f32 %v4163_v49  ;;  %v4190_v17 = vadd.f32 %v10323_v24, %v4186_v58  ;;  %v4193_v0 = vrot.slane %v10337_v40, 2  ;;  %v4194_v6 = vrot.slane %v10346_v16, 2  ;;  %4623 = vrot.lane.b32.xlu0 %v11506_v61, %s5408_s15 }
 0x5a1   : > { %v10358_v11 = vpop.eup %5049  ;;  %5061 = vpow2.f32 %v4165_v9  ;;  %v4201_v3 = vrot.slane %v10351_v52, 3  ;;  %v10365_v55 = vsel %vm415_vm0, %v10290_v62, %v10166_v26  ;;  %v10371_v22 = vsel %vm415_vm0, %v10244_v43, %v10292_v60 }
 0x5a2   : > { %v10375_v20 = vpop.eup %5051  ;;  %5063 = vpow2.f32 %v4173_v44  ;;  %v4197_v5 = vadd.f32 %v4193_v0, %v4189_v46  ;;  %v4198_v2 = vadd.f32 %v4194_v6, %v4190_v17  ;;  %v4202_v4 = vrot.slane %v10358_v11, 3 }
 0x5a3   : > { %v10378_v26 = vpop.eup %5053  ;;  %5065 = vpow2.f32 %v4175_v42  ;;  %v10384_v62 = vsel %vm415_vm0, %v10292_v60, %v10244_v43  ;;  %v10389_v30 = vsel %vm488_vm1, %v4310_v56, %v10254_v51  ;;  %v10394_v32 = vsel %vm488_vm1, %v10254_v51, %v4310_v56  ;;  %v4320_v6 = vpop.permute.xlu0 %4319 }
 0x5a4   : > { %v10396_v1 = vpop.eup %5055  ;;  %v4205_v25 = vadd.f32 %v4201_v3, %v4197_v5  ;;  %v4206_v35 = vadd.f32 %v4202_v4, %v4198_v2  ;;  %v10400_v49 = vsel %vm488_vm1, %v4308_v10, %v4316_v29  ;;  %5067 = vpow2.f32 %v4179_v36  ;;  %v4322_v3 = vpop.permute.xlu1 %4321 }
 0x5a5   : > { %v10402_v43 = vpop.eup %5057  ;;  %v10406_v60 = vsel %vm488_vm1, %v4316_v29, %v4308_v10  ;;  %v4211_v21 = vrot.slane %v10396_v1, 5  ;;  %5069 = vpow2.f32 %v4181_v31  ;;  %v10435_v2 = vsel %vm488_vm1, %v10228_v33, %v4320_v6 }
 0x5a6   : > { %v10408_v9 = vpop.eup %5059  ;;  %v4207_v51 = vadd.f32 %v10375_v20, %v4205_v25  ;;  %v4208_v56 = vadd.f32 %v10378_v26, %v4206_v35  ;;  %v4212_v44 = vrot.slane %v10402_v43, 5  ;;  %v10440_v4 = vsel %vm488_vm1, %v4320_v6, %v10228_v33  ;;  %v10450_v35 = vpop.permute.xlu2 %4409 }
 0x5a7   : > { %11516 = vst [vmem:[#allocation31_spill] sm:$0xff] %v10408_v9  ;;  %v10414_v7 = vpop.eup %5061  ;;  %4631 = vrot.lane.b32.xlu1 %v11510_v13, %s5408_s15  ;;  %v4219_v42 = vrot.slane %v10408_v9, 6  ;;  %4633 = vrot.lane.b32.xlu2 %v11512_v54, %s5408_s15  ;;  %v10444_v29 = vsel %vm488_vm1, %v4314_v45, %v4322_v3  ;;  %v10448_v25 = vsel %vm488_vm1, %v4322_v3, %v4314_v45  ;;  %v10508_v9 = vld [vmem:[#allocation12 + $0x8] sm:$0xff] }
 0x5a8   : > { %11517 = vst [vmem:[#allocation23_spill] sm:$0xff] %v10414_v7  ;;  %v10418_v27 = vpop.eup %5063  ;;  %v4215_v10 = vadd.f32 %v4211_v21, %v4207_v51  ;;  %v4216_v37 = vadd.f32 %v4212_v44, %v4208_v56  ;;  %v4220_v58 = vrot.slane %v10414_v7, 6  ;;  %4629 = vrot.lane.b32.xlu0 %v11508_v47, %s5408_s15 }
 0x5a9   : > { %11518 = vst [vmem:[#allocation56_spill] sm:$0xff] %v10418_v27  ;;  %v10424_v36 = vpop.eup %5065  ;;  %v4227_v17 = vrot.slane %v10418_v27, 7 }
 0x5aa   : > { %11519 = vst [vmem:[#allocation44_spill] sm:$0xff] %v10424_v36  ;;  %v4223_v31 = vadd.f32 %v4219_v42, %v4215_v10  ;;  %v4224_v46 = vadd.f32 %v4220_v58, %v4216_v37  ;;  %v4228_v0 = vrot.slane %v10424_v36, 7  ;;  %v10430_v5 = vpop.eup %5067 }
 0x5ab   : > { %11520 = vst [vmem:[#allocation89_spill] sm:$0xff] %v10430_v5  ;;  %v10452_v21 = vpop.eup %5069  ;;  %v4360_v33 = vpop.permute.xlu0 %4359 }
 0x5ac   : > { %v4231_v51 = vadd.f32 %v4227_v17, %v4223_v31  ;;  %v4232_v56 = vadd.f32 %v4228_v0, %v4224_v46  ;;  %11521 = vst [vmem:[#allocation94_spill] sm:$0xff] %v10452_v21  ;;  %v4362_v45 = vpop.permute.xlu1 %4361 }
 0x5ad   : > { %v10462_v37 = vsel %vm563_vm2, %v4362_v45, %v4370_v59  ;;  %v10466_v42 = vsel %vm563_vm2, %v4370_v59, %v4362_v45 }
 0x5ae   : > { %v4233_v44 = vadd.f32 %v10430_v5, %v4231_v51  ;;  %v4234_v10 = vadd.f32 %v10452_v21, %v4232_v56  ;;  %v4416_v58 = vpop.permute.xlu2 %4415 }
 0x5af   : > { %4637 = vrot.lane.b32.xlu1 %v11513_v38, %s5408_s15 }
 0x5b0   : > { %5071 = vrcp.f32 %v4233_v44  ;;  %4635 = vrot.lane.b32.xlu0 %v11511_v53, %s5408_s15 }
 0x5b1   : > { %5073 = vrcp.f32 %v4234_v10 }
 0x5b3   : > { %v4366_v51 = vpop.permute.xlu0 %4365 }
 0x5b4   : > { %v4368_v56 = vpop.permute.xlu1 %4367  ;;  %v10473_v57 = vsel %vm563_vm2, %v10298_v19, %v4366_v51  ;;  %v10478_v59 = vsel %vm563_vm2, %v4366_v51, %v10298_v19 }
 0x5b6   : > { %v5072_v31 = vpop.eup %5071 }
 0x5b7   : > { %v5074_v46 = vpop.eup %5073  ;;  %v4237_v17 = vmul.f32 %v5072_v31, %v4233_v44  ;;  %v10482_v44 = vsel %vm563_vm2, %v4360_v33, %v4368_v56 }
 0x5b8   : > { %v4238_v0 = vmul.f32 %v5074_v46, %v4234_v10  ;;  %v10484_v10 = vpop.permute.xlu2 %4421 }
 0x5b9   : > { %v4239_v6 = vsub.f32 2.0, %v4237_v17 }
 0x5ba   : > { %v4240_v3 = vsub.f32 2.0, %v4238_v0 }
 0x5bb   : > { %v10468_v48 = vmul.f32 %v5072_v31, %v4239_v6  ;;  %v10490_v31 = vsel %vm563_vm2, %v4368_v56, %v4360_v33  ;;  %v10502_v33 = vld [vmem:[#allocation12] sm:$0xff] }
 0x5bc   : > { %v10486_v45 = vmul.f32 %v5074_v46, %v4240_v3 }
 0x5bd   : > { %v4243_v17 = vmul.f32 %v10318_v12, %v10468_v48  ;;  %v4299_v0 = vrot.slane %v10468_v48, 7  ;;  %v4349_v19 = vrot.slane %v10468_v48, 6  ;;  %v4399_v6 = vrot.slane %v10468_v48, 5 }
 0x5be   : > { %v4244_v51 = vmul.f32 %v10323_v24, %v10486_v45  ;;  %v4300_v36 = vrot.slane %v10486_v45, 7  ;;  %v4350_v46 = vrot.slane %v10486_v45, 6  ;;  %v4400_v3 = vrot.slane %v10486_v45, 5 }
 0x5bf   : > { %v4245_v56 = vmul.f32 %v10502_v33, %v4243_v17  ;;  %v4303_v12 = vmul.f32 %v10327_v63, %v4299_v0  ;;  %v4353_v27 = vmul.f32 %v10337_v40, %v4349_v19  ;;  %v4403_v7 = vmul.f32 %v10351_v52, %v4399_v6  ;;  %v4372_v19 = vpop.permute.xlu0 %4371  ;;  %v4408_v6 = vpop.permute.xlu1 %4407 }
 0x5c0   : > { %v4246_v24 = vmul.f32 %v10508_v9, %v4244_v51  ;;  %v4304_v21 = vmul.f32 %v10330_v8, %v4300_v36  ;;  %v4354_v5 = vmul.f32 %v10346_v16, %v4350_v46  ;;  %v4404_v38 = vmul.f32 %v10358_v11, %v4400_v3 }
 0x5c1   : > { %v4279_v47 = vperm.slane %v4245_v56, 0  ;;  %v4305_v53 = vmul.f32 %v10502_v33, %v4303_v12  ;;  %v4355_v17 = vmul.f32 %v10502_v33, %v4353_v27  ;;  %v4405_v63 = vmul.f32 %v10502_v33, %v4403_v7  ;;  %v10524_v27 = vpop.permute.xlu2 %4481 }
 0x5c2   : > { %v4280_v40 = vperm.slane %v4246_v24, 0  ;;  %v4306_v52 = vmul.f32 %v10508_v9, %v4304_v21  ;;  %v4356_v0 = vmul.f32 %v10508_v9, %v4354_v5  ;;  %v4406_v8 = vmul.f32 %v10508_v9, %v4404_v38 }
 0x5c3   : > { %v4281_v16 = vmul.f32 %v4279_v47, %v10236_v18  ;;  %v4287_v11 = vmul.f32 %v4279_v47, %v10252_v39  ;;  %v4283_v36 = vmul.f32 %v4279_v47, %v10365_v55  ;;  %v4285_v51 = vmul.f32 %v4279_v47, %v10384_v62 }
 0x5c4   : > { %v4282_v7 = vmul.f32 %v4280_v40, %v10232_v28  ;;  %v4288_v21 = vmul.f32 %v4280_v40, %v10248_v34  ;;  %v4284_v5 = vmul.f32 %v4280_v40, %v10344_v23  ;;  %v4286_v46 = vmul.f32 %v4280_v40, %v10371_v22 }
 0x5c5   : > { %v4331_v3 = vperm.slane %v4305_v53, 1  ;;  %v4332_v38 = vperm.slane %v4306_v52, 1  ;;  %v4381_v56 = vperm.slane %v4355_v17, 2  ;;  %v4382_v18 = vperm.slane %v4356_v0, 2 }
 0x5c6   : > { %v4376_v39 = vsel %vm563_vm2, %v10325_v14, %v4372_v19  ;;  %v4380_v47 = vsel %vm563_vm2, %v4372_v19, %v10325_v14  ;;  %v4423_v28 = vsel %vm638_vm3, %v4408_v6, %v4416_v58  ;;  %v4427_v34 = vsel %vm638_vm3, %v4416_v58, %v4408_v6 }
 0x5c7   : > { %v4335_v23 = vmul.f32 %v4331_v3, %v10394_v32  ;;  %v4336_v53 = vmul.f32 %v4332_v38, %v10389_v30  ;;  %v4333_v55 = vmul.f32 %v4331_v3, %v10406_v60  ;;  %v4334_v22 = vmul.f32 %v4332_v38, %v10400_v49  ;;  %v4412_v6 = vpop.permute.xlu0 %4411  ;;  %v4414_v60 = vpop.permute.xlu1 %4413 }
 0x5c8   : > { %v4337_v62 = vmul.f32 %v4331_v3, %v10440_v4  ;;  %v4338_v12 = vmul.f32 %v4332_v38, %v10435_v2  ;;  %v4339_v14 = vmul.f32 %v4331_v3, %v10448_v25  ;;  %v4340_v24 = vmul.f32 %v4332_v38, %v10444_v29 }
 0x5c9   : > { %v4343_v17 = vadd.f32 %v4335_v23, %v4283_v36  ;;  %v4344_v40 = vadd.f32 %v4336_v53, %v4284_v5  ;;  %v4341_v52 = vadd.f32 %v4333_v55, %v4281_v16  ;;  %v4342_v58 = vadd.f32 %v4334_v22, %v4282_v7  ;;  %v10552_v3 = vpop.permute.xlu2 %4487 }
 0x5ca   : > { %v4345_v0 = vadd.f32 %v4337_v62, %v4285_v51  ;;  %v4346_v32 = vadd.f32 %v4338_v12, %v4286_v46  ;;  %v4347_v19 = vadd.f32 %v4339_v14, %v4287_v11  ;;  %v4348_v30 = vadd.f32 %v4340_v24, %v4288_v21 }
 0x5cb   : > { %v4387_v49 = vmul.f32 %v4381_v56, %v10466_v42  ;;  %v4388_v4 = vmul.f32 %v4382_v18, %v10462_v37  ;;  %v4383_v2 = vmul.f32 %v4381_v56, %v10478_v59  ;;  %v4384_v25 = vmul.f32 %v4382_v18, %v10473_v57 }
 0x5cc   : > { %v4385_v29 = vmul.f32 %v4381_v56, %v10490_v31  ;;  %v4386_v16 = vmul.f32 %v4382_v18, %v10482_v44  ;;  %v4389_v36 = vmul.f32 %v4381_v56, %v4380_v47  ;;  %v4390_v51 = vmul.f32 %v4382_v18, %v4376_v39 }
 0x5cd   : > { %v4395_v11 = vadd.f32 %v4387_v49, %v4345_v0  ;;  %v4396_v7 = vadd.f32 %v4388_v4, %v4346_v32  ;;  %v4391_v21 = vadd.f32 %v4383_v2, %v4341_v52  ;;  %v4392_v5 = vadd.f32 %v4384_v25, %v4342_v58 }
 0x5ce   : > { %v4393_v46 = vadd.f32 %v4385_v29, %v4343_v17  ;;  %v4394_v42 = vadd.f32 %v4386_v16, %v4344_v40  ;;  %v4397_v38 = vadd.f32 %v4389_v36, %v4347_v19  ;;  %v4398_v37 = vadd.f32 %v4390_v51, %v4348_v30 }
 0x5cf   : > { %v4431_v23 = vperm.slane %v4405_v63, 3  ;;  %v4432_v59 = vperm.slane %v4406_v8, 3  ;;  %v4426_v57 = vsel %vm638_vm3, %v4414_v60, %v10484_v10  ;;  %v4430_v44 = vsel %vm638_vm3, %v10484_v10, %v4414_v60  ;;  %v4418_v55 = vpop.permute.xlu0 %4417  ;;  %v4420_v22 = vpop.permute.xlu1 %4419 }
 0x5d0   : > { %v4449_v31 = vmul.f32 %v10375_v20, %v10468_v48  ;;  %v4450_v56 = vmul.f32 %v10378_v26, %v10486_v45  ;;  %v4469_v18 = vrot.slane %v10468_v48, 3  ;;  %v4470_v39 = vrot.slane %v10486_v45, 3 }
 0x5d1   : > { %v4433_v63 = vmul.f32 %v4431_v23, %v4427_v34  ;;  %v4434_v8 = vmul.f32 %v4432_v59, %v4423_v28  ;;  %v4439_v47 = vmul.f32 %v4431_v23, %v4430_v44  ;;  %v4440_v53 = vmul.f32 %v4432_v59, %v4426_v57  ;;  %v10570_v40 = vpop.permute.xlu2 %4527 }
 0x5d2   : > { %v4451_v62 = vperm.slane %v4449_v31, 0  ;;  %v4452_v12 = vperm.slane %v4450_v56, 0  ;;  %v4473_v10 = vmul.f32 %v10396_v1, %v4469_v18  ;;  %v4474_v14 = vmul.f32 %v10402_v43, %v4470_v39 }
 0x5d3   : > { %v4441_v20 = vadd.f32 %v4433_v63, %v4391_v21  ;;  %v4442_v24 = vadd.f32 %v4434_v8, %v4392_v5  ;;  %v4447_v17 = vadd.f32 %v4439_v47, %v4397_v38  ;;  %v4448_v26 = vadd.f32 %v4440_v53, %v4398_v37  ;;  %v11522_v5 = vld [vmem:[#allocation80_spill] sm:$0xff] }
 0x5d4   : > { %v4424_v28 = vsel %vm638_vm3, %v10450_v35, %v4418_v55  ;;  %v4428_v34 = vsel %vm638_vm3, %v4418_v55, %v10450_v35  ;;  %v4425_v52 = vsel %vm638_vm3, %v4412_v6, %v4420_v22  ;;  %v4429_v1 = vsel %vm638_vm3, %v4420_v22, %v4412_v6 }
 0x5d5   : > { %v4435_v43 = vmul.f32 %v4431_v23, %v4428_v34  ;;  %v4436_v58 = vmul.f32 %v4432_v59, %v4424_v28  ;;  %v4437_v0 = vmul.f32 %v4431_v23, %v4429_v1  ;;  %v4438_v32 = vmul.f32 %v4432_v59, %v4425_v52  ;;  %v11530_v34 = vld [vmem:[#allocation44_spill] sm:$0xff] }
 0x5d6   : > { %v4455_v19 = vmul.f32 %v4451_v62, %v11507_v50  ;;  %v4456_v30 = vmul.f32 %v4452_v12, %v11512_v54  ;;  %v4475_v60 = vmul.f32 %v10502_v33, %v4473_v10  ;;  %v4476_v49 = vmul.f32 %v10508_v9, %v4474_v14  ;;  %v11527_v14 = vld [vmem:[#allocation31_spill] sm:$0xff] }
 0x5d7   : > { %v4443_v4 = vadd.f32 %v4435_v43, %v4393_v46  ;;  %v4444_v35 = vadd.f32 %v4436_v58, %v4394_v42  ;;  %v4445_v2 = vadd.f32 %v4437_v0, %v4395_v11  ;;  %v4446_v25 = vadd.f32 %v4438_v32, %v4396_v7  ;;  %v4478_v38 = vpop.permute.xlu0 %4477  ;;  %v4480_v37 = vpop.permute.xlu1 %4479  ;;  %v11523_v46 = vld [vmem:[#allocation42_spill] sm:$0xff]  ;;  %v11524_v11 = vld [vmem:[#allocation37_spill] sm:$0xff] }
 0x5d8   : > { %v4501_v29 = vperm.slane %v4475_v60, 5  ;;  %v4502_v16 = vperm.slane %v4476_v49, 5  ;;  %v4453_v6 = vmul.f32 %v4451_v62, %v11506_v61  ;;  %v4454_v36 = vmul.f32 %v4452_v12, %v11510_v13 }
 0x5d9   : > { %v4463_v51 = vadd.f32 %v4455_v19, %v4443_v4  ;;  %v4464_v21 = vadd.f32 %v4456_v30, %v4444_v35  ;;  %v4457_v50 = vmul.f32 %v4451_v62, %v11509_v41  ;;  %v4458_v54 = vmul.f32 %v4452_v12, %v11522_v5  ;;  %v10598_v39 = vpop.permute.xlu2 %4533 }
 0x5da   : > { %v4461_v23 = vadd.f32 %v4453_v6, %v4441_v20  ;;  %v4462_v59 = vadd.f32 %v4454_v36, %v4442_v24  ;;  %v4459_v42 = vmul.f32 %v4451_v62, %v11523_v46  ;;  %v4460_v7 = vmul.f32 %v4452_v12, %v11524_v11  ;;  %v11526_v12 = vld [vmem:[#allocation94_spill] sm:$0xff]  ;;  %v11528_v24 = vld [vmem:[#allocation23_spill] sm:$0xff] }
 0x5db   : > { %v4494_v61 = vsel %vm763_vm4, %v4480_v37, %v10552_v3  ;;  %v4498_v13 = vsel %vm763_vm4, %v10552_v3, %v4480_v37  ;;  %v4465_v57 = vadd.f32 %v4457_v50, %v4445_v2  ;;  %v4466_v41 = vadd.f32 %v4458_v54, %v4446_v25  ;;  %v11525_v3 = vld [vmem:[#allocation89_spill] sm:$0xff] }
 0x5dc   : > { %v4505_v44 = vmul.f32 %v4501_v29, %v4494_v61  ;;  %v4506_v31 = vmul.f32 %v4502_v16, %v4498_v13  ;;  %v4467_v56 = vadd.f32 %v4459_v42, %v4447_v17  ;;  %v4468_v18 = vadd.f32 %v4460_v7, %v4448_v26  ;;  %v11529_v26 = vld [vmem:[#allocation56_spill] sm:$0xff] }
 0x5dd   : > { %v4519_v63 = vrot.slane %v10468_v48, 2  ;;  %v4520_v8 = vrot.slane %v10486_v45, 2  ;;  %v4569_v47 = vrot.slane %v10468_v48, 1  ;;  %v4570_v53 = vrot.slane %v10486_v45, 1 }
 0x5de   : > { %v4513_v55 = vadd.f32 %v4505_v44, %v4463_v51  ;;  %v4514_v22 = vadd.f32 %v4506_v31, %v4464_v21  ;;  %v10606_v62 = vmul.f32 %v11525_v3, %v10468_v48  ;;  %v10610_v10 = vmul.f32 %v11526_v12, %v10486_v45 }
 0x5df   : > { %v4523_v20 = vmul.f32 %v11527_v14, %v4519_v63  ;;  %v4524_v17 = vmul.f32 %v11528_v24, %v4520_v8  ;;  %v4573_v28 = vmul.f32 %v11529_v26, %v4569_v47  ;;  %v4574_v52 = vmul.f32 %v11530_v34, %v4570_v53  ;;  %v4484_v1 = vpop.permute.xlu0 %4483  ;;  %v4486_v43 = vpop.permute.xlu1 %4485 }
 0x5e0   : > { %v4493_v58 = vsel %vm763_vm4, %v4478_v38, %v4486_v43  ;;  %v4497_v48 = vsel %vm763_vm4, %v4486_v43, %v4478_v38 }
 0x5e1   : > { %v4503_v0 = vmul.f32 %v4501_v29, %v4493_v58  ;;  %v4504_v32 = vmul.f32 %v4502_v16, %v4497_v48  ;;  %v4540_v30 = vpop.permute.xlu2 %4539  ;;  %v4525_v50 = vmul.f32 %v10502_v33, %v4523_v20  ;;  %v4526_v5 = vmul.f32 %v10508_v9, %v4524_v17 }
 0x5e2   : > { %v4575_v14 = vmul.f32 %v10502_v33, %v4573_v28  ;;  %v4576_v20 = vmul.f32 %v10508_v9, %v4574_v52 }
 0x5e3   : > { %v4511_v45 = vadd.f32 %v4503_v0, %v4461_v23  ;;  %v4512_v19 = vadd.f32 %v4504_v32, %v4462_v59  ;;  %v4551_v42 = vperm.slane %v4525_v50, 6  ;;  %v4552_v11 = vperm.slane %v4526_v5, 6 }
 0x5e4   : > { %v4601_v43 = vperm.slane %v4575_v14, 7  ;;  %v4602_v58 = vperm.slane %v4576_v20, 7  ;;  %v5124_v14 = vld [vmem:[%s5614_s13 + $0x58] sm:$0xff] }
 0x5e7   : > { %v4490_v60 = vpop.permute.xlu0 %4489  ;;  %v4492_v49 = vpop.permute.xlu1 %4491 }
 0x5e8   : > { %v4495_v4 = vsel %vm763_vm4, %v10524_v27, %v4490_v60  ;;  %v4499_v35 = vsel %vm763_vm4, %v4490_v60, %v10524_v27  ;;  %v4496_v2 = vsel %vm763_vm4, %v4484_v1, %v4492_v49  ;;  %v4500_v25 = vsel %vm763_vm4, %v4492_v49, %v4484_v1 }
 0x5e9   : > { %v4507_v6 = vmul.f32 %v4501_v29, %v4495_v4  ;;  %v4508_v36 = vmul.f32 %v4502_v16, %v4499_v35  ;;  %v4509_v51 = vmul.f32 %v4501_v29, %v4496_v2  ;;  %v4510_v21 = vmul.f32 %v4502_v16, %v4500_v25  ;;  %v4580_v59 = vpop.permute.xlu2 %4579 }
 0x5eb   : > { %v4515_v54 = vadd.f32 %v4507_v6, %v4465_v57  ;;  %v4516_v38 = vadd.f32 %v4508_v36, %v4466_v41  ;;  %v4517_v37 = vadd.f32 %v4509_v51, %v4467_v56  ;;  %v4518_v23 = vadd.f32 %v4510_v21, %v4468_v18 }
 0x5ef   : > { %v4530_v27 = vpop.permute.xlu0 %4529  ;;  %v4532_v46 = vpop.permute.xlu1 %4531 }
 0x5f0   : > { %v4545_v7 = vsel %vm838_vm5, %v4532_v46, %v4540_v30  ;;  %v4549_v29 = vsel %vm838_vm5, %v4540_v30, %v4532_v46 }
 0x5f1   : > { %v4557_v16 = vmul.f32 %v4551_v42, %v4545_v7  ;;  %v4558_v61 = vmul.f32 %v4552_v11, %v4549_v29  ;;  %v4586_v41 = vpop.permute.xlu2 %4585  ;;  %v11532_v29 = vld [vmem:[#allocation85_spill] sm:$0xff] }
 0x5f3   : > { %v4565_v13 = vadd.f32 %v4557_v16, %v4515_v54  ;;  %v4566_v44 = vadd.f32 %v4558_v61, %v4516_v38  ;;  %v4622_v16 = vmul.f32 %v11532_v29, %v10610_v10 }
 0x5f7   : > { %v4536_v31 = vpop.permute.xlu0 %4535  ;;  %v4538_v57 = vpop.permute.xlu1 %4537 }
 0x5f8   : > { %v4543_v56 = vsel %vm838_vm5, %v10570_v40, %v4536_v31  ;;  %v4547_v18 = vsel %vm838_vm5, %v4536_v31, %v10570_v40  ;;  %v4544_v63 = vsel %vm838_vm5, %v4530_v27, %v4538_v57  ;;  %v4548_v8 = vsel %vm838_vm5, %v4538_v57, %v4530_v27 }
 0x5f9   : > { %v4553_v47 = vmul.f32 %v4551_v42, %v4543_v56  ;;  %v4554_v53 = vmul.f32 %v4552_v11, %v4547_v18  ;;  %v4555_v3 = vmul.f32 %v4551_v42, %v4544_v63  ;;  %v4556_v12 = vmul.f32 %v4552_v11, %v4548_v8  ;;  %v4592_v32 = vpop.permute.xlu2 %4591 }
 0x5fa   : > { %v4648_v8 = vperm.slane %v4622_v16, 0 }
 0x5fb   : > { %v4561_v24 = vadd.f32 %v4553_v47, %v4511_v45  ;;  %v4562_v17 = vadd.f32 %v4554_v53, %v4512_v19  ;;  %v4563_v26 = vadd.f32 %v4555_v3, %v4513_v55  ;;  %v4564_v34 = vadd.f32 %v4556_v12, %v4514_v22 }
 0x5ff   : > { %v4542_v1 = vpop.permute.xlu0 %4541  ;;  %v4578_v40 = vpop.permute.xlu1 %4577 }
 0x600   : > { %v4546_v48 = vsel %vm838_vm5, %v10598_v39, %v4542_v1  ;;  %v4550_v0 = vsel %vm838_vm5, %v4542_v1, %v10598_v39  ;;  %v4593_v33 = vsel %vm913_vm6, %v4578_v40, %v4586_v41  ;;  %v4597_v9 = vsel %vm913_vm6, %v4586_v41, %v4578_v40 }
 0x601   : > { %v4559_v55 = vmul.f32 %v4551_v42, %v4546_v48  ;;  %v4560_v22 = vmul.f32 %v4552_v11, %v4550_v0  ;;  %v4603_v28 = vmul.f32 %v4601_v43, %v4593_v33  ;;  %v4604_v52 = vmul.f32 %v4602_v58, %v4597_v9  ;;  %v4628_v51 = vpop.permute.xlu2 %4627  ;;  %v11531_v11 = vld [vmem:[#allocation83_spill] sm:$0xff]  ;;  %v5125_v48 = vld [vmem:[%s5614_s13 + $0x40] sm:$0xff]  ;;  %v5126_v33 = vld [vmem:[%s5614_s13 + $0x48] sm:$0xff] }
 0x602   : > { %v4621_v7 = vmul.f32 %v11531_v11, %v10606_v62 }
 0x603   : > { %v4567_v45 = vadd.f32 %v4559_v55, %v4517_v37  ;;  %v4568_v19 = vadd.f32 %v4560_v22, %v4518_v23  ;;  %v4611_v30 = vadd.f32 %v4603_v28, %v4561_v24  ;;  %v4612_v60 = vadd.f32 %v4604_v52, %v4562_v17 }
 0x604   : > { %v4647_v63 = vperm.slane %v4621_v7, 0 }
 0x607   : > { %v4582_v49 = vpop.permute.xlu0 %4581  ;;  %v4584_v4 = vpop.permute.xlu1 %4583 }
 0x608   : > { %v4596_v39 = vsel %vm913_vm6, %v4584_v4, %v4592_v32  ;;  %v4600_v35 = vsel %vm913_vm6, %v4592_v32, %v4584_v4 }
 0x609   : > { %v4609_v2 = vmul.f32 %v4601_v43, %v4596_v39  ;;  %v4610_v25 = vmul.f32 %v4602_v58, %v4600_v35  ;;  %v4634_v41 = vpop.permute.xlu2 %4633 }
 0x60b   : > { %v10662_v6 = vadd.f32 %v4609_v2, %v4567_v45  ;;  %v10664_v36 = vadd.f32 %v4610_v25, %v4568_v19  ;;  %v5127_v2 = vld [vmem:[%s5614_s13 + $0x60] sm:$0xff] }
 0x60f   : > { %v4588_v21 = vpop.permute.xlu0 %4587  ;;  %v4590_v50 = vpop.permute.xlu1 %4589 }
 0x610   : > { %v4594_v5 = vsel %vm913_vm6, %v4580_v59, %v4588_v21  ;;  %v4598_v54 = vsel %vm913_vm6, %v4588_v21, %v4580_v59  ;;  %v4595_v38 = vsel %vm913_vm6, %v4582_v49, %v4590_v50  ;;  %v4599_v37 = vsel %vm913_vm6, %v4590_v50, %v4582_v49  ;;  %v5129_v50 = vld [vmem:[%s5614_s13 + $0x70] sm:$0xff] }
 0x611   : > { %v4605_v23 = vmul.f32 %v4601_v43, %v4594_v5  ;;  %v4606_v27 = vmul.f32 %v4602_v58, %v4598_v54  ;;  %v4607_v46 = vmul.f32 %v4601_v43, %v4595_v38  ;;  %v4608_v42 = vmul.f32 %v4602_v58, %v4599_v37  ;;  %v5130_v54 = vld [vmem:[%s5614_s13 + $0x78] sm:$0xff] }
 0x613   : > { %v4613_v61 = vadd.f32 %v4605_v23, %v4563_v26  ;;  %v4614_v31 = vadd.f32 %v4606_v27, %v4564_v34  ;;  %v4615_v59 = vadd.f32 %v4607_v46, %v4565_v13  ;;  %v4616_v57 = vadd.f32 %v4608_v42, %v4566_v44  ;;  %v5123_v13 = vld [vmem:[%s5614_s13 + $0x50] sm:$0xff] }
 0x617   : > { %v4624_v56 = vpop.permute.xlu0 %4623  ;;  %v4626_v18 = vpop.permute.xlu1 %4625 }
 0x618   : > { %v4640_v47 = vsel %vm988_vm7, %v4626_v18, %v4634_v41  ;;  %v4644_v62 = vsel %vm988_vm7, %v4634_v41, %v4626_v18 }
 0x619   : > { %v4651_v10 = vmul.f32 %v4647_v63, %v4640_v47  ;;  %v4652_v53 = vmul.f32 %v4648_v8, %v4644_v62 }
 0x61b   : > { %v4659_v3 = vadd.f32 %v4651_v10, %v4613_v61  ;;  %v4660_v12 = vadd.f32 %v4652_v53, %v4614_v31 }
 0x61d   : > { %v4667_v44 = vadd.f32 %v5123_v13, %v4659_v3  ;;  %v4668_v20 = vadd.f32 %v5124_v14, %v4660_v12 }
 0x61f   : > { %4874 = vst [vmem:[%s8426_s4 + $0x50] sm:$0xff] %v4667_v44  ;;  %v4630_v24 = vpop.permute.xlu0 %4629  ;;  %v4632_v17 = vpop.permute.xlu1 %4631 }
 0x620   : > { %4875 = vst [vmem:[%s8426_s4 + $0x58] sm:$0xff] %v4668_v20  ;;  %v4639_v26 = vsel %vm988_vm7, %v4624_v56, %v4632_v17  ;;  %v4643_v34 = vsel %vm988_vm7, %v4632_v17, %v4624_v56 }
 0x621   : > { %v4649_v1 = vmul.f32 %v4647_v63, %v4639_v26  ;;  %v4650_v40 = vmul.f32 %v4648_v8, %v4643_v34 }
 0x623   : > { %v4657_v43 = vadd.f32 %v4649_v1, %v4611_v30  ;;  %v4658_v58 = vadd.f32 %v4650_v40, %v4612_v60 }
 0x625   : > { %v4665_v0 = vadd.f32 %v5125_v48, %v4657_v43  ;;  %v4666_v9 = vadd.f32 %v5126_v33, %v4658_v58 }
 0x627   : > { %4872 = vst [vmem:[%s8426_s4 + $0x40] sm:$0xff] %v4665_v0  ;;  %v4636_v55 = vpop.permute.xlu0 %4635  ;;  %v4638_v22 = vpop.permute.xlu1 %4637 }
 0x628   : > { %4873 = vst [vmem:[%s8426_s4 + $0x48] sm:$0xff] %v4666_v9  ;;  %v4641_v28 = vsel %vm988_vm7, %v4628_v51, %v4636_v55  ;;  %v4645_v52 = vsel %vm988_vm7, %v4636_v55, %v4628_v51  ;;  %v4642_v32 = vsel %vm988_vm7, %v4630_v24, %v4638_v22  ;;  %v4646_v45 = vsel %vm988_vm7, %v4638_v22, %v4630_v24  ;;  %v5128_v51 = vld [vmem:[%s5614_s13 + $0x68] sm:$0xff] }
 0x629   : > { %v4653_v19 = vmul.f32 %v4647_v63, %v4641_v28  ;;  %v4654_v30 = vmul.f32 %v4648_v8, %v4645_v52  ;;  %v4655_v60 = vmul.f32 %v4647_v63, %v4642_v32  ;;  %v4656_v49 = vmul.f32 %v4648_v8, %v4646_v45 }
 0x62b   : > { %v4661_v4 = vadd.f32 %v4653_v19, %v4615_v59  ;;  %v4662_v39 = vadd.f32 %v4654_v30, %v4616_v57  ;;  %v4663_v35 = vadd.f32 %v4655_v60, %v10662_v6  ;;  %v4664_v15 = vadd.f32 %v4656_v49, %v10664_v36 }
 0x62d   : > { %v4669_v25 = vadd.f32 %v5127_v2, %v4661_v4  ;;  %v4670_v21 = vadd.f32 %v5128_v51, %v4662_v39  ;;  %v4671_v5 = vadd.f32 %v5129_v50, %v4663_v35  ;;  %v4672_v38 = vadd.f32 %v5130_v54, %v4664_v15 }
 0x62f   : > { %4876 = vst [vmem:[%s8426_s4 + $0x60] sm:$0xff] %v4669_v25 }
 0x630   : > { %4877 = vst [vmem:[%s8426_s4 + $0x68] sm:$0xff] %v4670_v21 }
 0x631   : > { %4878 = vst [vmem:[%s8426_s4 + $0x70] sm:$0xff] %v4671_v5 }
 0x632   : > { %4879 = vst [vmem:[%s8426_s4 + $0x78] sm:$0xff] %v4672_v38 }
 0x633   : > { %5338 = shalt.err (!%p5335_p11)
}
 0x634   : > { %s5409_s26 = smov 256  }
 0x635   : > { %4912 = dma.vmem_to_hbm [thread:$0]  (%p5541_p3), %s4697_s3, 2048, %s4699_s5, %s4683_s0, %s5409_s26, %s5409_s26, %s5402_s18  }
 0x636 PF: > { %s4713_s29 = sand.u32 1, %s5381_s21   ;;  %p11533_p12 = scmp.ge.s32.totalorder %s5393_s24, 2 }
 0x637   : > { %s4714_s7 = scalar_lea.sflag [#allocation5], %s4713_s29 }
 0x638   : > { %p4935_p13 = pnand %p11533_p12, %p5480_p6 }
 0x63a   : > { %p4936_p0 = pneg %p4935_p13 }
 0x63c   : > { %5376 = dma.done.wait (%p4936_p0), %s4714_s7, 2048  }
 0x63d   : > { %5378 = vsyncadd (%p4936_p0), %s4714_s7, 4294965248  ;;  %p24_p5 = scmp.ge.s32.totalorder %s5531_s14, 4   ;;  %s11534_s21 = smov %s5385_s22 }
 0x63e   : > { %s11535_s22 = smov %s5389_s23  ;;  %s11536_s23 = smov %s5547_s20 }
 0x63f   : > { %s11537_s24 = smov %s5531_s14  ;;  %26 = sbr.rel (!%p24_p5) target bundleno = 15 (0xf), region = 145 }
 0x644   :  { %4720 = vsyncpa [#allocation4], 1 }
 0x645   :  { %4722 = vsyncpa [#allocation4 + $0x1], 1 }
 0x646   :  { %4723 = vsyncpa [#allocation7], 1 }
 0x647   :  { %4725 = vsyncpa [#allocation7 + $0x1], 1 }
 0x648   :  { %4726 = vsyncpa [#allocation10], 1 }
 0x649   :  { %4727 = vsyncpa [#allocation13], 1 }
 0x64a   :  { %4728 = vsyncpa [#allocation5], 1 }
 0x64b   :  { %4730 = vsyncpa [#allocation5 + $0x1], 1 }

</bundles_post_ra>
